<compile_context>
chip_gen: v6e
topology: v6e:2x2x1
jax: 0.10.0
libtpu: 0.0.40
codegen_flags: <defaults>
</compile_context>

<pallas_src>
import functools
import math

import jax
import jax.numpy as jnp
from jax.experimental import pallas as pl
from jax.experimental.pallas import tpu as pltpu


_COMPUTE_DTYPE = jnp.bfloat16          # MXU operand / activation-stream dtype
_VMEM_LIMIT = 32 * 1024 * 1024         # explicit scoped-VMEM budget (fits v5e..v7x)


def _round_up(x, m):
    return ((x + m - 1) // m) * m


def _pad_to(arr, shape):
    pads = [(0, t - s) for s, t in zip(arr.shape, shape)]
    if all(p == (0, 0) for p in pads):
        return arr
    return jnp.pad(arr, pads)


# ----------------------------- Pallas kernels ------------------------------ #

def _gelu_exact(x):
    # torch nn.GELU (approximate='none') == 0.5*x*(1+erf(x/sqrt(2))).
    # erf via Abramowitz–Stegun 7.1.26 (|err| < 1.5e-7, ~f32 precision).
    z = x * (1.0 / math.sqrt(2.0))
    a = jnp.abs(z)
    t = 1.0 / (1.0 + 0.3275911 * a)
    poly = ((((1.061405429 * t - 1.453152027) * t + 1.421413741) * t
             - 0.284496736) * t + 0.254829592) * t
    erf_abs = 1.0 - poly * jnp.exp(-a * a)
    erf = jnp.where(z >= 0.0, erf_abs, -erf_abs)
    return 0.5 * x * (1.0 + erf)


def _fused_matmul_kernel(*refs, activation, fuse_ln, fuse_residual, eps):
    """[opt LayerNorm] -> x @ w + b -> [opt GELU] -> [opt + residual]."""
    it = iter(refs)
    x_ref = next(it)
    w_ref = next(it)
    b_ref = next(it)
    g_ref = next(it) if fuse_ln else None
    bt_ref = next(it) if fuse_ln else None
    r_ref = next(it) if fuse_residual else None
    o_ref = next(it)

    if fuse_ln:
        # LayerNorm statistics in f32 over the full feature dim (K is un-tiled).
        x = x_ref[...].astype(jnp.float32)
        mean = jnp.mean(x, axis=-1, keepdims=True)
        xc = x - mean
        var = jnp.mean(xc * xc, axis=-1, keepdims=True)
        xn = xc * jax.lax.rsqrt(var + eps) * g_ref[...] + bt_ref[...]
        x_mm = xn.astype(w_ref.dtype)
    else:
        x_mm = x_ref[...]

    acc = jnp.dot(x_mm, w_ref[...], preferred_element_type=jnp.float32)
    acc = acc + b_ref[...]                                  # (1, tn) f32 bias
    if activation == "gelu":
        acc = _gelu_exact(acc)
    if fuse_residual:
        acc = acc + r_ref[...].astype(jnp.float32)
    o_ref[...] = acc.astype(o_ref.dtype)


def fused_matmul(x, w, b, *, gamma=None, beta=None, residual=None,
                 activation=None, eps=1e-6, out_dtype=None, tm=256, tn=256):
    """Gridded fused matmul: x:[M,K](bf16) @ w:[K,N](bf16) + b:[N](f32).

    Optional fused LayerNorm prologue (gamma/beta, f32 stats over K), GELU
    epilogue, and residual add epilogue.  M and N are tiled (256) and padded to
    tile multiples; K stays whole (<=3072 for ViT) so LN sees complete rows.
    """
    M, K = x.shape
    Kw, N = w.shape
    assert K == Kw
    out_dtype = out_dtype or x.dtype
    fuse_ln = gamma is not None
    fuse_res = residual is not None

    tm = M if M <= tm else tm            # full-dim block if small, else 256 (mult of 8)
    tn = N if N <= tn else tn            # full-dim block if small, else 256 (mult of 128)
    Mp = _round_up(M, tm)
    Npad = _round_up(N, tn)

    x_p = _pad_to(x, (Mp, K))
    w_p = _pad_to(w, (K, Npad))
    b_p = _pad_to(b.reshape(1, N).astype(jnp.float32), (1, Npad))

    in_specs = [
        pl.BlockSpec((tm, K), lambda i, j: (i, 0)),     # x row-tile, resident across j
        pl.BlockSpec((K, tn), lambda i, j: (0, j)),     # weight column-tile
        pl.BlockSpec((1, tn), lambda i, j: (0, j)),     # bias column-tile
    ]
    args = [x_p, w_p, b_p]
    if fuse_ln:
        in_specs += [pl.BlockSpec((1, K), lambda i, j: (0, 0)),
                     pl.BlockSpec((1, K), lambda i, j: (0, 0))]
        args += [gamma.reshape(1, K).astype(jnp.float32),
                 beta.reshape(1, K).astype(jnp.float32)]
    if fuse_res:
        in_specs.append(pl.BlockSpec((tm, tn), lambda i, j: (i, j)))
        args.append(_pad_to(residual, (Mp, Npad)))

    out = pl.pallas_call(
        functools.partial(_fused_matmul_kernel, activation=activation,
                          fuse_ln=fuse_ln, fuse_residual=fuse_res, eps=eps),
        out_shape=jax.ShapeDtypeStruct((Mp, Npad), out_dtype),
        grid=(Mp // tm, Npad // tn),
        in_specs=in_specs,
        out_specs=pl.BlockSpec((tm, tn), lambda i, j: (i, j)),
        compiler_params=pltpu.CompilerParams(
            dimension_semantics=("parallel", "parallel"),
            vmem_limit_bytes=_VMEM_LIMIT),
    )(*args)
    if (Mp, Npad) != (M, N):
        out = out[:M, :N]
    return out


def _attention_kernel(qkv_ref, o_ref, *, heads, scale, s_valid):
    """One batch element, all heads.  qkv_ref: [1, S, 3D], o_ref: [1, S, D]."""
    S = qkv_ref.shape[1]
    D = qkv_ref.shape[2] // 3
    Dh = D // heads

    qkv = qkv_ref[0]                                    # (S, 3D) bf16, single dense load

    # Key-padding mask for tokens >= s_valid (hoisted out of the head loop).
    if s_valid < S:
        key_idx = jax.lax.broadcasted_iota(jnp.int32, (1, S), 1)
        neg = jnp.where(key_idx < s_valid, 0.0, -1e30).astype(jnp.float32)
    else:
        neg = None

    outs = []
    for h in range(heads):                              # static unrolled head loop
        q = qkv[:, h * Dh:(h + 1) * Dh]                 # (S, Dh) bf16
        k = qkv[:, D + h * Dh:D + (h + 1) * Dh]
        v = qkv[:, 2 * D + h * Dh:2 * D + (h + 1) * Dh]
        # q @ k^T without an explicit transpose: contract the Dh dims directly.
        s = jax.lax.dot_general(q, k, (((1,), (1,)), ((), ())),
                                preferred_element_type=jnp.float32) * scale
        if neg is not None:
            s = s + neg
        m = jnp.max(s, axis=-1, keepdims=True)
        p = jnp.exp(s - m)
        l = jnp.sum(p, axis=-1, keepdims=True)
        o = jnp.dot(p.astype(v.dtype), v, preferred_element_type=jnp.float32)   # (S, Dh)
        # Normalize the small [S, Dh] output instead of the [S, S] scores.
        o = o * pl.reciprocal(l, approx=True)
        outs.append(o)

    # Single lane-dense [S, D] store (heads concatenated in timm column order).
    o_ref[0] = jnp.concatenate(outs, axis=-1).astype(o_ref.dtype)


def multihead_attention(qkv, *, heads, s_valid):
    """qkv: [B, S, 3D] (timm column layout q|k|v, heads contiguous) -> [B, S, D]."""
    B, S, D3 = qkv.shape
    D = D3 // 3
    Dh = D // heads
    scale = 1.0 / math.sqrt(Dh)
    return pl.pallas_call(
        functools.partial(_attention_kernel, heads=heads, scale=scale, s_valid=s_valid),
        out_shape=jax.ShapeDtypeStruct((B, S, D), qkv.dtype),
        grid=(B,),
        in_specs=[pl.BlockSpec((1, S, D3), lambda b: (b, 0, 0))],
        out_specs=pl.BlockSpec((1, S, D), lambda b: (b, 0, 0)),
        compiler_params=pltpu.CompilerParams(
            dimension_semantics=("parallel",),
            vmem_limit_bytes=_VMEM_LIMIT),
    )(qkv)


def _layernorm_kernel(x_ref, g_ref, b_ref, o_ref, *, eps):
    x = x_ref[...].astype(jnp.float32)
    mean = jnp.mean(x, axis=-1, keepdims=True)
    xc = x - mean
    var = jnp.mean(xc * xc, axis=-1, keepdims=True)
    o_ref[...] = (xc * jax.lax.rsqrt(var + eps) * g_ref[...] + b_ref[...]).astype(o_ref.dtype)


def layernorm(x, gamma, beta, *, eps=1e-6, out_dtype=None, tm=512):
    """Row-gridded LayerNorm (final norm only; per-block norms are fused)."""
    M, D = x.shape
    out_dtype = out_dtype or x.dtype
    tm = M if M <= tm else tm
    Mp = _round_up(M, tm)
    x_p = _pad_to(x, (Mp, D))
    out = pl.pallas_call(
        functools.partial(_layernorm_kernel, eps=eps),
        out_shape=jax.ShapeDtypeStruct((Mp, D), out_dtype),
        grid=(Mp // tm,),
        in_specs=[pl.BlockSpec((tm, D), lambda i: (i, 0)),
                  pl.BlockSpec((1, D), lambda i: (0, 0)),
                  pl.BlockSpec((1, D), lambda i: (0, 0))],
        out_specs=pl.BlockSpec((tm, D), lambda i: (i, 0)),
        compiler_params=pltpu.CompilerParams(
            dimension_semantics=("parallel",),
            vmem_limit_bytes=_VMEM_LIMIT),
    )(x_p, gamma.reshape(1, D).astype(jnp.float32),
      beta.reshape(1, D).astype(jnp.float32))
    return out[:M] if Mp != M else out


# ------------------------------ parameters --------------------------------- #

def init_vit_params(key, *, in_chans, patch, num_patches, dim, depth, heads,
                    mlp_ratio, num_classes):
    hidden = dim * mlp_ratio
    keys = jax.random.split(key, 4 + depth)

    def nrm(k, shape, std=0.02, dtype=_COMPUTE_DTYPE):
        return (std * jax.random.normal(k, shape)).astype(dtype)

    params = {
        # Conv2d(patch, stride=patch) weight, pre-flattened/transposed to
        # [C*p*p, D] and stored in the bf16 compute dtype.
        "patch_w": nrm(keys[0], (in_chans * patch * patch, dim)),
        "patch_b": jnp.zeros((dim,), jnp.float32),
        "cls_token": nrm(keys[1], (1, 1, dim)),
        "pos_embed": nrm(keys[2], (1, 1 + num_patches, dim)),
        "norm_g": jnp.ones((dim,), jnp.float32),
        "norm_b": jnp.zeros((dim,), jnp.float32),
        # nn.Linear head exists on the module but forward_intermediates never applies it.
        "head_w": nrm(keys[3], (dim, num_classes), dtype=jnp.float32),
        "head_b": jnp.zeros((num_classes,), jnp.float32),
        "blocks": [],
    }
    for d in range(depth):
        bk = jax.random.split(keys[4 + d], 4)
        params["blocks"].append({
            "n1_g": jnp.ones((dim,), jnp.float32),
            "n1_b": jnp.zeros((dim,), jnp.float32),
            "qkv_w": nrm(bk[0], (dim, 3 * dim)),
            "qkv_b": jnp.zeros((3 * dim,), jnp.float32),
            "proj_w": nrm(bk[1], (dim, dim)),
            "proj_b": jnp.zeros((dim,), jnp.float32),
            "n2_g": jnp.ones((dim,), jnp.float32),
            "n2_b": jnp.zeros((dim,), jnp.float32),
            "fc1_w": nrm(bk[2], (dim, hidden)),
            "fc1_b": jnp.zeros((hidden,), jnp.float32),
            "fc2_w": nrm(bk[3], (hidden, dim)),
            "fc2_b": jnp.zeros((dim,), jnp.float32),
        })
    return params


# -------------------------------- forward ---------------------------------- #

def vit_forward_intermediates(params, x, *, patch, heads):
    """Mirrors timm VisionTransformer.forward_intermediates (indices=None,
    norm=False, output_fmt='NCHW', intermediates_only=False)."""
    B, C, H, W = x.shape
    Hp, Wp = H // patch, W // patch
    Np = Hp * Wp
    dim = params["cls_token"].shape[-1]
    S = Np + 1
    S_pad = _round_up(S, 128)            # pad sequence (197 -> 256 for ViT-Base)
    cdt = _COMPUTE_DTYPE

    # --- patch embedding: Conv2d(stride == kernel) == patch-unfold + matmul ---
    patches = x.reshape(B, C, Hp, patch, Wp, patch)
    patches = patches.transpose(0, 2, 4, 1, 3, 5).reshape(B * Np, C * patch * patch)
    tokens = fused_matmul(patches.astype(cdt), params["patch_w"], params["patch_b"])
    tokens = tokens.reshape(B, Np, dim)

    # --- cls token + learned pos embed (pos_drop / norm_pre are identity) ---
    cls = jnp.broadcast_to(params["cls_token"].astype(cdt), (B, 1, dim))
    xt = jnp.concatenate([cls, tokens], axis=1) + params["pos_embed"].astype(cdt)
    xt = jnp.pad(xt, ((0, 0), (0, S_pad - S), (0, 0)))          # zero-padded tokens

    inter_tokens = []
    for blk in params["blocks"]:
        xf = xt.reshape(B * S_pad, dim)

        # ----- attention branch: x = x + proj(MHA(norm1(x))) -----
        qkv = fused_matmul(xf, blk["qkv_w"], blk["qkv_b"],
                           gamma=blk["n1_g"], beta=blk["n1_b"])          # LN fused
        attn = multihead_attention(qkv.reshape(B, S_pad, 3 * dim),
                                   heads=heads, s_valid=S)               # padded keys masked
        xf = fused_matmul(attn.reshape(B * S_pad, dim),
                          blk["proj_w"], blk["proj_b"], residual=xf)     # residual fused

        # ----- MLP branch: x = x + fc2(GELU(fc1(norm2(x)))) -----
        h = fused_matmul(xf, blk["fc1_w"], blk["fc1_b"],
                         gamma=blk["n2_g"], beta=blk["n2_b"],
                         activation="gelu")                              # LN + GELU fused
        xf = fused_matmul(h, blk["fc2_w"], blk["fc2_b"], residual=xf)    # residual fused

        xt = xf.reshape(B, S_pad, dim)
        inter_tokens.append(xt)          # keep token-major; NCHW transpose deferred

    # final norm on the token sequence (head is NOT applied, matching timm).
    out = layernorm(xt.reshape(B * S_pad, dim), params["norm_g"], params["norm_b"],
                    out_dtype=jnp.float32)
    out = out.reshape(B, S_pad, dim)[:, :S, :]

    # intermediates: un-normed block outputs, cls + padding stripped, NCHW, f32;
    # single transpose pass per block output done once at the end.
    intermediates = [
        t[:, 1:S, :].astype(jnp.float32).reshape(B, Hp, Wp, dim).transpose(0, 3, 1, 2)
        for t in inter_tokens
    ]
    return out, intermediates


# --------------------------------- main ------------------------------------ #

if __name__ == "__main__":
    key = jax.random.PRNGKey(0)
    k_param, k_x = jax.random.split(key)

    # Small ViT consistent with the module's forward (vit_base_patch16_224 scaled down):
    B, C, H, W = 2, 3, 16, 16
    patch, dim, depth, heads, mlp_ratio, num_classes = 4, 32, 2, 4, 4, 10
    Np = (H // patch) * (W // patch)

    params = init_vit_params(
        k_param, in_chans=C, patch=patch, num_patches=Np, dim=dim, depth=depth,
        heads=heads, mlp_ratio=mlp_ratio, num_classes=num_classes)
    x = jax.random.normal(k_x, (B, C, H, W), dtype=jnp.float32)

    fwd = jax.jit(vit_forward_intermediates, static_argnames=("patch", "heads"))
    output, intermediates = fwd(params, x, patch=patch, heads=heads)
    jax.block_until_ready(output)
    jax.block_until_ready(intermediates)

    assert output.shape == (B, 1 + Np, dim)
    assert output.dtype == jnp.float32
    assert len(intermediates) == depth
    assert all(y.shape == (B, dim, H // patch, W // patch) for y in intermediates)
    assert bool(jnp.all(jnp.isfinite(output)))
    assert all(bool(jnp.all(jnp.isfinite(y))) for y in intermediates)
    print("KERNEL_OK")
</pallas_src>

<mosaic_0001>
module attributes {stable_mosaic.version = 11 : i64} {
  func.func @_fused_matmul_kernel(%arg0: i32, %arg1: i32, %arg2: memref<32x48xbf16, #tpu.memory_space<vmem>>, %arg3: memref<48x32xbf16, #tpu.memory_space<vmem>>, %arg4: memref<1x32xf32, #tpu.memory_space<vmem>>, %arg5: memref<32x32xbf16, #tpu.memory_space<vmem>>) attributes {dimension_semantics = [#tpu.dimension_semantics<parallel>, #tpu.dimension_semantics<parallel>], iteration_bounds = array<i64: 1, 1>, scalar_prefetch = 0 : i64, scratch_operands = 0 : i64, tpu.core_type = #tpu.core_type<tc>, window_params = [{transform_indices = @transform_0, window_bounds = array<i64: 32, 48>}, {transform_indices = @transform_1, window_bounds = array<i64: 48, 32>}, {transform_indices = @transform_2, window_bounds = array<i64: 1, 32>}, {transform_indices = @transform_3, window_bounds = array<i64: 32, 32>}]} {
    %c0 = arith.constant 0 : index
    %c0_0 = arith.constant 0 : index
    %0 = vector.load %arg2[%c0, %c0_0] : memref<32x48xbf16, #tpu.memory_space<vmem>>, vector<32x48xbf16>
    %c0_1 = arith.constant 0 : index
    %c0_2 = arith.constant 0 : index
    %1 = vector.load %arg3[%c0_1, %c0_2] : memref<48x32xbf16, #tpu.memory_space<vmem>>, vector<48x32xbf16>
    %cst = arith.constant dense<0.000000e+00> : vector<32x32xf32>
    %2 = tpu.matmul %0, %1, %cst {dimension_numbers = #tpu.dot_dimension_numbers<[1], [0], [0], [1], [0, 0, 1, 1], [], []>} : vector<32x48xbf16>, vector<48x32xbf16>, vector<32x32xf32> -> vector<32x32xf32>
    %c0_3 = arith.constant 0 : index
    %c0_4 = arith.constant 0 : index
    %3 = vector.load %arg4[%c0_3, %c0_4] : memref<1x32xf32, #tpu.memory_space<vmem>>, vector<1x32xf32>
    %4 = vector.broadcast %3 : vector<1x32xf32> to vector<32x32xf32>
    %5 = arith.addf %2, %4 : vector<32x32xf32>
    %6 = arith.truncf %5 : vector<32x32xf32> to vector<32x32xbf16>
    %c0_5 = arith.constant 0 : index
    %c0_6 = arith.constant 0 : index
    %7 = vector.load %arg5[%c0_5, %c0_6] : memref<32x32xbf16, #tpu.memory_space<vmem>>, vector<32x32xbf16>
    tpu.vector_store %arg5[%c0_5, %c0_6], %6 {strides = array<i32>} : memref<32x32xbf16, #tpu.memory_space<vmem>>, vector<32x32xbf16>,
    return
  }
  func.func @transform_0(%arg0: i32, %arg1: i32) -> (i32, i32) {
    %c0_i32 = arith.constant 0 : i32
    %c0_i32_0 = arith.constant 0 : i32
    return %arg0, %c0_i32 : i32, i32
  }
  func.func @transform_1(%arg0: i32, %arg1: i32) -> (i32, i32) {
    %c0_i32 = arith.constant 0 : i32
    %c0_i32_0 = arith.constant 0 : i32
    return %c0_i32, %arg1 : i32, i32
  }
  func.func @transform_2(%arg0: i32, %arg1: i32) -> (i32, i32) {
    %c0_i32 = arith.constant 0 : i32
    %c0_i32_0 = arith.constant 0 : i32
    return %c0_i32, %arg1 : i32, i32
  }
  func.func @transform_3(%arg0: i32, %arg1: i32) -> (i32, i32) {
    %c0_i32 = arith.constant 0 : i32
    return %arg0, %arg1 : i32, i32
  }
}

module attributes {stable_mosaic.version = 11 : i64} {
  func.func @_fused_matmul_kernel(%arg0: i32, %arg1: i32, %arg2: memref<256x32xbf16, #tpu.memory_space<vmem>>, %arg3: memref<32x96xbf16, #tpu.memory_space<vmem>>, %arg4: memref<1x96xf32, #tpu.memory_space<vmem>>, %arg5: memref<1x32xf32, #tpu.memory_space<vmem>>, %arg6: memref<1x32xf32, #tpu.memory_space<vmem>>, %arg7: memref<256x96xbf16, #tpu.memory_space<vmem>>) attributes {dimension_semantics = [#tpu.dimension_semantics<parallel>, #tpu.dimension_semantics<parallel>], iteration_bounds = array<i64: 1, 1>, scalar_prefetch = 0 : i64, scratch_operands = 0 : i64, tpu.core_type = #tpu.core_type<tc>, window_params = [{transform_indices = @transform_0, window_bounds = array<i64: 256, 32>}, {transform_indices = @transform_1, window_bounds = array<i64: 32, 96>}, {transform_indices = @transform_2, window_bounds = array<i64: 1, 96>}, {pipeline_mode = #tpu.pipeline_mode<synchronous>, transform_indices = @transform_3, window_bounds = array<i64: 1, 32>}, {pipeline_mode = #tpu.pipeline_mode<synchronous>, transform_indices = @transform_4, window_bounds = array<i64: 1, 32>}, {transform_indices = @transform_5, window_bounds = array<i64: 256, 96>}]} {
    %c0 = arith.constant 0 : index
    %c0_0 = arith.constant 0 : index
    %0 = vector.load %arg2[%c0, %c0_0] : memref<256x32xbf16, #tpu.memory_space<vmem>>, vector<256x32xbf16>
    %1 = arith.extf %0 : vector<256x32xbf16> to vector<256x32xf32>
    %cst = arith.constant dense<0.000000e+00> : vector<256xf32>
    %2 = vector.multi_reduction <add>, %1, %cst [1] : vector<256x32xf32> to vector<256xf32>
    %3 = vector.shape_cast %2 : vector<256xf32> to vector<256x1xf32>
    %cst_1 = arith.constant 3.200000e+01 : f32
    %4 = vector.broadcast %cst_1 : f32 to vector<256x1xf32>
    %5 = arith.divf %3, %4 : vector<256x1xf32>
    %6 = vector.broadcast %5 : vector<256x1xf32> to vector<256x32xf32>
    %7 = arith.subf %1, %6 : vector<256x32xf32>
    %8 = arith.mulf %7, %7 : vector<256x32xf32>
    %cst_2 = arith.constant dense<0.000000e+00> : vector<256xf32>
    %9 = vector.multi_reduction <add>, %8, %cst_2 [1] : vector<256x32xf32> to vector<256xf32>
    %10 = vector.shape_cast %9 : vector<256xf32> to vector<256x1xf32>
    %cst_3 = arith.constant 3.200000e+01 : f32
    %11 = vector.broadcast %cst_3 : f32 to vector<256x1xf32>
    %12 = arith.divf %10, %11 : vector<256x1xf32>
    %cst_4 = arith.constant 9.99999997E-7 : f32
    %13 = vector.broadcast %cst_4 : f32 to vector<256x1xf32>
    %14 = arith.addf %12, %13 : vector<256x1xf32>
    %15 = math.rsqrt %14 : vector<256x1xf32>
    %16 = vector.broadcast %15 : vector<256x1xf32> to vector<256x32xf32>
    %17 = arith.mulf %7, %16 : vector<256x32xf32>
    %c0_5 = arith.constant 0 : index
    %c0_6 = arith.constant 0 : index
    %18 = vector.load %arg5[%c0_5, %c0_6] : memref<1x32xf32, #tpu.memory_space<vmem>>, vector<1x32xf32>
    %19 = vector.broadcast %18 : vector<1x32xf32> to vector<256x32xf32>
    %20 = arith.mulf %17, %19 : vector<256x32xf32>
    %c0_7 = arith.constant 0 : index
    %c0_8 = arith.constant 0 : index
    %21 = vector.load %arg6[%c0_7, %c0_8] : memref<1x32xf32, #tpu.memory_space<vmem>>, vector<1x32xf32>
    %22 = vector.broadcast %21 : vector<1x32xf32> to vector<256x32xf32>
    %23 = arith.addf %20, %22 : vector<256x32xf32>
    %24 = arith.truncf %23 : vector<256x32xf32> to vector<256x32xbf16>
    %c0_9 = arith.constant 0 : index
    %c0_10 = arith.constant 0 : index
    %25 = vector.load %arg3[%c0_9, %c0_10] : memref<32x96xbf16, #tpu.memory_space<vmem>>, vector<32x96xbf16>
    %cst_11 = arith.constant dense<0.000000e+00> : vector<256x96xf32>
    %26 = tpu.matmul %24, %25, %cst_11 {dimension_numbers = #tpu.dot_dimension_numbers<[1], [0], [0], [1], [0, 0, 1, 1], [], []>} : vector<256x32xbf16>, vector<32x96xbf16>, vector<256x96xf32> -> vector<256x96xf32>
    %c0_12 = arith.constant 0 : index
    %c0_13 = arith.constant 0 : index
    %27 = vector.load %arg4[%c0_12, %c0_13] : memref<1x96xf32, #tpu.memory_space<vmem>>, vector<1x96xf32>
    %28 = vector.broadcast %27 : vector<1x96xf32> to vector<256x96xf32>
    %29 = arith.addf %26, %28 : vector<256x96xf32>
    %30 = arith.truncf %29 : vector<256x96xf32> to vector<256x96xbf16>
    %c0_14 = arith.constant 0 : index
    %c0_15 = arith.constant 0 : index
    %31 = vector.load %arg7[%c0_14, %c0_15] : memref<256x96xbf16, #tpu.memory_space<vmem>>, vector<256x96xbf16>
    tpu.vector_store %arg7[%c0_14, %c0_15], %30 {strides = array<i32>} : memref<256x96xbf16, #tpu.memory_space<vmem>>, vector<256x96xbf16>,
    return
  }
  func.func @transform_0(%arg0: i32, %arg1: i32) -> (i32, i32) {
    %c0_i32 = arith.constant 0 : i32
    %c0_i32_0 = arith.constant 0 : i32
    return %arg0, %c0_i32 : i32, i32
  }
  func.func @transform_1(%arg0: i32, %arg1: i32) -> (i32, i32) {
    %c0_i32 = arith.constant 0 : i32
    %c0_i32_0 = arith.constant 0 : i32
    return %c0_i32, %arg1 : i32, i32
  }
  func.func @transform_2(%arg0: i32, %arg1: i32) -> (i32, i32) {
    %c0_i32 = arith.constant 0 : i32
    %c0_i32_0 = arith.constant 0 : i32
    return %c0_i32, %arg1 : i32, i32
  }
  func.func @transform_3(%arg0: i32, %arg1: i32) -> (i32, i32) {
    %c0_i32 = arith.constant 0 : i32
    %c0_i32_0 = arith.constant 0 : i32
    %c0_i32_1 = arith.constant 0 : i32
    return %c0_i32, %c0_i32_0 : i32, i32
  }
  func.func @transform_4(%arg0: i32, %arg1: i32) -> (i32, i32) {
    %c0_i32 = arith.constant 0 : i32
    %c0_i32_0 = arith.constant 0 : i32
    %c0_i32_1 = arith.constant 0 : i32
    return %c0_i32, %c0_i32_0 : i32, i32
  }
  func.func @transform_5(%arg0: i32, %arg1: i32) -> (i32, i32) {
    %c0_i32 = arith.constant 0 : i32
    return %arg0, %arg1 : i32, i32
  }
}

module attributes {stable_mosaic.version = 11 : i64} {
  func.func @_attention_kernel(%arg0: i32, %arg1: memref<1x128x96xbf16, #tpu.memory_space<vmem>>, %arg2: memref<1x128x32xbf16, #tpu.memory_space<vmem>>) attributes {dimension_semantics = [#tpu.dimension_semantics<parallel>], iteration_bounds = array<i64: 2>, scalar_prefetch = 0 : i64, scratch_operands = 0 : i64, tpu.core_type = #tpu.core_type<tc>, window_params = [{transform_indices = @transform_0, window_bounds = array<i64: 1, 128, 96>}, {transform_indices = @transform_1, window_bounds = array<i64: 1, 128, 32>}]} {
    %c0 = arith.constant 0 : index
    %c0_0 = arith.constant 0 : index
    %c0_1 = arith.constant 0 : index
    %0 = vector.load %arg1[%c0, %c0_0, %c0_1] : memref<1x128x96xbf16, #tpu.memory_space<vmem>>, vector<1x128x96xbf16>
    %1 = vector.shape_cast %0 : vector<1x128x96xbf16> to vector<128x96xbf16>
    %2 = tpu.iota {dimensions = array<i32: 1>} : vector<1x128xi32>
    %c17_i32 = arith.constant 17 : i32
    %3 = vector.broadcast %c17_i32 : i32 to vector<1x128xi32>
    %4 = arith.cmpi slt, %2, %3 : vector<1x128xi32>
    %cst = arith.constant 0.000000e+00 : f32
    %cst_2 = arith.constant -1.000000e+30 : f32
    %5 = vector.broadcast %cst : f32 to vector<1x128xf32>
    %6 = vector.broadcast %cst_2 : f32 to vector<1x128xf32>
    %7 = arith.select %4, %5, %6 : vector<1x128xi1>, vector<1x128xf32>
    %8 = vector.extract_strided_slice %1 {offsets = [0, 0], sizes = [128, 8], strides = [1, 1]} : vector<128x96xbf16> to vector<128x8xbf16>
    %9 = vector.extract_strided_slice %1 {offsets = [0, 32], sizes = [128, 8], strides = [1, 1]} : vector<128x96xbf16> to vector<128x8xbf16>
    %10 = vector.extract_strided_slice %1 {offsets = [0, 64], sizes = [128, 8], strides = [1, 1]} : vector<128x96xbf16> to vector<128x8xbf16>
    %cst_3 = arith.constant dense<0.000000e+00> : vector<128x128xf32>
    %11 = tpu.matmul %8, %9, %cst_3 {dimension_numbers = #tpu.dot_dimension_numbers<[1], [1], [0], [0], [0, 0, 1, 0], [], []>} : vector<128x8xbf16>, vector<128x8xbf16>, vector<128x128xf32> -> vector<128x128xf32>
    %cst_4 = arith.constant 0.353553385 : f32
    %12 = vector.broadcast %cst_4 : f32 to vector<128x128xf32>
    %13 = arith.mulf %11, %12 : vector<128x128xf32>
    %14 = vector.broadcast %7 : vector<1x128xf32> to vector<128x128xf32>
    %15 = arith.addf %13, %14 : vector<128x128xf32>
    %cst_5 = arith.constant dense<0xFF800000> : vector<128xf32>
    %16 = vector.multi_reduction <maximumf>, %15, %cst_5 [1] : vector<128x128xf32> to vector<128xf32>
    %17 = vector.shape_cast %16 : vector<128xf32> to vector<128x1xf32>
    %18 = vector.broadcast %17 : vector<128x1xf32> to vector<128x128xf32>
    %19 = arith.subf %15, %18 : vector<128x128xf32>
    %20 = math.exp %19 : vector<128x128xf32>
    %cst_6 = arith.constant dense<0.000000e+00> : vector<128xf32>
    %21 = vector.multi_reduction <add>, %20, %cst_6 [1] : vector<128x128xf32> to vector<128xf32>
    %22 = vector.shape_cast %21 : vector<128xf32> to vector<128x1xf32>
    %23 = arith.truncf %20 : vector<128x128xf32> to vector<128x128xbf16>
    %cst_7 = arith.constant dense<0.000000e+00> : vector<128x8xf32>
    %24 = tpu.matmul %23, %10, %cst_7 {dimension_numbers = #tpu.dot_dimension_numbers<[1], [0], [0], [1], [0, 0, 1, 1], [], []>} : vector<128x128xbf16>, vector<128x8xbf16>, vector<128x8xf32> -> vector<128x8xf32>
    %25 = tpu.reciprocal %22 {approx = true} : vector<128x1xf32> -> vector<128x1xf32>
    %26 = vector.broadcast %25 : vector<128x1xf32> to vector<128x8xf32>
    %27 = arith.mulf %24, %26 : vector<128x8xf32>
    %28 = vector.extract_strided_slice %1 {offsets = [0, 8], sizes = [128, 8], strides = [1, 1]} : vector<128x96xbf16> to vector<128x8xbf16>
    %29 = vector.extract_strided_slice %1 {offsets = [0, 40], sizes = [128, 8], strides = [1, 1]} : vector<128x96xbf16> to vector<128x8xbf16>
    %30 = vector.extract_strided_slice %1 {offsets = [0, 72], sizes = [128, 8], strides = [1, 1]} : vector<128x96xbf16> to vector<128x8xbf16>
    %cst_8 = arith.constant dense<0.000000e+00> : vector<128x128xf32>
    %31 = tpu.matmul %28, %29, %cst_8 {dimension_numbers = #tpu.dot_dimension_numbers<[1], [1], [0], [0], [0, 0, 1, 0], [], []>} : vector<128x8xbf16>, vector<128x8xbf16>, vector<128x128xf32> -> vector<128x128xf32>
    %cst_9 = arith.constant 0.353553385 : f32
    %32 = vector.broadcast %cst_9 : f32 to vector<128x128xf32>
    %33 = arith.mulf %31, %32 : vector<128x128xf32>
    %34 = vector.broadcast %7 : vector<1x128xf32> to vector<128x128xf32>
    %35 = arith.addf %33, %34 : vector<128x128xf32>
    %cst_10 = arith.constant dense<0xFF800000> : vector<128xf32>
    %36 = vector.multi_reduction <maximumf>, %35, %cst_10 [1] : vector<128x128xf32> to vector<128xf32>
    %37 = vector.shape_cast %36 : vector<128xf32> to vector<128x1xf32>
    %38 = vector.broadcast %37 : vector<128x1xf32> to vector<128x128xf32>
    %39 = arith.subf %35, %38 : vector<128x128xf32>
    %40 = math.exp %39 : vector<128x128xf32>
    %cst_11 = arith.constant dense<0.000000e+00> : vector<128xf32>
    %41 = vector.multi_reduction <add>, %40, %cst_11 [1] : vector<128x128xf32> to vector<128xf32>
    %42 = vector.shape_cast %41 : vector<128xf32> to vector<128x1xf32>
    %43 = arith.truncf %40 : vector<128x128xf32> to vector<128x128xbf16>
    %cst_12 = arith.constant dense<0.000000e+00> : vector<128x8xf32>
    %44 = tpu.matmul %43, %30, %cst_12 {dimension_numbers = #tpu.dot_dimension_numbers<[1], [0], [0], [1], [0, 0, 1, 1], [], []>} : vector<128x128xbf16>, vector<128x8xbf16>, vector<128x8xf32> -> vector<128x8xf32>
    %45 = tpu.reciprocal %42 {approx = true} : vector<128x1xf32> -> vector<128x1xf32>
    %46 = vector.broadcast %45 : vector<128x1xf32> to vector<128x8xf32>
    %47 = arith.mulf %44, %46 : vector<128x8xf32>
    %48 = vector.extract_strided_slice %1 {offsets = [0, 16], sizes = [128, 8], strides = [1, 1]} : vector<128x96xbf16> to vector<128x8xbf16>
    %49 = vector.extract_strided_slice %1 {offsets = [0, 48], sizes = [128, 8], strides = [1, 1]} : vector<128x96xbf16> to vector<128x8xbf16>
    %50 = vector.extract_strided_slice %1 {offsets = [0, 80], sizes = [128, 8], strides = [1, 1]} : vector<128x96xbf16> to vector<128x8xbf16>
    %cst_13 = arith.constant dense<0.000000e+00> : vector<128x128xf32>
    %51 = tpu.matmul %48, %49, %cst_13 {dimension_numbers = #tpu.dot_dimension_numbers<[1], [1], [0], [0], [0, 0, 1, 0], [], []>} : vector<128x8xbf16>, vector<128x8xbf16>, vector<128x128xf32> -> vector<128x128xf32>
    %cst_14 = arith.constant 0.353553385 : f32
    %52 = vector.broadcast %cst_14 : f32 to vector<128x128xf32>
    %53 = arith.mulf %51, %52 : vector<128x128xf32>
    %54 = vector.broadcast %7 : vector<1x128xf32> to vector<128x128xf32>
    %55 = arith.addf %53, %54 : vector<128x128xf32>
    %cst_15 = arith.constant dense<0xFF800000> : vector<128xf32>
    %56 = vector.multi_reduction <maximumf>, %55, %cst_15 [1] : vector<128x128xf32> to vector<128xf32>
    %57 = vector.shape_cast %56 : vector<128xf32> to vector<128x1xf32>
    %58 = vector.broadcast %57 : vector<128x1xf32> to vector<128x128xf32>
    %59 = arith.subf %55, %58 : vector<128x128xf32>
    %60 = math.exp %59 : vector<128x128xf32>
    %cst_16 = arith.constant dense<0.000000e+00> : vector<128xf32>
    %61 = vector.multi_reduction <add>, %60, %cst_16 [1] : vector<128x128xf32> to vector<128xf32>
    %62 = vector.shape_cast %61 : vector<128xf32> to vector<128x1xf32>
    %63 = arith.truncf %60 : vector<128x128xf32> to vector<128x128xbf16>
    %cst_17 = arith.constant dense<0.000000e+00> : vector<128x8xf32>
    %64 = tpu.matmul %63, %50, %cst_17 {dimension_numbers = #tpu.dot_dimension_numbers<[1], [0], [0], [1], [0, 0, 1, 1], [], []>} : vector<128x128xbf16>, vector<128x8xbf16>, vector<128x8xf32> -> vector<128x8xf32>
    %65 = tpu.reciprocal %62 {approx = true} : vector<128x1xf32> -> vector<128x1xf32>
    %66 = vector.broadcast %65 : vector<128x1xf32> to vector<128x8xf32>
    %67 = arith.mulf %64, %66 : vector<128x8xf32>
    %68 = vector.extract_strided_slice %1 {offsets = [0, 24], sizes = [128, 8], strides = [1, 1]} : vector<128x96xbf16> to vector<128x8xbf16>
    %69 = vector.extract_strided_slice %1 {offsets = [0, 56], sizes = [128, 8], strides = [1, 1]} : vector<128x96xbf16> to vector<128x8xbf16>
    %70 = vector.extract_strided_slice %1 {offsets = [0, 88], sizes = [128, 8], strides = [1, 1]} : vector<128x96xbf16> to vector<128x8xbf16>
    %cst_18 = arith.constant dense<0.000000e+00> : vector<128x128xf32>
    %71 = tpu.matmul %68, %69, %cst_18 {dimension_numbers = #tpu.dot_dimension_numbers<[1], [1], [0], [0], [0, 0, 1, 0], [], []>} : vector<128x8xbf16>, vector<128x8xbf16>, vector<128x128xf32> -> vector<128x128xf32>
    %cst_19 = arith.constant 0.353553385 : f32
    %72 = vector.broadcast %cst_19 : f32 to vector<128x128xf32>
    %73 = arith.mulf %71, %72 : vector<128x128xf32>
    %74 = vector.broadcast %7 : vector<1x128xf32> to vector<128x128xf32>
    %75 = arith.addf %73, %74 : vector<128x128xf32>
    %cst_20 = arith.constant dense<0xFF800000> : vector<128xf32>
    %76 = vector.multi_reduction <maximumf>, %75, %cst_20 [1] : vector<128x128xf32> to vector<128xf32>
    %77 = vector.shape_cast %76 : vector<128xf32> to vector<128x1xf32>
    %78 = vector.broadcast %77 : vector<128x1xf32> to vector<128x128xf32>
    %79 = arith.subf %75, %78 : vector<128x128xf32>
    %80 = math.exp %79 : vector<128x128xf32>
    %cst_21 = arith.constant dense<0.000000e+00> : vector<128xf32>
    %81 = vector.multi_reduction <add>, %80, %cst_21 [1] : vector<128x128xf32> to vector<128xf32>
    %82 = vector.shape_cast %81 : vector<128xf32> to vector<128x1xf32>
    %83 = arith.truncf %80 : vector<128x128xf32> to vector<128x128xbf16>
    %cst_22 = arith.constant dense<0.000000e+00> : vector<128x8xf32>
    %84 = tpu.matmul %83, %70, %cst_22 {dimension_numbers = #tpu.dot_dimension_numbers<[1], [0], [0], [1], [0, 0, 1, 1], [], []>} : vector<128x128xbf16>, vector<128x8xbf16>, vector<128x8xf32> -> vector<128x8xf32>
    %85 = tpu.reciprocal %82 {approx = true} : vector<128x1xf32> -> vector<128x1xf32>
    %86 = vector.broadcast %85 : vector<128x1xf32> to vector<128x8xf32>
    %87 = arith.mulf %84, %86 : vector<128x8xf32>
    %88 = tpu.concatenate %27, %47, %67, %87 in 1 : vector<128x8xf32>, vector<128x8xf32>, vector<128x8xf32>, vector<128x8xf32> -> vector<128x32xf32>
    %89 = arith.truncf %88 : vector<128x32xf32> to vector<128x32xbf16>
    %c0_23 = arith.constant 0 : index
    %c0_24 = arith.constant 0 : index
    %c0_25 = arith.constant 0 : index
    %90 = vector.load %arg2[%c0_23, %c0_24, %c0_25] : memref<1x128x32xbf16, #tpu.memory_space<vmem>>, vector<1x128x32xbf16>
    %91 = vector.shape_cast %90 : vector<1x128x32xbf16> to vector<128x32xbf16>
    %92 = vector.shape_cast %89 : vector<128x32xbf16> to vector<1x128x32xbf16>
    tpu.vector_store %arg2[%c0_23, %c0_24, %c0_25], %92 {strides = array<i32>} : memref<1x128x32xbf16, #tpu.memory_space<vmem>>, vector<1x128x32xbf16>,
    return
  }
  func.func @transform_0(%arg0: i32) -> (i32, i32, i32) {
    %c0_i32 = arith.constant 0 : i32
    %c0_i32_0 = arith.constant 0 : i32
    %c0_i32_1 = arith.constant 0 : i32
    return %arg0, %c0_i32, %c0_i32_0 : i32, i32, i32
  }
  func.func @transform_1(%arg0: i32) -> (i32, i32, i32) {
    %c0_i32 = arith.constant 0 : i32
    %c0_i32_0 = arith.constant 0 : i32
    %c0_i32_1 = arith.constant 0 : i32
    return %arg0, %c0_i32, %c0_i32_0 : i32, i32, i32
  }
}

module attributes {stable_mosaic.version = 11 : i64} {
  func.func @_fused_matmul_kernel(%arg0: i32, %arg1: i32, %arg2: memref<256x32xbf16, #tpu.memory_space<vmem>>, %arg3: memref<32x32xbf16, #tpu.memory_space<vmem>>, %arg4: memref<1x32xf32, #tpu.memory_space<vmem>>, %arg5: memref<256x32xbf16, #tpu.memory_space<vmem>>, %arg6: memref<256x32xbf16, #tpu.memory_space<vmem>>) attributes {dimension_semantics = [#tpu.dimension_semantics<parallel>, #tpu.dimension_semantics<parallel>], iteration_bounds = array<i64: 1, 1>, scalar_prefetch = 0 : i64, scratch_operands = 0 : i64, tpu.core_type = #tpu.core_type<tc>, window_params = [{transform_indices = @transform_0, window_bounds = array<i64: 256, 32>}, {transform_indices = @transform_1, window_bounds = array<i64: 32, 32>}, {transform_indices = @transform_2, window_bounds = array<i64: 1, 32>}, {transform_indices = @transform_3, window_bounds = array<i64: 256, 32>}, {transform_indices = @transform_4, window_bounds = array<i64: 256, 32>}]} {
    %c0 = arith.constant 0 : index
    %c0_0 = arith.constant 0 : index
    %0 = vector.load %arg2[%c0, %c0_0] : memref<256x32xbf16, #tpu.memory_space<vmem>>, vector<256x32xbf16>
    %c0_1 = arith.constant 0 : index
    %c0_2 = arith.constant 0 : index
    %1 = vector.load %arg3[%c0_1, %c0_2] : memref<32x32xbf16, #tpu.memory_space<vmem>>, vector<32x32xbf16>
    %cst = arith.constant dense<0.000000e+00> : vector<256x32xf32>
    %2 = tpu.matmul %0, %1, %cst {dimension_numbers = #tpu.dot_dimension_numbers<[1], [0], [0], [1], [0, 0, 1, 1], [], []>} : vector<256x32xbf16>, vector<32x32xbf16>, vector<256x32xf32> -> vector<256x32xf32>
    %c0_3 = arith.constant 0 : index
    %c0_4 = arith.constant 0 : index
    %3 = vector.load %arg4[%c0_3, %c0_4] : memref<1x32xf32, #tpu.memory_space<vmem>>, vector<1x32xf32>
    %4 = vector.broadcast %3 : vector<1x32xf32> to vector<256x32xf32>
    %5 = arith.addf %2, %4 : vector<256x32xf32>
    %c0_5 = arith.constant 0 : index
    %c0_6 = arith.constant 0 : index
    %6 = vector.load %arg5[%c0_5, %c0_6] : memref<256x32xbf16, #tpu.memory_space<vmem>>, vector<256x32xbf16>
    %7 = arith.extf %6 : vector<256x32xbf16> to vector<256x32xf32>
    %8 = arith.addf %5, %7 : vector<256x32xf32>
    %9 = arith.truncf %8 : vector<256x32xf32> to vector<256x32xbf16>
    %c0_7 = arith.constant 0 : index
    %c0_8 = arith.constant 0 : index
    %10 = vector.load %arg6[%c0_7, %c0_8] : memref<256x32xbf16, #tpu.memory_space<vmem>>, vector<256x32xbf16>
    tpu.vector_store %arg6[%c0_7, %c0_8], %9 {strides = array<i32>} : memref<256x32xbf16, #tpu.memory_space<vmem>>, vector<256x32xbf16>,
    return
  }
  func.func @transform_0(%arg0: i32, %arg1: i32) -> (i32, i32) {
    %c0_i32 = arith.constant 0 : i32
    %c0_i32_0 = arith.constant 0 : i32
    return %arg0, %c0_i32 : i32, i32
  }
  func.func @transform_1(%arg0: i32, %arg1: i32) -> (i32, i32) {
    %c0_i32 = arith.constant 0 : i32
    %c0_i32_0 = arith.constant 0 : i32
    return %c0_i32, %arg1 : i32, i32
  }
  func.func @transform_2(%arg0: i32, %arg1: i32) -> (i32, i32) {
    %c0_i32 = arith.constant 0 : i32
    %c0_i32_0 = arith.constant 0 : i32
    return %c0_i32, %arg1 : i32, i32
  }
  func.func @transform_3(%arg0: i32, %arg1: i32) -> (i32, i32) {
    %c0_i32 = arith.constant 0 : i32
    return %arg0, %arg1 : i32, i32
  }
  func.func @transform_4(%arg0: i32, %arg1: i32) -> (i32, i32) {
    %c0_i32 = arith.constant 0 : i32
    return %arg0, %arg1 : i32, i32
  }
}

module attributes {stable_mosaic.version = 11 : i64} {
  func.func @_fused_matmul_kernel(%arg0: i32, %arg1: i32, %arg2: memref<256x32xbf16, #tpu.memory_space<vmem>>, %arg3: memref<32x128xbf16, #tpu.memory_space<vmem>>, %arg4: memref<1x128xf32, #tpu.memory_space<vmem>>, %arg5: memref<1x32xf32, #tpu.memory_space<vmem>>, %arg6: memref<1x32xf32, #tpu.memory_space<vmem>>, %arg7: memref<256x128xbf16, #tpu.memory_space<vmem>>) attributes {dimension_semantics = [#tpu.dimension_semantics<parallel>, #tpu.dimension_semantics<parallel>], iteration_bounds = array<i64: 1, 1>, scalar_prefetch = 0 : i64, scratch_operands = 0 : i64, tpu.core_type = #tpu.core_type<tc>, window_params = [{transform_indices = @transform_0, window_bounds = array<i64: 256, 32>}, {transform_indices = @transform_1, window_bounds = array<i64: 32, 128>}, {transform_indices = @transform_2, window_bounds = array<i64: 1, 128>}, {pipeline_mode = #tpu.pipeline_mode<synchronous>, transform_indices = @transform_3, window_bounds = array<i64: 1, 32>}, {pipeline_mode = #tpu.pipeline_mode<synchronous>, transform_indices = @transform_4, window_bounds = array<i64: 1, 32>}, {transform_indices = @transform_5, window_bounds = array<i64: 256, 128>}]} {
    %c0 = arith.constant 0 : index
    %c0_0 = arith.constant 0 : index
    %0 = vector.load %arg2[%c0, %c0_0] : memref<256x32xbf16, #tpu.memory_space<vmem>>, vector<256x32xbf16>
    %1 = arith.extf %0 : vector<256x32xbf16> to vector<256x32xf32>
    %cst = arith.constant dense<0.000000e+00> : vector<256xf32>
    %2 = vector.multi_reduction <add>, %1, %cst [1] : vector<256x32xf32> to vector<256xf32>
    %3 = vector.shape_cast %2 : vector<256xf32> to vector<256x1xf32>
    %cst_1 = arith.constant 3.200000e+01 : f32
    %4 = vector.broadcast %cst_1 : f32 to vector<256x1xf32>
    %5 = arith.divf %3, %4 : vector<256x1xf32>
    %6 = vector.broadcast %5 : vector<256x1xf32> to vector<256x32xf32>
    %7 = arith.subf %1, %6 : vector<256x32xf32>
    %8 = arith.mulf %7, %7 : vector<256x32xf32>
    %cst_2 = arith.constant dense<0.000000e+00> : vector<256xf32>
    %9 = vector.multi_reduction <add>, %8, %cst_2 [1] : vector<256x32xf32> to vector<256xf32>
    %10 = vector.shape_cast %9 : vector<256xf32> to vector<256x1xf32>
    %cst_3 = arith.constant 3.200000e+01 : f32
    %11 = vector.broadcast %cst_3 : f32 to vector<256x1xf32>
    %12 = arith.divf %10, %11 : vector<256x1xf32>
    %cst_4 = arith.constant 9.99999997E-7 : f32
    %13 = vector.broadcast %cst_4 : f32 to vector<256x1xf32>
    %14 = arith.addf %12, %13 : vector<256x1xf32>
    %15 = math.rsqrt %14 : vector<256x1xf32>
    %16 = vector.broadcast %15 : vector<256x1xf32> to vector<256x32xf32>
    %17 = arith.mulf %7, %16 : vector<256x32xf32>
    %c0_5 = arith.constant 0 : index
    %c0_6 = arith.constant 0 : index
    %18 = vector.load %arg5[%c0_5, %c0_6] : memref<1x32xf32, #tpu.memory_space<vmem>>, vector<1x32xf32>
    %19 = vector.broadcast %18 : vector<1x32xf32> to vector<256x32xf32>
    %20 = arith.mulf %17, %19 : vector<256x32xf32>
    %c0_7 = arith.constant 0 : index
    %c0_8 = arith.constant 0 : index
    %21 = vector.load %arg6[%c0_7, %c0_8] : memref<1x32xf32, #tpu.memory_space<vmem>>, vector<1x32xf32>
    %22 = vector.broadcast %21 : vector<1x32xf32> to vector<256x32xf32>
    %23 = arith.addf %20, %22 : vector<256x32xf32>
    %24 = arith.truncf %23 : vector<256x32xf32> to vector<256x32xbf16>
    %c0_9 = arith.constant 0 : index
    %c0_10 = arith.constant 0 : index
    %25 = vector.load %arg3[%c0_9, %c0_10] : memref<32x128xbf16, #tpu.memory_space<vmem>>, vector<32x128xbf16>
    %cst_11 = arith.constant dense<0.000000e+00> : vector<256x128xf32>
    %26 = tpu.matmul %24, %25, %cst_11 {dimension_numbers = #tpu.dot_dimension_numbers<[1], [0], [0], [1], [0, 0, 1, 1], [], []>} : vector<256x32xbf16>, vector<32x128xbf16>, vector<256x128xf32> -> vector<256x128xf32>
    %c0_12 = arith.constant 0 : index
    %c0_13 = arith.constant 0 : index
    %27 = vector.load %arg4[%c0_12, %c0_13] : memref<1x128xf32, #tpu.memory_space<vmem>>, vector<1x128xf32>
    %28 = vector.broadcast %27 : vector<1x128xf32> to vector<256x128xf32>
    %29 = arith.addf %26, %28 : vector<256x128xf32>
    %cst_14 = arith.constant 0.707106769 : f32
    %30 = vector.broadcast %cst_14 : f32 to vector<256x128xf32>
    %31 = arith.mulf %29, %30 : vector<256x128xf32>
    %32 = math.absf %31 : vector<256x128xf32>
    %cst_15 = arith.constant 0.327591091 : f32
    %33 = vector.broadcast %cst_15 : f32 to vector<256x128xf32>
    %34 = arith.mulf %33, %32 : vector<256x128xf32>
    %cst_16 = arith.constant 1.000000e+00 : f32
    %35 = vector.broadcast %cst_16 : f32 to vector<256x128xf32>
    %36 = arith.addf %35, %34 : vector<256x128xf32>
    %cst_17 = arith.constant 1.000000e+00 : f32
    %37 = vector.broadcast %cst_17 : f32 to vector<256x128xf32>
    %38 = arith.divf %37, %36 : vector<256x128xf32>
    %cst_18 = arith.constant 1.06140542 : f32
    %39 = vector.broadcast %cst_18 : f32 to vector<256x128xf32>
    %40 = arith.mulf %39, %38 : vector<256x128xf32>
    %cst_19 = arith.constant 1.45315206 : f32
    %41 = vector.broadcast %cst_19 : f32 to vector<256x128xf32>
    %42 = arith.subf %40, %41 : vector<256x128xf32>
    %43 = arith.mulf %42, %38 : vector<256x128xf32>
    %cst_20 = arith.constant 1.42141378 : f32
    %44 = vector.broadcast %cst_20 : f32 to vector<256x128xf32>
    %45 = arith.addf %43, %44 : vector<256x128xf32>
    %46 = arith.mulf %45, %38 : vector<256x128xf32>
    %cst_21 = arith.constant 0.284496725 : f32
    %47 = vector.broadcast %cst_21 : f32 to vector<256x128xf32>
    %48 = arith.subf %46, %47 : vector<256x128xf32>
    %49 = arith.mulf %48, %38 : vector<256x128xf32>
    %cst_22 = arith.constant 0.254829586 : f32
    %50 = vector.broadcast %cst_22 : f32 to vector<256x128xf32>
    %51 = arith.addf %49, %50 : vector<256x128xf32>
    %52 = arith.mulf %51, %38 : vector<256x128xf32>
    %cst_23 = arith.constant 0.000000e+00 : f32
    %53 = vector.broadcast %cst_23 : f32 to vector<256x128xf32>
    %54 = arith.subf %53, %32 : vector<256x128xf32>
    %55 = arith.mulf %54, %32 : vector<256x128xf32>
    %56 = math.exp %55 : vector<256x128xf32>
    %57 = arith.mulf %52, %56 : vector<256x128xf32>
    %cst_24 = arith.constant 1.000000e+00 : f32
    %58 = vector.broadcast %cst_24 : f32 to vector<256x128xf32>
    %59 = arith.subf %58, %57 : vector<256x128xf32>
    %cst_25 = arith.constant 0.000000e+00 : f32
    %60 = vector.broadcast %cst_25 : f32 to vector<256x128xf32>
    %61 = arith.cmpf oge, %31, %60 : vector<256x128xf32>
    %cst_26 = arith.constant 0.000000e+00 : f32
    %62 = vector.broadcast %cst_26 : f32 to vector<256x128xf32>
    %63 = arith.subf %62, %59 : vector<256x128xf32>
    %64 = arith.select %61, %59, %63 : vector<256x128xi1>, vector<256x128xf32>
    %cst_27 = arith.constant 5.000000e-01 : f32
    %65 = vector.broadcast %cst_27 : f32 to vector<256x128xf32>
    %66 = arith.mulf %65, %29 : vector<256x128xf32>
    %cst_28 = arith.constant 1.000000e+00 : f32
    %67 = vector.broadcast %cst_28 : f32 to vector<256x128xf32>
    %68 = arith.addf %67, %64 : vector<256x128xf32>
    %69 = arith.mulf %66, %68 : vector<256x128xf32>
    %70 = arith.truncf %69 : vector<256x128xf32> to vector<256x128xbf16>
    %c0_29 = arith.constant 0 : index
    %c0_30 = arith.constant 0 : index
    %71 = vector.load %arg7[%c0_29, %c0_30] : memref<256x128xbf16, #tpu.memory_space<vmem>>, vector<256x128xbf16>
    tpu.vector_store %arg7[%c0_29, %c0_30], %70 {strides = array<i32>} : memref<256x128xbf16, #tpu.memory_space<vmem>>, vector<256x128xbf16>,
    return
  }
  func.func @transform_0(%arg0: i32, %arg1: i32) -> (i32, i32) {
    %c0_i32 = arith.constant 0 : i32
    %c0_i32_0 = arith.constant 0 : i32
    return %arg0, %c0_i32 : i32, i32
  }
  func.func @transform_1(%arg0: i32, %arg1: i32) -> (i32, i32) {
    %c0_i32 = arith.constant 0 : i32
    %c0_i32_0 = arith.constant 0 : i32
    return %c0_i32, %arg1 : i32, i32
  }
  func.func @transform_2(%arg0: i32, %arg1: i32) -> (i32, i32) {
    %c0_i32 = arith.constant 0 : i32
    %c0_i32_0 = arith.constant 0 : i32
    return %c0_i32, %arg1 : i32, i32
  }
  func.func @transform_3(%arg0: i32, %arg1: i32) -> (i32, i32) {
    %c0_i32 = arith.constant 0 : i32
    %c0_i32_0 = arith.constant 0 : i32
    %c0_i32_1 = arith.constant 0 : i32
    return %c0_i32, %c0_i32_0 : i32, i32
  }
  func.func @transform_4(%arg0: i32, %arg1: i32) -> (i32, i32) {
    %c0_i32 = arith.constant 0 : i32
    %c0_i32_0 = arith.constant 0 : i32
    %c0_i32_1 = arith.constant 0 : i32
    return %c0_i32, %c0_i32_0 : i32, i32
  }
  func.func @transform_5(%arg0: i32, %arg1: i32) -> (i32, i32) {
    %c0_i32 = arith.constant 0 : i32
    return %arg0, %arg1 : i32, i32
  }
}

module attributes {stable_mosaic.version = 11 : i64} {
  func.func @_fused_matmul_kernel(%arg0: i32, %arg1: i32, %arg2: memref<256x128xbf16, #tpu.memory_space<vmem>>, %arg3: memref<128x32xbf16, #tpu.memory_space<vmem>>, %arg4: memref<1x32xf32, #tpu.memory_space<vmem>>, %arg5: memref<256x32xbf16, #tpu.memory_space<vmem>>, %arg6: memref<256x32xbf16, #tpu.memory_space<vmem>>) attributes {dimension_semantics = [#tpu.dimension_semantics<parallel>, #tpu.dimension_semantics<parallel>], iteration_bounds = array<i64: 1, 1>, scalar_prefetch = 0 : i64, scratch_operands = 0 : i64, tpu.core_type = #tpu.core_type<tc>, window_params = [{transform_indices = @transform_0, window_bounds = array<i64: 256, 128>}, {transform_indices = @transform_1, window_bounds = array<i64: 128, 32>}, {transform_indices = @transform_2, window_bounds = array<i64: 1, 32>}, {transform_indices = @transform_3, window_bounds = array<i64: 256, 32>}, {transform_indices = @transform_4, window_bounds = array<i64: 256, 32>}]} {
    %c0 = arith.constant 0 : index
    %c0_0 = arith.constant 0 : index
    %0 = vector.load %arg2[%c0, %c0_0] : memref<256x128xbf16, #tpu.memory_space<vmem>>, vector<256x128xbf16>
    %c0_1 = arith.constant 0 : index
    %c0_2 = arith.constant 0 : index
    %1 = vector.load %arg3[%c0_1, %c0_2] : memref<128x32xbf16, #tpu.memory_space<vmem>>, vector<128x32xbf16>
    %cst = arith.constant dense<0.000000e+00> : vector<256x32xf32>
    %2 = tpu.matmul %0, %1, %cst {dimension_numbers = #tpu.dot_dimension_numbers<[1], [0], [0], [1], [0, 0, 1, 1], [], []>} : vector<256x128xbf16>, vector<128x32xbf16>, vector<256x32xf32> -> vector<256x32xf32>
    %c0_3 = arith.constant 0 : index
    %c0_4 = arith.constant 0 : index
    %3 = vector.load %arg4[%c0_3, %c0_4] : memref<1x32xf32, #tpu.memory_space<vmem>>, vector<1x32xf32>
    %4 = vector.broadcast %3 : vector<1x32xf32> to vector<256x32xf32>
    %5 = arith.addf %2, %4 : vector<256x32xf32>
    %c0_5 = arith.constant 0 : index
    %c0_6 = arith.constant 0 : index
    %6 = vector.load %arg5[%c0_5, %c0_6] : memref<256x32xbf16, #tpu.memory_space<vmem>>, vector<256x32xbf16>
    %7 = arith.extf %6 : vector<256x32xbf16> to vector<256x32xf32>
    %8 = arith.addf %5, %7 : vector<256x32xf32>
    %9 = arith.truncf %8 : vector<256x32xf32> to vector<256x32xbf16>
    %c0_7 = arith.constant 0 : index
    %c0_8 = arith.constant 0 : index
    %10 = vector.load %arg6[%c0_7, %c0_8] : memref<256x32xbf16, #tpu.memory_space<vmem>>, vector<256x32xbf16>
    tpu.vector_store %arg6[%c0_7, %c0_8], %9 {strides = array<i32>} : memref<256x32xbf16, #tpu.memory_space<vmem>>, vector<256x32xbf16>,
    return
  }
  func.func @transform_0(%arg0: i32, %arg1: i32) -> (i32, i32) {
    %c0_i32 = arith.constant 0 : i32
    %c0_i32_0 = arith.constant 0 : i32
    return %arg0, %c0_i32 : i32, i32
  }
  func.func @transform_1(%arg0: i32, %arg1: i32) -> (i32, i32) {
    %c0_i32 = arith.constant 0 : i32
    %c0_i32_0 = arith.constant 0 : i32
    return %c0_i32, %arg1 : i32, i32
  }
  func.func @transform_2(%arg0: i32, %arg1: i32) -> (i32, i32) {
    %c0_i32 = arith.constant 0 : i32
    %c0_i32_0 = arith.constant 0 : i32
    return %c0_i32, %arg1 : i32, i32
  }
  func.func @transform_3(%arg0: i32, %arg1: i32) -> (i32, i32) {
    %c0_i32 = arith.constant 0 : i32
    return %arg0, %arg1 : i32, i32
  }
  func.func @transform_4(%arg0: i32, %arg1: i32) -> (i32, i32) {
    %c0_i32 = arith.constant 0 : i32
    return %arg0, %arg1 : i32, i32
  }
}

module attributes {stable_mosaic.version = 11 : i64} {
  func.func @_layernorm_kernel(%arg0: i32, %arg1: memref<256x32xbf16, #tpu.memory_space<vmem>>, %arg2: memref<1x32xf32, #tpu.memory_space<vmem>>, %arg3: memref<1x32xf32, #tpu.memory_space<vmem>>, %arg4: memref<256x32xf32, #tpu.memory_space<vmem>>) attributes {dimension_semantics = [#tpu.dimension_semantics<parallel>], iteration_bounds = array<i64: 1>, scalar_prefetch = 0 : i64, scratch_operands = 0 : i64, tpu.core_type = #tpu.core_type<tc>, window_params = [{transform_indices = @transform_0, window_bounds = array<i64: 256, 32>}, {pipeline_mode = #tpu.pipeline_mode<synchronous>, transform_indices = @transform_1, window_bounds = array<i64: 1, 32>}, {pipeline_mode = #tpu.pipeline_mode<synchronous>, transform_indices = @transform_2, window_bounds = array<i64: 1, 32>}, {transform_indices = @transform_3, window_bounds = array<i64: 256, 32>}]} {
    %c0 = arith.constant 0 : index
    %c0_0 = arith.constant 0 : index
    %0 = vector.load %arg1[%c0, %c0_0] : memref<256x32xbf16, #tpu.memory_space<vmem>>, vector<256x32xbf16>
    %1 = arith.extf %0 : vector<256x32xbf16> to vector<256x32xf32>
    %cst = arith.constant dense<0.000000e+00> : vector<256xf32>
    %2 = vector.multi_reduction <add>, %1, %cst [1] : vector<256x32xf32> to vector<256xf32>
    %3 = vector.shape_cast %2 : vector<256xf32> to vector<256x1xf32>
    %cst_1 = arith.constant 3.200000e+01 : f32
    %4 = vector.broadcast %cst_1 : f32 to vector<256x1xf32>
    %5 = arith.divf %3, %4 : vector<256x1xf32>
    %6 = vector.broadcast %5 : vector<256x1xf32> to vector<256x32xf32>
    %7 = arith.subf %1, %6 : vector<256x32xf32>
    %8 = arith.mulf %7, %7 : vector<256x32xf32>
    %cst_2 = arith.constant dense<0.000000e+00> : vector<256xf32>
    %9 = vector.multi_reduction <add>, %8, %cst_2 [1] : vector<256x32xf32> to vector<256xf32>
    %10 = vector.shape_cast %9 : vector<256xf32> to vector<256x1xf32>
    %cst_3 = arith.constant 3.200000e+01 : f32
    %11 = vector.broadcast %cst_3 : f32 to vector<256x1xf32>
    %12 = arith.divf %10, %11 : vector<256x1xf32>
    %cst_4 = arith.constant 9.99999997E-7 : f32
    %13 = vector.broadcast %cst_4 : f32 to vector<256x1xf32>
    %14 = arith.addf %12, %13 : vector<256x1xf32>
    %15 = math.rsqrt %14 : vector<256x1xf32>
    %16 = vector.broadcast %15 : vector<256x1xf32> to vector<256x32xf32>
    %17 = arith.mulf %7, %16 : vector<256x32xf32>
    %c0_5 = arith.constant 0 : index
    %c0_6 = arith.constant 0 : index
    %18 = vector.load %arg2[%c0_5, %c0_6] : memref<1x32xf32, #tpu.memory_space<vmem>>, vector<1x32xf32>
    %19 = vector.broadcast %18 : vector<1x32xf32> to vector<256x32xf32>
    %20 = arith.mulf %17, %19 : vector<256x32xf32>
    %c0_7 = arith.constant 0 : index
    %c0_8 = arith.constant 0 : index
    %21 = vector.load %arg3[%c0_7, %c0_8] : memref<1x32xf32, #tpu.memory_space<vmem>>, vector<1x32xf32>
    %22 = vector.broadcast %21 : vector<1x32xf32> to vector<256x32xf32>
    %23 = arith.addf %20, %22 : vector<256x32xf32>
    %c0_9 = arith.constant 0 : index
    %c0_10 = arith.constant 0 : index
    %24 = vector.load %arg4[%c0_9, %c0_10] : memref<256x32xf32, #tpu.memory_space<vmem>>, vector<256x32xf32>
    tpu.vector_store %arg4[%c0_9, %c0_10], %23 {strides = array<i32>} : memref<256x32xf32, #tpu.memory_space<vmem>>, vector<256x32xf32>,
    return
  }
  func.func @transform_0(%arg0: i32) -> (i32, i32) {
    %c0_i32 = arith.constant 0 : i32
    %c0_i32_0 = arith.constant 0 : i32
    return %arg0, %c0_i32 : i32, i32
  }
  func.func @transform_1(%arg0: i32) -> (i32, i32) {
    %c0_i32 = arith.constant 0 : i32
    %c0_i32_0 = arith.constant 0 : i32
    %c0_i32_1 = arith.constant 0 : i32
    return %c0_i32, %c0_i32_0 : i32, i32
  }
  func.func @transform_2(%arg0: i32) -> (i32, i32) {
    %c0_i32 = arith.constant 0 : i32
    %c0_i32_0 = arith.constant 0 : i32
    %c0_i32_1 = arith.constant 0 : i32
    return %c0_i32, %c0_i32_0 : i32, i32
  }
  func.func @transform_3(%arg0: i32) -> (i32, i32) {
    %c0_i32 = arith.constant 0 : i32
    %c0_i32_0 = arith.constant 0 : i32
    return %arg0, %c0_i32 : i32, i32
  }
}

</mosaic_0001>

<bundles_post_ra>
// kernel: vit_forward_intermediates.12
= control target key start
LH: loop header
LB: loop body
LE: loop exit
PB: predicated region body
PF: predicated region fallthrough
CT: control target
= control target key end

     0   :  { %vm60_vm0 = vcmask 392192   ;;  %vm132_vm1 = vcmask 257024   ;;  %s227_s1 = inlined_call_operand.vmem [shape: bf16[48,32], index: 1, kind: input, shape index: {}]   ;;  %s228_s0 = inlined_call_operand.vmem [shape: bf16[32,48], index: 0, kind: input, shape index: {}]   ;;  %s229_s2 = inlined_call_operand.vmem [shape: f32[1,32], index: 2, kind: input, shape index: {}]   ;;  %s230_s3 = inlined_call_operand.vmem [shape: bf16[32,32], index: 3, kind: output, shape index: {}]  }
   0x1   :  { %v172_v0 = vld [vmem:[%s227_s1 + $0x10] sm:$0xff]   ;;  %v173_v1 = vld [vmem:[%s227_s1 + $0x8] sm:$0xff]   ;;  %v175_v2 = vld [vmem:[%s228_s0] sm:$0xff]  }
   0x2   :  { %162 = vmatprep.subr.bf16.mxu0 %v172_v0  ;;  %v174_v3 = vld [vmem:[%s227_s1] sm:$0xff]   ;;  %168 = vmatprep.mubr.msk.bf16.mxu0 %vm60_vm0, %v175_v2  ;;  %v176_v4 = vld [vmem:[%s228_s0 + $0x8] sm:$0xff]  }
   0x3   :  { %163 = vmatpush3.bf16.msra.mxu0 %v172_v0  ;;  %v141_v5 = vld [vmem:[%s229_s2] ss:$0 sm:$0xff] }
   0x4   :  { %164 = vmatprep.subr.bf16.mxu0 %v173_v1 }
   0x7   :  { %165 = vmatpush3.bf16.msra.mxu0 %v173_v1 }
   0x8   :  { %166 = vmatprep.subr.bf16.mxu0 %v174_v3 }
   0xb   :  { %167 = vmatpush3.bf16.msra.mxu0 %v174_v3 }
   0xe   :  { %169 = vmatmul.mubr.msk.bf16.vlgmr.msra.gmra.mxu0 %vm60_vm0, %v176_v4 }
  0xce   :  { %v170_v6 = vpop.f32.mrf.mxu0 }
  0xcf   :  { %v110_v7 = vadd.f32 %v170_v6, %v141_v5 }
  0xd0   :  { %v101_v8 = vpop.f32.mrf.mxu0 }
  0xd1   :  { %v155_v9 = vpack.c.bf16 %v110_v7, %v110_v7  ;;  %v102_v10 = vadd.f32 %v141_v5, %v101_v8 }
  0xd2   :  { %v171_v11 = vpop.f32.mrf.mxu0 }
  0xd3   :  { %135 = vst.msk [vmem:[%s230_s3 + $0x8] sm:$0xf] %vm132_vm1, %v155_v9  ;;  %v153_v12 = vpack.c.bf16 %v102_v10, %v102_v10  ;;  %v113_v13 = vadd.f32 %v171_v11, %v141_v5 }
  0xd4   :  { %v104_v14 = vpop.f32.mrf.mxu0 }
  0xd5   :  { %133 = vst.msk [vmem:[%s230_s3] sm:$0xf] %vm132_vm1, %v153_v12  ;;  %v156_v15 = vpack.c.bf16 %v113_v13, %v113_v13  ;;  %v105_v16 = vadd.f32 %v141_v5, %v104_v14 }
  0xd7   :  { %136 = vst.msk [vmem:[%s230_s3 + $0xc] sm:$0xf] %vm132_vm1, %v156_v15  ;;  %v154_v17 = vpack.c.bf16 %v105_v16, %v105_v16 }
  0xd9   :  { %134 = vst.msk [vmem:[%s230_s3 + $0x4] sm:$0xf] %vm132_vm1, %v154_v17 }

// kernel: vit_forward_intermediates.13
= control target key start
LH: loop header
LB: loop body
LE: loop exit
PB: predicated region body
PF: predicated region fallthrough
CT: control target
= control target key end

     0   :  { %vm85_vm0 = vcmask 261120   ;;  %vm957_vm1 = vcmask 781312   ;;  %s2037_s0 = inlined_call_operand.vmem [shape: bf16[256,32], index: 0, kind: input, shape index: {}]   ;;  %s2038_s1 = inlined_call_operand.vmem [shape: bf16[32,96], index: 1, kind: input, shape index: {}]   ;;  %s2039_s3 = inlined_call_operand.vmem [shape: f32[1,32], index: 3, kind: input, shape index: {}]   ;;  %s2040_s4 = inlined_call_operand.vmem [shape: f32[1,32], index: 4, kind: input, shape index: {}]   ;;  %s2041_s2 = inlined_call_operand.vmem [shape: f32[1,96], index: 2, kind: input, shape index: {}]   ;;  %s2042_s5 = inlined_call_operand.vmem [shape: bf16[256,96], index: 5, kind: output, shape index: {}]  }
   0x1   :  { %v1315_v0 = vld [vmem:[%s2037_s0] sm:$0xff]   ;;  %v1329_v6 = vld [vmem:[%s2037_s0 + $0x8] sm:$0xff]   ;;  %v1361_v18 = vld [vmem:[%s2037_s0 + $0x10] sm:$0xff]  }
   0x2   :  { %v1320_v1 = vld [vmem:[%s2037_s0 + $0x40] sm:$0xff]   ;;  %v1081_v2 = vunpack.c.l.bf16 %v1315_v0  ;;  %v1082_v4 = vunpack.c.h.bf16 %v1315_v0  ;;  %v1085_v11 = vunpack.c.l.bf16 %v1329_v6  ;;  %v1086_v12 = vunpack.c.h.bf16 %v1329_v6  ;;  %v1348_v13 = vld [vmem:[%s2037_s0 + $0x48] sm:$0xff]   ;;  %v1374_v23 = vld [vmem:[%s2037_s0 + $0x50] sm:$0xff]  }
   0x3   :  { %v1113_v3 = vunpack.c.l.bf16 %v1320_v1  ;;  %v1114_v5 = vunpack.c.h.bf16 %v1320_v1  ;;  %v1117_v16 = vunpack.c.l.bf16 %v1348_v13  ;;  %v1118_v17 = vunpack.c.h.bf16 %v1348_v13  ;;  %v1387_v28 = vld [vmem:[%s2037_s0 + $0x18] sm:$0xff]   ;;  %v1413_v38 = vld [vmem:[%s2037_s0 + $0x20] sm:$0xff]   ;;  %v1439_v48 = vld [vmem:[%s2037_s0 + $0x28] sm:$0xff]  }
   0x4   :  { %v86_v7 = vsel %vm85_vm0, %v1081_v2, 0.0  ;;  %v89_v9 = vsel %vm85_vm0, %v1082_v4, 0.0  ;;  %v92_v14 = vsel %vm85_vm0, %v1085_v11, 0.0  ;;  %v95_v15 = vsel %vm85_vm0, %v1086_v12, 0.0  ;;  %v1400_v33 = vld [vmem:[%s2037_s0 + $0x58] sm:$0xff]   ;;  %v1426_v43 = vld [vmem:[%s2037_s0 + $0x60] sm:$0xff]  }
   0x5   :  { %v134_v8 = vsel %vm85_vm0, %v1113_v3, 0.0  ;;  %87 = vadd.xlane.f32.xlu0 %v86_v7  ;;  %v137_v10 = vsel %vm85_vm0, %v1114_v5, 0.0  ;;  %v140_v19 = vsel %vm85_vm0, %v1117_v16, 0.0  ;;  %v143_v20 = vsel %vm85_vm0, %v1118_v17, 0.0  ;;  %v1452_v53 = vld [vmem:[%s2037_s0 + $0x68] sm:$0xff]   ;;  %v1465_v58 = vld [vmem:[%s2037_s0 + $0x30] sm:$0xff]  }
   0x6   :  { %135 = vadd.xlane.f32.xlu1 %v134_v8  ;;  %v1089_v21 = vunpack.c.l.bf16 %v1361_v18  ;;  %v1090_v22 = vunpack.c.h.bf16 %v1361_v18  ;;  %v1121_v26 = vunpack.c.l.bf16 %v1374_v23  ;;  %v1122_v27 = vunpack.c.h.bf16 %v1374_v23  ;;  %v1478_v63 = vld [vmem:[%s2037_s0 + $0x70] sm:$0xff]  }
   0x7   :  { %v1093_v31 = vunpack.c.l.bf16 %v1387_v28  ;;  %v1094_v32 = vunpack.c.h.bf16 %v1387_v28  ;;  %v1125_v36 = vunpack.c.l.bf16 %v1400_v33  ;;  %v1126_v37 = vunpack.c.h.bf16 %v1400_v33 }
   0x8   :  { %v98_v24 = vsel %vm85_vm0, %v1089_v21, 0.0  ;;  %v101_v25 = vsel %vm85_vm0, %v1090_v22, 0.0  ;;  %v146_v29 = vsel %vm85_vm0, %v1121_v26, 0.0  ;;  %v149_v30 = vsel %vm85_vm0, %v1122_v27, 0.0 }
   0x9   :  { %90 = vadd.xlane.f32.xlu0 %v89_v9  ;;  %v104_v34 = vsel %vm85_vm0, %v1093_v31, 0.0  ;;  %v107_v35 = vsel %vm85_vm0, %v1094_v32, 0.0  ;;  %v152_v39 = vsel %vm85_vm0, %v1125_v36, 0.0  ;;  %v155_v40 = vsel %vm85_vm0, %v1126_v37, 0.0 }
   0xa   :  { %138 = vadd.xlane.f32.xlu1 %v137_v10  ;;  %v1097_v41 = vunpack.c.l.bf16 %v1413_v38  ;;  %v1098_v42 = vunpack.c.h.bf16 %v1413_v38  ;;  %v1129_v46 = vunpack.c.l.bf16 %v1426_v43  ;;  %v1130_v47 = vunpack.c.h.bf16 %v1426_v43 }
   0xb   :  { %v1101_v51 = vunpack.c.l.bf16 %v1439_v48  ;;  %v1102_v52 = vunpack.c.h.bf16 %v1439_v48  ;;  %v1133_v56 = vunpack.c.l.bf16 %v1452_v53  ;;  %v1134_v57 = vunpack.c.h.bf16 %v1452_v53 }
   0xc   :  { %v110_v44 = vsel %vm85_vm0, %v1097_v41, 0.0  ;;  %v113_v45 = vsel %vm85_vm0, %v1098_v42, 0.0  ;;  %v158_v49 = vsel %vm85_vm0, %v1129_v46, 0.0  ;;  %v161_v50 = vsel %vm85_vm0, %v1130_v47, 0.0 }
   0xd   :  { %93 = vadd.xlane.f32.xlu0 %v92_v14  ;;  %v116_v54 = vsel %vm85_vm0, %v1101_v51, 0.0  ;;  %v119_v55 = vsel %vm85_vm0, %v1102_v52, 0.0  ;;  %v164_v59 = vsel %vm85_vm0, %v1133_v56, 0.0  ;;  %v167_v60 = vsel %vm85_vm0, %v1134_v57, 0.0  ;;  %v1491_v14 = vld [vmem:[%s2037_s0 + $0x38] sm:$0xff]  }
   0xe   :  { %96 = vadd.xlane.f32.xlu1 %v95_v15  ;;  %v1105_v61 = vunpack.c.l.bf16 %v1465_v58  ;;  %v1106_v62 = vunpack.c.h.bf16 %v1465_v58  ;;  %v1137_v9 = vunpack.c.l.bf16 %v1478_v63  ;;  %v1138_v10 = vunpack.c.h.bf16 %v1478_v63 }
  0x10   :  { %v122_v7 = vsel %vm85_vm0, %v1105_v61, 0.0  ;;  %v125_v8 = vsel %vm85_vm0, %v1106_v62, 0.0  ;;  %v170_v15 = vsel %vm85_vm0, %v1137_v9, 0.0 }
  0x11   :  { %141 = vadd.xlane.f32.xlu0 %v140_v19  ;;  %v173_v19 = vsel %vm85_vm0, %v1138_v10, 0.0 }
  0x12   :  { %144 = vadd.xlane.f32.xlu1 %v143_v20  ;;  %v1109_v20 = vunpack.c.l.bf16 %v1491_v14 }
  0x15   :  { %99 = vadd.xlane.f32.xlu0 %v98_v24  ;;  %v1110_v24 = vunpack.c.h.bf16 %v1491_v14 }
  0x16   :  { %102 = vadd.xlane.f32.xlu1 %v101_v25  ;;  %v1504_v25 = vld [vmem:[%s2037_s0 + $0x78] sm:$0xff]  }
  0x19   :  { %147 = vadd.xlane.f32.xlu0 %v146_v29  ;;  %v128_v29 = vsel %vm85_vm0, %v1109_v20, 0.0 }
  0x1a   :  { %150 = vadd.xlane.f32.xlu1 %v149_v30  ;;  %v131_v30 = vsel %vm85_vm0, %v1110_v24, 0.0 }
  0x1d   :  { %105 = vadd.xlane.f32.xlu0 %v104_v34  ;;  %v1141_v34 = vunpack.c.l.bf16 %v1504_v25 }
  0x1e   :  { %108 = vadd.xlane.f32.xlu1 %v107_v35  ;;  %v1142_v35 = vunpack.c.h.bf16 %v1504_v25 }
  0x21   :  { %153 = vadd.xlane.f32.xlu0 %v152_v39  ;;  %v176_v39 = vsel %vm85_vm0, %v1141_v34, 0.0 }
  0x22   :  { %156 = vadd.xlane.f32.xlu1 %v155_v40  ;;  %v179_v40 = vsel %vm85_vm0, %v1142_v35, 0.0 }
  0x25   :  { %111 = vadd.xlane.f32.xlu0 %v110_v44 }
  0x26   :  { %114 = vadd.xlane.f32.xlu1 %v113_v45 }
  0x29   :  { %159 = vadd.xlane.f32.xlu0 %v158_v49 }
  0x2a   :  { %162 = vadd.xlane.f32.xlu1 %v161_v50 }
  0x2d   :  { %117 = vadd.xlane.f32.xlu0 %v116_v54 }
  0x2e   :  { %120 = vadd.xlane.f32.xlu1 %v119_v55 }
  0x31   :  { %165 = vadd.xlane.f32.xlu0 %v164_v59 }
  0x32   :  { %168 = vadd.xlane.f32.xlu1 %v167_v60 }
  0x35   :  { %123 = vadd.xlane.f32.xlu0 %v122_v7 }
  0x36   :  { %126 = vadd.xlane.f32.xlu1 %v125_v8 }
  0x39   :  { %171 = vadd.xlane.f32.xlu0 %v170_v15 }
  0x3a   :  { %174 = vadd.xlane.f32.xlu1 %v173_v19 }
  0x3d   :  { %129 = vadd.xlane.f32.xlu0 %v128_v29 }
  0x3e   :  { %132 = vadd.xlane.f32.xlu1 %v131_v30 }
  0x41   :  { %177 = vadd.xlane.f32.xlu0 %v176_v39 }
  0x42   :  { %180 = vadd.xlane.f32.xlu1 %v179_v40 }
  0x8e   :  { %v88_v44 = vpop.xlane.xlu0 %87 }
  0x8f   :  { %v136_v45 = vpop.xlane.xlu1 %135  ;;  %v183_v49 = vmul.f32 0.03125, %v88_v44 }
  0x90   :  { %v199_v50 = vmul.f32 0.03125, %v136_v45 }
  0x91   :  { %v1522_v54 = vsub.f32 %v1081_v2, %v183_v49 }
  0x92   :  { %v1526_v55 = vsub.f32 %v1113_v3, %v199_v50  ;;  %v91_v59 = vpop.xlane.xlu0 %90 }
  0x93   :  { %v139_v60 = vpop.xlane.xlu1 %138  ;;  %v184_v7 = vmul.f32 0.03125, %v91_v59  ;;  %v247_v15 = vmul.f32 %v1522_v54, %v1522_v54 }
  0x94   :  { %v200_v8 = vmul.f32 0.03125, %v139_v60  ;;  %v263_v19 = vmul.f32 %v1526_v55, %v1526_v55 }
  0x95   :  { %v1534_v29 = vsub.f32 %v1082_v4, %v184_v7  ;;  %v279_v3 = vsel %vm85_vm0, %v247_v15, 0.0 }
  0x96   :  { %v1538_v2 = vsub.f32 %v1114_v5, %v200_v8  ;;  %280 = vadd.xlane.f32.xlu0 %v279_v3  ;;  %v94_v30 = vpop.xlane.xlu0 %93  ;;  %v327_v40 = vsel %vm85_vm0, %v263_v19, 0.0 }
  0x97   :  { %v97_v39 = vpop.xlane.xlu1 %96  ;;  %v185_v44 = vmul.f32 0.03125, %v94_v30  ;;  %v248_v49 = vmul.f32 %v1534_v29, %v1534_v29 }
  0x98   :  { %v186_v45 = vmul.f32 0.03125, %v97_v39  ;;  %v264_v0 = vmul.f32 %v1538_v2, %v1538_v2 }
  0x99   :  { %v1548_v1 = vsub.f32 %v1085_v11, %v185_v44  ;;  %v282_v5 = vsel %vm85_vm0, %v248_v49, 0.0 }
  0x9a   :  { %v1552_v4 = vsub.f32 %v1086_v12, %v186_v45  ;;  %328 = vadd.xlane.f32.xlu0 %v327_v40  ;;  %283 = vadd.xlane.f32.xlu1 %v282_v5  ;;  %v142_v50 = vpop.xlane.xlu0 %141  ;;  %v330_v60 = vsel %vm85_vm0, %v264_v0, 0.0 }
  0x9b   :  { %v145_v59 = vpop.xlane.xlu1 %144  ;;  %v201_v7 = vmul.f32 0.03125, %v142_v50  ;;  %v249_v15 = vmul.f32 %v1548_v1, %v1548_v1 }
  0x9c   :  { %v202_v8 = vmul.f32 0.03125, %v145_v59  ;;  %v250_v11 = vmul.f32 %v1552_v4, %v1552_v4 }
  0x9d   :  { %v1562_v6 = vsub.f32 %v1117_v16, %v201_v7  ;;  %v285_v19 = vsel %vm85_vm0, %v249_v15, 0.0 }
  0x9e   :  { %v1566_v12 = vsub.f32 %v1118_v17, %v202_v8  ;;  %331 = vadd.xlane.f32.xlu1 %v330_v60  ;;  %286 = vadd.xlane.f32.xlu0 %v285_v19  ;;  %v100_v3 = vpop.xlane.xlu0 %99  ;;  %v288_v39 = vsel %vm85_vm0, %v250_v11, 0.0 }
  0x9f   :  { %v103_v30 = vpop.xlane.xlu1 %102  ;;  %v187_v40 = vmul.f32 0.03125, %v100_v3  ;;  %v265_v45 = vmul.f32 %v1562_v6, %v1562_v6 }
  0xa0   :  { %v188_v44 = vmul.f32 0.03125, %v103_v30  ;;  %v266_v16 = vmul.f32 %v1566_v12, %v1566_v12 }
  0xa1   :  { %v1576_v13 = vsub.f32 %v1089_v21, %v187_v40  ;;  %v333_v49 = vsel %vm85_vm0, %v265_v45, 0.0 }
  0xa2   :  { %v1580_v17 = vsub.f32 %v1090_v22, %v188_v44  ;;  %289 = vadd.xlane.f32.xlu1 %v288_v39  ;;  %334 = vadd.xlane.f32.xlu0 %v333_v49  ;;  %v148_v0 = vpop.xlane.xlu0 %147  ;;  %v336_v50 = vsel %vm85_vm0, %v266_v16, 0.0 }
  0xa3   :  { %v151_v5 = vpop.xlane.xlu1 %150  ;;  %v203_v59 = vmul.f32 0.03125, %v148_v0  ;;  %v251_v7 = vmul.f32 %v1576_v13, %v1576_v13 }
  0xa4   :  { %v204_v60 = vmul.f32 0.03125, %v151_v5  ;;  %v252_v21 = vmul.f32 %v1580_v17, %v1580_v17 }
  0xa5   :  { %v1590_v18 = vsub.f32 %v1121_v26, %v203_v59  ;;  %v291_v8 = vsel %vm85_vm0, %v251_v7, 0.0 }
  0xa6   :  { %v1594_v22 = vsub.f32 %v1122_v27, %v204_v60  ;;  %337 = vadd.xlane.f32.xlu1 %v336_v50  ;;  %292 = vadd.xlane.f32.xlu0 %v291_v8  ;;  %v106_v15 = vpop.xlane.xlu0 %105  ;;  %v294_v19 = vsel %vm85_vm0, %v252_v21, 0.0 }
  0xa7   :  { %v109_v11 = vpop.xlane.xlu1 %108  ;;  %v189_v3 = vmul.f32 0.03125, %v106_v15  ;;  %v267_v39 = vmul.f32 %v1590_v18, %v1590_v18 }
  0xa8   :  { %v190_v30 = vmul.f32 0.03125, %v109_v11  ;;  %v268_v26 = vmul.f32 %v1594_v22, %v1594_v22 }
  0xa9   :  { %v1604_v23 = vsub.f32 %v1093_v31, %v189_v3  ;;  %v339_v40 = vsel %vm85_vm0, %v267_v39, 0.0 }
  0xaa   :  { %v1608_v27 = vsub.f32 %v1094_v32, %v190_v30  ;;  %295 = vadd.xlane.f32.xlu1 %v294_v19  ;;  %340 = vadd.xlane.f32.xlu0 %v339_v40  ;;  %v154_v44 = vpop.xlane.xlu0 %153  ;;  %v342_v16 = vsel %vm85_vm0, %v268_v26, 0.0 }
  0xab   :  { %v157_v45 = vpop.xlane.xlu1 %156  ;;  %v205_v49 = vmul.f32 0.03125, %v154_v44  ;;  %v253_v5 = vmul.f32 %v1604_v23, %v1604_v23 }
  0xac   :  { %v206_v0 = vmul.f32 0.03125, %v157_v45  ;;  %v254_v31 = vmul.f32 %v1608_v27, %v1608_v27 }
  0xad   :  { %v1618_v28 = vsub.f32 %v1125_v36, %v205_v49  ;;  %v297_v50 = vsel %vm85_vm0, %v253_v5, 0.0 }
  0xae   :  { %v1622_v32 = vsub.f32 %v1126_v37, %v206_v0  ;;  %343 = vadd.xlane.f32.xlu1 %v342_v16  ;;  %298 = vadd.xlane.f32.xlu0 %v297_v50  ;;  %v112_v59 = vpop.xlane.xlu0 %111  ;;  %v300_v7 = vsel %vm85_vm0, %v254_v31, 0.0 }
  0xaf   :  { %v115_v60 = vpop.xlane.xlu1 %114  ;;  %v191_v21 = vmul.f32 0.03125, %v112_v59  ;;  %v269_v15 = vmul.f32 %v1618_v28, %v1618_v28 }
  0xb0   :  { %v192_v8 = vmul.f32 0.03125, %v115_v60  ;;  %v270_v36 = vmul.f32 %v1622_v32, %v1622_v32 }
  0xb1   :  { %v1632_v33 = vsub.f32 %v1097_v41, %v191_v21  ;;  %v345_v11 = vsel %vm85_vm0, %v269_v15, 0.0 }
  0xb2   :  { %v1636_v37 = vsub.f32 %v1098_v42, %v192_v8  ;;  %301 = vadd.xlane.f32.xlu1 %v300_v7  ;;  %346 = vadd.xlane.f32.xlu0 %v345_v11  ;;  %v160_v19 = vpop.xlane.xlu0 %159  ;;  %v348_v30 = vsel %vm85_vm0, %v270_v36, 0.0 }
  0xb3   :  { %v163_v3 = vpop.xlane.xlu1 %162  ;;  %v207_v39 = vmul.f32 0.03125, %v160_v19  ;;  %v255_v40 = vmul.f32 %v1632_v33, %v1632_v33 }
  0xb4   :  { %v208_v26 = vmul.f32 0.03125, %v163_v3  ;;  %v256_v41 = vmul.f32 %v1636_v37, %v1636_v37 }
  0xb5   :  { %v1646_v38 = vsub.f32 %v1129_v46, %v207_v39  ;;  %v303_v44 = vsel %vm85_vm0, %v255_v40, 0.0 }
  0xb6   :  { %v1650_v42 = vsub.f32 %v1130_v47, %v208_v26  ;;  %349 = vadd.xlane.f32.xlu1 %v348_v30  ;;  %304 = vadd.xlane.f32.xlu0 %v303_v44  ;;  %v118_v45 = vpop.xlane.xlu0 %117  ;;  %v306_v49 = vsel %vm85_vm0, %v256_v41, 0.0  ;;  %v1216_v30 = vld [vmem:[%s2038_s1 + $0x8] sm:$0xff]   ;;  %v1217_v44 = vld [vmem:[%s2038_s1] sm:$0xff]  }
  0xb7   :  { %v121_v16 = vpop.xlane.xlu1 %120  ;;  %v193_v0 = vmul.f32 0.03125, %v118_v45  ;;  %v271_v31 = vmul.f32 %v1646_v38, %v1646_v38  ;;  %1176 = vmatprep.subr.bf16.mxu0 %v1216_v30  ;;  %1212 = vmatprep.subr.bf16.mxu1 %v1216_v30 }
  0xb8   :  { %v194_v5 = vmul.f32 0.03125, %v121_v16  ;;  %v272_v46 = vmul.f32 %v1650_v42, %v1650_v42  ;;  %1177 = vmatpush3.bf16.msra.mxu0 %v1216_v30  ;;  %1214 = vmatpush3.bf16.msra.mxu1 %v1216_v30 }
  0xb9   :  { %v1660_v43 = vsub.f32 %v1101_v51, %v193_v0  ;;  %v351_v50 = vsel %vm85_vm0, %v271_v31, 0.0  ;;  %1178 = vmatprep.subr.bf16.mxu0 %v1217_v44  ;;  %1213 = vmatprep.subr.bf16.mxu1 %v1217_v44 }
  0xba   :  { %v1664_v47 = vsub.f32 %v1102_v52, %v194_v5  ;;  %307 = vadd.xlane.f32.xlu1 %v306_v49  ;;  %352 = vadd.xlane.f32.xlu0 %v351_v50  ;;  %v166_v59 = vpop.xlane.xlu0 %165  ;;  %v354_v7 = vsel %vm85_vm0, %v272_v46, 0.0 }
  0xbb   :  { %v169_v60 = vpop.xlane.xlu1 %168  ;;  %v209_v21 = vmul.f32 0.03125, %v166_v59  ;;  %v257_v15 = vmul.f32 %v1660_v43, %v1660_v43 }
  0xbc   :  { %v210_v8 = vmul.f32 0.03125, %v169_v60  ;;  %v258_v51 = vmul.f32 %v1664_v47, %v1664_v47  ;;  %1179 = vmatpush3.bf16.msra.mxu0 %v1217_v44  ;;  %1215 = vmatpush3.bf16.msra.mxu1 %v1217_v44 }
  0xbd   :  { %v1674_v48 = vsub.f32 %v1133_v56, %v209_v21  ;;  %v309_v36 = vsel %vm85_vm0, %v257_v15, 0.0 }
  0xbe   :  { %v1678_v52 = vsub.f32 %v1134_v57, %v210_v8  ;;  %355 = vadd.xlane.f32.xlu1 %v354_v7  ;;  %310 = vadd.xlane.f32.xlu0 %v309_v36  ;;  %v124_v11 = vpop.xlane.xlu0 %123  ;;  %v312_v3 = vsel %vm85_vm0, %v258_v51, 0.0 }
  0xbf   :  { %v127_v19 = vpop.xlane.xlu1 %126  ;;  %v195_v39 = vmul.f32 0.03125, %v124_v11  ;;  %v273_v56 = vmul.f32 %v1674_v48, %v1674_v48 }
  0xc0   :  { %v196_v26 = vmul.f32 0.03125, %v127_v19  ;;  %v274_v53 = vmul.f32 %v1678_v52, %v1678_v52 }
  0xc1   :  { %v1691_v57 = vsub.f32 %v1105_v61, %v195_v39  ;;  %v357_v41 = vsel %vm85_vm0, %v273_v56, 0.0 }
  0xc2   :  { %v1695_v40 = vsub.f32 %v1106_v62, %v196_v26  ;;  %313 = vadd.xlane.f32.xlu1 %v312_v3  ;;  %358 = vadd.xlane.f32.xlu0 %v357_v41  ;;  %v172_v45 = vpop.xlane.xlu0 %171  ;;  %v360_v49 = vsel %vm85_vm0, %v274_v53, 0.0 }
  0xc3   :  { %v175_v16 = vpop.xlane.xlu1 %174  ;;  %v211_v61 = vmul.f32 0.03125, %v172_v45  ;;  %v259_v58 = vmul.f32 %v1691_v57, %v1691_v57 }
  0xc4   :  { %v212_v0 = vmul.f32 0.03125, %v175_v16  ;;  %v260_v62 = vmul.f32 %v1695_v40, %v1695_v40 }
  0xc5   :  { %v1708_v5 = vsub.f32 %v1137_v9, %v211_v61  ;;  %v315_v46 = vsel %vm85_vm0, %v259_v58, 0.0 }
  0xc6   :  { %v1712_v31 = vsub.f32 %v1138_v10, %v212_v0  ;;  %361 = vadd.xlane.f32.xlu1 %v360_v49  ;;  %316 = vadd.xlane.f32.xlu0 %v315_v46  ;;  %v130_v50 = vpop.xlane.xlu0 %129  ;;  %v318_v60 = vsel %vm85_vm0, %v260_v62, 0.0 }
  0xc7   :  { %v133_v59 = vpop.xlane.xlu1 %132  ;;  %v197_v7 = vmul.f32 0.03125, %v130_v50  ;;  %v275_v9 = vmul.f32 %v1708_v5, %v1708_v5 }
  0xc8   :  { %v198_v21 = vmul.f32 0.03125, %v133_v59  ;;  %v276_v63 = vmul.f32 %v1712_v31, %v1712_v31 }
  0xc9   :  { %v1722_v10 = vsub.f32 %v1109_v20, %v197_v7  ;;  %v363_v15 = vsel %vm85_vm0, %v275_v9, 0.0 }
  0xca   :  { %v1726_v8 = vsub.f32 %v1110_v24, %v198_v21  ;;  %319 = vadd.xlane.f32.xlu1 %v318_v60  ;;  %364 = vadd.xlane.f32.xlu0 %v363_v15  ;;  %v178_v51 = vpop.xlane.xlu0 %177  ;;  %v366_v11 = vsel %vm85_vm0, %v276_v63, 0.0 }
  0xcb   :  { %v181_v36 = vpop.xlane.xlu1 %180  ;;  %v213_v19 = vmul.f32 0.03125, %v178_v51  ;;  %v261_v30 = vmul.f32 %v1722_v10, %v1722_v10 }
  0xcc   :  { %v214_v3 = vmul.f32 0.03125, %v181_v36  ;;  %v262_v20 = vmul.f32 %v1726_v8, %v1726_v8 }
  0xcd   :  { %v1736_v14 = vsub.f32 %v1141_v34, %v213_v19  ;;  %v321_v39 = vsel %vm85_vm0, %v261_v30, 0.0 }
  0xce   :  { %v1740_v24 = vsub.f32 %v1142_v35, %v214_v3  ;;  %367 = vadd.xlane.f32.xlu1 %v366_v11  ;;  %322 = vadd.xlane.f32.xlu0 %v321_v39  ;;  %v324_v26 = vsel %vm85_vm0, %v262_v20, 0.0 }
  0xcf   :  { %v277_v56 = vmul.f32 %v1736_v14, %v1736_v14 }
  0xd0   :  { %v278_v53 = vmul.f32 %v1740_v24, %v1740_v24 }
  0xd1   :  { %v369_v41 = vsel %vm85_vm0, %v277_v56, 0.0 }
  0xd2   :  { %325 = vadd.xlane.f32.xlu1 %v324_v26  ;;  %370 = vadd.xlane.f32.xlu0 %v369_v41  ;;  %v372_v25 = vsel %vm85_vm0, %v278_v53, 0.0  ;;  %v1754_v53 = vld [vmem:[%s2039_s3] ss:$0 sm:$0xff] }
  0xd6   :  { %373 = vadd.xlane.f32.xlu1 %v372_v25 }
 0x11f   :  { %v281_v34 = vpop.xlane.xlu0 %280 }
 0x120   :  { %v375_v35 = vmul.f32 0.03125, %v281_v34 }
 0x122   :  { %v407_v44 = vadd.f32 1e-06, %v375_v35 }
 0x123   :  { %v284_v45 = vpop.xlane.xlu1 %283  ;;  %v329_v16 = vpop.xlane.xlu0 %328 }
 0x124   :  { %1218 = vrsqrt.f32 %v407_v44  ;;  %v376_v49 = vmul.f32 0.03125, %v284_v45  ;;  %v391_v61 = vmul.f32 0.03125, %v329_v16 }
 0x126   :  { %v408_v0 = vadd.f32 1e-06, %v376_v49  ;;  %v423_v58 = vadd.f32 1e-06, %v391_v61 }
 0x127   :  { %v332_v62 = vpop.xlane.xlu1 %331  ;;  %v287_v46 = vpop.xlane.xlu0 %286 }
 0x128   :  { %1220 = vrsqrt.f32 %v408_v0  ;;  %v392_v50 = vmul.f32 0.03125, %v332_v62  ;;  %v377_v59 = vmul.f32 0.03125, %v287_v46 }
 0x129   :  { %1222 = vrsqrt.f32 %v423_v58 }
 0x12a   :  { %v424_v60 = vadd.f32 1e-06, %v392_v50  ;;  %v409_v7 = vadd.f32 1e-06, %v377_v59 }
 0x12b   :  { %v290_v21 = vpop.xlane.xlu1 %289  ;;  %v335_v9 = vpop.xlane.xlu0 %334 }
 0x12c   :  { %1224 = vrsqrt.f32 %v424_v60  ;;  %v378_v63 = vmul.f32 0.03125, %v290_v21  ;;  %v393_v15 = vmul.f32 0.03125, %v335_v9 }
 0x12d   :  { %1226 = vrsqrt.f32 %v409_v7 }
 0x12e   :  { %v410_v51 = vadd.f32 1e-06, %v378_v63  ;;  %v425_v36 = vadd.f32 1e-06, %v393_v15 }
 0x12f   :  { %v338_v11 = vpop.xlane.xlu1 %337  ;;  %v293_v19 = vpop.xlane.xlu0 %292 }
 0x130   :  { %1228 = vrsqrt.f32 %v410_v51  ;;  %v394_v3 = vmul.f32 0.03125, %v338_v11  ;;  %v379_v30 = vmul.f32 0.03125, %v293_v19 }
 0x131   :  { %v1219_v20 = vpop.eup %1218  ;;  %1230 = vrsqrt.f32 %v425_v36 }
 0x132   :  { %v426_v39 = vadd.f32 1e-06, %v394_v3  ;;  %v411_v26 = vadd.f32 1e-06, %v379_v30  ;;  %v471_v56 = vmul.f32 %v1219_v20, %v1522_v54  ;;  %v1761_v54 = vld [vmem:[%s2040_s4] ss:$0 sm:$0xff] }
 0x133   :  { %v296_v41 = vpop.xlane.xlu1 %295  ;;  %v341_v25 = vpop.xlane.xlu0 %340 }
 0x134   :  { %1232 = vrsqrt.f32 %v426_v39  ;;  %v380_v34 = vmul.f32 0.03125, %v296_v41  ;;  %v395_v35 = vmul.f32 0.03125, %v341_v25  ;;  %v510_v45 = vmul.f32 %v1754_v53, %v471_v56 }
 0x135   :  { %v1221_v44 = vpop.eup %1220  ;;  %1234 = vrsqrt.f32 %v411_v26 }
 0x136   :  { %v1223_v16 = vpop.eup %1222  ;;  %v412_v49 = vadd.f32 1e-06, %v380_v34  ;;  %v427_v61 = vadd.f32 1e-06, %v395_v35  ;;  %v472_v0 = vmul.f32 %v1221_v44, %v1534_v29  ;;  %v549_v21 = vadd.f32 %v1761_v54, %v510_v45 }
 0x137   :  { %v344_v58 = vpop.xlane.xlu1 %343  ;;  %v299_v62 = vpop.xlane.xlu0 %298  ;;  %v487_v46 = vmul.f32 %v1223_v16, %v1526_v55 }
 0x138   :  { %1236 = vrsqrt.f32 %v412_v49  ;;  %v396_v50 = vmul.f32 0.03125, %v344_v58  ;;  %v381_v59 = vmul.f32 0.03125, %v299_v62  ;;  %v511_v60 = vmul.f32 %v1754_v53, %v472_v0 }
 0x139   :  { %v1225_v7 = vpop.eup %1224  ;;  %1238 = vrsqrt.f32 %v427_v61  ;;  %v526_v55 = vmul.f32 %v1754_v53, %v487_v46 }
 0x13a   :  { %v1227_v9 = vpop.eup %1226  ;;  %v428_v29 = vadd.f32 1e-06, %v396_v50  ;;  %v413_v63 = vadd.f32 1e-06, %v381_v59  ;;  %v550_v15 = vadd.f32 %v1761_v54, %v511_v60  ;;  %v488_v51 = vmul.f32 %v1225_v7, %v1538_v2 }
 0x13b   :  { %v302_v36 = vpop.xlane.xlu1 %301  ;;  %v347_v11 = vpop.xlane.xlu0 %346  ;;  %v473_v19 = vmul.f32 %v1227_v9, %v1548_v1  ;;  %v565_v1 = vadd.f32 %v1761_v54, %v526_v55 }
 0x13c   :  { %1240 = vrsqrt.f32 %v428_v29  ;;  %v382_v3 = vmul.f32 0.03125, %v302_v36  ;;  %v397_v30 = vmul.f32 0.03125, %v347_v11  ;;  %v581_v20 = vpack.c.bf16 %v550_v15, %v549_v21 }
 0x13d   :  { %v1229_v39 = vpop.eup %1228  ;;  %1242 = vrsqrt.f32 %v413_v63  ;;  %v527_v26 = vmul.f32 %v1754_v53, %v488_v51  ;;  %v512_v56 = vmul.f32 %v1754_v53, %v473_v19 }
 0x13e   :  { %v1231_v41 = vpop.eup %1230  ;;  %v414_v25 = vadd.f32 1e-06, %v382_v3  ;;  %v429_v34 = vadd.f32 1e-06, %v397_v30  ;;  %1180 = vmatprep.mubr.msk.bf16.mxu0 %vm85_vm0, %v581_v20  ;;  %v474_v2 = vmul.f32 %v1229_v39, %v1552_v4 }
 0x13f   :  { %v350_v35 = vpop.xlane.xlu1 %349  ;;  %v305_v44 = vpop.xlane.xlu0 %304  ;;  %v566_v45 = vadd.f32 %v1761_v54, %v527_v26  ;;  %v489_v16 = vmul.f32 %v1231_v41, %v1562_v6  ;;  %v551_v46 = vadd.f32 %v1761_v54, %v512_v56 }
 0x140   :  { %1244 = vrsqrt.f32 %v414_v25  ;;  %v398_v49 = vmul.f32 0.03125, %v350_v35  ;;  %v383_v61 = vmul.f32 0.03125, %v305_v44  ;;  %v513_v0 = vmul.f32 %v1754_v53, %v474_v2 }
 0x141   :  { %v1233_v58 = vpop.eup %1232  ;;  %1246 = vrsqrt.f32 %v429_v34  ;;  %v589_v62 = vpack.c.bf16 %v566_v45, %v565_v1  ;;  %v528_v9 = vmul.f32 %v1754_v53, %v489_v16 }
 0x142   :  { %v1235_v50 = vpop.eup %1234  ;;  %v430_v4 = vadd.f32 1e-06, %v398_v49  ;;  %v415_v59 = vadd.f32 1e-06, %v383_v61  ;;  %v552_v60 = vadd.f32 %v1761_v54, %v513_v0  ;;  %v490_v7 = vmul.f32 %v1233_v58, %v1566_v12 }
 0x143   :  { %1196 = vmatprep.mubr.msk.bf16.mxu1 %vm85_vm0, %v589_v62  ;;  %v308_v6 = vpop.xlane.xlu1 %307  ;;  %v353_v21 = vpop.xlane.xlu0 %352  ;;  %v475_v29 = vmul.f32 %v1235_v50, %v1576_v13  ;;  %v567_v13 = vadd.f32 %v1761_v54, %v528_v9 }
 0x144   :  { %1248 = vrsqrt.f32 %v430_v4  ;;  %v384_v63 = vmul.f32 0.03125, %v308_v6  ;;  %v399_v15 = vmul.f32 0.03125, %v353_v21  ;;  %v582_v51 = vpack.c.bf16 %v552_v60, %v551_v46 }
 0x145   :  { %v1237_v36 = vpop.eup %1236  ;;  %1250 = vrsqrt.f32 %v415_v59  ;;  %v529_v11 = vmul.f32 %v1754_v53, %v490_v7  ;;  %v514_v55 = vmul.f32 %v1754_v53, %v475_v29 }
 0x146   :  { %v1239_v19 = vpop.eup %1238  ;;  %v416_v12 = vadd.f32 1e-06, %v384_v63  ;;  %v431_v3 = vadd.f32 1e-06, %v399_v15  ;;  %1181 = vmatmul.mubr.msk.bf16.vlgmr.msra.gmra.mxu0 %vm85_vm0, %v582_v51  ;;  %v476_v30 = vmul.f32 %v1237_v36, %v1580_v17 }
 0x147   :  { %v356_v20 = vpop.xlane.xlu1 %355  ;;  %v311_v39 = vpop.xlane.xlu0 %310  ;;  %v568_v26 = vadd.f32 %v1761_v54, %v529_v11  ;;  %v491_v56 = vmul.f32 %v1239_v19, %v1590_v18  ;;  %v553_v44 = vadd.f32 %v1761_v54, %v514_v55 }
 0x148   :  { %1252 = vrsqrt.f32 %v416_v12  ;;  %v400_v41 = vmul.f32 0.03125, %v356_v20  ;;  %v385_v25 = vmul.f32 0.03125, %v311_v39  ;;  %v515_v34 = vmul.f32 %v1754_v53, %v476_v30 }
 0x149   :  { %v1241_v2 = vpop.eup %1240  ;;  %1254 = vrsqrt.f32 %v431_v3  ;;  %v590_v35 = vpack.c.bf16 %v568_v26, %v567_v13  ;;  %v530_v0 = vmul.f32 %v1754_v53, %v491_v56 }
 0x14a   :  { %v1243_v1 = vpop.eup %1242  ;;  %v432_v17 = vadd.f32 1e-06, %v400_v41  ;;  %v417_v45 = vadd.f32 1e-06, %v385_v25  ;;  %v554_v16 = vadd.f32 %v1761_v54, %v515_v34  ;;  %v492_v49 = vmul.f32 %v1241_v2, %v1594_v22 }
 0x14b   :  { %1197 = vmatmul.mubr.msk.bf16.vlgmr.msra.gmra.mxu1 %vm85_vm0, %v590_v35  ;;  %v314_v18 = vpop.xlane.xlu1 %313  ;;  %v359_v61 = vpop.xlane.xlu0 %358  ;;  %v477_v58 = vmul.f32 %v1243_v1, %v1604_v23  ;;  %v569_v23 = vadd.f32 %v1761_v54, %v530_v0 }
 0x14c   :  { %1256 = vrsqrt.f32 %v432_v17  ;;  %v386_v62 = vmul.f32 0.03125, %v314_v18  ;;  %v401_v46 = vmul.f32 0.03125, %v359_v61  ;;  %v583_v50 = vpack.c.bf16 %v554_v16, %v553_v44 }
 0x14d   :  { %v1245_v4 = vpop.eup %1244  ;;  %1258 = vrsqrt.f32 %v417_v45  ;;  %v531_v59 = vmul.f32 %v1754_v53, %v492_v49  ;;  %v516_v60 = vmul.f32 %v1754_v53, %v477_v58 }
 0x14e   :  { %v1247_v7 = vpop.eup %1246  ;;  %v418_v22 = vadd.f32 1e-06, %v386_v62  ;;  %v433_v6 = vadd.f32 1e-06, %v401_v46  ;;  %1184 = vmatprep.mubr.msk.bf16.mxu0 %vm85_vm0, %v583_v50  ;;  %v478_v21 = vmul.f32 %v1245_v4, %v1608_v27 }
 0x14f   :  { %v362_v9 = vpop.xlane.xlu1 %361  ;;  %v317_v29 = vpop.xlane.xlu0 %316  ;;  %v570_v63 = vadd.f32 %v1761_v54, %v531_v59  ;;  %v493_v15 = vmul.f32 %v1247_v7, %v1618_v28  ;;  %v555_v12 = vadd.f32 %v1761_v54, %v516_v60 }
 0x150   :  { %1260 = vrsqrt.f32 %v418_v22  ;;  %v402_v51 = vmul.f32 0.03125, %v362_v9  ;;  %v387_v36 = vmul.f32 0.03125, %v317_v29  ;;  %v517_v11 = vmul.f32 %v1754_v53, %v478_v21 }
 0x151   :  { %v1249_v55 = vpop.eup %1248  ;;  %1262 = vrsqrt.f32 %v433_v6  ;;  %v591_v19 = vpack.c.bf16 %v570_v63, %v569_v23  ;;  %v532_v26 = vmul.f32 %v1754_v53, %v493_v15 }
 0x152   :  { %v1251_v3 = vpop.eup %1250  ;;  %v434_v27 = vadd.f32 1e-06, %v402_v51  ;;  %v419_v30 = vadd.f32 1e-06, %v387_v36  ;;  %v556_v20 = vadd.f32 %v1761_v54, %v517_v11  ;;  %v494_v39 = vmul.f32 %v1249_v55, %v1622_v32 }
 0x153   :  { %1200 = vmatprep.mubr.msk.bf16.mxu1 %vm85_vm0, %v591_v19  ;;  %v320_v28 = vpop.xlane.xlu1 %319  ;;  %v365_v13 = vpop.xlane.xlu0 %364  ;;  %v479_v56 = vmul.f32 %v1251_v3, %v1632_v33  ;;  %v571_v33 = vadd.f32 %v1761_v54, %v532_v26 }
 0x154   :  { %1264 = vrsqrt.f32 %v434_v27  ;;  %v388_v41 = vmul.f32 0.03125, %v320_v28  ;;  %v403_v25 = vmul.f32 0.03125, %v365_v13  ;;  %v584_v34 = vpack.c.bf16 %v556_v20, %v555_v12 }
 0x155   :  { %v1253_v2 = vpop.eup %1252  ;;  %1266 = vrsqrt.f32 %v419_v30  ;;  %v533_v35 = vmul.f32 %v1754_v53, %v494_v39  ;;  %v518_v44 = vmul.f32 %v1754_v53, %v479_v56 }
 0x156   :  { %v1255_v1 = vpop.eup %1254  ;;  %v420_v32 = vadd.f32 1e-06, %v388_v41  ;;  %v435_v17 = vadd.f32 1e-06, %v403_v25  ;;  %1185 = vmatmul.mubr.msk.bf16.gmra.mxu0 %vm85_vm0, %v584_v34  ;;  %v480_v45 = vmul.f32 %v1253_v2, %v1636_v37 }
 0x157   :  { %v368_v16 = vpop.xlane.xlu1 %367  ;;  %v323_v49 = vpop.xlane.xlu0 %322  ;;  %v572_v18 = vadd.f32 %v1761_v54, %v533_v35  ;;  %v495_v61 = vmul.f32 %v1255_v1, %v1646_v38  ;;  %v557_v4 = vadd.f32 %v1761_v54, %v518_v44 }
 0x158   :  { %1268 = vrsqrt.f32 %v420_v32  ;;  %v404_v0 = vmul.f32 0.03125, %v368_v16  ;;  %v389_v58 = vmul.f32 0.03125, %v323_v49  ;;  %v519_v62 = vmul.f32 %v1754_v53, %v480_v45 }
 0x159   :  { %v1257_v46 = vpop.eup %1256  ;;  %1270 = vrsqrt.f32 %v435_v17  ;;  %v592_v50 = vpack.c.bf16 %v572_v18, %v571_v33  ;;  %v534_v21 = vmul.f32 %v1754_v53, %v495_v61 }
 0x15a   :  { %v1259_v59 = vpop.eup %1258  ;;  %v436_v37 = vadd.f32 1e-06, %v404_v0  ;;  %v421_v60 = vadd.f32 1e-06, %v389_v58  ;;  %v558_v7 = vadd.f32 %v1761_v54, %v519_v62  ;;  %v496_v22 = vmul.f32 %v1257_v46, %v1650_v42 }
 0x15b   :  { %1201 = vmatmul.mubr.msk.bf16.gmra.mxu1 %vm85_vm0, %v592_v50  ;;  %v326_v38 = vpop.xlane.xlu1 %325  ;;  %v371_v6 = vpop.xlane.xlu0 %370  ;;  %v481_v9 = vmul.f32 %v1259_v59, %v1660_v43  ;;  %v573_v43 = vadd.f32 %v1761_v54, %v534_v21 }
 0x15c   :  { %1272 = vrsqrt.f32 %v436_v37  ;;  %v390_v29 = vmul.f32 0.03125, %v326_v38  ;;  %v405_v23 = vmul.f32 0.03125, %v371_v6  ;;  %v585_v63 = vpack.c.bf16 %v558_v7, %v557_v4 }
 0x15d   :  { %v1261_v15 = vpop.eup %1260  ;;  %1274 = vrsqrt.f32 %v421_v60  ;;  %v535_v51 = vmul.f32 %v1754_v53, %v496_v22  ;;  %v520_v36 = vmul.f32 %v1754_v53, %v481_v9 }
 0x15e   :  { %v1263_v11 = vpop.eup %1262  ;;  %v422_v42 = vadd.f32 1e-06, %v390_v29  ;;  %v437_v55 = vadd.f32 1e-06, %v405_v23  ;;  %1188 = vmatprep.mubr.msk.bf16.mxu0 %vm85_vm0, %v585_v63  ;;  %v482_v19 = vmul.f32 %v1261_v15, %v1664_v47  ;;  %v1875_v15 = vld [vmem:[%s2041_s2] ss:$0 sm:$0xff] }
 0x15f   :  { %v374_v12 = vpop.xlane.xlu1 %373  ;;  %v574_v3 = vadd.f32 %v1761_v54, %v535_v51  ;;  %v497_v27 = vmul.f32 %v1263_v11, %v1674_v48  ;;  %v559_v13 = vadd.f32 %v1761_v54, %v520_v36 }
 0x160   :  { %1276 = vrsqrt.f32 %v422_v42  ;;  %v406_v30 = vmul.f32 0.03125, %v374_v12  ;;  %v521_v20 = vmul.f32 %v1754_v53, %v482_v19 }
 0x161   :  { %v1265_v39 = vpop.eup %1264  ;;  %1278 = vrsqrt.f32 %v437_v55  ;;  %v593_v28 = vpack.c.bf16 %v574_v3, %v573_v43  ;;  %v536_v25 = vmul.f32 %v1754_v53, %v497_v27 }
 0x162   :  { %v1267_v26 = vpop.eup %1266  ;;  %v438_v56 = vadd.f32 1e-06, %v406_v30  ;;  %v560_v47 = vadd.f32 %v1761_v54, %v521_v20  ;;  %v498_v41 = vmul.f32 %v1265_v39, %v1678_v52 }
 0x163   :  { %1204 = vmatprep.mubr.msk.bf16.mxu1 %vm85_vm0, %v593_v28  ;;  %v483_v48 = vmul.f32 %v1267_v26, %v1691_v57  ;;  %v575_v1 = vadd.f32 %v1761_v54, %v536_v25 }
 0x164   :  { %1280 = vrsqrt.f32 %v438_v56  ;;  %v586_v34 = vpack.c.bf16 %v560_v47, %v559_v13  ;;  %v537_v2 = vmul.f32 %v1754_v53, %v498_v41 }
 0x165   :  { %v1269_v35 = vpop.eup %1268  ;;  %v522_v17 = vmul.f32 %v1754_v53, %v483_v48 }
 0x166   :  { %v1271_v44 = vpop.eup %1270  ;;  %1189 = vmatmul.mubr.msk.bf16.gmra.mxu0 %vm85_vm0, %v586_v34  ;;  %v576_v32 = vadd.f32 %v1761_v54, %v537_v2  ;;  %v484_v52 = vmul.f32 %v1269_v35, %v1695_v40 }
 0x167   :  { %v499_v45 = vmul.f32 %v1271_v44, %v1708_v5  ;;  %v561_v18 = vadd.f32 %v1761_v54, %v522_v17 }
 0x168   :  { %v594_v16 = vpack.c.bf16 %v576_v32, %v575_v1  ;;  %v523_v57 = vmul.f32 %v1754_v53, %v484_v52 }
 0x169   :  { %v1273_v49 = vpop.eup %1272  ;;  %v538_v58 = vmul.f32 %v1754_v53, %v499_v45 }
 0x16a   :  { %v1275_v33 = vpop.eup %1274  ;;  %1205 = vmatmul.mubr.msk.bf16.gmra.mxu1 %vm85_vm0, %v594_v16  ;;  %v562_v61 = vadd.f32 %v1761_v54, %v523_v57  ;;  %v500_v0 = vmul.f32 %v1273_v49, %v1712_v31 }
 0x16b   :  { %v485_v40 = vmul.f32 %v1275_v33, %v1722_v10  ;;  %v577_v4 = vadd.f32 %v1761_v54, %v538_v58 }
 0x16c   :  { %v587_v62 = vpack.c.bf16 %v562_v61, %v561_v18  ;;  %v539_v5 = vmul.f32 %v1754_v53, %v500_v0 }
 0x16d   :  { %v1277_v46 = vpop.eup %1276  ;;  %v524_v60 = vmul.f32 %v1754_v53, %v485_v40 }
 0x16e   :  { %v1279_v50 = vpop.eup %1278  ;;  %1192 = vmatprep.mubr.msk.bf16.mxu0 %vm85_vm0, %v587_v62  ;;  %v578_v59 = vadd.f32 %v1761_v54, %v539_v5  ;;  %v486_v37 = vmul.f32 %v1277_v46, %v1726_v8 }
 0x16f   :  { %v501_v31 = vmul.f32 %v1279_v50, %v1736_v14  ;;  %v563_v38 = vadd.f32 %v1761_v54, %v524_v60 }
 0x170   :  { %v595_v7 = vpack.c.bf16 %v578_v59, %v577_v4  ;;  %v525_v10 = vmul.f32 %v1754_v53, %v486_v37 }
 0x171   :  { %v1281_v22 = vpop.eup %1280  ;;  %v540_v9 = vmul.f32 %v1754_v53, %v501_v31 }
 0x172   :  { %1208 = vmatprep.mubr.msk.bf16.mxu1 %vm85_vm0, %v595_v7  ;;  %v564_v6 = vadd.f32 %v1761_v54, %v525_v10  ;;  %v502_v21 = vmul.f32 %v1281_v22, %v1740_v24 }
 0x173   :  { %v579_v14 = vadd.f32 %v1761_v54, %v540_v9 }
 0x174   :  { %v588_v29 = vpack.c.bf16 %v564_v6, %v563_v38  ;;  %v541_v8 = vmul.f32 %v1754_v53, %v502_v21 }
 0x176   :  { %1193 = vmatmul.mubr.msk.bf16.gmra.mxu0 %vm85_vm0, %v588_v29  ;;  %v580_v23 = vadd.f32 %v1761_v54, %v541_v8 }
 0x178   :  { %v596_v63 = vpack.c.bf16 %v580_v23, %v579_v14 }
 0x17a   :  { %1209 = vmatmul.mubr.msk.bf16.gmra.mxu1 %vm85_vm0, %v596_v63 }
 0x206   :  { %v1182_v24 = vpop.f32.mrf.mxu0 }
 0x207   :  { %v711_v51 = vadd.f32 %v1182_v24, %v1875_v15 }
 0x208   :  { %v702_v36 = vpop.f32.mrf.mxu0 }
 0x209   :  { %v1049_v53 = vpack.c.bf16 %v711_v51, %v711_v51  ;;  %v703_v11 = vadd.f32 %v1875_v15, %v702_v36 }
 0x20a   :  { %v1183_v42 = vpop.f32.mrf.mxu0 }
 0x20b   :  { %960 = vst.msk [vmem:[%s2042_s5 + $0x8] sm:$0xf] %vm957_vm1, %v1049_v53  ;;  %v1047_v54 = vpack.c.bf16 %v703_v11, %v703_v11  ;;  %v714_v55 = vadd.f32 %v1183_v42, %v1875_v15  ;;  %v1198_v19 = vpop.f32.mrf.mxu1 }
 0x20c   :  { %v775_v12 = vadd.f32 %v1198_v19, %v1875_v15  ;;  %v705_v43 = vpop.f32.mrf.mxu0 }
 0x20d   :  { %958 = vst.msk [vmem:[%s2042_s5] sm:$0xf] %vm957_vm1, %v1047_v54  ;;  %v1050_v3 = vpack.c.bf16 %v714_v55, %v714_v55  ;;  %v706_v27 = vadd.f32 %v1875_v15, %v705_v43  ;;  %v766_v30 = vpop.f32.mrf.mxu1 }
 0x20e   :  { %v1065_v20 = vpack.c.bf16 %v775_v12, %v775_v12  ;;  %v767_v39 = vadd.f32 %v1875_v15, %v766_v30 }
 0x20f   :  { %961 = vst.msk [vmem:[%s2042_s5 + $0xc] sm:$0xf] %vm957_vm1, %v1050_v3  ;;  %v1048_v28 = vpack.c.bf16 %v706_v27, %v706_v27  ;;  %v1199_v13 = vpop.f32.mrf.mxu1 }
 0x210   :  { %976 = vst.msk [vmem:[%s2042_s5 + $0x48] sm:$0xf] %vm957_vm1, %v1065_v20  ;;  %v1063_v26 = vpack.c.bf16 %v767_v39, %v767_v39  ;;  %v778_v56 = vadd.f32 %v1199_v13, %v1875_v15 }
 0x211   :  { %959 = vst.msk [vmem:[%s2042_s5 + $0x4] sm:$0xf] %vm957_vm1, %v1048_v28  ;;  %v769_v47 = vpop.f32.mrf.mxu1 }
 0x212   :  { %974 = vst.msk [vmem:[%s2042_s5 + $0x40] sm:$0xf] %vm957_vm1, %v1063_v26  ;;  %v1066_v41 = vpack.c.bf16 %v778_v56, %v778_v56  ;;  %v770_v25 = vadd.f32 %v1875_v15, %v769_v47 }
 0x214   :  { %977 = vst.msk [vmem:[%s2042_s5 + $0x4c] sm:$0xf] %vm957_vm1, %v1066_v41  ;;  %v1064_v48 = vpack.c.bf16 %v770_v25, %v770_v25 }
 0x216   :  { %975 = vst.msk [vmem:[%s2042_s5 + $0x44] sm:$0xf] %vm957_vm1, %v1064_v48  ;;  %v1186_v34 = vpop.f32.mrf.mxu0 }
 0x217   :  { %v727_v2 = vadd.f32 %v1186_v34, %v1875_v15 }
 0x218   :  { %v718_v35 = vpop.f32.mrf.mxu0 }
 0x219   :  { %v1053_v44 = vpack.c.bf16 %v727_v2, %v727_v2  ;;  %v719_v1 = vadd.f32 %v1875_v15, %v718_v35 }
 0x21a   :  { %v1187_v32 = vpop.f32.mrf.mxu0 }
 0x21b   :  { %964 = vst.msk [vmem:[%s2042_s5 + $0x18] sm:$0xf] %vm957_vm1, %v1053_v44  ;;  %v1051_v52 = vpack.c.bf16 %v719_v1, %v719_v1  ;;  %v730_v17 = vadd.f32 %v1187_v32, %v1875_v15  ;;  %v1202_v45 = vpop.f32.mrf.mxu1 }
 0x21c   :  { %v791_v16 = vadd.f32 %v1202_v45, %v1875_v15  ;;  %v721_v57 = vpop.f32.mrf.mxu0 }
 0x21d   :  { %962 = vst.msk [vmem:[%s2042_s5 + $0x10] sm:$0xf] %vm957_vm1, %v1051_v52  ;;  %v1054_v49 = vpack.c.bf16 %v730_v17, %v730_v17  ;;  %v722_v33 = vadd.f32 %v1875_v15, %v721_v57  ;;  %v782_v18 = vpop.f32.mrf.mxu1 }
 0x21e   :  { %v1069_v61 = vpack.c.bf16 %v791_v16, %v791_v16  ;;  %v783_v0 = vadd.f32 %v1875_v15, %v782_v18 }
 0x21f   :  { %965 = vst.msk [vmem:[%s2042_s5 + $0x1c] sm:$0xf] %vm957_vm1, %v1054_v49  ;;  %v1052_v58 = vpack.c.bf16 %v722_v33, %v722_v33  ;;  %v1203_v40 = vpop.f32.mrf.mxu1 }
 0x220   :  { %980 = vst.msk [vmem:[%s2042_s5 + $0x58] sm:$0xf] %vm957_vm1, %v1069_v61  ;;  %v1067_v62 = vpack.c.bf16 %v783_v0, %v783_v0  ;;  %v794_v5 = vadd.f32 %v1203_v40, %v1875_v15 }
 0x221   :  { %963 = vst.msk [vmem:[%s2042_s5 + $0x14] sm:$0xf] %vm957_vm1, %v1052_v58  ;;  %v785_v46 = vpop.f32.mrf.mxu1 }
 0x222   :  { %978 = vst.msk [vmem:[%s2042_s5 + $0x50] sm:$0xf] %vm957_vm1, %v1067_v62  ;;  %v1070_v50 = vpack.c.bf16 %v794_v5, %v794_v5  ;;  %v786_v4 = vadd.f32 %v1875_v15, %v785_v46 }
 0x224   :  { %981 = vst.msk [vmem:[%s2042_s5 + $0x5c] sm:$0xf] %vm957_vm1, %v1070_v50  ;;  %v1068_v59 = vpack.c.bf16 %v786_v4, %v786_v4 }
 0x226   :  { %979 = vst.msk [vmem:[%s2042_s5 + $0x54] sm:$0xf] %vm957_vm1, %v1068_v59  ;;  %v1190_v37 = vpop.f32.mrf.mxu0 }
 0x227   :  { %v743_v60 = vadd.f32 %v1190_v37, %v1875_v15 }
 0x228   :  { %v734_v31 = vpop.f32.mrf.mxu0 }
 0x229   :  { %v1057_v7 = vpack.c.bf16 %v743_v60, %v743_v60  ;;  %v735_v10 = vadd.f32 %v1875_v15, %v734_v31 }
 0x22a   :  { %v1191_v22 = vpop.f32.mrf.mxu0  ;;  %v1206_v38 = vpop.f32.mrf.mxu1 }
 0x22b   :  { %968 = vst.msk [vmem:[%s2042_s5 + $0x28] sm:$0xf] %vm957_vm1, %v1057_v7  ;;  %v1055_v6 = vpack.c.bf16 %v735_v10, %v735_v10  ;;  %v746_v21 = vadd.f32 %v1191_v22, %v1875_v15  ;;  %v807_v9 = vadd.f32 %v1206_v38, %v1875_v15 }
 0x22c   :  { %v737_v29 = vpop.f32.mrf.mxu0  ;;  %v798_v8 = vpop.f32.mrf.mxu1 }
 0x22d   :  { %966 = vst.msk [vmem:[%s2042_s5 + $0x20] sm:$0xf] %vm957_vm1, %v1055_v6  ;;  %v1058_v14 = vpack.c.bf16 %v746_v21, %v746_v21  ;;  %v1073_v23 = vpack.c.bf16 %v807_v9, %v807_v9  ;;  %v738_v63 = vadd.f32 %v1875_v15, %v737_v29  ;;  %v799_v24 = vadd.f32 %v1875_v15, %v798_v8 }
 0x22e   :  { %v1207_v51 = vpop.f32.mrf.mxu1 }
 0x22f   :  { %969 = vst.msk [vmem:[%s2042_s5 + $0x2c] sm:$0xf] %vm957_vm1, %v1058_v14  ;;  %984 = vst.msk [vmem:[%s2042_s5 + $0x68] sm:$0xf] %vm957_vm1, %v1073_v23  ;;  %v1056_v36 = vpack.c.bf16 %v738_v63, %v738_v63  ;;  %v1071_v53 = vpack.c.bf16 %v799_v24, %v799_v24  ;;  %v810_v11 = vadd.f32 %v1207_v51, %v1875_v15 }
 0x230   :  { %v801_v42 = vpop.f32.mrf.mxu1 }
 0x231   :  { %967 = vst.msk [vmem:[%s2042_s5 + $0x24] sm:$0xf] %vm957_vm1, %v1056_v36  ;;  %982 = vst.msk [vmem:[%s2042_s5 + $0x60] sm:$0xf] %vm957_vm1, %v1071_v53  ;;  %v1074_v54 = vpack.c.bf16 %v810_v11, %v810_v11  ;;  %v802_v55 = vadd.f32 %v1875_v15, %v801_v42 }
 0x233   :  { %985 = vst.msk [vmem:[%s2042_s5 + $0x6c] sm:$0xf] %vm957_vm1, %v1074_v54  ;;  %v1072_v19 = vpack.c.bf16 %v802_v55, %v802_v55 }
 0x235   :  { %983 = vst.msk [vmem:[%s2042_s5 + $0x64] sm:$0xf] %vm957_vm1, %v1072_v19 }
 0x236   :  { %v1194_v12 = vpop.f32.mrf.mxu0 }
 0x237   :  { %v759_v43 = vadd.f32 %v1194_v12, %v1875_v15 }
 0x238   :  { %v750_v3 = vpop.f32.mrf.mxu0 }
 0x239   :  { %v1061_v27 = vpack.c.bf16 %v759_v43, %v759_v43  ;;  %v751_v30 = vadd.f32 %v1875_v15, %v750_v3 }
 0x23a   :  { %v1195_v20 = vpop.f32.mrf.mxu0  ;;  %v1210_v39 = vpop.f32.mrf.mxu1 }
 0x23b   :  { %972 = vst.msk [vmem:[%s2042_s5 + $0x38] sm:$0xf] %vm957_vm1, %v1061_v27  ;;  %v1059_v28 = vpack.c.bf16 %v751_v30, %v751_v30  ;;  %v762_v13 = vadd.f32 %v1195_v20, %v1875_v15  ;;  %v823_v26 = vadd.f32 %v1210_v39, %v1875_v15 }
 0x23c   :  { %v753_v56 = vpop.f32.mrf.mxu0  ;;  %v814_v47 = vpop.f32.mrf.mxu1 }
 0x23d   :  { %970 = vst.msk [vmem:[%s2042_s5 + $0x30] sm:$0xf] %vm957_vm1, %v1059_v28  ;;  %v1062_v41 = vpack.c.bf16 %v762_v13, %v762_v13  ;;  %v1077_v25 = vpack.c.bf16 %v823_v26, %v823_v26  ;;  %v754_v48 = vadd.f32 %v1875_v15, %v753_v56  ;;  %v815_v34 = vadd.f32 %v1875_v15, %v814_v47 }
 0x23e   :  { %v1211_v2 = vpop.f32.mrf.mxu1 }
 0x23f   :  { %973 = vst.msk [vmem:[%s2042_s5 + $0x3c] sm:$0xf] %vm957_vm1, %v1062_v41  ;;  %988 = vst.msk [vmem:[%s2042_s5 + $0x78] sm:$0xf] %vm957_vm1, %v1077_v25  ;;  %v1060_v35 = vpack.c.bf16 %v754_v48, %v754_v48  ;;  %v1075_v44 = vpack.c.bf16 %v815_v34, %v815_v34  ;;  %v826_v1 = vadd.f32 %v1211_v2, %v1875_v15 }
 0x240   :  { %v817_v32 = vpop.f32.mrf.mxu1 }
 0x241   :  { %971 = vst.msk [vmem:[%s2042_s5 + $0x34] sm:$0xf] %vm957_vm1, %v1060_v35  ;;  %986 = vst.msk [vmem:[%s2042_s5 + $0x70] sm:$0xf] %vm957_vm1, %v1075_v44  ;;  %v1078_v52 = vpack.c.bf16 %v826_v1, %v826_v1  ;;  %v818_v17 = vadd.f32 %v1875_v15, %v817_v32 }
 0x243   :  { %989 = vst.msk [vmem:[%s2042_s5 + $0x7c] sm:$0xf] %vm957_vm1, %v1078_v52  ;;  %v1076_v45 = vpack.c.bf16 %v818_v17, %v818_v17 }
 0x245   :  { %987 = vst.msk [vmem:[%s2042_s5 + $0x74] sm:$0xf] %vm957_vm1, %v1076_v45 }

// kernel: vit_forward_intermediates.15
= control target key start
LH: loop header
LB: loop body
LE: loop exit
PB: predicated region body
PF: predicated region fallthrough
CT: control target
= control target key end

     0   :  { %vm153_vm0 = vcmask 261120   ;;  %vm587_vm1 = vcmask 257024   ;;  %s1234_s1 = inlined_call_operand.vmem [shape: bf16[32,32], index: 1, kind: input, shape index: {}]   ;;  %s1235_s0 = inlined_call_operand.vmem [shape: bf16[256,32], index: 0, kind: input, shape index: {}]   ;;  %s1236_s3 = inlined_call_operand.vmem [shape: bf16[256,32], index: 3, kind: input, shape index: {}]   ;;  %s1237_s2 = inlined_call_operand.vmem [shape: f32[1,32], index: 2, kind: input, shape index: {}]   ;;  %s1238_s4 = inlined_call_operand.vmem [shape: bf16[256,32], index: 4, kind: output, shape index: {}]  }
   0x1   :  { %v860_v0 = vld [vmem:[%s1234_s1 + $0x8] sm:$0xff]   ;;  %v861_v1 = vld [vmem:[%s1234_s1] sm:$0xff]   ;;  %v866_v6 = vld [vmem:[%s1235_s0 + $0x10] sm:$0xff]  }
   0x2   :  { %820 = vmatprep.subr.bf16.mxu0 %v860_v0  ;;  %856 = vmatprep.subr.bf16.mxu1 %v860_v0  ;;  %v862_v2 = vld [vmem:[%s1235_s0] sm:$0xff]   ;;  %v864_v4 = vld [vmem:[%s1235_s0 + $0x8] sm:$0xff]   ;;  %v867_v7 = vld [vmem:[%s1235_s0 + $0x50] sm:$0xff]  }
   0x3   :  { %821 = vmatpush3.bf16.msra.mxu0 %v860_v0  ;;  %858 = vmatpush3.bf16.msra.mxu1 %v860_v0  ;;  %v863_v3 = vld [vmem:[%s1235_s0 + $0x40] sm:$0xff]   ;;  %v865_v5 = vld [vmem:[%s1235_s0 + $0x48] sm:$0xff]   ;;  %v868_v8 = vld [vmem:[%s1235_s0 + $0x18] sm:$0xff]  }
   0x4   :  { %822 = vmatprep.subr.bf16.mxu0 %v861_v1  ;;  %857 = vmatprep.subr.bf16.mxu1 %v861_v1  ;;  %v869_v9 = vld [vmem:[%s1235_s0 + $0x58] sm:$0xff]   ;;  %v870_v10 = vld [vmem:[%s1235_s0 + $0x20] sm:$0xff]   ;;  %v872_v12 = vld [vmem:[%s1235_s0 + $0x28] sm:$0xff]  }
   0x5   :  { %824 = vmatprep.mubr.msk.bf16.mxu0 %vm153_vm0, %v862_v2  ;;  %840 = vmatprep.mubr.msk.bf16.mxu1 %vm153_vm0, %v863_v3  ;;  %v871_v11 = vld [vmem:[%s1235_s0 + $0x60] sm:$0xff]   ;;  %v873_v13 = vld [vmem:[%s1235_s0 + $0x68] sm:$0xff]   ;;  %v874_v14 = vld [vmem:[%s1235_s0 + $0x30] sm:$0xff]  }
   0x6   :  { %v875_v15 = vld [vmem:[%s1235_s0 + $0x70] sm:$0xff]   ;;  %v876_v16 = vld [vmem:[%s1235_s0 + $0x38] sm:$0xff]   ;;  %v787_v18 = vld [vmem:[%s1236_s3 + $0x8] sm:$0xff]  }
   0x7   :  { %823 = vmatpush3.bf16.msra.mxu0 %v861_v1  ;;  %859 = vmatpush3.bf16.msra.mxu1 %v861_v1  ;;  %v877_v17 = vld [vmem:[%s1235_s0 + $0x78] sm:$0xff]   ;;  %v795_v19 = vld [vmem:[%s1236_s3 + $0x48] sm:$0xff]   ;;  %v982_v20 = vld [vmem:[%s1237_s2] ss:$0 sm:$0xff]  ;;  %v729_v23 = vunpack.c.l.bf16 %v787_v18  ;;  %v730_v40 = vunpack.c.h.bf16 %v787_v18 }
   0x8   :  { %v724_v21 = vld [vmem:[%s1236_s3] sm:$0xff]   ;;  %v761_v24 = vunpack.c.l.bf16 %v795_v19  ;;  %v997_v37 = vld [vmem:[%s1236_s3 + $0x18] sm:$0xff]   ;;  %v762_v42 = vunpack.c.h.bf16 %v795_v19  ;;  %v1007_v49 = vld [vmem:[%s1236_s3 + $0x10] sm:$0xff]  }
   0x9   :  { %v794_v22 = vld [vmem:[%s1236_s3 + $0x40] sm:$0xff]   ;;  %v725_v29 = vunpack.c.l.bf16 %v724_v21  ;;  %v1002_v38 = vld [vmem:[%s1236_s3 + $0x58] sm:$0xff]   ;;  %v726_v43 = vunpack.c.h.bf16 %v724_v21  ;;  %v1012_v50 = vld [vmem:[%s1236_s3 + $0x50] sm:$0xff]   ;;  %v737_v55 = vunpack.c.l.bf16 %v997_v37  ;;  %v733_v1 = vunpack.c.l.bf16 %v1007_v49 }
   0xa   :  { %825 = vmatmul.mubr.msk.bf16.vlgmr.msra.gmra.mxu0 %vm153_vm0, %v864_v4  ;;  %841 = vmatmul.mubr.msk.bf16.vlgmr.msra.gmra.mxu1 %vm153_vm0, %v865_v5  ;;  %v757_v30 = vunpack.c.l.bf16 %v794_v22  ;;  %v758_v44 = vunpack.c.h.bf16 %v794_v22  ;;  %v769_v56 = vunpack.c.l.bf16 %v1002_v38  ;;  %v765_v2 = vunpack.c.l.bf16 %v1012_v50  ;;  %v1050_v18 = vld [vmem:[%s1236_s3 + $0x68] sm:$0xff]  }
   0xb   :  { %828 = vmatprep.mubr.msk.bf16.mxu0 %vm153_vm0, %v866_v6  ;;  %844 = vmatprep.mubr.msk.bf16.mxu1 %vm153_vm0, %v867_v7 }
  0x12   :  { %829 = vmatmul.mubr.msk.bf16.gmra.mxu0 %vm153_vm0, %v868_v8  ;;  %845 = vmatmul.mubr.msk.bf16.gmra.mxu1 %vm153_vm0, %v869_v9 }
  0x13   :  { %832 = vmatprep.mubr.msk.bf16.mxu0 %vm153_vm0, %v870_v10  ;;  %848 = vmatprep.mubr.msk.bf16.mxu1 %vm153_vm0, %v871_v11  ;;  %v738_v11 = vunpack.c.h.bf16 %v997_v37  ;;  %v777_v37 = vunpack.c.l.bf16 %v1050_v18 }
  0x1a   :  { %833 = vmatmul.mubr.msk.bf16.gmra.mxu0 %vm153_vm0, %v872_v12  ;;  %849 = vmatmul.mubr.msk.bf16.gmra.mxu1 %vm153_vm0, %v873_v13  ;;  %v770_v12 = vunpack.c.h.bf16 %v1002_v38 }
  0x1b   :  { %836 = vmatprep.mubr.msk.bf16.mxu0 %vm153_vm0, %v874_v14  ;;  %852 = vmatprep.mubr.msk.bf16.mxu1 %vm153_vm0, %v875_v15 }
  0x22   :  { %837 = vmatmul.mubr.msk.bf16.gmra.mxu0 %vm153_vm0, %v876_v16  ;;  %853 = vmatmul.mubr.msk.bf16.gmra.mxu1 %vm153_vm0, %v877_v17  ;;  %v1045_v17 = vld [vmem:[%s1236_s3 + $0x28] sm:$0xff]  }
  0xca   :  { %v826_v25 = vpop.f32.mrf.mxu0  ;;  %v842_v26 = vpop.f32.mrf.mxu1 }
  0xcb   :  { %v245_v27 = vadd.f32 %v826_v25, %v982_v20  ;;  %v309_v28 = vadd.f32 %v842_v26, %v982_v20  ;;  %v766_v25 = vunpack.c.h.bf16 %v1012_v50 }
  0xcc   :  { %v236_v31 = vpop.f32.mrf.mxu0  ;;  %v300_v32 = vpop.f32.mrf.mxu1 }
  0xcd   :  { %v429_v33 = vadd.f32 %v729_v23, %v245_v27  ;;  %v445_v34 = vadd.f32 %v761_v24, %v309_v28  ;;  %v237_v35 = vadd.f32 %v982_v20, %v236_v31  ;;  %v301_v36 = vadd.f32 %v982_v20, %v300_v32  ;;  %v1082_v31 = vld [vmem:[%s1236_s3 + $0x60] sm:$0xff]  }
  0xce   :  { %v827_v39 = vpop.f32.mrf.mxu0  ;;  %v843_v41 = vpop.f32.mrf.mxu1  ;;  %v734_v24 = vunpack.c.h.bf16 %v1007_v49 }
  0xcf   :  { %v693_v45 = vpack.c.bf16 %v429_v33, %v429_v33  ;;  %v709_v46 = vpack.c.bf16 %v445_v34, %v445_v34  ;;  %v427_v47 = vadd.f32 %v725_v29, %v237_v35  ;;  %v443_v48 = vadd.f32 %v757_v30, %v301_v36  ;;  %v1077_v30 = vld [vmem:[%s1236_s3 + $0x20] sm:$0xff]  }
  0xd0   :  { %v248_v51 = vadd.f32 %v827_v39, %v982_v20  ;;  %v312_v52 = vadd.f32 %v843_v41, %v982_v20  ;;  %v239_v53 = vpop.f32.mrf.mxu0  ;;  %v303_v54 = vpop.f32.mrf.mxu1  ;;  %v745_v36 = vunpack.c.l.bf16 %v1045_v17 }
  0xd1   :  { %590 = vst.msk [vmem:[%s1238_s4 + $0x8] sm:$0xf] %vm587_vm1, %v693_v45  ;;  %606 = vst.msk [vmem:[%s1238_s4 + $0x48] sm:$0xf] %vm587_vm1, %v709_v46  ;;  %v691_v57 = vpack.c.bf16 %v427_v47, %v427_v47  ;;  %v707_v58 = vpack.c.bf16 %v443_v48, %v443_v48  ;;  %v240_v59 = vadd.f32 %v982_v20, %v239_v53  ;;  %v741_v46 = vunpack.c.l.bf16 %v1077_v30 }
  0xd2   :  { %v304_v60 = vadd.f32 %v982_v20, %v303_v54  ;;  %v430_v61 = vadd.f32 %v730_v40, %v248_v51  ;;  %v446_v62 = vadd.f32 %v762_v42, %v312_v52  ;;  %v830_v63 = vpop.f32.mrf.mxu0  ;;  %v846_v0 = vpop.f32.mrf.mxu1  ;;  %v773_v47 = vunpack.c.l.bf16 %v1082_v31 }
  0xd3   :  { %588 = vst.msk [vmem:[%s1238_s4] sm:$0xf] %vm587_vm1, %v691_v57  ;;  %604 = vst.msk [vmem:[%s1238_s4 + $0x40] sm:$0xf] %vm587_vm1, %v707_v58  ;;  %v428_v3 = vadd.f32 %v726_v43, %v240_v59  ;;  %v261_v5 = vadd.f32 %v830_v63, %v982_v20  ;;  %v325_v6 = vadd.f32 %v846_v0, %v982_v20  ;;  %v778_v57 = vunpack.c.h.bf16 %v1050_v18  ;;  %v1128_v63 = vld [vmem:[%s1236_s3 + $0x78] sm:$0xff]  }
  0xd4   :  { %v444_v4 = vadd.f32 %v758_v44, %v304_v60  ;;  %v694_v7 = vpack.c.bf16 %v430_v61, %v430_v61  ;;  %v710_v8 = vpack.c.bf16 %v446_v62, %v446_v62  ;;  %v252_v9 = vpop.f32.mrf.mxu0  ;;  %v316_v10 = vpop.f32.mrf.mxu1  ;;  %v1123_v62 = vld [vmem:[%s1236_s3 + $0x38] sm:$0xff]  }
  0xd5   :  { %v692_v13 = vpack.c.bf16 %v428_v3, %v428_v3  ;;  %v433_v15 = vadd.f32 %v737_v55, %v261_v5  ;;  %v449_v16 = vadd.f32 %v769_v56, %v325_v6  ;;  %v253_v19 = vadd.f32 %v982_v20, %v252_v9 }
  0xd6   :  { %v708_v14 = vpack.c.bf16 %v444_v4, %v444_v4  ;;  %591 = vst.msk [vmem:[%s1238_s4 + $0xc] sm:$0xf] %vm587_vm1, %v694_v7  ;;  %607 = vst.msk [vmem:[%s1238_s4 + $0x4c] sm:$0xf] %vm587_vm1, %v710_v8  ;;  %v317_v21 = vadd.f32 %v982_v20, %v316_v10  ;;  %v831_v22 = vpop.f32.mrf.mxu0  ;;  %v847_v23 = vpop.f32.mrf.mxu1  ;;  %v746_v56 = vunpack.c.h.bf16 %v1045_v17  ;;  %v742_v4 = vunpack.c.h.bf16 %v1077_v30  ;;  %v1145_v10 = vld [vmem:[%s1236_s3 + $0x30] sm:$0xff]  }
  0xd7   :  { %589 = vst.msk [vmem:[%s1238_s4 + $0x4] sm:$0xf] %vm587_vm1, %v692_v13  ;;  %v697_v26 = vpack.c.bf16 %v433_v15, %v433_v15  ;;  %v713_v27 = vpack.c.bf16 %v449_v16, %v449_v16  ;;  %v264_v28 = vadd.f32 %v831_v22, %v982_v20  ;;  %v328_v29 = vadd.f32 %v847_v23, %v982_v20 }
  0xd8   :  { %605 = vst.msk [vmem:[%s1238_s4 + $0x44] sm:$0xf] %vm587_vm1, %v708_v14  ;;  %v431_v32 = vadd.f32 %v733_v1, %v253_v19  ;;  %v447_v33 = vadd.f32 %v765_v2, %v317_v21  ;;  %v255_v34 = vpop.f32.mrf.mxu0  ;;  %v319_v35 = vpop.f32.mrf.mxu1  ;;  %v774_v5 = vunpack.c.h.bf16 %v1082_v31  ;;  %v753_v16 = vunpack.c.l.bf16 %v1123_v62 }
  0xd9   :  { %594 = vst.msk [vmem:[%s1238_s4 + $0x18] sm:$0xf] %vm587_vm1, %v697_v26  ;;  %610 = vst.msk [vmem:[%s1238_s4 + $0x58] sm:$0xf] %vm587_vm1, %v713_v27  ;;  %v434_v38 = vadd.f32 %v738_v11, %v264_v28  ;;  %v450_v39 = vadd.f32 %v770_v12, %v328_v29  ;;  %v256_v40 = vadd.f32 %v982_v20, %v255_v34  ;;  %v1150_v11 = vld [vmem:[%s1236_s3 + $0x70] sm:$0xff]   ;;  %v785_v17 = vunpack.c.l.bf16 %v1128_v63 }
  0xda   :  { %v320_v41 = vadd.f32 %v982_v20, %v319_v35  ;;  %v695_v42 = vpack.c.bf16 %v431_v32, %v431_v32  ;;  %v711_v43 = vpack.c.bf16 %v447_v33, %v447_v33  ;;  %v834_v44 = vpop.f32.mrf.mxu0  ;;  %v850_v45 = vpop.f32.mrf.mxu1  ;;  %v749_v27 = vunpack.c.l.bf16 %v1145_v10 }
  0xdb   :  { %v698_v48 = vpack.c.bf16 %v434_v38, %v434_v38  ;;  %v714_v49 = vpack.c.bf16 %v450_v39, %v450_v39  ;;  %v432_v50 = vadd.f32 %v734_v24, %v256_v40  ;;  %v277_v52 = vadd.f32 %v834_v44, %v982_v20 }
  0xdc   :  { %v448_v51 = vadd.f32 %v766_v25, %v320_v41  ;;  %592 = vst.msk [vmem:[%s1238_s4 + $0x10] sm:$0xf] %vm587_vm1, %v695_v42  ;;  %608 = vst.msk [vmem:[%s1238_s4 + $0x50] sm:$0xf] %vm587_vm1, %v711_v43  ;;  %v341_v53 = vadd.f32 %v850_v45, %v982_v20  ;;  %v268_v54 = vpop.f32.mrf.mxu0  ;;  %v332_v55 = vpop.f32.mrf.mxu1  ;;  %v781_v28 = vunpack.c.l.bf16 %v1150_v11  ;;  %v786_v38 = vunpack.c.h.bf16 %v1128_v63 }
  0xdd   :  { %595 = vst.msk [vmem:[%s1238_s4 + $0x1c] sm:$0xf] %vm587_vm1, %v698_v48  ;;  %611 = vst.msk [vmem:[%s1238_s4 + $0x5c] sm:$0xf] %vm587_vm1, %v714_v49  ;;  %v696_v58 = vpack.c.bf16 %v432_v50, %v432_v50  ;;  %v269_v60 = vadd.f32 %v982_v20, %v268_v54  ;;  %v333_v61 = vadd.f32 %v982_v20, %v332_v55  ;;  %v782_v48 = vunpack.c.h.bf16 %v1150_v11 }
  0xde   :  { %v712_v59 = vpack.c.bf16 %v448_v51, %v448_v51  ;;  %v437_v0 = vadd.f32 %v745_v36, %v277_v52  ;;  %v453_v1 = vadd.f32 %v777_v37, %v341_v53  ;;  %v835_v2 = vpop.f32.mrf.mxu0  ;;  %v851_v3 = vpop.f32.mrf.mxu1  ;;  %v754_v37 = vunpack.c.h.bf16 %v1123_v62 }
  0xdf   :  { %593 = vst.msk [vmem:[%s1238_s4 + $0x14] sm:$0xf] %vm587_vm1, %v696_v58  ;;  %v435_v6 = vadd.f32 %v741_v46, %v269_v60  ;;  %v451_v7 = vadd.f32 %v773_v47, %v333_v61  ;;  %v280_v8 = vadd.f32 %v835_v2, %v982_v20  ;;  %v344_v9 = vadd.f32 %v851_v3, %v982_v20 }
  0xe0   :  { %609 = vst.msk [vmem:[%s1238_s4 + $0x54] sm:$0xf] %vm587_vm1, %v712_v59  ;;  %v701_v12 = vpack.c.bf16 %v437_v0, %v437_v0  ;;  %v717_v13 = vpack.c.bf16 %v453_v1, %v453_v1  ;;  %v271_v14 = vpop.f32.mrf.mxu0  ;;  %v335_v15 = vpop.f32.mrf.mxu1  ;;  %v750_v47 = vunpack.c.h.bf16 %v1145_v10 }
  0xe1   :  { %v699_v18 = vpack.c.bf16 %v435_v6, %v435_v6  ;;  %v715_v19 = vpack.c.bf16 %v451_v7, %v451_v7  ;;  %v438_v21 = vadd.f32 %v746_v56, %v280_v8  ;;  %v454_v22 = vadd.f32 %v778_v57, %v344_v9 }
  0xe2   :  { %598 = vst.msk [vmem:[%s1238_s4 + $0x28] sm:$0xf] %vm587_vm1, %v701_v12  ;;  %614 = vst.msk [vmem:[%s1238_s4 + $0x68] sm:$0xf] %vm587_vm1, %v717_v13  ;;  %v272_v23 = vadd.f32 %v982_v20, %v271_v14  ;;  %v336_v24 = vadd.f32 %v982_v20, %v335_v15  ;;  %v838_v25 = vpop.f32.mrf.mxu0  ;;  %v854_v26 = vpop.f32.mrf.mxu1 }
  0xe3   :  { %596 = vst.msk [vmem:[%s1238_s4 + $0x20] sm:$0xf] %vm587_vm1, %v699_v18  ;;  %612 = vst.msk [vmem:[%s1238_s4 + $0x60] sm:$0xf] %vm587_vm1, %v715_v19  ;;  %v702_v29 = vpack.c.bf16 %v438_v21, %v438_v21  ;;  %v718_v30 = vpack.c.bf16 %v454_v22, %v454_v22  ;;  %v293_v31 = vadd.f32 %v838_v25, %v982_v20 }
  0xe4   :  { %v357_v32 = vadd.f32 %v854_v26, %v982_v20  ;;  %v436_v33 = vadd.f32 %v742_v4, %v272_v23  ;;  %v452_v34 = vadd.f32 %v774_v5, %v336_v24  ;;  %v284_v35 = vpop.f32.mrf.mxu0  ;;  %v348_v36 = vpop.f32.mrf.mxu1 }
  0xe5   :  { %599 = vst.msk [vmem:[%s1238_s4 + $0x2c] sm:$0xf] %vm587_vm1, %v702_v29  ;;  %615 = vst.msk [vmem:[%s1238_s4 + $0x6c] sm:$0xf] %vm587_vm1, %v718_v30  ;;  %v441_v39 = vadd.f32 %v753_v16, %v293_v31  ;;  %v285_v41 = vadd.f32 %v982_v20, %v284_v35  ;;  %v349_v42 = vadd.f32 %v982_v20, %v348_v36 }
  0xe6   :  { %v457_v40 = vadd.f32 %v785_v17, %v357_v32  ;;  %v700_v43 = vpack.c.bf16 %v436_v33, %v436_v33  ;;  %v716_v44 = vpack.c.bf16 %v452_v34, %v452_v34  ;;  %v839_v45 = vpop.f32.mrf.mxu0  ;;  %v855_v46 = vpop.f32.mrf.mxu1 }
  0xe7   :  { %v705_v49 = vpack.c.bf16 %v441_v39, %v441_v39  ;;  %v439_v51 = vadd.f32 %v749_v27, %v285_v41  ;;  %v455_v52 = vadd.f32 %v781_v28, %v349_v42  ;;  %v296_v53 = vadd.f32 %v839_v45, %v982_v20 }
  0xe8   :  { %v721_v50 = vpack.c.bf16 %v457_v40, %v457_v40  ;;  %597 = vst.msk [vmem:[%s1238_s4 + $0x24] sm:$0xf] %vm587_vm1, %v700_v43  ;;  %613 = vst.msk [vmem:[%s1238_s4 + $0x64] sm:$0xf] %vm587_vm1, %v716_v44  ;;  %v360_v54 = vadd.f32 %v855_v46, %v982_v20  ;;  %v287_v55 = vpop.f32.mrf.mxu0  ;;  %v351_v56 = vpop.f32.mrf.mxu1 }
  0xe9   :  { %602 = vst.msk [vmem:[%s1238_s4 + $0x38] sm:$0xf] %vm587_vm1, %v705_v49  ;;  %v703_v57 = vpack.c.bf16 %v439_v51, %v439_v51  ;;  %v719_v58 = vpack.c.bf16 %v455_v52, %v455_v52  ;;  %v288_v59 = vadd.f32 %v982_v20, %v287_v55  ;;  %v352_v60 = vadd.f32 %v982_v20, %v351_v56 }
  0xea   :  { %618 = vst.msk [vmem:[%s1238_s4 + $0x78] sm:$0xf] %vm587_vm1, %v721_v50  ;;  %v442_v61 = vadd.f32 %v754_v37, %v296_v53  ;;  %v458_v62 = vadd.f32 %v786_v38, %v360_v54 }
  0xeb   :  { %600 = vst.msk [vmem:[%s1238_s4 + $0x30] sm:$0xf] %vm587_vm1, %v703_v57  ;;  %616 = vst.msk [vmem:[%s1238_s4 + $0x70] sm:$0xf] %vm587_vm1, %v719_v58  ;;  %v440_v63 = vadd.f32 %v750_v47, %v288_v59  ;;  %v456_v0 = vadd.f32 %v782_v48, %v352_v60 }
  0xec   :  { %v706_v1 = vpack.c.bf16 %v442_v61, %v442_v61  ;;  %v722_v2 = vpack.c.bf16 %v458_v62, %v458_v62 }
  0xed   :  { %v704_v3 = vpack.c.bf16 %v440_v63, %v440_v63  ;;  %v720_v4 = vpack.c.bf16 %v456_v0, %v456_v0 }
  0xee   :  { %603 = vst.msk [vmem:[%s1238_s4 + $0x3c] sm:$0xf] %vm587_vm1, %v706_v1  ;;  %619 = vst.msk [vmem:[%s1238_s4 + $0x7c] sm:$0xf] %vm587_vm1, %v722_v2 }
  0xef   :  { %601 = vst.msk [vmem:[%s1238_s4 + $0x34] sm:$0xf] %vm587_vm1, %v704_v3  ;;  %617 = vst.msk [vmem:[%s1238_s4 + $0x74] sm:$0xf] %vm587_vm1, %v720_v4 }

// kernel: vit_forward_intermediates.14
= control target key start
LH: loop header
LB: loop body
LE: loop exit
PB: predicated region body
PF: predicated region fallthrough
CT: control target
= control target key end

     0   :  { %s3418_s6 = smov 0   ;;  %s4613_s0 = inlined_call_operand.vmem [shape: bf16[2,128,96], index: 0, kind: input, shape index: {}]   ;;  %s4614_s1 = inlined_call_operand.vmem [shape: bf16[2,128,32], index: 1, kind: output, shape index: {}]  }
   0x1 LB: > { %s2469_s7 = sadd.s32 4294967295, %s3391_s6   ;;  %p2473_p0 = scmp.ge.s32.totalorder %s3391_s6, 1  ;;  %s3391_s6 = sphi %s3418_s6, %s11_s6  }
   0x2   : > { %p87_p1 = scmp.lt.s32.totalorder %s3391_s6, 3 }
   0x4   : > { %p88_p2 = pnand %p2473_p0, %p87_p1 }
   0x6   : > { %91 = sbr.rel (%p88_p2) target bundleno = 2268 (0x8dc), region = 24 }
   0xb   : > { %p107_p3 = scmp.lt.s32.totalorder %s2469_s7, 1  ;;  %s3393_s12 = smov 96   ;;  %vm194_vm0 = vcmask 64512   ;;  %v134_v33 = vlaneseq  ;;  %v3396_v36 = vmov -1e+30   ;;  %vm2299_vm2 = vcmask 130048  }
   0xc   : > { %s3394_s13 = smov 64   ;;  %s3395_s14 = smov 88   ;;  %vm2316_vm3 = vcmask 195584   ;;  %vm2397_vm4 = vcmask 257024  }
   0xd   : > { %s4742_s7 = smov (!%p107_p3, %s2469_s7), 1  ;;  %v135_v34 = vand.u32 127, %v134_v33  ;;  %s3397_s15 = smov 120  }
   0xe   : > { %s2536_s8 = sshll.u32 %s4742_s7, 6  ;;  %s3398_s16 = smov 56  }
   0xf   : > { %s3434_s11 = scalar_lea.vmem %s4613_s0, %s2536_s8  ;;  %vm136_vm1 = vcmp.lt.s32.totalorder %v135_v34, 17  ;;  %s3399_s17 = smov 80  }
  0x10   : > { %v3437_v0 = vld [vmem:[%s3434_s11 + $0x38] sm:$0xff]   ;;  %v3440_v1 = vld [vmem:[%s3434_s11 + $0x30] sm:$0xff]   ;;  %v3444_v2 = vld [vmem:[%s3434_s11 + $0x28] sm:$0xff]   ;;  %v3520_v37 = vsel %vm136_vm1, 0.0, %v3396_v36  ;;  %s3400_s18 = smov 112   ;;  %s3401_s19 = smov 48  }
  0x11   : > { %192 = vrot.lane.b32.xlu0 %v3437_v0, %s3393_s12  ;;  %188 = vrot.lane.b32.xlu1 %v3444_v2, %s3393_s12  ;;  %v3448_v3 = vld [vmem:[%s3434_s11 + $0x20] sm:$0xff]   ;;  %v3452_v4 = vld [vmem:[%s3434_s11 + $0x18] sm:$0xff]   ;;  %s3402_s20 = smov 72   ;;  %s3403_s21 = smov 104  }
  0x12   : > { %v3455_v5 = vld [vmem:[%s3434_s11] sm:$0xff]   ;;  %v3459_v6 = vld [vmem:[%s3434_s11 + $0x10] sm:$0xff]   ;;  %v3465_v7 = vld [vmem:[%s3434_s11 + $0x8] sm:$0xff]   ;;  %s3404_s22 = smov 40   ;;  %s3405_s23 = smov 8  }
  0x13   : > { %2698 = vmatprep.mubr.msk.bf16.mxu0 %vm194_vm0, %v3455_v5  ;;  %s3406_s24 = smov 16   ;;  %s3407_s25 = smov 24  }
  0x14   : > { %s4499_s28 = scalar_lea.vmem %s4614_s1, %s2536_s8 }
  0x15   : > { %190 = vrot.lane.b32.xlu0 %v3440_v1, %s3393_s12  ;;  %186 = vrot.lane.b32.xlu1 %v3448_v3, %s3393_s12 }
  0x19   : > { %184 = vrot.lane.b32.xlu0 %v3452_v4, %s3393_s12  ;;  %182 = vrot.lane.b32.xlu1 %v3459_v6, %s3393_s12 }
  0x1d   : > { %180 = vrot.lane.b32.xlu0 %v3465_v7, %s3393_s12  ;;  %178 = vrot.lane.b32.xlu1 %v3455_v5, %s3393_s12 }
  0x21   : > { %506 = vrot.lane.b32.xlu0 %v3437_v0, %s3394_s13  ;;  %504 = vrot.lane.b32.xlu1 %v3440_v1, %s3394_s13 }
  0x25   : > { %502 = vrot.lane.b32.xlu0 %v3444_v2, %s3394_s13  ;;  %496 = vrot.lane.b32.xlu1 %v3459_v6, %s3394_s13 }
  0x29   : > { %500 = vrot.lane.b32.xlu0 %v3448_v3, %s3394_s13  ;;  %492 = vrot.lane.b32.xlu1 %v3455_v5, %s3394_s13 }
  0x2d   : > { %498 = vrot.lane.b32.xlu0 %v3452_v4, %s3394_s13  ;;  %671 = vrot.lane.b32.xlu1 %v3444_v2, %s3395_s14 }
  0x31   : > { %494 = vrot.lane.b32.xlu0 %v3465_v7, %s3394_s13 }
  0x35   : > { %675 = vrot.lane.b32.xlu0 %v3437_v0, %s3395_s14 }
  0x39   : > { %673 = vrot.lane.b32.xlu0 %v3440_v1, %s3395_s14 }
  0x3d   : > { %669 = vrot.lane.b32.xlu0 %v3448_v3, %s3395_s14 }
  0x83   : > { %v193_v8 = vpop.permute.xlu0 %192  ;;  %v189_v12 = vpop.permute.xlu1 %188 }
  0x84   : > { %2938 = vmatprep.subr.msk.bf16.mxu0 %vm194_vm0, %v193_v8  ;;  %v241_v9 = vsel %vm194_vm0, %v193_v8, 0  ;;  %v235_v13 = vsel %vm194_vm0, %v189_v12, 0 }
  0x85   : > { %2683 = vmatpush3.bf16.xpose.msra.mxu0 %v241_v9 }
  0x87   : > { %v191_v10 = vpop.permute.xlu0 %190  ;;  %v187_v14 = vpop.permute.xlu1 %186 }
  0x88   : > { %2939 = vmatprep.subr.msk.bf16.mxu0 %vm194_vm0, %v191_v10  ;;  %v238_v11 = vsel %vm194_vm0, %v191_v10, 0  ;;  %v232_v15 = vsel %vm194_vm0, %v187_v14, 0 }
  0x8b   : > { %v185_v16 = vpop.permute.xlu0 %184  ;;  %v183_v18 = vpop.permute.xlu1 %182 }
  0x8c   : > { %v229_v17 = vsel %vm194_vm0, %v185_v16, 0  ;;  %v226_v19 = vsel %vm194_vm0, %v183_v18, 0 }
  0x8d   : > { %2685 = vmatpush3.bf16.xpose.msra.mxu0 %v238_v11 }
  0x8e   : > { %2940 = vmatprep.subr.msk.bf16.mxu0 %vm194_vm0, %v189_v12 }
  0x8f   : > { %v181_v20 = vpop.permute.xlu0 %180  ;;  %v179_v22 = vpop.permute.xlu1 %178 }
  0x90   : > { %v223_v21 = vsel %vm194_vm0, %v181_v20, 0  ;;  %v220_v23 = vsel %vm194_vm0, %v179_v22, 0 }
  0x93   : > { %v507_v24 = vpop.permute.xlu0 %506  ;;  %v505_v25 = vpop.permute.xlu1 %504 }
  0x94   : > { %2714 = vmatprep.subr.bf16.mxu1 %v507_v24 }
  0x95   : > { %2687 = vmatpush3.bf16.xpose.msra.mxu0 %v235_v13  ;;  %2715 = vmatpush3.bf16.msra.mxu1 %v507_v24 }
  0x96   : > { %2941 = vmatprep.subr.msk.bf16.mxu0 %vm194_vm0, %v187_v14  ;;  %2716 = vmatprep.subr.bf16.mxu1 %v505_v25 }
  0x97   : > { %v503_v26 = vpop.permute.xlu0 %502  ;;  %v497_v29 = vpop.permute.xlu1 %496 }
  0x99   : > { %2717 = vmatpush3.bf16.msra.mxu1 %v505_v25 }
  0x9a   : > { %2718 = vmatprep.subr.bf16.mxu1 %v503_v26 }
  0x9b   : > { %v501_v27 = vpop.permute.xlu0 %500  ;;  %v493_v31 = vpop.permute.xlu1 %492 }
  0x9d   : > { %2689 = vmatpush3.bf16.xpose.msra.mxu0 %v232_v15  ;;  %2719 = vmatpush3.bf16.msra.mxu1 %v503_v26 }
  0x9e   : > { %2942 = vmatprep.subr.msk.bf16.mxu0 %vm194_vm0, %v185_v16  ;;  %2720 = vmatprep.subr.bf16.mxu1 %v501_v27 }
  0x9f   : > { %v499_v28 = vpop.permute.xlu0 %498 }
  0xa1   : > { %2721 = vmatpush3.bf16.msra.mxu1 %v501_v27 }
  0xa2   : > { %2722 = vmatprep.subr.bf16.mxu1 %v499_v28 }
  0xa3   : > { %v495_v30 = vpop.permute.xlu0 %494 }
  0xa5   : > { %2691 = vmatpush3.bf16.xpose.msra.mxu0 %v229_v17  ;;  %2723 = vmatpush3.bf16.msra.mxu1 %v499_v28 }
  0xa6   : > { %2943 = vmatprep.subr.msk.bf16.mxu0 %vm194_vm0, %v183_v18  ;;  %2724 = vmatprep.subr.bf16.mxu1 %v497_v29 }
  0xa7   : > { %v3516_v32 = vpop.permute.xlu0 %675 }
  0xa9   : > { %2725 = vmatpush3.bf16.msra.mxu1 %v497_v29 }
  0xaa   : > { %2726 = vmatprep.subr.bf16.mxu1 %v495_v30 }
  0xab   : > { %v3602_v29 = vpop.permute.xlu0 %673 }
  0xad   : > { %2693 = vmatpush3.bf16.xpose.msra.mxu0 %v226_v19  ;;  %2727 = vmatpush3.bf16.msra.mxu1 %v495_v30  ;;  %v3604_v30 = vpop.permute.xlu1 %671 }
  0xae   : > { %2944 = vmatprep.subr.msk.bf16.mxu0 %vm194_vm0, %v181_v20  ;;  %2728 = vmatprep.subr.bf16.mxu1 %v493_v31 }
  0xb1   : > { %2729 = vmatpush3.bf16.msra.mxu1 %v493_v31  ;;  %v3606_v31 = vpop.permute.xlu0 %669 }
  0xb2   : > { %2946 = vmatprep.subr.msk.bf16.mxu1 %vm194_vm0, %v3516_v32 }
  0xb5   : > { %2695 = vmatpush3.bf16.xpose.msra.mxu0 %v223_v21 }
  0xb6   : > { %2945 = vmatprep.subr.msk.bf16.mxu0 %vm194_vm0, %v179_v22 }
  0xbd   : > { %2697 = vmatpush3.bf16.xpose.msra.mxu0 %v220_v23 }
  0xc4   : > { %2699 = vmatmul.mubr.msk.bf16.vlgmr.msra.gmra.mxu0 %vm194_vm0, %v3465_v7 }
  0xc5   : > { %2702 = vmatprep.mubr.msk.bf16.mxu0 %vm194_vm0, %v3459_v6 }
  0xcc   : > { %2703 = vmatmul.mubr.msk.bf16.gmra.mxu0 %vm194_vm0, %v3452_v4 }
  0xcd   : > { %2706 = vmatprep.mubr.msk.bf16.mxu0 %vm194_vm0, %v3448_v3 }
  0xd4   : > { %2707 = vmatmul.mubr.msk.bf16.gmra.mxu0 %vm194_vm0, %v3444_v2 }
  0xd5   : > { %2710 = vmatprep.mubr.msk.bf16.mxu0 %vm194_vm0, %v3440_v1 }
  0xdc   : > { %2711 = vmatmul.mubr.msk.bf16.gmra.mxu0 %vm194_vm0, %v3437_v0 }
 0x184   : > { %v2700_v35 = vpop.f32.mrf.mxu0 }
 0x185   : > { %v342_v38 = vmul.f32 0.35355338, %v2700_v35 }
 0x186   : > { %v277_v39 = vpop.f32.mrf.mxu0 }
 0x187   : > { %v340_v40 = vmul.f32 0.35355338, %v277_v39  ;;  %v3523_v41 = vadd.f32 %v342_v38, %v3520_v37 }
 0x188   : > { %v2701_v42 = vpop.f32.mrf.mxu0 }
 0x189   : > { %v343_v43 = vmul.f32 0.35355338, %v2701_v42  ;;  %376 = vmax.xlane.f32.xlu1 %v3523_v41  ;;  %v3527_v44 = vadd.f32 %v340_v40, %v3520_v37 }
 0x18a   : > { %v280_v45 = vpop.f32.mrf.mxu0 }
 0x18b   : > { %v341_v46 = vmul.f32 0.35355338, %v280_v45  ;;  %372 = vmax.xlane.f32.xlu0 %v3527_v44  ;;  %v3531_v47 = vadd.f32 %v343_v43, %v3520_v37 }
 0x18c   : > { %v2704_v48 = vpop.f32.mrf.mxu0 }
 0x18d   : > { %v346_v49 = vmul.f32 0.35355338, %v2704_v48  ;;  %378 = vmax.xlane.f32.xlu1 %v3531_v47  ;;  %v3535_v52 = vadd.f32 %v341_v46, %v3520_v37 }
 0x18e   : > { %v293_v50 = vpop.f32.mrf.mxu0 }
 0x18f   : > { %v344_v51 = vmul.f32 0.35355338, %v293_v50  ;;  %v3538_v53 = vadd.f32 %v346_v49, %v3520_v37 }
 0x190   : > { %v2705_v54 = vpop.f32.mrf.mxu0 }
 0x191   : > { %374 = vmax.xlane.f32.xlu1 %v3535_v52  ;;  %384 = vmax.xlane.f32.xlu0 %v3538_v53  ;;  %v347_v56 = vmul.f32 0.35355338, %v2705_v54  ;;  %v3543_v58 = vadd.f32 %v344_v51, %v3520_v37 }
 0x192   : > { %v296_v55 = vpop.f32.mrf.mxu0 }
 0x193   : > { %v345_v57 = vmul.f32 0.35355338, %v296_v55  ;;  %v3551_v62 = vadd.f32 %v347_v56, %v3520_v37 }
 0x194   : > { %v2708_v59 = vpop.f32.mrf.mxu0 }
 0x195   : > { %v350_v60 = vmul.f32 0.35355338, %v2708_v59  ;;  %380 = vmax.xlane.f32.xlu1 %v3543_v58  ;;  %v3547_v61 = vadd.f32 %v345_v57, %v3520_v37 }
 0x196   : > { %v309_v63 = vpop.f32.mrf.mxu0 }
 0x197   : > { %382 = vmax.xlane.f32.xlu0 %v3547_v61  ;;  %v3555_v8 = vadd.f32 %v350_v60, %v3520_v37  ;;  %v348_v9 = vmul.f32 0.35355338, %v309_v63 }
 0x198   : > { %v2709_v10 = vpop.f32.mrf.mxu0 }
 0x199   : > { %386 = vmax.xlane.f32.xlu1 %v3551_v62  ;;  %v351_v11 = vmul.f32 0.35355338, %v2709_v10  ;;  %v3559_v12 = vadd.f32 %v348_v9, %v3520_v37 }
 0x19a   : > { %v312_v13 = vpop.f32.mrf.mxu0 }
 0x19b   : > { %v349_v14 = vmul.f32 0.35355338, %v312_v13  ;;  %v3563_v15 = vadd.f32 %v351_v11, %v3520_v37 }
 0x19c   : > { %v2712_v17 = vpop.f32.mrf.mxu0 }
 0x19d   : > { %392 = vmax.xlane.f32.xlu1 %v3555_v8  ;;  %v3567_v16 = vadd.f32 %v349_v14, %v3520_v37  ;;  %v354_v18 = vmul.f32 0.35355338, %v2712_v17 }
 0x19e   : > { %v325_v19 = vpop.f32.mrf.mxu0 }
 0x19f   : > { %v352_v20 = vmul.f32 0.35355338, %v325_v19  ;;  %v3575_v21 = vadd.f32 %v354_v18, %v3520_v37  ;;  %v723_v18 = vsel %vm194_vm0, %v3516_v32, 0 }
 0x1a0   : > { %v2713_v22 = vpop.f32.mrf.mxu0 }
 0x1a1   : > { %388 = vmax.xlane.f32.xlu1 %v3559_v12  ;;  %v355_v23 = vmul.f32 0.35355338, %v2713_v22  ;;  %v3579_v24 = vadd.f32 %v352_v20, %v3520_v37 }
 0x1a2   : > { %v328_v26 = vpop.f32.mrf.mxu0 }
 0x1a3   : > { %v3583_v25 = vadd.f32 %v355_v23, %v3520_v37  ;;  %v353_v27 = vmul.f32 0.35355338, %v328_v26 }
 0x1a5   : > { %394 = vmax.xlane.f32.xlu1 %v3563_v15  ;;  %v3587_v28 = vadd.f32 %v353_v27, %v3520_v37 }
 0x1a9   : > { %390 = vmax.xlane.f32.xlu1 %v3567_v16 }
 0x1ad   : > { %665 = vrot.lane.b32.xlu0 %v3459_v6, %s3395_s14 }
 0x1ba   : > { %667 = vrot.lane.b32.xlu1 %v3452_v4, %s3395_s14 }
 0x1cc   : > { %400 = vmax.xlane.f32.xlu0 %v3575_v21 }
 0x1d0   : > { %396 = vmax.xlane.f32.xlu0 %v3579_v24 }
 0x1d4   : > { %402 = vmax.xlane.f32.xlu0 %v3583_v25 }
 0x1de   : > { %398 = vmax.xlane.f32.xlu1 %v3587_v28 }
 0x1ea   : > { %663 = vrot.lane.b32.xlu0 %v3465_v7, %s3395_s14 }
 0x1ee   : > { %645 = vrot.lane.b32.xlu0 %v3455_v5, %s3397_s15 }
 0x1ef   : > { %661 = vrot.lane.b32.xlu1 %v3455_v5, %s3395_s14 }
 0x1f2   : > { %649 = vrot.lane.b32.xlu0 %v3459_v6, %s3397_s15 }
 0x1f3   : > { %647 = vrot.lane.b32.xlu1 %v3465_v7, %s3397_s15 }
 0x1f6   : > { %653 = vrot.lane.b32.xlu0 %v3448_v3, %s3397_s15 }
 0x1f7   : > { %651 = vrot.lane.b32.xlu1 %v3452_v4, %s3397_s15 }
 0x1fa   : > { %657 = vrot.lane.b32.xlu0 %v3440_v1, %s3397_s15 }
 0x1fb   : > { %655 = vrot.lane.b32.xlu1 %v3444_v2, %s3397_s15 }
 0x1fe   : > { %988 = vrot.lane.b32.xlu0 %v3437_v0, %s3398_s16 }
 0x1ff   : > { %659 = vrot.lane.b32.xlu1 %v3437_v0, %s3397_s15 }
 0x202   : > { %984 = vrot.lane.b32.xlu0 %v3444_v2, %s3398_s16 }
 0x203   : > { %986 = vrot.lane.b32.xlu1 %v3440_v1, %s3398_s16 }
 0x206   : > { %982 = vrot.lane.b32.xlu0 %v3448_v3, %s3398_s16 }
 0x207   : > { %978 = vrot.lane.b32.xlu1 %v3459_v6, %s3398_s16 }
 0x20a   : > { %980 = vrot.lane.b32.xlu0 %v3452_v4, %s3398_s16 }
 0x20b   : > { %974 = vrot.lane.b32.xlu1 %v3455_v5, %s3398_s16 }
 0x20e   : > { %976 = vrot.lane.b32.xlu0 %v3465_v7, %s3398_s16 }
 0x20f   : > { %1153 = vrot.lane.b32.xlu1 %v3444_v2, %s3399_s17 }
 0x212   : > { %v377_v33 = vpop.xlane.xlu1 %376  ;;  %1157 = vrot.lane.b32.xlu0 %v3437_v0, %s3399_s17 }
 0x213   : > { %v406_v39 = vsub.f32 %v3523_v41, %v377_v33 }
 0x214   : > { %v373_v34 = vpop.xlane.xlu0 %372 }
 0x215   : > { %v404_v35 = vsub.f32 %v3527_v44, %v373_v34  ;;  %v424_v48 = vmul.f32 1.442695, %v406_v39 }
 0x216   : > { %v379_v36 = vpop.xlane.xlu1 %378  ;;  %1155 = vrot.lane.b32.xlu0 %v3440_v1, %s3399_s17 }
 0x217   : > { %v407_v38 = vsub.f32 %v3531_v47, %v379_v36  ;;  %v420_v40 = vmul.f32 1.442695, %v404_v35  ;;  %v720_v35 = vsel %vm194_vm0, %v3602_v29, 0 }
 0x219   : > { %v426_v42 = vmul.f32 1.442695, %v407_v38  ;;  %3121 = vpow2.f32 %v420_v40 }
 0x21a   : > { %v375_v43 = vpop.xlane.xlu1 %374  ;;  %v385_v46 = vpop.xlane.xlu0 %384  ;;  %1151 = vrot.lane.b32.xlu0 %v3448_v3, %s3399_s17 }
 0x21b   : > { %v405_v45 = vsub.f32 %v3535_v52, %v375_v43  ;;  %3123 = vpow2.f32 %v426_v42  ;;  %v410_v50 = vsub.f32 %v3538_v53, %v385_v46 }
 0x21d   : > { %v422_v49 = vmul.f32 1.442695, %v405_v45  ;;  %v432_v55 = vmul.f32 1.442695, %v410_v50 }
 0x21e   : > { %v381_v51 = vpop.xlane.xlu1 %380 }
 0x21f   : > { %3125 = vpow2.f32 %v422_v49  ;;  %v408_v44 = vsub.f32 %v3543_v58, %v381_v51 }
 0x220   : > { %3127 = vpow2.f32 %v424_v48  ;;  %v383_v47 = vpop.xlane.xlu0 %382 }
 0x221   : > { %v428_v54 = vmul.f32 1.442695, %v408_v44  ;;  %v409_v41 = vsub.f32 %v3547_v61, %v383_v47 }
 0x222   : > { %v387_v56 = vpop.xlane.xlu1 %386 }
 0x223   : > { %v430_v57 = vmul.f32 1.442695, %v409_v41  ;;  %v411_v52 = vsub.f32 %v3551_v62, %v387_v56  ;;  %3129 = vpow2.f32 %v428_v54 }
 0x224   : > { %v666_v46 = vpop.permute.xlu0 %665 }
 0x225   : > { %3131 = vpow2.f32 %v430_v57  ;;  %v434_v59 = vmul.f32 1.442695, %v411_v52  ;;  %v708_v49 = vsel %vm194_vm0, %v666_v46, 0 }
 0x226   : > { %3133 = vpow2.f32 %v432_v55  ;;  %v393_v60 = vpop.xlane.xlu1 %392  ;;  %v3616_v53 = vpop.eup %3121 }
 0x227   : > { %3135 = vpow2.f32 %v434_v59  ;;  %v414_v17 = vsub.f32 %v3555_v8, %v393_v60 }
 0x228   : > { %v3618_v58 = vpop.eup %3123 }
 0x229   : > { %v440_v32 = vmul.f32 1.442695, %v414_v17 }
 0x22a   : > { %v389_v63 = vpop.xlane.xlu1 %388 }
 0x22b   : > { %v412_v61 = vsub.f32 %v3559_v12, %v389_v63 }
 0x22c   : > { %v3620_v9 = vpop.eup %3125 }
 0x22d   : > { %v3622_v10 = vpop.eup %3127  ;;  %v484_v62 = vpack.c.bf16 %v3620_v9, %v3616_v53  ;;  %v436_v20 = vmul.f32 1.442695, %v412_v61 }
 0x22e   : > { %v395_v11 = vpop.xlane.xlu1 %394  ;;  %v485_v13 = vpack.c.bf16 %v3618_v58, %v3622_v10 }
 0x22f   : > { %v415_v14 = vsub.f32 %v3563_v15, %v395_v11  ;;  %2730 = vmatprep.mubr.bf16.mxu1 %v484_v62  ;;  %3137 = vpow2.f32 %v436_v20 }
 0x230   : > { %2731 = vmatmul.mubr.bf16.vlgmr.msra.gmra.mxu1 %v485_v13  ;;  %v3633_v19 = vpop.eup %3129 }
 0x231   : > { %4627 = vst [vmem:[#allocation2_spill] sm:$0xff] %v3633_v19  ;;  %2747 = vmatpush3.bf16.xpose.msra.mxu1 %v723_v18  ;;  %v442_v22 = vmul.f32 1.442695, %v415_v14 }
 0x232   : > { %v3635_v12 = vpop.eup %3131  ;;  %2947 = vmatprep.subr.msk.bf16.mxu1 %vm194_vm0, %v3602_v29  ;;  %v391_v23 = vpop.xlane.xlu1 %390 }
 0x233   : > { %4628 = vst [vmem:[#allocation3_spill] sm:$0xff] %v3635_v12  ;;  %v3639_v26 = vpop.eup %3133  ;;  %v413_v15 = vsub.f32 %v3567_v16, %v391_v23  ;;  %v486_v8 = vpack.c.bf16 %v3635_v12, %v3633_v19  ;;  %3139 = vpow2.f32 %v442_v22  ;;  %v717_v16 = vsel %vm194_vm0, %v3604_v30, 0 }
 0x234   : > { %4629 = vst [vmem:[#allocation4_spill] sm:$0xff] %v3639_v26  ;;  %v3644_v27 = vpop.eup %3135 }
 0x235   : > { %4630 = vst [vmem:[#allocation5_spill] sm:$0xff] %v3644_v27  ;;  %v438_v33 = vmul.f32 1.442695, %v413_v15  ;;  %2734 = vmatprep.mubr.bf16.mxu1 %v486_v8  ;;  %v487_v34 = vpack.c.bf16 %v3644_v27, %v3639_v26 }
 0x236   : > { %v668_v43 = vpop.permute.xlu1 %667 }
 0x237   : > { %3141 = vpow2.f32 %v438_v33  ;;  %v711_v45 = vsel %vm194_vm0, %v668_v43, 0 }
 0x238   : > { %3143 = vpow2.f32 %v440_v32  ;;  %2735 = vmatmul.mubr.bf16.gmra.mxu1 %v487_v34 }
 0x239   : > { %2749 = vmatpush3.bf16.xpose.msra.mxu1 %v720_v35 }
 0x23a   : > { %2948 = vmatprep.subr.msk.bf16.mxu1 %vm194_vm0, %v3604_v30  ;;  %v714_v30 = vsel %vm194_vm0, %v3606_v31, 0 }
 0x23c   : > { %v3654_v36 = vpop.eup %3137 }
 0x23d   : > { %4631 = vst [vmem:[#allocation6_spill] sm:$0xff] %v3654_v36 }
 0x240   : > { %v3658_v38 = vpop.eup %3139 }
 0x241   : > { %2751 = vmatpush3.bf16.xpose.msra.mxu1 %v717_v16  ;;  %4632 = vst [vmem:[#allocation7_spill] sm:$0xff] %v3658_v38 }
 0x242   : > { %2949 = vmatprep.subr.msk.bf16.mxu1 %vm194_vm0, %v3606_v31 }
 0x244   : > { %v3660_v39 = vpop.eup %3141 }
 0x245   : > { %4633 = vst [vmem:[#allocation8_spill] sm:$0xff] %v3660_v39  ;;  %v3662_v40 = vpop.eup %3143  ;;  %v488_v29 = vpack.c.bf16 %v3660_v39, %v3654_v36 }
 0x246   : > { %4634 = vst [vmem:[#allocation9_spill] sm:$0xff] %v3662_v40  ;;  %v489_v42 = vpack.c.bf16 %v3658_v38, %v3662_v40 }
 0x247   : > { %2738 = vmatprep.mubr.bf16.mxu1 %v488_v29 }
 0x248   : > { %2739 = vmatmul.mubr.bf16.gmra.mxu1 %v489_v42 }
 0x249   : > { %2753 = vmatpush3.bf16.xpose.msra.mxu1 %v714_v30 }
 0x24a   : > { %2950 = vmatprep.subr.msk.bf16.mxu1 %vm194_vm0, %v668_v43 }
 0x251   : > { %2755 = vmatpush3.bf16.xpose.msra.mxu1 %v711_v45 }
 0x252   : > { %2951 = vmatprep.subr.msk.bf16.mxu1 %vm194_vm0, %v666_v46 }
 0x255   : > { %v401_v48 = vpop.xlane.xlu0 %400 }
 0x256   : > { %v418_v41 = vsub.f32 %v3575_v21, %v401_v48 }
 0x258   : > { %v448_v59 = vmul.f32 1.442695, %v418_v41 }
 0x259   : > { %2757 = vmatpush3.bf16.xpose.msra.mxu1 %v708_v49  ;;  %v397_v50 = vpop.xlane.xlu0 %396 }
 0x25a   : > { %v416_v47 = vsub.f32 %v3579_v24, %v397_v50 }
 0x25c   : > { %v444_v55 = vmul.f32 1.442695, %v416_v47 }
 0x25d   : > { %v403_v51 = vpop.xlane.xlu0 %402 }
 0x25e   : > { %v419_v54 = vsub.f32 %v3583_v25, %v403_v51  ;;  %3145 = vpow2.f32 %v444_v55 }
 0x260   : > { %v450_v56 = vmul.f32 1.442695, %v419_v54 }
 0x261   : > { %v664_v44 = vpop.permute.xlu0 %663 }
 0x262   : > { %2952 = vmatprep.subr.msk.bf16.mxu1 %vm194_vm0, %v664_v44  ;;  %v705_v31 = vsel %vm194_vm0, %v664_v44, 0  ;;  %3147 = vpow2.f32 %v450_v56 }
 0x263   : > { %2759 = vmatpush3.bf16.xpose.msra.mxu1 %v705_v31 }
 0x265   : > { %v646_v13 = vpop.permute.xlu0 %645 }
 0x267   : > { %v399_v57 = vpop.xlane.xlu1 %398 }
 0x268   : > { %v417_v52 = vsub.f32 %v3587_v28, %v399_v57 }
 0x269   : > { %v650_v17 = vpop.permute.xlu0 %649 }
 0x26a   : > { %v446_v60 = vmul.f32 1.442695, %v417_v52 }
 0x26b   : > { %v662_v63 = vpop.permute.xlu1 %661  ;;  %v3682_v25 = vpop.eup %3145 }
 0x26c   : > { %3149 = vpow2.f32 %v446_v60  ;;  %2953 = vmatprep.subr.msk.bf16.mxu1 %vm194_vm0, %v662_v63  ;;  %v702_v24 = vsel %vm194_vm0, %v662_v63, 0  ;;  %4635 = vst [vmem:[#allocation10_spill] sm:$0xff] %v3682_v25 }
 0x26d   : > { %3151 = vpow2.f32 %v448_v59  ;;  %2761 = vmatpush3.bf16.xpose.msra.mxu1 %v702_v24  ;;  %v654_v20 = vpop.permute.xlu0 %653 }
 0x26f   : > { %v3684_v21 = vpop.eup %3147  ;;  %v648_v14 = vpop.permute.xlu1 %647 }
 0x270   : > { %4636 = vst [vmem:[#allocation11_spill] sm:$0xff] %v3684_v21 }
 0x271   : > { %v658_v23 = vpop.permute.xlu0 %657 }
 0x273   : > { %v652_v18 = vpop.permute.xlu1 %651 }
 0x275   : > { %v989_v8 = vpop.permute.xlu0 %988 }
 0x276   : > { %2778 = vmatprep.subr.bf16.mxu0 %v989_v8 }
 0x277   : > { %v656_v22 = vpop.permute.xlu1 %655  ;;  %2779 = vmatpush3.bf16.msra.mxu0 %v989_v8 }
 0x279   : > { %v3686_v61 = vpop.eup %3149  ;;  %v985_v33 = vpop.permute.xlu0 %984 }
 0x27a   : > { %4637 = vst [vmem:[#allocation12_spill] sm:$0xff] %v3686_v61  ;;  %v3688_v62 = vpop.eup %3151  ;;  %v490_v28 = vpack.c.bf16 %v3686_v61, %v3682_v25 }
 0x27b   : > { %4638 = vst [vmem:[#allocation13_spill] sm:$0xff] %v3688_v62  ;;  %v491_v11 = vpack.c.bf16 %v3684_v21, %v3688_v62  ;;  %v660_v15 = vpop.permute.xlu1 %659 }
 0x27c   : > { %2742 = vmatprep.mubr.bf16.mxu1 %v490_v28 }
 0x27d   : > { %2743 = vmatmul.mubr.bf16.gmra.mxu1 %v491_v11  ;;  %v983_v34 = vpop.permute.xlu0 %982 }
 0x27e   : > { %2762 = vmatprep.mubr.msk.bf16.mxu1 %vm194_vm0, %v646_v13 }
 0x27f   : > { %v987_v32 = vpop.permute.xlu1 %986 }
 0x280   : > { %2780 = vmatprep.subr.bf16.mxu0 %v987_v32 }
 0x281   : > { %2781 = vmatpush3.bf16.msra.mxu0 %v987_v32  ;;  %v981_v35 = vpop.permute.xlu0 %980 }
 0x282   : > { %2782 = vmatprep.subr.bf16.mxu0 %v985_v33 }
 0x283   : > { %v979_v16 = vpop.permute.xlu1 %978 }
 0x285   : > { %2763 = vmatmul.mubr.msk.bf16.vlgmr.msra.gmra.mxu1 %vm194_vm0, %v648_v14  ;;  %2783 = vmatpush3.bf16.msra.mxu0 %v985_v33  ;;  %v977_v29 = vpop.permute.xlu0 %976 }
 0x286   : > { %2766 = vmatprep.mubr.msk.bf16.mxu1 %vm194_vm0, %v650_v17  ;;  %2784 = vmatprep.subr.bf16.mxu0 %v983_v34 }
 0x287   : > { %v975_v30 = vpop.permute.xlu1 %974 }
 0x289   : > { %2785 = vmatpush3.bf16.msra.mxu0 %v983_v34  ;;  %v3726_v48 = vpop.permute.xlu0 %1157 }
 0x28a   : > { %2786 = vmatprep.subr.bf16.mxu0 %v981_v35 }
 0x28d   : > { %2767 = vmatmul.mubr.msk.bf16.gmra.mxu1 %vm194_vm0, %v652_v18  ;;  %2787 = vmatpush3.bf16.msra.mxu0 %v981_v35 }
 0x28e   : > { %2770 = vmatprep.mubr.msk.bf16.mxu1 %vm194_vm0, %v654_v20  ;;  %2788 = vmatprep.subr.bf16.mxu0 %v979_v16 }
 0x291   : > { %2789 = vmatpush3.bf16.msra.mxu0 %v979_v16 }
 0x292   : > { %2790 = vmatprep.subr.bf16.mxu0 %v977_v29 }
 0x295   : > { %2771 = vmatmul.mubr.msk.bf16.gmra.mxu1 %vm194_vm0, %v656_v22  ;;  %2791 = vmatpush3.bf16.msra.mxu0 %v977_v29 }
 0x296   : > { %2774 = vmatprep.mubr.msk.bf16.mxu1 %vm194_vm0, %v658_v23  ;;  %2792 = vmatprep.subr.bf16.mxu0 %v975_v30 }
 0x299   : > { %2793 = vmatpush3.bf16.msra.mxu0 %v975_v30 }
 0x29a   : > { %2954 = vmatprep.subr.msk.bf16.mxu0 %vm194_vm0, %v3726_v48 }
 0x29d   : > { %2775 = vmatmul.mubr.msk.bf16.gmra.mxu1 %vm194_vm0, %v660_v15 }
 0x2f0   : > { %v3718_v42 = vpop.f32.mrf.mxu1 }
 0x2f1   : > { %4639 = vst [vmem:[#allocation14_spill] sm:$0xff] %v3718_v42 }
 0x2f2   : > { %v3720_v43 = vpop.f32.mrf.mxu1 }
 0x2f3   : > { %4640 = vst [vmem:[#allocation15_spill] sm:$0xff] %v3720_v43 }
 0x2f4   : > { %v3722_v45 = vpop.f32.mrf.mxu1 }
 0x2f5   : > { %4641 = vst [vmem:[#allocation16_spill] sm:$0xff] %v3722_v45 }
 0x2f6   : > { %v3724_v46 = vpop.f32.mrf.mxu1 }
 0x2f7   : > { %4642 = vst [vmem:[#allocation17_spill] sm:$0xff] %v3724_v46 }
 0x2f8   : > { %v3730_v49 = vpop.f32.mrf.mxu1 }
 0x2f9   : > { %4643 = vst [vmem:[#allocation18_spill] sm:$0xff] %v3730_v49 }
 0x2fa   : > { %v3732_v50 = vpop.f32.mrf.mxu1 }
 0x2fb   : > { %4644 = vst [vmem:[#allocation19_spill] sm:$0xff] %v3732_v50 }
 0x2fc   : > { %v3734_v51 = vpop.f32.mrf.mxu1 }
 0x2fd   : > { %4645 = vst [vmem:[#allocation20_spill] sm:$0xff] %v3734_v51 }
 0x2fe   : > { %v3736_v44 = vpop.f32.mrf.mxu1 }
 0x2ff   : > { %4646 = vst [vmem:[#allocation21_spill] sm:$0xff] %v3736_v44 }
 0x308   : > { %v3738_v47 = vpop.f32.mrf.mxu1 }
 0x309   : > { %4647 = vst [vmem:[#allocation22_spill] sm:$0xff] %v3738_v47 }
 0x30a   : > { %v3740_v31 = vpop.f32.mrf.mxu1 }
 0x30b   : > { %4648 = vst [vmem:[#allocation23_spill] sm:$0xff] %v3740_v31 }
 0x30c   : > { %v3742_v54 = vpop.f32.mrf.mxu1 }
 0x30d   : > { %4649 = vst [vmem:[#allocation24_spill] sm:$0xff] %v3742_v54 }
 0x30e   : > { %v3744_v41 = vpop.f32.mrf.mxu1 }
 0x30f   : > { %4650 = vst [vmem:[#allocation25_spill] sm:$0xff] %v3744_v41 }
 0x33d   : > { %v3746_v55 = vpop.f32.mrf.mxu1 }
 0x33e   : > { %4651 = vst [vmem:[#allocation26_spill] sm:$0xff] %v3746_v55 }
 0x33f   : > { %v3748_v56 = vpop.f32.mrf.mxu1 }
 0x340   : > { %4652 = vst [vmem:[#allocation27_spill] sm:$0xff] %v3748_v56 }
 0x341   : > { %v3750_v57 = vpop.f32.mrf.mxu1 }
 0x342   : > { %4653 = vst [vmem:[#allocation28_spill] sm:$0xff] %v3750_v57 }
 0x343   : > { %v3752_v52 = vpop.f32.mrf.mxu1 }
 0x344   : > { %4654 = vst [vmem:[#allocation29_spill] sm:$0xff] %v3752_v52 }
 0x345   : > { %v2764_v59 = vpop.f32.mrf.mxu1 }
 0x346   : > { %v824_v60 = vmul.f32 0.35355338, %v2764_v59 }
 0x347   : > { %v759_v63 = vpop.f32.mrf.mxu1 }
 0x348   : > { %v822_v24 = vmul.f32 0.35355338, %v759_v63  ;;  %v3755_v28 = vadd.f32 %v824_v60, %v3520_v37 }
 0x349   : > { %v2765_v11 = vpop.f32.mrf.mxu1 }
 0x34a   : > { %v825_v13 = vmul.f32 0.35355338, %v2765_v11  ;;  %858 = vmax.xlane.f32.xlu1 %v3755_v28  ;;  %v3759_v14 = vadd.f32 %v822_v24, %v3520_v37 }
 0x34b   : > { %v762_v17 = vpop.f32.mrf.mxu1 }
 0x34c   : > { %v823_v18 = vmul.f32 0.35355338, %v762_v17  ;;  %854 = vmax.xlane.f32.xlu0 %v3759_v14  ;;  %v3763_v20 = vadd.f32 %v825_v13, %v3520_v37 }
 0x34d   : > { %v2768_v22 = vpop.f32.mrf.mxu1 }
 0x34e   : > { %v828_v23 = vmul.f32 0.35355338, %v2768_v22  ;;  %860 = vmax.xlane.f32.xlu1 %v3763_v20  ;;  %v3767_v32 = vadd.f32 %v823_v18, %v3520_v37 }
 0x34f   : > { %v775_v15 = vpop.f32.mrf.mxu1 }
 0x350   : > { %v826_v8 = vmul.f32 0.35355338, %v775_v15  ;;  %v3770_v33 = vadd.f32 %v828_v23, %v3520_v37 }
 0x351   : > { %v2769_v34 = vpop.f32.mrf.mxu1 }
 0x352   : > { %856 = vmax.xlane.f32.xlu1 %v3767_v32  ;;  %866 = vmax.xlane.f32.xlu0 %v3770_v33  ;;  %v829_v16 = vmul.f32 0.35355338, %v2769_v34  ;;  %v3775_v30 = vadd.f32 %v826_v8, %v3520_v37 }
 0x353   : > { %v778_v35 = vpop.f32.mrf.mxu1 }
 0x354   : > { %v827_v29 = vmul.f32 0.35355338, %v778_v35  ;;  %v3783_v24 = vadd.f32 %v829_v16, %v3520_v37 }
 0x355   : > { %v2772_v59 = vpop.f32.mrf.mxu1 }
 0x356   : > { %v832_v60 = vmul.f32 0.35355338, %v2772_v59  ;;  %862 = vmax.xlane.f32.xlu1 %v3775_v30  ;;  %v3779_v63 = vadd.f32 %v827_v29, %v3520_v37 }
 0x357   : > { %v791_v11 = vpop.f32.mrf.mxu1 }
 0x358   : > { %864 = vmax.xlane.f32.xlu0 %v3779_v63  ;;  %v3787_v13 = vadd.f32 %v832_v60, %v3520_v37  ;;  %v830_v17 = vmul.f32 0.35355338, %v791_v11 }
 0x359   : > { %v2773_v18 = vpop.f32.mrf.mxu1 }
 0x35a   : > { %868 = vmax.xlane.f32.xlu1 %v3783_v24  ;;  %v833_v22 = vmul.f32 0.35355338, %v2773_v18  ;;  %v3791_v23 = vadd.f32 %v830_v17, %v3520_v37 }
 0x35b   : > { %v794_v15 = vpop.f32.mrf.mxu1 }
 0x35c   : > { %v831_v8 = vmul.f32 0.35355338, %v794_v15  ;;  %v3795_v34 = vadd.f32 %v833_v22, %v3520_v37 }
 0x35d   : > { %v2776_v16 = vpop.f32.mrf.mxu1 }
 0x35e   : > { %874 = vmax.xlane.f32.xlu1 %v3787_v13  ;;  %v3799_v35 = vadd.f32 %v831_v8, %v3520_v37  ;;  %v836_v29 = vmul.f32 0.35355338, %v2776_v16 }
 0x35f   : > { %v807_v59 = vpop.f32.mrf.mxu1 }
 0x360   : > { %v834_v60 = vmul.f32 0.35355338, %v807_v59  ;;  %v3807_v11 = vadd.f32 %v836_v29, %v3520_v37  ;;  %v3834_v29 = vpop.permute.xlu0 %1155 }
 0x361   : > { %v2777_v17 = vpop.f32.mrf.mxu1 }
 0x362   : > { %870 = vmax.xlane.f32.xlu1 %v3791_v23  ;;  %v837_v18 = vmul.f32 0.35355338, %v2777_v17  ;;  %v3811_v22 = vadd.f32 %v834_v60, %v3520_v37  ;;  %v3836_v60 = vpop.permute.xlu1 %1153 }
 0x363   : > { %v810_v8 = vpop.f32.mrf.mxu1 }
 0x364   : > { %v3815_v15 = vadd.f32 %v837_v18, %v3520_v37  ;;  %v835_v16 = vmul.f32 0.35355338, %v810_v8  ;;  %v3838_v17 = vpop.permute.xlu0 %1151 }
 0x366   : > { %876 = vmax.xlane.f32.xlu1 %v3795_v34  ;;  %v3819_v59 = vadd.f32 %v835_v16, %v3520_v37 }
 0x36a   : > { %872 = vmax.xlane.f32.xlu1 %v3799_v35 }
 0x36e   : > { %1147 = vrot.lane.b32.xlu0 %v3459_v6, %s3399_s17 }
 0x37b   : > { %1149 = vrot.lane.b32.xlu1 %v3452_v4, %s3399_s17 }
 0x38d   : > { %882 = vmax.xlane.f32.xlu0 %v3807_v11 }
 0x391   : > { %878 = vmax.xlane.f32.xlu0 %v3811_v22 }
 0x395   : > { %884 = vmax.xlane.f32.xlu0 %v3815_v15 }
 0x39f   : > { %880 = vmax.xlane.f32.xlu1 %v3819_v59 }
 0x3ab   : > { %1145 = vrot.lane.b32.xlu0 %v3465_v7, %s3399_s17 }
 0x3af   : > { %1127 = vrot.lane.b32.xlu0 %v3455_v5, %s3400_s18 }
 0x3b0   : > { %1143 = vrot.lane.b32.xlu1 %v3455_v5, %s3399_s17 }
 0x3b3   : > { %1131 = vrot.lane.b32.xlu0 %v3459_v6, %s3400_s18 }
 0x3b4   : > { %1129 = vrot.lane.b32.xlu1 %v3465_v7, %s3400_s18 }
 0x3b7   : > { %1135 = vrot.lane.b32.xlu0 %v3448_v3, %s3400_s18 }
 0x3b8   : > { %1133 = vrot.lane.b32.xlu1 %v3452_v4, %s3400_s18 }
 0x3bb   : > { %1139 = vrot.lane.b32.xlu0 %v3440_v1, %s3400_s18 }
 0x3bc   : > { %1137 = vrot.lane.b32.xlu1 %v3444_v2, %s3400_s18 }
 0x3c0   : > { %1141 = vrot.lane.b32.xlu1 %v3437_v0, %s3400_s18 }
 0x3d3   : > { %v859_v5 = vpop.xlane.xlu1 %858 }
 0x3d4   : > { %v888_v4 = vsub.f32 %v3755_v28, %v859_v5 }
 0x3d5   : > { %v855_v6 = vpop.xlane.xlu0 %854 }
 0x3d6   : > { %v886_v7 = vsub.f32 %v3759_v14, %v855_v6  ;;  %v906_v56 = vmul.f32 1.442695, %v888_v4 }
 0x3d7   : > { %v861_v18 = vpop.xlane.xlu1 %860 }
 0x3d8   : > { %v889_v3 = vsub.f32 %v3763_v20, %v861_v18  ;;  %v902_v1 = vmul.f32 1.442695, %v886_v7 }
 0x3da   : > { %v908_v2 = vmul.f32 1.442695, %v889_v3  ;;  %3153 = vpow2.f32 %v902_v1 }
 0x3db   : > { %v857_v8 = vpop.xlane.xlu1 %856  ;;  %v867_v16 = vpop.xlane.xlu0 %866 }
 0x3dc   : > { %v887_v0 = vsub.f32 %v3767_v32, %v857_v8  ;;  %v892_v57 = vsub.f32 %v3770_v33, %v867_v16  ;;  %3155 = vpow2.f32 %v908_v2 }
 0x3de   : > { %v904_v52 = vmul.f32 1.442695, %v887_v0  ;;  %v914_v5 = vmul.f32 1.442695, %v892_v57 }
 0x3df   : > { %v863_v55 = vpop.xlane.xlu1 %862 }
 0x3e0   : > { %v890_v14 = vsub.f32 %v3775_v30, %v863_v55  ;;  %3157 = vpow2.f32 %v904_v52 }
 0x3e1   : > { %v865_v6 = vpop.xlane.xlu0 %864  ;;  %3159 = vpow2.f32 %v906_v56 }
 0x3e2   : > { %v910_v20 = vmul.f32 1.442695, %v890_v14  ;;  %v891_v28 = vsub.f32 %v3779_v63, %v865_v6 }
 0x3e3   : > { %v869_v7 = vpop.xlane.xlu1 %868 }
 0x3e4   : > { %v912_v18 = vmul.f32 1.442695, %v891_v28  ;;  %v893_v32 = vsub.f32 %v3783_v24, %v869_v7  ;;  %3161 = vpow2.f32 %v910_v20 }
 0x3e6   : > { %3163 = vpow2.f32 %v912_v18  ;;  %v916_v3 = vmul.f32 1.442695, %v893_v32  ;;  %v1202_v32 = vsel %vm194_vm0, %v3834_v29, 0 }
 0x3e7   : > { %3165 = vpow2.f32 %v914_v5  ;;  %v875_v33 = vpop.xlane.xlu1 %874  ;;  %v3848_v1 = vpop.eup %3153 }
 0x3e8   : > { %3167 = vpow2.f32 %v916_v3  ;;  %v896_v2 = vsub.f32 %v3787_v13, %v875_v33 }
 0x3e9   : > { %v3850_v55 = vpop.eup %3155 }
 0x3ea   : > { %v922_v7 = vmul.f32 1.442695, %v896_v2 }
 0x3eb   : > { %v871_v4 = vpop.xlane.xlu1 %870 }
 0x3ec   : > { %v894_v52 = vsub.f32 %v3791_v23, %v871_v4  ;;  %v1205_v23 = vsel %vm194_vm0, %v3726_v48, 0 }
 0x3ed   : > { %v3852_v56 = vpop.eup %3157 }
 0x3ee   : > { %v3855_v57 = vpop.eup %3159  ;;  %v966_v63 = vpack.c.bf16 %v3852_v56, %v3848_v1  ;;  %v918_v0 = vmul.f32 1.442695, %v894_v52 }
 0x3ef   : > { %v877_v30 = vpop.xlane.xlu1 %876  ;;  %v967_v8 = vpack.c.bf16 %v3850_v55, %v3855_v57 }
 0x3f0   : > { %v897_v24 = vsub.f32 %v3795_v34, %v877_v30  ;;  %2794 = vmatprep.mubr.bf16.mxu0 %v966_v63  ;;  %3169 = vpow2.f32 %v918_v0 }
 0x3f1   : > { %v3863_v16 = vpop.eup %3161  ;;  %2795 = vmatmul.mubr.bf16.vlgmr.msra.gmra.mxu0 %v967_v8 }
 0x3f2   : > { %v924_v6 = vmul.f32 1.442695, %v897_v24  ;;  %2811 = vmatpush3.bf16.xpose.msra.mxu0 %v1205_v23  ;;  %v1148_v24 = vpop.permute.xlu0 %1147 }
 0x3f3   : > { %v3867_v14 = vpop.eup %3163  ;;  %v873_v20 = vpop.xlane.xlu1 %872  ;;  %2955 = vmatprep.subr.msk.bf16.mxu0 %vm194_vm0, %v3834_v29  ;;  %v1190_v0 = vsel %vm194_vm0, %v1148_v24, 0 }
 0x3f4   : > { %v3869_v28 = vpop.eup %3165  ;;  %v895_v13 = vsub.f32 %v3799_v35, %v873_v20  ;;  %v968_v34 = vpack.c.bf16 %v3867_v14, %v3863_v16  ;;  %3171 = vpow2.f32 %v924_v6  ;;  %v1199_v35 = vsel %vm194_vm0, %v3836_v60, 0 }
 0x3f5   : > { %v3876_v5 = vpop.eup %3167 }
 0x3f6   : > { %v920_v48 = vmul.f32 1.442695, %v895_v13  ;;  %2798 = vmatprep.mubr.bf16.mxu0 %v968_v34  ;;  %v969_v18 = vpack.c.bf16 %v3876_v5, %v3869_v28 }
 0x3f7   : > { %v1150_v63 = vpop.permute.xlu1 %1149 }
 0x3f8   : > { %3173 = vpow2.f32 %v920_v48  ;;  %v1193_v8 = vsel %vm194_vm0, %v1150_v63, 0 }
 0x3f9   : > { %3175 = vpow2.f32 %v922_v7  ;;  %2799 = vmatmul.mubr.bf16.gmra.mxu0 %v969_v18 }
 0x3fa   : > { %2813 = vmatpush3.bf16.xpose.msra.mxu0 %v1202_v32 }
 0x3fb   : > { %2956 = vmatprep.subr.msk.bf16.mxu0 %vm194_vm0, %v3836_v60  ;;  %v1196_v60 = vsel %vm194_vm0, %v3838_v17, 0 }
 0x3fd   : > { %v3886_v3 = vpop.eup %3169 }
 0x401   : > { %v3888_v33 = vpop.eup %3171 }
 0x402   : > { %2815 = vmatpush3.bf16.xpose.msra.mxu0 %v1199_v35 }
 0x403   : > { %2957 = vmatprep.subr.msk.bf16.mxu0 %vm194_vm0, %v3838_v17 }
 0x405   : > { %v3892_v4 = vpop.eup %3173 }
 0x406   : > { %v3894_v52 = vpop.eup %3175  ;;  %v970_v29 = vpack.c.bf16 %v3892_v4, %v3886_v3 }
 0x407   : > { %v971_v30 = vpack.c.bf16 %v3888_v33, %v3894_v52 }
 0x408   : > { %2802 = vmatprep.mubr.bf16.mxu0 %v970_v29 }
 0x409   : > { %2803 = vmatmul.mubr.bf16.gmra.mxu0 %v971_v30 }
 0x40a   : > { %2817 = vmatpush3.bf16.xpose.msra.mxu0 %v1196_v60 }
 0x40b   : > { %2958 = vmatprep.subr.msk.bf16.mxu0 %vm194_vm0, %v1150_v63 }
 0x412   : > { %2819 = vmatpush3.bf16.xpose.msra.mxu0 %v1193_v8 }
 0x413   : > { %2959 = vmatprep.subr.msk.bf16.mxu0 %vm194_vm0, %v1148_v24 }
 0x416   : > { %v883_v2 = vpop.xlane.xlu0 %882 }
 0x417   : > { %v900_v7 = vsub.f32 %v3807_v11, %v883_v2 }
 0x419   : > { %v930_v29 = vmul.f32 1.442695, %v900_v7  ;;  %v3950_v7 = vld [vmem:[%s3434_s11] sm:$0xff]  }
 0x41a   : > { %v879_v23 = vpop.xlane.xlu0 %878  ;;  %2821 = vmatpush3.bf16.xpose.msra.mxu0 %v1190_v0  ;;  %v3928_v0 = vld [vmem:[%s3434_s11 + $0x38] sm:$0xff]  }
 0x41b   : > { %v898_v13 = vsub.f32 %v3811_v22, %v879_v23  ;;  %1470 = vrot.lane.b32.xlu0 %v3928_v0, %s3401_s19  ;;  %v3932_v23 = vld [vmem:[%s3434_s11 + $0x30] sm:$0xff]  }
 0x41c   : > { %1468 = vrot.lane.b32.xlu1 %v3932_v23, %s3401_s19 }
 0x41d   : > { %v926_v48 = vmul.f32 1.442695, %v898_v13  ;;  %v3936_v13 = vld [vmem:[%s3434_s11 + $0x28] sm:$0xff]  }
 0x41e   : > { %v885_v6 = vpop.xlane.xlu0 %884 }
 0x41f   : > { %v901_v34 = vsub.f32 %v3815_v15, %v885_v6  ;;  %3177 = vpow2.f32 %v926_v48  ;;  %1466 = vrot.lane.b32.xlu0 %v3936_v13, %s3401_s19 }
 0x421   : > { %v932_v18 = vmul.f32 1.442695, %v901_v34  ;;  %v3946_v34 = vld [vmem:[%s3434_s11 + $0x20] sm:$0xff]  }
 0x422   : > { %v1146_v20 = vpop.permute.xlu0 %1145 }
 0x423   : > { %2960 = vmatprep.subr.msk.bf16.mxu0 %vm194_vm0, %v1146_v20  ;;  %v1187_v17 = vsel %vm194_vm0, %v1146_v20, 0  ;;  %3179 = vpow2.f32 %v932_v18  ;;  %1464 = vrot.lane.b32.xlu0 %v3946_v34, %s3401_s19 }
 0x424   : > { %2823 = vmatpush3.bf16.xpose.msra.mxu0 %v1187_v17  ;;  %v3940_v17 = vld [vmem:[%s3434_s11 + $0x10] sm:$0xff]  }
 0x425   : > { %1460 = vrot.lane.b32.xlu1 %v3940_v17, %s3401_s19 }
 0x426   : > { %v1128_v2 = vpop.permute.xlu0 %1127 }
 0x428   : > { %v881_v32 = vpop.xlane.xlu1 %880 }
 0x429   : > { %v899_v35 = vsub.f32 %v3819_v59, %v881_v32  ;;  %1456 = vrot.lane.b32.xlu1 %v3950_v7, %s3401_s19  ;;  %v3954_v32 = vld [vmem:[%s3434_s11 + $0x18] sm:$0xff]  }
 0x42a   : > { %v1132_v20 = vpop.permute.xlu0 %1131  ;;  %1462 = vrot.lane.b32.xlu0 %v3954_v32, %s3401_s19 }
 0x42b   : > { %v928_v30 = vmul.f32 1.442695, %v899_v35  ;;  %v3962_v35 = vld [vmem:[%s3434_s11 + $0x8] sm:$0xff]  }
 0x42c   : > { %v1144_v60 = vpop.permute.xlu1 %1143  ;;  %v3914_v11 = vpop.eup %3177 }
 0x42d   : > { %3181 = vpow2.f32 %v928_v30  ;;  %2961 = vmatprep.subr.msk.bf16.mxu0 %vm194_vm0, %v1144_v60  ;;  %v1184_v22 = vsel %vm194_vm0, %v1144_v60, 0  ;;  %1635 = vrot.lane.b32.xlu1 %v3936_v13, %s3402_s20 }
 0x42e   : > { %3183 = vpow2.f32 %v930_v29  ;;  %2825 = vmatpush3.bf16.xpose.msra.mxu0 %v1184_v22  ;;  %v1136_v18 = vpop.permute.xlu0 %1135  ;;  %1458 = vrot.lane.b32.xlu0 %v3962_v35, %s3401_s19 }
 0x430   : > { %v3916_v15 = vpop.eup %3179  ;;  %v1130_v6 = vpop.permute.xlu1 %1129 }
 0x432   : > { %v1140_v30 = vpop.permute.xlu0 %1139  ;;  %1639 = vrot.lane.b32.xlu0 %v3928_v0, %s3402_s20 }
 0x434   : > { %v1134_v48 = vpop.permute.xlu1 %1133 }
 0x436   : > { %1637 = vrot.lane.b32.xlu0 %v3932_v23, %s3402_s20 }
 0x438   : > { %v1138_v29 = vpop.permute.xlu1 %1137 }
 0x43a   : > { %v3918_v59 = vpop.eup %3181  ;;  %1633 = vrot.lane.b32.xlu0 %v3946_v34, %s3402_s20 }
 0x43b   : > { %v3920_v63 = vpop.eup %3183  ;;  %v972_v24 = vpack.c.bf16 %v3918_v59, %v3914_v11 }
 0x43c   : > { %v973_v8 = vpack.c.bf16 %v3916_v15, %v3920_v63  ;;  %v1142_v60 = vpop.permute.xlu1 %1141 }
 0x43d   : > { %2806 = vmatprep.mubr.bf16.mxu0 %v972_v24 }
 0x43e   : > { %2807 = vmatmul.mubr.bf16.gmra.mxu0 %v973_v8 }
 0x43f   : > { %2826 = vmatprep.mubr.msk.bf16.mxu0 %vm194_vm0, %v1128_v2 }
 0x446   : > { %2827 = vmatmul.mubr.msk.bf16.vlgmr.msra.gmra.mxu0 %vm194_vm0, %v1130_v6 }
 0x447   : > { %2830 = vmatprep.mubr.msk.bf16.mxu0 %vm194_vm0, %v1132_v20 }
 0x44e   : > { %2831 = vmatmul.mubr.msk.bf16.gmra.mxu0 %vm194_vm0, %v1134_v48 }
 0x44f   : > { %2834 = vmatprep.mubr.msk.bf16.mxu0 %vm194_vm0, %v1136_v18 }
 0x456   : > { %2835 = vmatmul.mubr.msk.bf16.gmra.mxu0 %vm194_vm0, %v1138_v29 }
 0x457   : > { %2838 = vmatprep.mubr.msk.bf16.mxu0 %vm194_vm0, %v1140_v30 }
 0x45e   : > { %2839 = vmatmul.mubr.msk.bf16.gmra.mxu0 %vm194_vm0, %v1142_v60 }
 0x48d   : > { %v1471_v22 = vpop.permute.xlu0 %1470 }
 0x48e   : > { %2842 = vmatprep.subr.bf16.mxu1 %v1471_v22  ;;  %v1469_v24 = vpop.permute.xlu1 %1468 }
 0x48f   : > { %2843 = vmatpush3.bf16.msra.mxu1 %v1471_v22 }
 0x490   : > { %2844 = vmatprep.subr.bf16.mxu1 %v1469_v24 }
 0x491   : > { %v1467_v8 = vpop.permute.xlu0 %1466 }
 0x493   : > { %2845 = vmatpush3.bf16.msra.mxu1 %v1469_v24 }
 0x494   : > { %2846 = vmatprep.subr.bf16.mxu1 %v1467_v8 }
 0x495   : > { %v1465_v2 = vpop.permute.xlu0 %1464 }
 0x497   : > { %2847 = vmatpush3.bf16.msra.mxu1 %v1467_v8  ;;  %v1461_v20 = vpop.permute.xlu1 %1460 }
 0x498   : > { %2848 = vmatprep.subr.bf16.mxu1 %v1465_v2 }
 0x49b   : > { %2849 = vmatpush3.bf16.msra.mxu1 %v1465_v2  ;;  %v1457_v29 = vpop.permute.xlu1 %1456 }
 0x49c   : > { %v1463_v6 = vpop.permute.xlu0 %1462 }
 0x49d   : > { %2850 = vmatprep.subr.bf16.mxu1 %v1463_v6 }
 0x49f   : > { %2851 = vmatpush3.bf16.msra.mxu1 %v1463_v6 }
 0x4a0   : > { %2852 = vmatprep.subr.bf16.mxu1 %v1461_v20  ;;  %v1459_v48 = vpop.permute.xlu0 %1458 }
 0x4a3   : > { %2853 = vmatpush3.bf16.msra.mxu1 %v1461_v20 }
 0x4a4   : > { %2854 = vmatprep.subr.bf16.mxu1 %v1459_v48  ;;  %v3982_v24 = vpop.permute.xlu0 %1639 }
 0x4a7   : > { %2855 = vmatpush3.bf16.msra.mxu1 %v1459_v48 }
 0x4a8   : > { %2856 = vmatprep.subr.bf16.mxu1 %v1457_v29 }
 0x4ab   : > { %2857 = vmatpush3.bf16.msra.mxu1 %v1457_v29 }
 0x4ac   : > { %2962 = vmatprep.subr.msk.bf16.mxu1 %vm194_vm0, %v3982_v24 }
 0x4b1   : > { %v3974_v18 = vpop.f32.mrf.mxu0 }
 0x4b2   : > { %4655 = vst [vmem:[#allocation30_spill] sm:$0xff] %v3974_v18 }
 0x4b3   : > { %v3976_v30 = vpop.f32.mrf.mxu0 }
 0x4b4   : > { %4656 = vst [vmem:[#allocation31_spill] sm:$0xff] %v3976_v30 }
 0x4b5   : > { %v3978_v60 = vpop.f32.mrf.mxu0 }
 0x4b6   : > { %4657 = vst [vmem:[#allocation32_spill] sm:$0xff] %v3978_v60 }
 0x4b7   : > { %v3980_v22 = vpop.f32.mrf.mxu0 }
 0x4b8   : > { %4658 = vst [vmem:[#allocation33_spill] sm:$0xff] %v3980_v22 }
 0x4b9   : > { %v3986_v8 = vpop.f32.mrf.mxu0 }
 0x4ba   : > { %4659 = vst [vmem:[#allocation34_spill] sm:$0xff] %v3986_v8 }
 0x4bb   : > { %v3988_v2 = vpop.f32.mrf.mxu0 }
 0x4bc   : > { %4660 = vst [vmem:[#allocation35_spill] sm:$0xff] %v3988_v2 }
 0x4bd   : > { %v3990_v6 = vpop.f32.mrf.mxu0 }
 0x4be   : > { %4661 = vst [vmem:[#allocation36_spill] sm:$0xff] %v3990_v6 }
 0x4bf   : > { %v3992_v20 = vpop.f32.mrf.mxu0 }
 0x4c0   : > { %4662 = vst [vmem:[#allocation37_spill] sm:$0xff] %v3992_v20 }
 0x4c9   : > { %v3994_v48 = vpop.f32.mrf.mxu0 }
 0x4ca   : > { %4663 = vst [vmem:[#allocation38_spill] sm:$0xff] %v3994_v48 }
 0x4cb   : > { %v3996_v29 = vpop.f32.mrf.mxu0 }
 0x4cc   : > { %4664 = vst [vmem:[#allocation39_spill] sm:$0xff] %v3996_v29 }
 0x4cd   : > { %v3998_v54 = vpop.f32.mrf.mxu0 }
 0x4ce   : > { %4665 = vst [vmem:[#allocation40_spill] sm:$0xff] %v3998_v54 }
 0x4cf   : > { %v4000_v47 = vpop.f32.mrf.mxu0 }
 0x4d0   : > { %4666 = vst [vmem:[#allocation41_spill] sm:$0xff] %v4000_v47 }
 0x4fe   : > { %v4002_v31 = vpop.f32.mrf.mxu0 }
 0x4ff   : > { %4667 = vst [vmem:[#allocation42_spill] sm:$0xff] %v4002_v31 }
 0x500   : > { %v4004_v41 = vpop.f32.mrf.mxu0 }
 0x501   : > { %4668 = vst [vmem:[#allocation43_spill] sm:$0xff] %v4004_v41 }
 0x502   : > { %v4006_v51 = vpop.f32.mrf.mxu0 }
 0x503   : > { %4669 = vst [vmem:[#allocation44_spill] sm:$0xff] %v4006_v51 }
 0x504   : > { %v4008_v49 = vpop.f32.mrf.mxu0 }
 0x505   : > { %4670 = vst [vmem:[#allocation45_spill] sm:$0xff] %v4008_v49 }
 0x506   : > { %v2828_v44 = vpop.f32.mrf.mxu0 }
 0x507   : > { %v1306_v50 = vmul.f32 0.35355338, %v2828_v44 }
 0x508   : > { %v1241_v45 = vpop.f32.mrf.mxu0 }
 0x509   : > { %v1304_v42 = vmul.f32 0.35355338, %v1241_v45  ;;  %v4011_v46 = vadd.f32 %v1306_v50, %v3520_v37 }
 0x50a   : > { %v2829_v43 = vpop.f32.mrf.mxu0 }
 0x50b   : > { %v4014_v54 = vadd.f32 %v1304_v42, %v3520_v37  ;;  %v1307_v48 = vmul.f32 0.35355338, %v2829_v43  ;;  %1340 = vmax.xlane.f32.xlu1 %v4011_v46 }
 0x50c   : > { %v1244_v31 = vpop.f32.mrf.mxu0 }
 0x50d   : > { %v4018_v41 = vadd.f32 %v1307_v48, %v3520_v37  ;;  %v1305_v51 = vmul.f32 0.35355338, %v1244_v31  ;;  %1336 = vmax.xlane.f32.xlu0 %v4014_v54 }
 0x50e   : > { %v2832_v44 = vpop.f32.mrf.mxu0 }
 0x50f   : > { %v1310_v49 = vmul.f32 0.35355338, %v2832_v44  ;;  %1342 = vmax.xlane.f32.xlu1 %v4018_v41  ;;  %v4023_v50 = vadd.f32 %v1305_v51, %v3520_v37 }
 0x510   : > { %v1257_v45 = vpop.f32.mrf.mxu0 }
 0x511   : > { %v4026_v42 = vadd.f32 %v1310_v49, %v3520_v37  ;;  %v1308_v43 = vmul.f32 0.35355338, %v1257_v45 }
 0x512   : > { %v2833_v47 = vpop.f32.mrf.mxu0 }
 0x513   : > { %1338 = vmax.xlane.f32.xlu1 %v4023_v50  ;;  %1348 = vmax.xlane.f32.xlu0 %v4026_v42  ;;  %v4031_v48 = vadd.f32 %v1308_v43, %v3520_v37  ;;  %v1311_v44 = vmul.f32 0.35355338, %v2833_v47 }
 0x514   : > { %v1260_v31 = vpop.f32.mrf.mxu0 }
 0x515   : > { %v1309_v29 = vmul.f32 0.35355338, %v1260_v31  ;;  %v4038_v49 = vadd.f32 %v1311_v44, %v3520_v37 }
 0x516   : > { %v2836_v6 = vpop.f32.mrf.mxu0 }
 0x517   : > { %v4034_v8 = vadd.f32 %v1309_v29, %v3520_v37  ;;  %v1314_v51 = vmul.f32 0.35355338, %v2836_v6  ;;  %1344 = vmax.xlane.f32.xlu1 %v4031_v48 }
 0x518   : > { %v1273_v45 = vpop.f32.mrf.mxu0 }
 0x519   : > { %1346 = vmax.xlane.f32.xlu0 %v4034_v8  ;;  %v4042_v20 = vadd.f32 %v1314_v51, %v3520_v37  ;;  %v1312_v47 = vmul.f32 0.35355338, %v1273_v45 }
 0x51a   : > { %v2837_v43 = vpop.f32.mrf.mxu0 }
 0x51b   : > { %1350 = vmax.xlane.f32.xlu1 %v4038_v49  ;;  %v4047_v29 = vadd.f32 %v1312_v47, %v3520_v37  ;;  %v1315_v6 = vmul.f32 0.35355338, %v2837_v43 }
 0x51c   : > { %v1276_v31 = vpop.f32.mrf.mxu0 }
 0x51d   : > { %v4051_v44 = vadd.f32 %v1315_v6, %v3520_v37  ;;  %v1313_v2 = vmul.f32 0.35355338, %v1276_v31 }
 0x51e   : > { %v2840_v45 = vpop.f32.mrf.mxu0 }
 0x51f   : > { %1356 = vmax.xlane.f32.xlu1 %v4042_v20  ;;  %v4055_v51 = vadd.f32 %v1313_v2, %v3520_v37  ;;  %v1318_v47 = vmul.f32 0.35355338, %v2840_v45 }
 0x520   : > { %v1289_v43 = vpop.f32.mrf.mxu0 }
 0x521   : > { %v4063_v6 = vadd.f32 %v1318_v47, %v3520_v37  ;;  %v1316_v31 = vmul.f32 0.35355338, %v1289_v43 }
 0x522   : > { %v2841_v60 = vpop.f32.mrf.mxu0 }
 0x523   : > { %1352 = vmax.xlane.f32.xlu1 %v4047_v29  ;;  %v4066_v18 = vadd.f32 %v1316_v31, %v3520_v37  ;;  %v1319_v2 = vmul.f32 0.35355338, %v2841_v60  ;;  %v4092_v60 = vpop.permute.xlu1 %1635 }
 0x524   : > { %v1292_v45 = vpop.f32.mrf.mxu0 }
 0x525   : > { %v4070_v22 = vadd.f32 %v1319_v2, %v3520_v37  ;;  %v1317_v30 = vmul.f32 0.35355338, %v1292_v45 }
 0x527   : > { %1358 = vmax.xlane.f32.xlu1 %v4051_v44  ;;  %v4075_v47 = vadd.f32 %v1317_v30, %v3520_v37  ;;  %v4090_v30 = vpop.permute.xlu0 %1637 }
 0x52b   : > { %1354 = vmax.xlane.f32.xlu1 %v4055_v51  ;;  %v4094_v43 = vpop.permute.xlu0 %1633 }
 0x52f   : > { %1629 = vrot.lane.b32.xlu0 %v3940_v17, %s3402_s20 }
 0x53c   : > { %1631 = vrot.lane.b32.xlu1 %v3954_v32, %s3402_s20 }
 0x54e   : > { %1364 = vmax.xlane.f32.xlu0 %v4063_v6 }
 0x552   : > { %1360 = vmax.xlane.f32.xlu0 %v4066_v18 }
 0x556   : > { %1366 = vmax.xlane.f32.xlu0 %v4070_v22 }
 0x560   : > { %1362 = vmax.xlane.f32.xlu1 %v4075_v47 }
 0x56c   : > { %1627 = vrot.lane.b32.xlu0 %v3962_v35, %s3402_s20 }
 0x570   : > { %1609 = vrot.lane.b32.xlu0 %v3950_v7, %s3403_s21 }
 0x571   : > { %1625 = vrot.lane.b32.xlu1 %v3950_v7, %s3402_s20 }
 0x574   : > { %1613 = vrot.lane.b32.xlu0 %v3940_v17, %s3403_s21 }
 0x575   : > { %1611 = vrot.lane.b32.xlu1 %v3962_v35, %s3403_s21 }
 0x578   : > { %1617 = vrot.lane.b32.xlu0 %v3946_v34, %s3403_s21 }
 0x579   : > { %1615 = vrot.lane.b32.xlu1 %v3954_v32, %s3403_s21 }
 0x57c   : > { %1621 = vrot.lane.b32.xlu0 %v3932_v23, %s3403_s21 }
 0x57d   : > { %1619 = vrot.lane.b32.xlu1 %v3936_v13, %s3403_s21 }
 0x580   : > { %1950 = vrot.lane.b32.xlu0 %v3932_v23, %s3404_s22 }
 0x581   : > { %1623 = vrot.lane.b32.xlu1 %v3928_v0, %s3403_s21 }
 0x584   : > { %1946 = vrot.lane.b32.xlu0 %v3946_v34, %s3404_s22 }
 0x585   : > { %1952 = vrot.lane.b32.xlu1 %v3928_v0, %s3404_s22 }
 0x588   : > { %1942 = vrot.lane.b32.xlu0 %v3940_v17, %s3404_s22 }
 0x589   : > { %1948 = vrot.lane.b32.xlu1 %v3936_v13, %s3404_s22 }
 0x58d   : > { %1944 = vrot.lane.b32.xlu1 %v3954_v32, %s3404_s22 }
 0x594   : > { %v1341_v31 = vpop.xlane.xlu1 %1340 }
 0x595   : > { %v1370_v61 = vsub.f32 %v4011_v46, %v1341_v31 }
 0x596   : > { %v1337_v2 = vpop.xlane.xlu0 %1336 }
 0x597   : > { %v1368_v45 = vsub.f32 %v4014_v54, %v1337_v2  ;;  %v1388_v27 = vmul.f32 1.442695, %v1370_v61 }
 0x598   : > { %v1343_v21 = vpop.xlane.xlu1 %1342 }
 0x599   : > { %v1371_v62 = vsub.f32 %v4018_v41, %v1343_v21  ;;  %v1384_v25 = vmul.f32 1.442695, %v1368_v45 }
 0x59b   : > { %v1390_v40 = vmul.f32 1.442695, %v1371_v62  ;;  %3185 = vpow2.f32 %v1384_v25 }
 0x59c   : > { %v1339_v38 = vpop.xlane.xlu1 %1338  ;;  %v1349_v39 = vpop.xlane.xlu0 %1348 }
 0x59d   : > { %v1369_v36 = vsub.f32 %v4023_v50, %v1339_v38  ;;  %v1374_v12 = vsub.f32 %v4026_v42, %v1349_v39  ;;  %3187 = vpow2.f32 %v1390_v40 }
 0x59f   : > { %v1386_v26 = vmul.f32 1.442695, %v1369_v36  ;;  %v1396_v41 = vmul.f32 1.442695, %v1374_v12 }
 0x5a0   : > { %v1345_v19 = vpop.xlane.xlu1 %1344 }
 0x5a1   : > { %v1372_v54 = vsub.f32 %v4031_v48, %v1345_v19  ;;  %3189 = vpow2.f32 %v1386_v26 }
 0x5a2   : > { %v1347_v2 = vpop.xlane.xlu0 %1346  ;;  %3191 = vpow2.f32 %v1388_v27 }
 0x5a3   : > { %v1392_v21 = vmul.f32 1.442695, %v1372_v54  ;;  %v1373_v46 = vsub.f32 %v4034_v8, %v1347_v2 }
 0x5a4   : > { %v1351_v62 = vpop.xlane.xlu1 %1350 }
 0x5a5   : > { %v1394_v31 = vmul.f32 1.442695, %v1373_v46  ;;  %v1375_v38 = vsub.f32 %v4038_v49, %v1351_v62  ;;  %3193 = vpow2.f32 %v1392_v21 }
 0x5a7   : > { %3195 = vpow2.f32 %v1394_v31  ;;  %v1398_v36 = vmul.f32 1.442695, %v1375_v38  ;;  %v1684_v38 = vsel %vm194_vm0, %v4090_v30, 0 }
 0x5a8   : > { %3197 = vpow2.f32 %v1396_v41  ;;  %v1357_v39 = vpop.xlane.xlu1 %1356  ;;  %v4104_v25 = vpop.eup %3185 }
 0x5a9   : > { %3199 = vpow2.f32 %v1398_v36  ;;  %v1378_v48 = vsub.f32 %v4042_v20, %v1357_v39 }
 0x5aa   : > { %v4106_v19 = vpop.eup %3187 }
 0x5ab   : > { %v1404_v62 = vmul.f32 1.442695, %v1378_v48 }
 0x5ac   : > { %v1353_v40 = vpop.xlane.xlu1 %1352 }
 0x5ad   : > { %v1376_v27 = vsub.f32 %v4047_v29, %v1353_v40  ;;  %v1687_v29 = vsel %vm194_vm0, %v3982_v24, 0 }
 0x5ae   : > { %v4108_v26 = vpop.eup %3189 }
 0x5af   : > { %v4111_v12 = vpop.eup %3191  ;;  %v1448_v8 = vpack.c.bf16 %v4108_v26, %v4104_v25  ;;  %v1400_v45 = vmul.f32 1.442695, %v1376_v27 }
 0x5b0   : > { %v1359_v61 = vpop.xlane.xlu1 %1358  ;;  %v1449_v42 = vpack.c.bf16 %v4106_v19, %v4111_v12 }
 0x5b1   : > { %v1379_v50 = vsub.f32 %v4051_v44, %v1359_v61  ;;  %2858 = vmatprep.mubr.bf16.mxu1 %v1448_v8  ;;  %3201 = vpow2.f32 %v1400_v45 }
 0x5b2   : > { %v4119_v49 = vpop.eup %3193  ;;  %2859 = vmatmul.mubr.bf16.vlgmr.msra.gmra.mxu1 %v1449_v42 }
 0x5b3   : > { %v1406_v2 = vmul.f32 1.442695, %v1379_v50  ;;  %2875 = vmatpush3.bf16.xpose.msra.mxu1 %v1687_v29  ;;  %v1630_v50 = vpop.permute.xlu0 %1629 }
 0x5b4   : > { %v4123_v54 = vpop.eup %3195  ;;  %v1355_v21 = vpop.xlane.xlu1 %1354  ;;  %2963 = vmatprep.subr.msk.bf16.mxu1 %vm194_vm0, %v4090_v30  ;;  %v1672_v45 = vsel %vm194_vm0, %v1630_v50, 0 }
 0x5b5   : > { %v4125_v46 = vpop.eup %3197  ;;  %v1377_v20 = vsub.f32 %v4055_v51, %v1355_v21  ;;  %v1450_v44 = vpack.c.bf16 %v4123_v54, %v4119_v49  ;;  %3203 = vpow2.f32 %v1406_v2  ;;  %v1681_v51 = vsel %vm194_vm0, %v4092_v60, 0 }
 0x5b6   : > { %v4132_v41 = vpop.eup %3199 }
 0x5b7   : > { %v1402_v24 = vmul.f32 1.442695, %v1377_v20  ;;  %2862 = vmatprep.mubr.bf16.mxu1 %v1450_v44  ;;  %v1451_v31 = vpack.c.bf16 %v4132_v41, %v4125_v46 }
 0x5b8   : > { %v1632_v8 = vpop.permute.xlu1 %1631 }
 0x5b9   : > { %3205 = vpow2.f32 %v1402_v24  ;;  %v1675_v42 = vsel %vm194_vm0, %v1632_v8, 0 }
 0x5ba   : > { %3207 = vpow2.f32 %v1404_v62  ;;  %2863 = vmatmul.mubr.bf16.gmra.mxu1 %v1451_v31 }
 0x5bb   : > { %2877 = vmatpush3.bf16.xpose.msra.mxu1 %v1684_v38 }
 0x5bc   : > { %2964 = vmatprep.subr.msk.bf16.mxu1 %vm194_vm0, %v4092_v60  ;;  %v1678_v60 = vsel %vm194_vm0, %v4094_v43, 0 }
 0x5be   : > { %v4142_v36 = vpop.eup %3201 }
 0x5c2   : > { %v4144_v39 = vpop.eup %3203 }
 0x5c3   : > { %2879 = vmatpush3.bf16.xpose.msra.mxu1 %v1681_v51 }
 0x5c4   : > { %2965 = vmatprep.subr.msk.bf16.mxu1 %vm194_vm0, %v4094_v43 }
 0x5c6   : > { %v4148_v40 = vpop.eup %3205 }
 0x5c7   : > { %v4150_v27 = vpop.eup %3207  ;;  %v1452_v30 = vpack.c.bf16 %v4148_v40, %v4142_v36 }
 0x5c8   : > { %v1453_v61 = vpack.c.bf16 %v4144_v39, %v4150_v27 }
 0x5c9   : > { %2866 = vmatprep.mubr.bf16.mxu1 %v1452_v30 }
 0x5ca   : > { %2867 = vmatmul.mubr.bf16.gmra.mxu1 %v1453_v61 }
 0x5cb   : > { %2881 = vmatpush3.bf16.xpose.msra.mxu1 %v1678_v60 }
 0x5cc   : > { %2966 = vmatprep.subr.msk.bf16.mxu1 %vm194_vm0, %v1632_v8 }
 0x5d3   : > { %2883 = vmatpush3.bf16.xpose.msra.mxu1 %v1675_v42 }
 0x5d4   : > { %2967 = vmatprep.subr.msk.bf16.mxu1 %vm194_vm0, %v1630_v50 }
 0x5d7   : > { %v1365_v48 = vpop.xlane.xlu0 %1364 }
 0x5d8   : > { %v1382_v62 = vsub.f32 %v4063_v6, %v1365_v48 }
 0x5da   : > { %v1412_v30 = vmul.f32 1.442695, %v1382_v62 }
 0x5db   : > { %v1361_v29 = vpop.xlane.xlu0 %1360  ;;  %2885 = vmatpush3.bf16.xpose.msra.mxu1 %v1672_v45 }
 0x5dc   : > { %v1380_v20 = vsub.f32 %v4066_v18, %v1361_v29 }
 0x5de   : > { %v1408_v24 = vmul.f32 1.442695, %v1380_v20 }
 0x5df   : > { %v1367_v2 = vpop.xlane.xlu0 %1366 }
 0x5e0   : > { %v1383_v44 = vsub.f32 %v4070_v22, %v1367_v2  ;;  %3209 = vpow2.f32 %v1408_v24 }
 0x5e2   : > { %v1414_v31 = vmul.f32 1.442695, %v1383_v44 }
 0x5e3   : > { %v1628_v21 = vpop.permute.xlu0 %1627 }
 0x5e4   : > { %2968 = vmatprep.subr.msk.bf16.mxu1 %vm194_vm0, %v1628_v21  ;;  %v1669_v43 = vsel %vm194_vm0, %v1628_v21, 0  ;;  %3211 = vpow2.f32 %v1414_v31 }
 0x5e5   : > { %2887 = vmatpush3.bf16.xpose.msra.mxu1 %v1669_v43 }
 0x5e7   : > { %v1610_v48 = vpop.permute.xlu0 %1609 }
 0x5e9   : > { %v1363_v38 = vpop.xlane.xlu1 %1362 }
 0x5ea   : > { %v1381_v51 = vsub.f32 %v4075_v47, %v1363_v38 }
 0x5eb   : > { %v1614_v29 = vpop.permute.xlu0 %1613 }
 0x5ec   : > { %v1410_v61 = vmul.f32 1.442695, %v1381_v51 }
 0x5ed   : > { %v1626_v60 = vpop.permute.xlu1 %1625  ;;  %v4170_v22 = vpop.eup %3209 }
 0x5ee   : > { %3213 = vpow2.f32 %v1410_v61  ;;  %2969 = vmatprep.subr.msk.bf16.mxu1 %vm194_vm0, %v1626_v60  ;;  %v1666_v18 = vsel %vm194_vm0, %v1626_v60, 0 }
 0x5ef   : > { %3215 = vpow2.f32 %v1412_v30  ;;  %2889 = vmatpush3.bf16.xpose.msra.mxu1 %v1666_v18  ;;  %v1618_v21 = vpop.permute.xlu0 %1617 }
 0x5f1   : > { %v4172_v6 = vpop.eup %3211  ;;  %v1612_v45 = vpop.permute.xlu1 %1611 }
 0x5f3   : > { %v1622_v43 = vpop.permute.xlu0 %1621 }
 0x5f5   : > { %v1616_v2 = vpop.permute.xlu1 %1615 }
 0x5f7   : > { %v1951_v44 = vpop.permute.xlu0 %1950 }
 0x5f9   : > { %v1620_v20 = vpop.permute.xlu1 %1619 }
 0x5fb   : > { %v4174_v8 = vpop.eup %3213  ;;  %v1947_v34 = vpop.permute.xlu0 %1946 }
 0x5fc   : > { %v4176_v50 = vpop.eup %3215  ;;  %v1454_v47 = vpack.c.bf16 %v4174_v8, %v4170_v22 }
 0x5fd   : > { %v1455_v42 = vpack.c.bf16 %v4172_v6, %v4176_v50  ;;  %v1624_v0 = vpop.permute.xlu1 %1623 }
 0x5fe   : > { %2870 = vmatprep.mubr.bf16.mxu1 %v1454_v47 }
 0x5ff   : > { %2871 = vmatmul.mubr.bf16.gmra.mxu1 %v1455_v42  ;;  %v1943_v38 = vpop.permute.xlu0 %1942 }
 0x600   : > { %2890 = vmatprep.mubr.msk.bf16.mxu1 %vm194_vm0, %v1610_v48 }
 0x601   : > { %v1953_v23 = vpop.permute.xlu1 %1952 }
 0x602   : > { %2906 = vmatprep.subr.bf16.mxu0 %v1953_v23 }
 0x603   : > { %2907 = vmatpush3.bf16.msra.mxu0 %v1953_v23 }
 0x604   : > { %2908 = vmatprep.subr.bf16.mxu0 %v1951_v44 }
 0x605   : > { %v1949_v13 = vpop.permute.xlu1 %1948 }
 0x607   : > { %2891 = vmatmul.mubr.msk.bf16.vlgmr.msra.gmra.mxu1 %vm194_vm0, %v1612_v45  ;;  %2909 = vmatpush3.bf16.msra.mxu0 %v1951_v44 }
 0x608   : > { %2894 = vmatprep.mubr.msk.bf16.mxu1 %vm194_vm0, %v1614_v29  ;;  %2910 = vmatprep.subr.bf16.mxu0 %v1949_v13 }
 0x609   : > { %v1945_v62 = vpop.permute.xlu1 %1944 }
 0x60b   : > { %2911 = vmatpush3.bf16.msra.mxu0 %v1949_v13 }
 0x60c   : > { %2912 = vmatprep.subr.bf16.mxu0 %v1947_v34 }
 0x60f   : > { %2895 = vmatmul.mubr.msk.bf16.gmra.mxu1 %vm194_vm0, %v1616_v2  ;;  %2913 = vmatpush3.bf16.msra.mxu0 %v1947_v34 }
 0x610   : > { %2898 = vmatprep.mubr.msk.bf16.mxu1 %vm194_vm0, %v1618_v21  ;;  %2914 = vmatprep.subr.bf16.mxu0 %v1945_v62 }
 0x613   : > { %2915 = vmatpush3.bf16.msra.mxu0 %v1945_v62 }
 0x614   : > { %2916 = vmatprep.subr.bf16.mxu0 %v1943_v38 }
 0x617   : > { %2899 = vmatmul.mubr.msk.bf16.gmra.mxu1 %vm194_vm0, %v1620_v20  ;;  %2917 = vmatpush3.bf16.msra.mxu0 %v1943_v38 }
 0x618   : > { %2902 = vmatprep.mubr.msk.bf16.mxu1 %vm194_vm0, %v1622_v43 }
 0x61f   : > { %2903 = vmatmul.mubr.msk.bf16.gmra.mxu1 %vm194_vm0, %v1624_v0 }
 0x672   : > { %v4202_v32 = vpop.f32.mrf.mxu1 }
 0x674   : > { %v4204_v17 = vpop.f32.mrf.mxu1 }
 0x676   : > { %v4206_v24 = vpop.f32.mrf.mxu1 }
 0x677   : > { %4671 = vst [vmem:[#allocation46_spill] sm:$0xff] %v4206_v24 }
 0x678   : > { %v4208_v31 = vpop.f32.mrf.mxu1 }
 0x67a   : > { %v4210_v51 = vpop.f32.mrf.mxu1 }
 0x67b   : > { %4672 = vst [vmem:[#allocation47_spill] sm:$0xff] %v4210_v51 }
 0x67c   : > { %v4212_v30 = vpop.f32.mrf.mxu1 }
 0x67d   : > { %4673 = vst [vmem:[#allocation48_spill] sm:$0xff] %v4212_v30 }
 0x67e   : > { %v4214_v61 = vpop.f32.mrf.mxu1 }
 0x67f   : > { %4674 = vst [vmem:[#allocation49_spill] sm:$0xff] %v4214_v61 }
 0x680   : > { %v4216_v60 = vpop.f32.mrf.mxu1 }
 0x681   : > { %4675 = vst [vmem:[#allocation50_spill] sm:$0xff] %v4216_v60 }
 0x68a   : > { %v4218_v18 = vpop.f32.mrf.mxu1 }
 0x68b   : > { %4676 = vst [vmem:[#allocation51_spill] sm:$0xff] %v4218_v18 }
 0x68c   : > { %v4220_v47 = vpop.f32.mrf.mxu1 }
 0x68d   : > { %4677 = vst [vmem:[#allocation52_spill] sm:$0xff] %v4220_v47 }
 0x68e   : > { %v4222_v42 = vpop.f32.mrf.mxu1 }
 0x68f   : > { %4678 = vst [vmem:[#allocation53_spill] sm:$0xff] %v4222_v42 }
 0x690   : > { %v4224_v48 = vpop.f32.mrf.mxu1 }
 0x691   : > { %4679 = vst [vmem:[#allocation54_spill] sm:$0xff] %v4224_v48 }
 0x6bf   : > { %v4226_v45 = vpop.f32.mrf.mxu1 }
 0x6c0   : > { %4680 = vst [vmem:[#allocation55_spill] sm:$0xff] %v4226_v45 }
 0x6c1   : > { %v4228_v29 = vpop.f32.mrf.mxu1 }
 0x6c2   : > { %4681 = vst [vmem:[#allocation56_spill] sm:$0xff] %v4228_v29 }
 0x6c3   : > { %v4230_v2 = vpop.f32.mrf.mxu1 }
 0x6c4   : > { %4682 = vst [vmem:[#allocation57_spill] sm:$0xff] %v4230_v2 }
 0x6c5   : > { %v4232_v21 = vpop.f32.mrf.mxu1 }
 0x6c6   : > { %4683 = vst [vmem:[#allocation58_spill] sm:$0xff] %v4232_v21 }
 0x6c7   : > { %v2892_v20 = vpop.f32.mrf.mxu1 }
 0x6c8   : > { %v1788_v43 = vmul.f32 0.35355338, %v2892_v20 }
 0x6c9   : > { %v1723_v0 = vpop.f32.mrf.mxu1 }
 0x6ca   : > { %v4235_v23 = vadd.f32 %v1788_v43, %v3520_v37  ;;  %v1786_v44 = vmul.f32 0.35355338, %v1723_v0 }
 0x6cb   : > { %v2893_v13 = vpop.f32.mrf.mxu1 }
 0x6cc   : > { %1822 = vmax.xlane.f32.xlu0 %v4235_v23  ;;  %v4239_v62 = vadd.f32 %v1786_v44, %v3520_v37  ;;  %v1789_v38 = vmul.f32 0.35355338, %v2893_v13 }
 0x6cd   : > { %v1726_v34 = vpop.f32.mrf.mxu1 }
 0x6ce   : > { %v1787_v45 = vmul.f32 0.35355338, %v1726_v34  ;;  %v4246_v43 = vadd.f32 %v1789_v38, %v3520_v37 }
 0x6cf   : > { %v2896_v29 = vpop.f32.mrf.mxu1 }
 0x6d0   : > { %v4242_v2 = vadd.f32 %v1787_v45, %v3520_v37  ;;  %v1792_v21 = vmul.f32 0.35355338, %v2896_v29  ;;  %1818 = vmax.xlane.f32.xlu0 %v4239_v62 }
 0x6d1   : > { %v1739_v20 = vpop.f32.mrf.mxu1 }
 0x6d2   : > { %v4249_v0 = vadd.f32 %v1792_v21, %v3520_v37  ;;  %1820 = vmax.xlane.f32.xlu1 %v4242_v2  ;;  %v1790_v42 = vmul.f32 0.35355338, %v1739_v20 }
 0x6d3   : > { %v2897_v44 = vpop.f32.mrf.mxu1 }
 0x6d4   : > { %v1793_v13 = vmul.f32 0.35355338, %v2897_v44  ;;  %1824 = vmax.xlane.f32.xlu0 %v4246_v43  ;;  %v4258_v38 = vadd.f32 %v1790_v42, %v3520_v37 }
 0x6d5   : > { %v1742_v34 = vpop.f32.mrf.mxu1 }
 0x6d6   : > { %v4254_v45 = vadd.f32 %v1793_v13, %v3520_v37  ;;  %v1791_v29 = vmul.f32 0.35355338, %v1742_v34  ;;  %1830 = vmax.xlane.f32.xlu1 %v4249_v0 }
 0x6d7   : > { %v2900_v18 = vpop.f32.mrf.mxu1 }
 0x6d8   : > { %v1796_v21 = vmul.f32 0.35355338, %v2900_v18  ;;  %1832 = vmax.xlane.f32.xlu0 %v4254_v45  ;;  %v4262_v20 = vadd.f32 %v1791_v29, %v3520_v37 }
 0x6d9   : > { %v1755_v48 = vpop.f32.mrf.mxu1 }
 0x6da   : > { %v4265_v44 = vadd.f32 %v1796_v21, %v3520_v37  ;;  %1826 = vmax.xlane.f32.xlu1 %v4258_v38  ;;  %v1794_v34 = vmul.f32 0.35355338, %v1755_v48 }
 0x6db   : > { %v2901_v13 = vpop.f32.mrf.mxu1 }
 0x6dc   : > { %v1797_v47 = vmul.f32 0.35355338, %v2901_v13  ;;  %1828 = vmax.xlane.f32.xlu0 %v4262_v20  ;;  %v4274_v29 = vadd.f32 %v1794_v34, %v3520_v37 }
 0x6dd   : > { %v1758_v61 = vpop.f32.mrf.mxu1 }
 0x6de   : > { %v4270_v42 = vadd.f32 %v1797_v47, %v3520_v37  ;;  %v1795_v18 = vmul.f32 0.35355338, %v1758_v61  ;;  %1838 = vmax.xlane.f32.xlu1 %v4265_v44 }
 0x6df   : > { %v2904_v51 = vpop.f32.mrf.mxu1 }
 0x6e0   : > { %v1800_v21 = vmul.f32 0.35355338, %v2904_v51  ;;  %1840 = vmax.xlane.f32.xlu0 %v4270_v42  ;;  %v4278_v48 = vadd.f32 %v1795_v18, %v3520_v37 }
 0x6e1   : > { %v1771_v60 = vpop.f32.mrf.mxu1 }
 0x6e2   : > { %v4281_v13 = vadd.f32 %v1800_v21, %v3520_v37  ;;  %1834 = vmax.xlane.f32.xlu1 %v4274_v29  ;;  %v1798_v61 = vmul.f32 0.35355338, %v1771_v60 }
 0x6e3   : > { %v2905_v47 = vpop.f32.mrf.mxu1 }
 0x6e4   : > { %v1801_v30 = vmul.f32 0.35355338, %v2905_v47  ;;  %1836 = vmax.xlane.f32.xlu0 %v4278_v48  ;;  %v4290_v18 = vadd.f32 %v1798_v61, %v3520_v37 }
 0x6e5   : > { %v1774_v24 = vpop.f32.mrf.mxu1 }
 0x6e6   : > { %v4286_v34 = vadd.f32 %v1801_v30, %v3520_v37  ;;  %v1799_v51 = vmul.f32 0.35355338, %v1774_v24  ;;  %1846 = vmax.xlane.f32.xlu1 %v4281_v13  ;;  %v4688_v30 = vld [vmem:[#allocation6_spill] sm:$0xff] }
 0x6e8   : > { %1848 = vmax.xlane.f32.xlu0 %v4286_v34  ;;  %v4294_v21 = vadd.f32 %v1799_v51, %v3520_v37 }
 0x6ea   : > { %1842 = vmax.xlane.f32.xlu1 %v4290_v18 }
 0x6ec   : > { %1844 = vmax.xlane.f32.xlu0 %v4294_v21 }
 0x6fb   : > { %1940 = vrot.lane.b32.xlu1 %v3962_v35, %s3404_s22 }
 0x702   : > { %1938 = vrot.lane.b32.xlu0 %v3950_v7, %s3404_s22 }
 0x71f   : > { %934 = vadd.xlane.f32.xlu1 %v3848_v1 }
 0x721   : > { %936 = vadd.xlane.f32.xlu0 %v3852_v56 }
 0x723   : > { %938 = vadd.xlane.f32.xlu1 %v3855_v57 }
 0x725   : > { %940 = vadd.xlane.f32.xlu0 %v3850_v55 }
 0x727   : > { %942 = vadd.xlane.f32.xlu1 %v3863_v16 }
 0x729   : > { %944 = vadd.xlane.f32.xlu0 %v3867_v14 }
 0x72b   : > { %946 = vadd.xlane.f32.xlu1 %v3869_v28 }
 0x72d   : > { %948 = vadd.xlane.f32.xlu0 %v3876_v5 }
 0x72f   : > { %950 = vadd.xlane.f32.xlu1 %v3886_v3 }
 0x731   : > { %952 = vadd.xlane.f32.xlu0 %v3892_v4 }
 0x733   : > { %954 = vadd.xlane.f32.xlu1 %v3894_v52 }
 0x735   : > { %956 = vadd.xlane.f32.xlu0 %v3888_v33 }
 0x737   : > { %958 = vadd.xlane.f32.xlu1 %v3914_v11 }
 0x739   : > { %960 = vadd.xlane.f32.xlu0 %v3918_v59 }
 0x73b   : > { %962 = vadd.xlane.f32.xlu1 %v3920_v63 }
 0x73d   : > { %964 = vadd.xlane.f32.xlu0 %v3916_v15 }
 0x73f   : > { %1416 = vadd.xlane.f32.xlu1 %v4104_v25  ;;  %v4684_v25 = vld [vmem:[#allocation2_spill] sm:$0xff] }
 0x741   : > { %1418 = vadd.xlane.f32.xlu0 %v4108_v26 }
 0x743   : > { %1420 = vadd.xlane.f32.xlu1 %v4111_v12 }
 0x745   : > { %1422 = vadd.xlane.f32.xlu0 %v4106_v19 }
 0x747   : > { %1424 = vadd.xlane.f32.xlu1 %v4119_v49  ;;  %v4685_v49 = vld [vmem:[#allocation3_spill] sm:$0xff] }
 0x749   : > { %1426 = vadd.xlane.f32.xlu0 %v4123_v54 }
 0x74b   : > { %1428 = vadd.xlane.f32.xlu1 %v4125_v46  ;;  %v4686_v46 = vld [vmem:[#allocation4_spill] sm:$0xff] }
 0x74d   : > { %1430 = vadd.xlane.f32.xlu0 %v4132_v41 }
 0x74f   : > { %1432 = vadd.xlane.f32.xlu1 %v4142_v36 }
 0x751   : > { %1434 = vadd.xlane.f32.xlu0 %v4148_v40 }
 0x753   : > { %1436 = vadd.xlane.f32.xlu1 %v4150_v27 }
 0x755   : > { %v1823_v37 = vpop.xlane.xlu0 %1822  ;;  %1438 = vadd.xlane.f32.xlu0 %v4144_v39 }
 0x756   : > { %v1852_v14 = vsub.f32 %v4235_v23, %v1823_v37 }
 0x757   : > { %1440 = vadd.xlane.f32.xlu1 %v4170_v22  ;;  %v4687_v22 = vld [vmem:[#allocation5_spill] sm:$0xff] }
 0x758   : > { %v1870_v52 = vmul.f32 1.442695, %v1852_v14 }
 0x759   : > { %v1819_v1 = vpop.xlane.xlu0 %1818  ;;  %1442 = vadd.xlane.f32.xlu0 %v4174_v8 }
 0x75a   : > { %v1850_v55 = vsub.f32 %v4239_v62, %v1819_v1 }
 0x75b   : > { %1444 = vadd.xlane.f32.xlu1 %v4176_v50  ;;  %v1821_v56 = vpop.xlane.xlu1 %1820 }
 0x75c   : > { %v1866_v57 = vmul.f32 1.442695, %v1850_v55  ;;  %v1851_v16 = vsub.f32 %v4242_v2, %v1821_v56 }
 0x75d   : > { %v1825_v28 = vpop.xlane.xlu0 %1824  ;;  %1446 = vadd.xlane.f32.xlu0 %v4172_v6 }
 0x75e   : > { %v1868_v5 = vmul.f32 1.442695, %v1851_v16  ;;  %v1853_v3 = vsub.f32 %v4246_v43, %v1825_v28  ;;  %3217 = vpow2.f32 %v1866_v57 }
 0x75f   : > { %452 = vadd.xlane.f32.xlu1 %v3616_v53  ;;  %v1831_v33 = vpop.xlane.xlu1 %1830 }
 0x760   : > { %3219 = vpow2.f32 %v1868_v5  ;;  %v1872_v4 = vmul.f32 1.442695, %v1853_v3  ;;  %v1856_v63 = vsub.f32 %v4249_v0, %v1831_v33 }
 0x761   : > { %v1833_v11 = vpop.xlane.xlu0 %1832  ;;  %454 = vadd.xlane.f32.xlu0 %v3620_v9 }
 0x762   : > { %3221 = vpow2.f32 %v1872_v4  ;;  %v1857_v15 = vsub.f32 %v4254_v45, %v1833_v11  ;;  %v1878_v26 = vmul.f32 1.442695, %v1856_v63 }
 0x763   : > { %456 = vadd.xlane.f32.xlu1 %v3622_v10  ;;  %v1827_v59 = vpop.xlane.xlu1 %1826  ;;  %3223 = vpow2.f32 %v1870_v52 }
 0x764   : > { %v1880_v53 = vmul.f32 1.442695, %v1857_v15  ;;  %v1854_v9 = vsub.f32 %v4258_v38, %v1827_v59 }
 0x765   : > { %v1829_v7 = vpop.xlane.xlu0 %1828  ;;  %458 = vadd.xlane.f32.xlu0 %v3618_v58 }
 0x766   : > { %v1855_v35 = vsub.f32 %v4262_v20, %v1829_v7  ;;  %3225 = vpow2.f32 %v1880_v53  ;;  %v1874_v39 = vmul.f32 1.442695, %v1854_v9  ;;  %v4689_v7 = vld [vmem:[#allocation8_spill] sm:$0xff]  ;;  %v4690_v53 = vld [vmem:[#allocation9_spill] sm:$0xff] }
 0x767   : > { %460 = vadd.xlane.f32.xlu1 %v4684_v25  ;;  %v1839_v19 = vpop.xlane.xlu1 %1838  ;;  %3227 = vpow2.f32 %v1878_v26  ;;  %v4693_v26 = vld [vmem:[#allocation12_spill] sm:$0xff]  ;;  %v4694_v9 = vld [vmem:[#allocation13_spill] sm:$0xff] }
 0x768   : > { %v1876_v10 = vmul.f32 1.442695, %v1855_v35  ;;  %v1860_v40 = vsub.f32 %v4265_v44, %v1839_v19  ;;  %v4691_v35 = vld [vmem:[#allocation7_spill] sm:$0xff]  ;;  %v4692_v19 = vld [vmem:[#allocation10_spill] sm:$0xff] }
 0x769   : > { %v1841_v12 = vpop.xlane.xlu0 %1840  ;;  %462 = vadd.xlane.f32.xlu0 %v4685_v49 }
 0x76a   : > { %v1861_v54 = vsub.f32 %v4270_v42, %v1841_v12  ;;  %3229 = vpow2.f32 %v1876_v10  ;;  %v1886_v2 = vmul.f32 1.442695, %v1860_v40  ;;  %v4695_v12 = vld [vmem:[#allocation11_spill] sm:$0xff] }
 0x76b   : > { %464 = vadd.xlane.f32.xlu1 %v4686_v46  ;;  %v1835_v41 = vpop.xlane.xlu1 %1834  ;;  %v3218_v58 = vpop.eup %3217  ;;  %3231 = vpow2.f32 %v1874_v39 }
 0x76c   : > { %v1888_v50 = vmul.f32 1.442695, %v1861_v54  ;;  %v1858_v23 = vsub.f32 %v4274_v29, %v1835_v41 }
 0x76d   : > { %v3220_v36 = vpop.eup %3219  ;;  %v1837_v27 = vpop.xlane.xlu0 %1836  ;;  %466 = vadd.xlane.f32.xlu0 %v4687_v22 }
 0x76e   : > { %v1930_v6 = vpack.c.bf16 %v3220_v36, %v3218_v58  ;;  %v1859_v24 = vsub.f32 %v4278_v48, %v1837_v27  ;;  %3233 = vpow2.f32 %v1888_v50  ;;  %v1882_v20 = vmul.f32 1.442695, %v1858_v23  ;;  %v4697_v50 = vld [vmem:[#allocation33_spill] sm:$0xff] }
 0x76f   : > { %v3222_v8 = vpop.eup %3221  ;;  %468 = vadd.xlane.f32.xlu1 %v4688_v30  ;;  %v1847_v60 = vpop.xlane.xlu1 %1846  ;;  %3235 = vpow2.f32 %v1886_v2 }
 0x770   : > { %2922 = vmatprep.mubr.bf16.mxu0 %v1930_v6  ;;  %v3224_v43 = vpop.eup %3223  ;;  %v1884_v0 = vmul.f32 1.442695, %v1859_v24  ;;  %v1864_v44 = vsub.f32 %v4281_v13, %v1847_v60  ;;  %v4696_v6 = vld [vmem:[#allocation31_spill] sm:$0xff] }
 0x771   : > { %v1849_v62 = vpop.xlane.xlu0 %1848  ;;  %1904 = vadd.xlane.f32.xlu0 %v3222_v8  ;;  %v1931_v57 = vpack.c.bf16 %v3222_v8, %v3224_v43 }
 0x772   : > { %v1865_v45 = vsub.f32 %v4286_v34, %v1849_v62  ;;  %3237 = vpow2.f32 %v1884_v0  ;;  %v1894_v51 = vmul.f32 1.442695, %v1864_v44 }
 0x773   : > { %1902 = vadd.xlane.f32.xlu1 %v3224_v43  ;;  %v1843_v38 = vpop.xlane.xlu1 %1842  ;;  %v3226_v61 = vpop.eup %3225  ;;  %3239 = vpow2.f32 %v1882_v20  ;;  %v4698_v43 = vld [vmem:[#allocation30_spill] sm:$0xff] }
 0x774   : > { %v1896_v48 = vmul.f32 1.442695, %v1865_v45  ;;  %v1862_v34 = vsub.f32 %v4290_v18, %v1843_v38  ;;  %v3228_v1 = vpop.eup %3227  ;;  %v4699_v45 = vld [vmem:[#allocation32_spill] sm:$0xff] }
 0x775   : > { %v1845_v42 = vpop.xlane.xlu0 %1844  ;;  %1900 = vadd.xlane.f32.xlu0 %v3220_v36  ;;  %v1933_v3 = vpack.c.bf16 %v3226_v61, %v3228_v1 }
 0x776   : > { %v1863_v47 = vsub.f32 %v4294_v21, %v1845_v42  ;;  %3241 = vpow2.f32 %v1896_v48  ;;  %v1890_v56 = vmul.f32 1.442695, %v1862_v34 }
 0x777   : > { %1898 = vadd.xlane.f32.xlu1 %v3218_v58  ;;  %v1941_v29 = vpop.permute.xlu1 %1940  ;;  %v3230_v55 = vpop.eup %3229  ;;  %3243 = vpow2.f32 %v1894_v51  ;;  %v4701_v51 = vld [vmem:[#allocation37_spill] sm:$0xff] }
 0x778   : > { %2918 = vmatprep.subr.bf16.mxu0 %v1941_v29  ;;  %v1892_v13 = vmul.f32 1.442695, %v1863_v47  ;;  %v3232_v21 = vpop.eup %3231 }
 0x779   : > { %1912 = vadd.xlane.f32.xlu0 %v3226_v61  ;;  %2919 = vmatpush3.bf16.msra.mxu0 %v1941_v29  ;;  %v1939_v37 = vpop.permute.xlu0 %1938  ;;  %v1932_v16 = vpack.c.bf16 %v3230_v55, %v3232_v21  ;;  %v4700_v29 = vld [vmem:[#allocation35_spill] sm:$0xff] }
 0x77a   : > { %2920 = vmatprep.subr.bf16.mxu0 %v1939_v37  ;;  %3245 = vpow2.f32 %v1892_v13 }
 0x77b   : > { %1910 = vadd.xlane.f32.xlu1 %v3228_v1  ;;  %v3234_v14 = vpop.eup %3233  ;;  %3247 = vpow2.f32 %v1890_v56 }
 0x77c   : > { %v3236_v18 = vpop.eup %3235 }
 0x77d   : > { %1908 = vadd.xlane.f32.xlu0 %v3230_v55  ;;  %2921 = vmatpush3.bf16.msra.mxu0 %v1939_v37  ;;  %v1935_v59 = vpack.c.bf16 %v3234_v14, %v3236_v18 }
 0x77f   : > { %1906 = vadd.xlane.f32.xlu1 %v3232_v21  ;;  %v3238_v28 = vpop.eup %3237  ;;  %v4702_v21 = vld [vmem:[#allocation34_spill] sm:$0xff] }
 0x780   : > { %2923 = vmatmul.mubr.bf16.vlgmr.msra.gmra.mxu0 %v1931_v57  ;;  %v3240_v5 = vpop.eup %3239 }
 0x781   : > { %1920 = vadd.xlane.f32.xlu0 %v3234_v14  ;;  %2926 = vmatprep.mubr.bf16.mxu0 %v1932_v16  ;;  %v1934_v33 = vpack.c.bf16 %v3238_v28, %v3240_v5  ;;  %v4703_v16 = vld [vmem:[#allocation36_spill] sm:$0xff] }
 0x783   : > { %1918 = vadd.xlane.f32.xlu1 %v3236_v18  ;;  %v3242_v4 = vpop.eup %3241 }
 0x784   : > { %v3244_v52 = vpop.eup %3243 }
 0x785   : > { %1916 = vadd.xlane.f32.xlu0 %v3238_v28  ;;  %v1937_v25 = vpack.c.bf16 %v3242_v4, %v3244_v52 }
 0x787   : > { %1914 = vadd.xlane.f32.xlu1 %v3240_v5  ;;  %v3246_v11 = vpop.eup %3245 }
 0x788   : > { %2927 = vmatmul.mubr.bf16.gmra.mxu0 %v1933_v3  ;;  %v3248_v15 = vpop.eup %3247 }
 0x789   : > { %1928 = vadd.xlane.f32.xlu0 %v3242_v4  ;;  %2930 = vmatprep.mubr.bf16.mxu0 %v1934_v33  ;;  %v1936_v63 = vpack.c.bf16 %v3246_v11, %v3248_v15  ;;  %v4704_v4 = vld [vmem:[#allocation39_spill] sm:$0xff] }
 0x78b   : > { %1926 = vadd.xlane.f32.xlu1 %v3244_v52 }
 0x78d   : > { %1924 = vadd.xlane.f32.xlu0 %v3246_v11  ;;  %v4705_v11 = vld [vmem:[#allocation41_spill] sm:$0xff] }
 0x78f   : > { %1922 = vadd.xlane.f32.xlu1 %v3248_v15 }
 0x790   : > { %2931 = vmatmul.mubr.bf16.gmra.mxu0 %v1935_v59 }
 0x791   : > { %470 = vadd.xlane.f32.xlu0 %v4689_v7  ;;  %2934 = vmatprep.mubr.bf16.mxu0 %v1936_v63 }
 0x793   : > { %472 = vadd.xlane.f32.xlu1 %v4690_v53 }
 0x795   : > { %474 = vadd.xlane.f32.xlu0 %v4691_v35 }
 0x797   : > { %476 = vadd.xlane.f32.xlu1 %v4692_v19 }
 0x798   : > { %2935 = vmatmul.mubr.bf16.gmra.mxu0 %v1937_v25  ;;  %v4706_v25 = vld [vmem:[#allocation38_spill] sm:$0xff] }
 0x799   : > { %478 = vadd.xlane.f32.xlu0 %v4693_v26  ;;  %v4707_v26 = vld [vmem:[#allocation40_spill] sm:$0xff] }
 0x79b   : > { %480 = vadd.xlane.f32.xlu1 %v4694_v9 }
 0x79d   : > { %482 = vadd.xlane.f32.xlu0 %v4695_v12 }
 0x7a8   : > { %v935_v49 = vpop.xlane.xlu1 %934 }
 0x7a9   : > { %3249 = vrcp.f32 %v935_v49 }
 0x7aa   : > { %v937_v10 = vpop.xlane.xlu0 %936 }
 0x7ab   : > { %3251 = vrcp.f32 %v937_v10 }
 0x7ac   : > { %v939_v54 = vpop.xlane.xlu1 %938 }
 0x7ad   : > { %3253 = vrcp.f32 %v939_v54 }
 0x7ae   : > { %v941_v46 = vpop.xlane.xlu0 %940 }
 0x7af   : > { %3255 = vrcp.f32 %v941_v46 }
 0x7b0   : > { %v943_v41 = vpop.xlane.xlu1 %942 }
 0x7b1   : > { %3257 = vrcp.f32 %v943_v41  ;;  %v4708_v41 = vld [vmem:[#allocation43_spill] sm:$0xff] }
 0x7b2   : > { %v945_v58 = vpop.xlane.xlu0 %944 }
 0x7b3   : > { %3259 = vrcp.f32 %v945_v58 }
 0x7b4   : > { %v947_v36 = vpop.xlane.xlu1 %946 }
 0x7b5   : > { %3261 = vrcp.f32 %v947_v36  ;;  %v4709_v36 = vld [vmem:[#allocation45_spill] sm:$0xff] }
 0x7b6   : > { %v3250_v39 = vpop.eup %3249  ;;  %v949_v40 = vpop.xlane.xlu0 %948 }
 0x7b7   : > { %3263 = vrcp.f32 %v949_v40  ;;  %v1111_v8 = vmul.f32 %v3250_v39, %v4696_v6 }
 0x7b8   : > { %v3252_v27 = vpop.eup %3251  ;;  %v951_v22 = vpop.xlane.xlu1 %950 }
 0x7b9   : > { %3265 = vrcp.f32 %v951_v22  ;;  %v1112_v24 = vmul.f32 %v3252_v27, %v4697_v50  ;;  %v4710_v50 = vld [vmem:[#allocation42_spill] sm:$0xff] }
 0x7ba   : > { %v3254_v30 = vpop.eup %3253  ;;  %v953_v60 = vpop.xlane.xlu0 %952 }
 0x7bb   : > { %3267 = vrcp.f32 %v953_v60  ;;  %v2993_v2 = vpack.i.bf16 %v1112_v24, %v1111_v8  ;;  %v1113_v0 = vmul.f32 %v3254_v30, %v4698_v43  ;;  %v4711_v30 = vld [vmem:[#allocation44_spill] sm:$0xff] }
 0x7bc   : > { %v3256_v23 = vpop.eup %3255  ;;  %v955_v62 = vpop.xlane.xlu1 %954 }
 0x7bd   : > { %3269 = vrcp.f32 %v955_v62  ;;  %2994 = vrot.lane.b32.xlu1 %v2993_v2, %s3405_s23  ;;  %v1114_v38 = vmul.f32 %v3256_v23, %v4699_v45 }
 0x7be   : > { %v3258_v20 = vpop.eup %3257  ;;  %v957_v44 = vpop.xlane.xlu0 %956 }
 0x7bf   : > { %3271 = vrcp.f32 %v957_v44  ;;  %v2998_v42 = vpack.i.bf16 %v1114_v38, %v1113_v0  ;;  %v1115_v61 = vmul.f32 %v3258_v20, %v4700_v29 }
 0x7c0   : > { %v3260_v48 = vpop.eup %3259  ;;  %v959_v47 = vpop.xlane.xlu1 %958 }
 0x7c1   : > { %3273 = vrcp.f32 %v959_v47  ;;  %2999 = vrot.lane.b32.xlu0 %v2998_v42, %s3405_s23  ;;  %v1116_v34 = vmul.f32 %v3260_v48, %v4701_v51 }
 0x7c2   : > { %v3262_v37 = vpop.eup %3261  ;;  %v961_v1 = vpop.xlane.xlu0 %960 }
 0x7c3   : > { %3275 = vrcp.f32 %v961_v1  ;;  %v3003_v13 = vpack.i.bf16 %v1116_v34, %v1115_v61  ;;  %v1117_v57 = vmul.f32 %v3262_v37, %v4702_v21  ;;  %v4712_v61 = vld [vmem:[#allocation46_spill] sm:$0xff] }
 0x7c4   : > { %v3264_v55 = vpop.eup %3263  ;;  %v963_v56 = vpop.xlane.xlu1 %962 }
 0x7c5   : > { %3277 = vrcp.f32 %v963_v56  ;;  %3004 = vrot.lane.b32.xlu1 %v3003_v13, %s3405_s23  ;;  %v1118_v14 = vmul.f32 %v3264_v55, %v4703_v16  ;;  %v4713_v13 = vld [vmem:[#allocation48_spill] sm:$0xff]  ;;  %v4714_v56 = vld [vmem:[#allocation50_spill] sm:$0xff] }
 0x7c6   : > { %v3266_v18 = vpop.eup %3265  ;;  %v965_v28 = vpop.xlane.xlu0 %964 }
 0x7c7   : > { %3279 = vrcp.f32 %v965_v28  ;;  %v3008_v5 = vpack.i.bf16 %v1118_v14, %v1117_v57  ;;  %v1119_v52 = vmul.f32 %v3266_v18, %v4704_v4  ;;  %v4715_v28 = vld [vmem:[#allocation47_spill] sm:$0xff] }
 0x7c8   : > { %v3268_v3 = vpop.eup %3267  ;;  %v1417_v33 = vpop.xlane.xlu1 %1416 }
 0x7c9   : > { %3281 = vrcp.f32 %v1417_v33  ;;  %3009 = vrot.lane.b32.xlu1 %v3008_v5, %s3405_s23  ;;  %v1120_v15 = vmul.f32 %v3268_v3, %v4705_v11  ;;  %v4716_v3 = vld [vmem:[#allocation49_spill] sm:$0xff] }
 0x7ca   : > { %v3270_v59 = vpop.eup %3269  ;;  %v1419_v63 = vpop.xlane.xlu0 %1418 }
 0x7cb   : > { %3283 = vrcp.f32 %v1419_v63  ;;  %v3013_v7 = vpack.i.bf16 %v1120_v15, %v1119_v52  ;;  %v1121_v19 = vmul.f32 %v3270_v59, %v4706_v25  ;;  %v4717_v59 = vld [vmem:[#allocation52_spill] sm:$0xff] }
 0x7cc   : > { %v3272_v53 = vpop.eup %3271  ;;  %v1421_v35 = vpop.xlane.xlu1 %1420 }
 0x7cd   : > { %3285 = vrcp.f32 %v1421_v35  ;;  %3014 = vrot.lane.b32.xlu0 %v3013_v7, %s3405_s23  ;;  %v1122_v9 = vmul.f32 %v3272_v53, %v4707_v26  ;;  %v4718_v7 = vld [vmem:[#allocation54_spill] sm:$0xff]  ;;  %v4719_v26 = vld [vmem:[#allocation51_spill] sm:$0xff] }
 0x7ce   : > { %v3274_v12 = vpop.eup %3273  ;;  %v1423_v49 = vpop.xlane.xlu0 %1422 }
 0x7cf   : > { %3287 = vrcp.f32 %v1423_v49  ;;  %v3018_v10 = vpack.i.bf16 %v1122_v9, %v1121_v19  ;;  %v1123_v58 = vmul.f32 %v3274_v12, %v4708_v41  ;;  %v4720_v12 = vld [vmem:[#allocation53_spill] sm:$0xff]  ;;  %v4721_v41 = vld [vmem:[#allocation56_spill] sm:$0xff] }
 0x7d0   : > { %v3276_v54 = vpop.eup %3275  ;;  %v1425_v46 = vpop.xlane.xlu1 %1424 }
 0x7d1   : > { %3289 = vrcp.f32 %v1425_v46  ;;  %3019 = vrot.lane.b32.xlu1 %v3018_v10, %s3405_s23  ;;  %v1124_v39 = vmul.f32 %v3276_v54, %v4709_v36  ;;  %v4722_v36 = vld [vmem:[#allocation58_spill] sm:$0xff] }
 0x7d2   : > { %v3278_v40 = vpop.eup %3277  ;;  %v1427_v27 = vpop.xlane.xlu0 %1426 }
 0x7d3   : > { %3291 = vrcp.f32 %v1427_v27  ;;  %v3023_v22 = vpack.i.bf16 %v1124_v39, %v1123_v58  ;;  %v1125_v24 = vmul.f32 %v3278_v40, %v4710_v50  ;;  %v4724_v50 = vld [vmem:[#allocation57_spill] sm:$0xff] }
 0x7d4   : > { %v3280_v6 = vpop.eup %3279  ;;  %v1429_v8 = vpop.xlane.xlu1 %1428 }
 0x7d5   : > { %3293 = vrcp.f32 %v1429_v8  ;;  %3024 = vrot.lane.b32.xlu0 %v3023_v22, %s3405_s23  ;;  %v1126_v60 = vmul.f32 %v3280_v6, %v4711_v30  ;;  %v4723_v6 = vld [vmem:[#allocation55_spill] sm:$0xff] }
 0x7d6   : > { %v3282_v2 = vpop.eup %3281  ;;  %v1431_v23 = vpop.xlane.xlu0 %1430 }
 0x7d7   : > { %3295 = vrcp.f32 %v1431_v23  ;;  %v3028_v62 = vpack.i.bf16 %v1126_v60, %v1125_v24  ;;  %v1593_v45 = vmul.f32 %v3282_v2, %v4204_v17 }
 0x7d8   : > { %v3284_v43 = vpop.eup %3283  ;;  %v1433_v0 = vpop.xlane.xlu1 %1432 }
 0x7d9   : > { %3297 = vrcp.f32 %v1433_v0  ;;  %3029 = vrot.lane.b32.xlu1 %v3028_v62, %s3405_s23  ;;  %v1594_v38 = vmul.f32 %v3284_v43, %v4208_v31 }
 0x7da   : > { %v3286_v20 = vpop.eup %3285  ;;  %v1435_v44 = vpop.xlane.xlu0 %1434 }
 0x7db   : > { %3299 = vrcp.f32 %v1435_v44  ;;  %v3033_v42 = vpack.i.bf16 %v1594_v38, %v1593_v45  ;;  %v1595_v29 = vmul.f32 %v3286_v20, %v4202_v32 }
 0x7dc   : > { %v3288_v48 = vpop.eup %3287  ;;  %v1437_v47 = vpop.xlane.xlu1 %1436 }
 0x7dd   : > { %3301 = vrcp.f32 %v1437_v47  ;;  %3034 = vrot.lane.b32.xlu0 %v3033_v42, %s3406_s24  ;;  %v1596_v51 = vmul.f32 %v3288_v48, %v4712_v61 }
 0x7de   : > { %v3290_v34 = vpop.eup %3289  ;;  %v1439_v37 = vpop.xlane.xlu0 %1438 }
 0x7df   : > { %3303 = vrcp.f32 %v1439_v37  ;;  %v3038_v17 = vpack.i.bf16 %v1596_v51, %v1595_v29  ;;  %v1597_v55 = vmul.f32 %v3290_v34, %v4713_v13 }
 0x7e0   : > { %v3292_v1 = vpop.eup %3291  ;;  %v1441_v31 = vpop.xlane.xlu1 %1440 }
 0x7e1   : > { %3305 = vrcp.f32 %v1441_v31  ;;  %3039 = vrot.lane.b32.xlu1 %v3038_v17, %s3406_s24  ;;  %v1598_v21 = vmul.f32 %v3292_v1, %v4714_v56 }
 0x7e2   : > { %v3294_v57 = vpop.eup %3293  ;;  %v1443_v16 = vpop.xlane.xlu0 %1442 }
 0x7e3   : > { %3307 = vrcp.f32 %v1443_v16  ;;  %v3043_v14 = vpack.i.bf16 %v1598_v21, %v1597_v55  ;;  %v1599_v5 = vmul.f32 %v3294_v57, %v4715_v28 }
 0x7e4   : > { %v3296_v32 = vpop.eup %3295  ;;  %v1445_v18 = vpop.xlane.xlu1 %1444 }
 0x7e5   : > { %3309 = vrcp.f32 %v1445_v18  ;;  %3044 = vrot.lane.b32.xlu0 %v3043_v14, %s3406_s24  ;;  %v1600_v33 = vmul.f32 %v3296_v32, %v4716_v3 }
 0x7e6   : > { %v3298_v4 = vpop.eup %3297  ;;  %v1447_v52 = vpop.xlane.xlu0 %1446 }
 0x7e7   : > { %3311 = vrcp.f32 %v1447_v52  ;;  %v3048_v11 = vpack.i.bf16 %v1600_v33, %v1599_v5  ;;  %v1601_v63 = vmul.f32 %v3298_v4, %v4717_v59 }
 0x7e8   : > { %v3300_v15 = vpop.eup %3299  ;;  %v4414_v60 = vpop.xlane.xlu1 %452 }
 0x7e9   : > { %3049 = vrot.lane.b32.xlu1 %v3048_v11, %s3406_s24  ;;  %v1602_v53 = vmul.f32 %v3300_v15, %v4718_v7 }
 0x7ea   : > { %v3302_v35 = vpop.eup %3301  ;;  %v4416_v2 = vpop.xlane.xlu0 %454 }
 0x7eb   : > { %v3053_v25 = vpack.i.bf16 %v1602_v53, %v1601_v63  ;;  %v1603_v9 = vmul.f32 %v3302_v35, %v4719_v26 }
 0x7ec   : > { %v3304_v19 = vpop.eup %3303  ;;  %v4418_v23 = vpop.xlane.xlu1 %456 }
 0x7ed   : > { %3054 = vrot.lane.b32.xlu0 %v3053_v25, %s3406_s24  ;;  %v1604_v49 = vmul.f32 %v3304_v19, %v4720_v12 }
 0x7ee   : > { %v3306_v10 = vpop.eup %3305  ;;  %v4420_v62 = vpop.xlane.xlu0 %458 }
 0x7ef   : > { %v3058_v54 = vpack.i.bf16 %v1604_v49, %v1603_v9  ;;  %v1605_v58 = vmul.f32 %v3306_v10, %v4721_v41 }
 0x7f0   : > { %v3308_v46 = vpop.eup %3307  ;;  %v4422_v43 = vpop.xlane.xlu1 %460 }
 0x7f1   : > { %3059 = vrot.lane.b32.xlu1 %v3058_v54, %s3406_s24  ;;  %v1606_v39 = vmul.f32 %v3308_v46, %v4722_v36 }
 0x7f2   : > { %v3310_v40 = vpop.eup %3309  ;;  %v4424_v0 = vpop.xlane.xlu0 %462 }
 0x7f3   : > { %v3063_v27 = vpack.i.bf16 %v1606_v39, %v1605_v58  ;;  %v1607_v8 = vmul.f32 %v3310_v40, %v4723_v6 }
 0x7f4   : > { %v3312_v22 = vpop.eup %3311  ;;  %v4426_v45 = vpop.xlane.xlu1 %464 }
 0x7f5   : > { %3064 = vrot.lane.b32.xlu0 %v3063_v27, %s3406_s24  ;;  %v1608_v24 = vmul.f32 %v3312_v22, %v4724_v50 }
 0x7f6   : > { %v4428_v38 = vpop.xlane.xlu0 %466 }
 0x7f7   : > { %v3068_v30 = vpack.i.bf16 %v1608_v24, %v1607_v8 }
 0x7f8   : > { %v4430_v20 = vpop.xlane.xlu1 %468 }
 0x7f9   : > { %3069 = vrot.lane.b32.xlu1 %v3068_v30, %s3406_s24 }
 0x7fa   : > { %v1905_v44 = vpop.xlane.xlu0 %1904 }
 0x7fb   : > { %3313 = vrcp.f32 %v1905_v44 }
 0x7fc   : > { %v1903_v42 = vpop.xlane.xlu1 %1902 }
 0x7fd   : > { %3315 = vrcp.f32 %v1903_v42 }
 0x7fe   : > { %v1901_v48 = vpop.xlane.xlu0 %1900 }
 0x7ff   : > { %3317 = vrcp.f32 %v1901_v48 }
 0x800   : > { %v1899_v47 = vpop.xlane.xlu1 %1898 }
 0x801   : > { %3319 = vrcp.f32 %v1899_v47 }
 0x802   : > { %v1913_v29 = vpop.xlane.xlu0 %1912 }
 0x803   : > { %3321 = vrcp.f32 %v1913_v29 }
 0x804   : > { %v1911_v61 = vpop.xlane.xlu1 %1910 }
 0x805   : > { %3323 = vrcp.f32 %v1911_v61 }
 0x806   : > { %v1909_v51 = vpop.xlane.xlu0 %1908 }
 0x807   : > { %3325 = vrcp.f32 %v1909_v51 }
 0x808   : > { %v1907_v34 = vpop.xlane.xlu1 %1906  ;;  %v3314_v56 = vpop.eup %3313 }
 0x809   : > { %3327 = vrcp.f32 %v1907_v34 }
 0x80a   : > { %v1921_v37 = vpop.xlane.xlu0 %1920  ;;  %v3316_v21 = vpop.eup %3315 }
 0x80b   : > { %3329 = vrcp.f32 %v1921_v37 }
 0x80c   : > { %v1919_v17 = vpop.xlane.xlu1 %1918  ;;  %v3318_v16 = vpop.eup %3317 }
 0x80d   : > { %3331 = vrcp.f32 %v1919_v17 }
 0x80e   : > { %v1917_v31 = vpop.xlane.xlu0 %1916  ;;  %v3320_v18 = vpop.eup %3319 }
 0x80f   : > { %3333 = vrcp.f32 %v1917_v31 }
 0x810   : > { %v1915_v13 = vpop.xlane.xlu1 %1914  ;;  %v3322_v63 = vpop.eup %3321 }
 0x811   : > { %3335 = vrcp.f32 %v1915_v13 }
 0x812   : > { %v1929_v5 = vpop.xlane.xlu0 %1928  ;;  %v3324_v7 = vpop.eup %3323 }
 0x813   : > { %3337 = vrcp.f32 %v1929_v5 }
 0x814   : > { %v1927_v52 = vpop.xlane.xlu1 %1926  ;;  %v3326_v35 = vpop.eup %3325 }
 0x815   : > { %3339 = vrcp.f32 %v1927_v52 }
 0x816   : > { %v1925_v25 = vpop.xlane.xlu0 %1924  ;;  %v3328_v9 = vpop.eup %3327 }
 0x817   : > { %3341 = vrcp.f32 %v1925_v25 }
 0x818   : > { %v1923_v12 = vpop.xlane.xlu1 %1922  ;;  %v3330_v39 = vpop.eup %3329 }
 0x819   : > { %3343 = vrcp.f32 %v1923_v12 }
 0x81a   : > { %v3332_v40 = vpop.eup %3331  ;;  %3345 = vrcp.f32 %v4414_v60 }
 0x81b   : > { %3347 = vrcp.f32 %v4416_v2 }
 0x81c   : > { %v3334_v22 = vpop.eup %3333  ;;  %3349 = vrcp.f32 %v4418_v23 }
 0x81d   : > { %3351 = vrcp.f32 %v4420_v62 }
 0x81e   : > { %v3336_v50 = vpop.eup %3335  ;;  %3353 = vrcp.f32 %v4422_v43 }
 0x81f   : > { %3355 = vrcp.f32 %v4424_v0 }
 0x820   : > { %v3338_v61 = vpop.eup %3337  ;;  %3357 = vrcp.f32 %v4426_v45 }
 0x821   : > { %3359 = vrcp.f32 %v4428_v38 }
 0x822   : > { %v3340_v51 = vpop.eup %3339  ;;  %3361 = vrcp.f32 %v4430_v20  ;;  %v4726_v20 = vld [vmem:[#allocation17_spill] sm:$0xff] }
 0x824   : > { %v3342_v37 = vpop.eup %3341 }
 0x826   : > { %v3344_v31 = vpop.eup %3343 }
 0x827   : > { %v3346_v23 = vpop.eup %3345 }
 0x840   : > { %v2924_v1 = vpop.f32.mrf.mxu0 }
 0x841   : > { %v2077_v14 = vmul.f32 %v3316_v21, %v2924_v1 }
 0x842   : > { %v1996_v55 = vpop.f32.mrf.mxu0 }
 0x843   : > { %v2075_v3 = vmul.f32 %v3320_v18, %v1996_v55 }
 0x844   : > { %v2925_v57 = vpop.f32.mrf.mxu0 }
 0x845   : > { %v2078_v32 = vmul.f32 %v3314_v56, %v2925_v57 }
 0x846   : > { %v1999_v28 = vpop.f32.mrf.mxu0 }
 0x847   : > { %v3073_v33 = vpack.i.bf16 %v2078_v32, %v2077_v14  ;;  %v2076_v4 = vmul.f32 %v3318_v16, %v1999_v28  ;;  %v473_v16 = vpop.xlane.xlu1 %472  ;;  %v471_v14 = vpop.xlane.xlu0 %470 }
 0x848   : > { %v2928_v11 = vpop.f32.mrf.mxu0  ;;  %3363 = vrcp.f32 %v471_v14 }
 0x849   : > { %v3078_v15 = vpack.i.bf16 %v2076_v4, %v2075_v3  ;;  %3074 = vrot.lane.b32.xlu1 %v3073_v33, %s3407_s25  ;;  %v2081_v19 = vmul.f32 %v3324_v7, %v2928_v11  ;;  %3365 = vrcp.f32 %v473_v16 }
 0x84a   : > { %v2012_v59 = vpop.f32.mrf.mxu0 }
 0x84b   : > { %3079 = vrot.lane.b32.xlu0 %v3078_v15, %s3407_s25  ;;  %v2079_v10 = vmul.f32 %v3328_v9, %v2012_v59  ;;  %v477_v32 = vpop.xlane.xlu1 %476  ;;  %v475_v18 = vpop.xlane.xlu0 %474  ;;  %v4725_v9 = vld [vmem:[#allocation15_spill] sm:$0xff] }
 0x84c   : > { %v2929_v53 = vpop.f32.mrf.mxu0  ;;  %v629_v12 = vmul.f32 %v3346_v23, %v4725_v9  ;;  %3367 = vrcp.f32 %v475_v18 }
 0x84d   : > { %v2082_v26 = vmul.f32 %v3322_v63, %v2929_v53  ;;  %3369 = vrcp.f32 %v477_v32 }
 0x84e   : > { %v2015_v49 = vpop.f32.mrf.mxu0 }
 0x84f   : > { %v3083_v54 = vpack.i.bf16 %v2082_v26, %v2081_v19  ;;  %v2080_v46 = vmul.f32 %v3326_v35, %v2015_v49  ;;  %v481_v28 = vpop.xlane.xlu1 %480  ;;  %v479_v3 = vpop.xlane.xlu0 %478 }
 0x850   : > { %v2932_v41 = vpop.f32.mrf.mxu0  ;;  %v3348_v35 = vpop.eup %3347  ;;  %3371 = vrcp.f32 %v479_v3 }
 0x851   : > { %v3088_v58 = vpack.i.bf16 %v2080_v46, %v2079_v10  ;;  %3084 = vrot.lane.b32.xlu1 %v3083_v54, %s3407_s25  ;;  %v2085_v6 = vmul.f32 %v3332_v40, %v2932_v41  ;;  %v3350_v43 = vpop.eup %3349  ;;  %v630_v49 = vmul.f32 %v3348_v35, %v4726_v20  ;;  %v4728_v40 = vld [vmem:[#allocation16_spill] sm:$0xff]  ;;  %3373 = vrcp.f32 %v481_v28  ;;  %v4733_v20 = vld [vmem:[#allocation25_spill] sm:$0xff] }
 0x852   : > { %v2028_v36 = vpop.f32.mrf.mxu0  ;;  %v3352_v25 = vpop.eup %3351 }
 0x853   : > { %3089 = vrot.lane.b32.xlu0 %v3088_v58, %s3407_s25  ;;  %v2083_v30 = vmul.f32 %v3336_v50, %v2028_v36  ;;  %v2995_v5 = vpop.permute.xlu1 %2994  ;;  %v4442_v4 = vpop.xlane.xlu0 %482  ;;  %v4727_v36 = vld [vmem:[#allocation14_spill] sm:$0xff]  ;;  %v4729_v50 = vld [vmem:[#allocation19_spill] sm:$0xff] }
 0x854   : > { %v2933_v27 = vpop.f32.mrf.mxu0  ;;  %v3354_v19 = vpop.eup %3353  ;;  %v2997_v10 = vunpack.i.h.bf16 %v2995_v5  ;;  %v2996_v54 = vunpack.i.l.bf16 %v2995_v5  ;;  %3375 = vrcp.f32 %v4442_v4 }
 0x855   : > { %v2086_v8 = vmul.f32 %v3330_v39, %v2933_v27  ;;  %v3356_v26 = vpop.eup %3355  ;;  %v631_v39 = vmul.f32 %v3350_v43, %v4727_v36  ;;  %v632_v27 = vmul.f32 %v3352_v25, %v4728_v40 }
 0x856   : > { %v2031_v24 = vpop.f32.mrf.mxu0  ;;  %v3358_v38 = vpop.eup %3357 }
 0x857   : > { %v3093_v44 = vpack.i.bf16 %v2086_v8, %v2085_v6  ;;  %v2084_v42 = vmul.f32 %v3334_v22, %v2031_v24  ;;  %v4440_v33 = vpop.permute.xlu1 %3004  ;;  %v3000_v11 = vpop.permute.xlu0 %2999  ;;  %v633_v24 = vmul.f32 %v3354_v19, %v4729_v50 }
 0x858   : > { %v2936_v48 = vpop.f32.mrf.mxu0  ;;  %v3002_v41 = vunpack.i.h.bf16 %v3000_v11  ;;  %v3001_v58 = vunpack.i.l.bf16 %v3000_v11 }
 0x859   : > { %v3098_v47 = vpack.i.bf16 %v2084_v42, %v2083_v30  ;;  %3094 = vrot.lane.b32.xlu1 %v3093_v44, %s3407_s25  ;;  %v2089_v17 = vmul.f32 %v3340_v51, %v2936_v48  ;;  %v4730_v30 = vld [vmem:[#allocation21_spill] sm:$0xff]  ;;  %v4731_v42 = vld [vmem:[#allocation18_spill] sm:$0xff] }
 0x85a   : > { %v2044_v29 = vpop.f32.mrf.mxu0  ;;  %v634_v44 = vmul.f32 %v3356_v26, %v4730_v30  ;;  %v635_v48 = vmul.f32 %v3358_v38, %v4731_v42  ;;  %v4732_v38 = vld [vmem:[#allocation20_spill] sm:$0xff] }
 0x85b   : > { %3099 = vrot.lane.b32.xlu0 %v3098_v47, %s3407_s25  ;;  %v2087_v55 = vmul.f32 %v3344_v31, %v2044_v29  ;;  %v4444_v52 = vpop.permute.xlu1 %3009  ;;  %v4450_v59 = vpop.permute.xlu0 %3014  ;;  %v2284_v47 = vsel %vm194_vm0, %v630_v49, %v2997_v10  ;;  %v2283_v29 = vsel %vm194_vm0, %v629_v12, %v2996_v54  ;;  %v4734_v10 = vld [vmem:[#allocation23_spill] sm:$0xff] }
 0x85c   : > { %v2937_v34 = vpop.f32.mrf.mxu0  ;;  %v3012_v23 = vunpack.i.h.bf16 %v4444_v52  ;;  %v3011_v35 = vunpack.i.l.bf16 %v4444_v52 }
 0x85d   : > { %v2090_v1 = vmul.f32 %v3338_v61, %v2937_v34 }
 0x85e   : > { %v2047_v13 = vpop.f32.mrf.mxu0 }
 0x85f   : > { %v3108_v56 = vpack.i.bf16 %v2090_v1, %v2089_v17  ;;  %v2088_v21 = vmul.f32 %v3342_v37, %v2047_v13  ;;  %v4446_v15 = vpop.permute.xlu1 %3019  ;;  %v4458_v7 = vpop.permute.xlu0 %3024  ;;  %v2286_v37 = vsel %vm194_vm0, %v632_v27, %v3002_v41  ;;  %v2285_v17 = vsel %vm194_vm0, %v631_v39, %v3001_v58 }
 0x860   : > { %v3360_v13 = vpop.eup %3359 }
 0x861   : > { %v3103_v57 = vpack.i.bf16 %v2088_v21, %v2087_v55  ;;  %3109 = vrot.lane.b32.xlu1 %v3108_v56, %s3407_s25  ;;  %v3007_v55 = vunpack.i.h.bf16 %v4440_v33  ;;  %v3006_v56 = vunpack.i.l.bf16 %v4440_v33  ;;  %v3362_v14 = vpop.eup %3361  ;;  %v636_v52 = vmul.f32 %v3360_v13, %v4732_v38 }
 0x862   : > { %v3364_v3 = vpop.eup %3363  ;;  %v637_v54 = vmul.f32 %v3362_v14, %v4734_v10  ;;  %v3022_v13 = vunpack.i.h.bf16 %v4446_v15 }
 0x863   : > { %3104 = vrot.lane.b32.xlu0 %v3103_v57, %s3407_s25  ;;  %v4454_v63 = vpop.permute.xlu1 %3029  ;;  %v4461_v60 = vpop.permute.xlu0 %3034  ;;  %v638_v49 = vmul.f32 %v3364_v3, %v4733_v20  ;;  %v2288_v58 = vsel %vm194_vm0, %v634_v44, %v3007_v55  ;;  %v2287_v36 = vsel %vm194_vm0, %v633_v24, %v3006_v56  ;;  %v2290_v27 = vsel %vm194_vm0, %v636_v52, %v3012_v23 }
 0x864   : > { %v3037_v61 = vunpack.i.h.bf16 %v4461_v60  ;;  %v3036_v51 = vunpack.i.l.bf16 %v4461_v60  ;;  %v3366_v41 = vpop.eup %3365  ;;  %v3017_v24 = vunpack.i.h.bf16 %v4450_v59  ;;  %v3016_v44 = vunpack.i.l.bf16 %v4450_v59 }
 0x865   : > { %v3368_v40 = vpop.eup %3367  ;;  %v3021_v55 = vunpack.i.l.bf16 %v4446_v15 }
 0x866   : > { %v2300_v33 = vsel %vm2299_vm2, %v2283_v29, %v3036_v51  ;;  %v2301_v11 = vsel %vm2299_vm2, %v2284_v47, %v3037_v61  ;;  %v4529_v30 = vpop.eup %3369  ;;  %v2292_v15 = vsel %vm194_vm0, %v638_v49, %v3017_v24  ;;  %v4738_v24 = vld [vmem:[#allocation28_spill] sm:$0xff] }
 0x867   : > { %v3040_v53 = vpop.permute.xlu1 %3039  ;;  %v4467_v62 = vpop.permute.xlu0 %3044 }
 0x868   : > { %v3042_v22 = vunpack.i.h.bf16 %v3040_v53  ;;  %v3041_v6 = vunpack.i.l.bf16 %v3040_v53  ;;  %v3046_v39 = vunpack.i.l.bf16 %v4467_v62  ;;  %v3372_v29 = vpop.eup %3371 }
 0x86a   : > { %v2303_v21 = vsel %vm2299_vm2, %v2286_v37, %v3042_v22  ;;  %v2302_v57 = vsel %vm2299_vm2, %v2285_v17, %v3041_v6  ;;  %v2289_v22 = vsel %vm194_vm0, %v635_v48, %v3011_v35  ;;  %v3374_v37 = vpop.eup %3373  ;;  %v2304_v17 = vsel %vm2299_vm2, %v2287_v36, %v3046_v39 }
 0x86b   : > { %v4463_v2 = vpop.permute.xlu1 %3049  ;;  %v4471_v45 = vpop.permute.xlu0 %3054  ;;  %v3031_v36 = vunpack.i.l.bf16 %v4454_v63 }
 0x86c   : > { %v3052_v19 = vunpack.i.h.bf16 %v4463_v2  ;;  %v3051_v26 = vunpack.i.l.bf16 %v4463_v2  ;;  %v3047_v2 = vunpack.i.h.bf16 %v4467_v62  ;;  %v3376_v49 = vpop.eup %3375 }
 0x86e   : > { %v2306_v62 = vsel %vm2299_vm2, %v2289_v22, %v3051_v26  ;;  %v2307_v42 = vsel %vm2299_vm2, %v2290_v27, %v3052_v19  ;;  %v3026_v19 = vunpack.i.l.bf16 %v4458_v7 }
 0x86f   : > { %v4469_v0 = vpop.permute.xlu1 %3059  ;;  %v4479_v8 = vpop.permute.xlu0 %3064 }
 0x873   : > { %v4475_v46 = vpop.permute.xlu1 %3069 }
 0x8bb   : > { %v3075_v34 = vpop.permute.xlu1 %3074 }
 0x8bc   : > { %v3077_v1 = vunpack.i.h.bf16 %v3075_v34  ;;  %v3076_v31 = vunpack.i.l.bf16 %v3075_v34 }
 0x8bd   : > { %v3080_v16 = vpop.permute.xlu0 %3079 }
 0x8be   : > { %v2319_v32 = vsel %vm2316_vm3, %v2302_v57, %v3076_v31  ;;  %v2320_v18 = vsel %vm2316_vm3, %v2303_v21, %v3077_v1  ;;  %v3082_v28 = vunpack.i.h.bf16 %v3080_v16  ;;  %v3081_v5 = vunpack.i.l.bf16 %v3080_v16 }
 0x8bf   : > { %v2540_v53 = vpack.c.bf16 %v2319_v32, %v2319_v32  ;;  %v2541_v60 = vpack.c.bf16 %v2320_v18, %v2320_v18  ;;  %v2305_v1 = vsel %vm2299_vm2, %v2288_v58, %v3047_v2  ;;  %v3062_v57 = vunpack.i.h.bf16 %v4469_v0  ;;  %v4735_v18 = vld [vmem:[#allocation22_spill] sm:$0xff] }
 0x8c0   : > { %v2317_v43 = vsel %vm2316_vm3, %v2300_v33, %v3081_v5  ;;  %v2318_v25 = vsel %vm2316_vm3, %v2301_v11, %v3082_v28  ;;  %v3061_v16 = vunpack.i.l.bf16 %v4469_v0  ;;  %v639_v28 = vmul.f32 %v3366_v41, %v4735_v18  ;;  %v4736_v5 = vld [vmem:[#allocation24_spill] sm:$0xff] }
 0x8c1   : > { %2400 = vst.msk [vmem:[%s4499_s28 + $0x8] sm:$0xf] %vm2397_vm4, %v2540_v53  ;;  %2401 = vst.msk [vmem:[%s4499_s28 + $0xc] sm:$0xf] %vm2397_vm4, %v2541_v60  ;;  %v2538_v9 = vpack.c.bf16 %v2317_v43, %v2317_v43  ;;  %v2539_v12 = vpack.c.bf16 %v2318_v25, %v2318_v25  ;;  %v640_v3 = vmul.f32 %v3368_v40, %v4736_v5  ;;  %v3057_v11 = vunpack.i.h.bf16 %v4471_v45 }
 0x8c2   : > { %v2291_v33 = vsel %vm194_vm0, %v637_v54, %v3016_v44  ;;  %v3056_v53 = vunpack.i.l.bf16 %v4471_v45  ;;  %v2293_v23 = vsel %vm194_vm0, %v639_v28, %v3021_v55  ;;  %v3027_v25 = vunpack.i.h.bf16 %v4458_v7 }
 0x8c3   : > { %2398 = vst.msk [vmem:[%s4499_s28] sm:$0xf] %vm2397_vm4, %v2538_v9  ;;  %2399 = vst.msk [vmem:[%s4499_s28 + $0x4] sm:$0xf] %vm2397_vm4, %v2539_v12  ;;  %v3085_v4 = vpop.permute.xlu1 %3084  ;;  %v2294_v60 = vsel %vm194_vm0, %v640_v3, %v3022_v13  ;;  %v2310_v26 = vsel %vm2299_vm2, %v2293_v23, %v3061_v16  ;;  %v2309_v10 = vsel %vm2299_vm2, %v2292_v15, %v3057_v11  ;;  %v3032_v58 = vunpack.i.h.bf16 %v4454_v63  ;;  %v4739_v63 = vld [vmem:[#allocation29_spill] sm:$0xff] }
 0x8c4   : > { %v3087_v6 = vunpack.i.h.bf16 %v3085_v4  ;;  %v3086_v50 = vunpack.i.l.bf16 %v3085_v4  ;;  %v2311_v9 = vsel %vm2299_vm2, %v2294_v60, %v3062_v57  ;;  %v2308_v54 = vsel %vm2299_vm2, %v2291_v33, %v3056_v53 }
 0x8c5   : > { %v3090_v47 = vpop.permute.xlu0 %3089  ;;  %v3072_v4 = vunpack.i.h.bf16 %v4475_v46  ;;  %v3071_v40 = vunpack.i.l.bf16 %v4475_v46  ;;  %v644_v44 = vmul.f32 %v3376_v49, %v4738_v24 }
 0x8c6   : > { %v2323_v61 = vsel %vm2316_vm3, %v2306_v62, %v3086_v50  ;;  %v2324_v48 = vsel %vm2316_vm3, %v2307_v42, %v3087_v6  ;;  %v3092_v51 = vunpack.i.h.bf16 %v3090_v47  ;;  %v3091_v34 = vunpack.i.l.bf16 %v3090_v47  ;;  %v4737_v6 = vld [vmem:[#allocation26_spill] sm:$0xff]  ;;  %v4740_v42 = vld [vmem:[#allocation27_spill] sm:$0xff] }
 0x8c7   : > { %v2544_v59 = vpack.c.bf16 %v2323_v61, %v2323_v61  ;;  %v2545_v31 = vpack.c.bf16 %v2324_v48, %v2324_v48  ;;  %v643_v50 = vmul.f32 %v3374_v37, %v4737_v6  ;;  %v642_v62 = vmul.f32 %v3372_v29, %v4739_v63 }
 0x8c8   : > { %v2321_v56 = vsel %vm2316_vm3, %v2304_v17, %v3091_v34  ;;  %v2322_v21 = vsel %vm2316_vm3, %v2305_v1, %v3092_v51  ;;  %v641_v47 = vmul.f32 %v4529_v30, %v4740_v42  ;;  %v3067_v61 = vunpack.i.h.bf16 %v4479_v8 }
 0x8c9   : > { %2404 = vst.msk [vmem:[%s4499_s28 + $0x18] sm:$0xf] %vm2397_vm4, %v2544_v59  ;;  %2405 = vst.msk [vmem:[%s4499_s28 + $0x1c] sm:$0xf] %vm2397_vm4, %v2545_v31  ;;  %v2542_v14 = vpack.c.bf16 %v2321_v56, %v2321_v56  ;;  %v2543_v32 = vpack.c.bf16 %v2322_v21, %v2322_v21  ;;  %v3066_v48 = vunpack.i.l.bf16 %v4479_v8  ;;  %v2298_v51 = vsel %vm194_vm0, %v644_v44, %v3032_v58 }
 0x8ca   : > { %v2297_v34 = vsel %vm194_vm0, %v643_v50, %v3031_v36  ;;  %v2296_v29 = vsel %vm194_vm0, %v642_v62, %v3027_v25  ;;  %v2295_v30 = vsel %vm194_vm0, %v641_v47, %v3026_v19  ;;  %v2315_v8 = vsel %vm2299_vm2, %v2298_v51, %v3072_v4 }
 0x8cb   : > { %2402 = vst.msk [vmem:[%s4499_s28 + $0x10] sm:$0xf] %vm2397_vm4, %v2542_v14  ;;  %2403 = vst.msk [vmem:[%s4499_s28 + $0x14] sm:$0xf] %vm2397_vm4, %v2543_v32  ;;  %v3095_v0 = vpop.permute.xlu1 %3094  ;;  %v2314_v1 = vsel %vm2299_vm2, %v2297_v34, %v3071_v40  ;;  %v2313_v21 = vsel %vm2299_vm2, %v2296_v29, %v3067_v61  ;;  %v2312_v57 = vsel %vm2299_vm2, %v2295_v30, %v3066_v48 }
 0x8cc   : > { %v3097_v35 = vunpack.i.h.bf16 %v3095_v0  ;;  %v3096_v43 = vunpack.i.l.bf16 %v3095_v0 }
 0x8cd   : > { %v3100_v45 = vpop.permute.xlu0 %3099 }
 0x8ce   : > { %v2327_v12 = vsel %vm2316_vm3, %v2310_v26, %v3096_v43  ;;  %v2328_v38 = vsel %vm2316_vm3, %v2311_v9, %v3097_v35  ;;  %v3102_v52 = vunpack.i.h.bf16 %v3100_v45  ;;  %v3101_v20 = vunpack.i.l.bf16 %v3100_v45 }
 0x8cf   : > { %v2548_v41 = vpack.c.bf16 %v2327_v12, %v2327_v12  ;;  %v2549_v7 = vpack.c.bf16 %v2328_v38, %v2328_v38 }
 0x8d0   : > { %v2326_v2 = vsel %vm2316_vm3, %v2309_v10, %v3102_v52  ;;  %v2325_v39 = vsel %vm2316_vm3, %v2308_v54, %v3101_v20 }
 0x8d1   : > { %2408 = vst.msk [vmem:[%s4499_s28 + $0x28] sm:$0xf] %vm2397_vm4, %v2548_v41  ;;  %2409 = vst.msk [vmem:[%s4499_s28 + $0x2c] sm:$0xf] %vm2397_vm4, %v2549_v7  ;;  %v2547_v27 = vpack.c.bf16 %v2326_v2, %v2326_v2  ;;  %v2546_v22 = vpack.c.bf16 %v2325_v39, %v2325_v39 }
 0x8d3   : > { %2407 = vst.msk [vmem:[%s4499_s28 + $0x24] sm:$0xf] %vm2397_vm4, %v2547_v27  ;;  %2406 = vst.msk [vmem:[%s4499_s28 + $0x20] sm:$0xf] %vm2397_vm4, %v2546_v22  ;;  %v3110_v46 = vpop.permute.xlu1 %3109 }
 0x8d4   : > { %v3112_v37 = vunpack.i.h.bf16 %v3110_v46  ;;  %v3111_v17 = vunpack.i.l.bf16 %v3110_v46 }
 0x8d5   : > { %v3105_v59 = vpop.permute.xlu0 %3104 }
 0x8d6   : > { %v2331_v31 = vsel %vm2316_vm3, %v2314_v1, %v3111_v17  ;;  %v2332_v13 = vsel %vm2316_vm3, %v2315_v8, %v3112_v37  ;;  %v3107_v55 = vunpack.i.h.bf16 %v3105_v59  ;;  %v3106_v56 = vunpack.i.l.bf16 %v3105_v59 }
 0x8d7   : > { %v2552_v16 = vpack.c.bf16 %v2331_v31, %v2331_v31  ;;  %v2553_v14 = vpack.c.bf16 %v2332_v13, %v2332_v13 }
 0x8d8   : > { %v2330_v32 = vsel %vm2316_vm3, %v2313_v21, %v3107_v55  ;;  %v2329_v18 = vsel %vm2316_vm3, %v2312_v57, %v3106_v56 }
 0x8d9   : > { %2412 = vst.msk [vmem:[%s4499_s28 + $0x38] sm:$0xf] %vm2397_vm4, %v2552_v16  ;;  %2413 = vst.msk [vmem:[%s4499_s28 + $0x3c] sm:$0xf] %vm2397_vm4, %v2553_v14  ;;  %v2551_v28 = vpack.c.bf16 %v2330_v32, %v2330_v32  ;;  %v2550_v5 = vpack.c.bf16 %v2329_v18, %v2329_v18 }
 0x8db   : > { %2411 = vst.msk [vmem:[%s4499_s28 + $0x34] sm:$0xf] %vm2397_vm4, %v2551_v28  ;;  %2410 = vst.msk [vmem:[%s4499_s28 + $0x30] sm:$0xf] %vm2397_vm4, %v2550_v5 }
 0x8dc PF: > { %s11_s6 = sadd.s32 1, %s3391_s6  }
 0x8dd   : > { %p8_p4 = scmp.ge.s32.totalorder %s11_s6, 4  }
 0x8df   :  { %10 = sbr.rel (!%p8_p4) target bundleno = 1 (0x1), region = 54 }

// kernel: vit_forward_intermediates.16
= control target key start
LH: loop header
LB: loop body
LE: loop exit
PB: predicated region body
PF: predicated region fallthrough
CT: control target
= control target key end

     0   :  { %vm85_vm0 = vcmask 261120   ;;  %s3698_s0 = inlined_call_operand.vmem [shape: bf16[256,32], index: 0, kind: input, shape index: {}]   ;;  %s3699_s1 = inlined_call_operand.vmem [shape: bf16[32,128], index: 1, kind: input, shape index: {}]   ;;  %s3700_s3 = inlined_call_operand.vmem [shape: f32[1,32], index: 3, kind: input, shape index: {}]   ;;  %s3701_s4 = inlined_call_operand.vmem [shape: f32[1,32], index: 4, kind: input, shape index: {}]   ;;  %s3702_s2 = inlined_call_operand.vmem [shape: f32[1,128], index: 2, kind: input, shape index: {}]   ;;  %s3703_s5 = inlined_call_operand.vmem [shape: bf16[256,128], index: 5, kind: output, shape index: {}]  }
   0x1   :  { %v2466_v0 = vld [vmem:[%s3698_s0] sm:$0xff]   ;;  %v2480_v6 = vld [vmem:[%s3698_s0 + $0x8] sm:$0xff]   ;;  %v2512_v18 = vld [vmem:[%s3698_s0 + $0x10] sm:$0xff]  }
   0x2   :  { %v2471_v1 = vld [vmem:[%s3698_s0 + $0x40] sm:$0xff]   ;;  %v2008_v2 = vunpack.c.l.bf16 %v2466_v0  ;;  %v2009_v4 = vunpack.c.h.bf16 %v2466_v0  ;;  %v2012_v11 = vunpack.c.l.bf16 %v2480_v6  ;;  %v2013_v12 = vunpack.c.h.bf16 %v2480_v6  ;;  %v2499_v13 = vld [vmem:[%s3698_s0 + $0x48] sm:$0xff]   ;;  %v2525_v23 = vld [vmem:[%s3698_s0 + $0x50] sm:$0xff]  }
   0x3   :  { %v2040_v3 = vunpack.c.l.bf16 %v2471_v1  ;;  %v2041_v5 = vunpack.c.h.bf16 %v2471_v1  ;;  %v2044_v16 = vunpack.c.l.bf16 %v2499_v13  ;;  %v2045_v17 = vunpack.c.h.bf16 %v2499_v13  ;;  %v2538_v28 = vld [vmem:[%s3698_s0 + $0x18] sm:$0xff]   ;;  %v2564_v38 = vld [vmem:[%s3698_s0 + $0x20] sm:$0xff]   ;;  %v2590_v48 = vld [vmem:[%s3698_s0 + $0x28] sm:$0xff]  }
   0x4   :  { %v86_v7 = vsel %vm85_vm0, %v2008_v2, 0.0  ;;  %v89_v9 = vsel %vm85_vm0, %v2009_v4, 0.0  ;;  %v92_v14 = vsel %vm85_vm0, %v2012_v11, 0.0  ;;  %v95_v15 = vsel %vm85_vm0, %v2013_v12, 0.0  ;;  %v2551_v33 = vld [vmem:[%s3698_s0 + $0x58] sm:$0xff]   ;;  %v2577_v43 = vld [vmem:[%s3698_s0 + $0x60] sm:$0xff]  }
   0x5   :  { %v134_v8 = vsel %vm85_vm0, %v2040_v3, 0.0  ;;  %87 = vadd.xlane.f32.xlu0 %v86_v7  ;;  %v137_v10 = vsel %vm85_vm0, %v2041_v5, 0.0  ;;  %v140_v19 = vsel %vm85_vm0, %v2044_v16, 0.0  ;;  %v143_v20 = vsel %vm85_vm0, %v2045_v17, 0.0  ;;  %v2603_v53 = vld [vmem:[%s3698_s0 + $0x68] sm:$0xff]   ;;  %v2616_v58 = vld [vmem:[%s3698_s0 + $0x30] sm:$0xff]  }
   0x6   :  { %135 = vadd.xlane.f32.xlu1 %v134_v8  ;;  %v2016_v21 = vunpack.c.l.bf16 %v2512_v18  ;;  %v2017_v22 = vunpack.c.h.bf16 %v2512_v18  ;;  %v2048_v26 = vunpack.c.l.bf16 %v2525_v23  ;;  %v2049_v27 = vunpack.c.h.bf16 %v2525_v23  ;;  %v2629_v63 = vld [vmem:[%s3698_s0 + $0x70] sm:$0xff]  }
   0x7   :  { %v2020_v31 = vunpack.c.l.bf16 %v2538_v28  ;;  %v2021_v32 = vunpack.c.h.bf16 %v2538_v28  ;;  %v2052_v36 = vunpack.c.l.bf16 %v2551_v33  ;;  %v2053_v37 = vunpack.c.h.bf16 %v2551_v33 }
   0x8   :  { %v98_v24 = vsel %vm85_vm0, %v2016_v21, 0.0  ;;  %v101_v25 = vsel %vm85_vm0, %v2017_v22, 0.0  ;;  %v146_v29 = vsel %vm85_vm0, %v2048_v26, 0.0  ;;  %v149_v30 = vsel %vm85_vm0, %v2049_v27, 0.0 }
   0x9   :  { %90 = vadd.xlane.f32.xlu0 %v89_v9  ;;  %v104_v34 = vsel %vm85_vm0, %v2020_v31, 0.0  ;;  %v107_v35 = vsel %vm85_vm0, %v2021_v32, 0.0  ;;  %v152_v39 = vsel %vm85_vm0, %v2052_v36, 0.0  ;;  %v155_v40 = vsel %vm85_vm0, %v2053_v37, 0.0 }
   0xa   :  { %138 = vadd.xlane.f32.xlu1 %v137_v10  ;;  %v2024_v41 = vunpack.c.l.bf16 %v2564_v38  ;;  %v2025_v42 = vunpack.c.h.bf16 %v2564_v38  ;;  %v2056_v46 = vunpack.c.l.bf16 %v2577_v43  ;;  %v2057_v47 = vunpack.c.h.bf16 %v2577_v43 }
   0xb   :  { %v2028_v51 = vunpack.c.l.bf16 %v2590_v48  ;;  %v2029_v52 = vunpack.c.h.bf16 %v2590_v48  ;;  %v2060_v56 = vunpack.c.l.bf16 %v2603_v53  ;;  %v2061_v57 = vunpack.c.h.bf16 %v2603_v53 }
   0xc   :  { %v110_v44 = vsel %vm85_vm0, %v2024_v41, 0.0  ;;  %v113_v45 = vsel %vm85_vm0, %v2025_v42, 0.0  ;;  %v158_v49 = vsel %vm85_vm0, %v2056_v46, 0.0  ;;  %v161_v50 = vsel %vm85_vm0, %v2057_v47, 0.0 }
   0xd   :  { %93 = vadd.xlane.f32.xlu0 %v92_v14  ;;  %v116_v54 = vsel %vm85_vm0, %v2028_v51, 0.0  ;;  %v119_v55 = vsel %vm85_vm0, %v2029_v52, 0.0  ;;  %v164_v59 = vsel %vm85_vm0, %v2060_v56, 0.0  ;;  %v167_v60 = vsel %vm85_vm0, %v2061_v57, 0.0  ;;  %v2642_v14 = vld [vmem:[%s3698_s0 + $0x38] sm:$0xff]  }
   0xe   :  { %96 = vadd.xlane.f32.xlu1 %v95_v15  ;;  %v2032_v61 = vunpack.c.l.bf16 %v2616_v58  ;;  %v2033_v62 = vunpack.c.h.bf16 %v2616_v58  ;;  %v2064_v9 = vunpack.c.l.bf16 %v2629_v63  ;;  %v2065_v10 = vunpack.c.h.bf16 %v2629_v63 }
  0x10   :  { %v122_v7 = vsel %vm85_vm0, %v2032_v61, 0.0  ;;  %v125_v8 = vsel %vm85_vm0, %v2033_v62, 0.0  ;;  %v170_v15 = vsel %vm85_vm0, %v2064_v9, 0.0 }
  0x11   :  { %141 = vadd.xlane.f32.xlu0 %v140_v19  ;;  %v173_v19 = vsel %vm85_vm0, %v2065_v10, 0.0 }
  0x12   :  { %144 = vadd.xlane.f32.xlu1 %v143_v20  ;;  %v2036_v20 = vunpack.c.l.bf16 %v2642_v14 }
  0x15   :  { %99 = vadd.xlane.f32.xlu0 %v98_v24  ;;  %v2037_v24 = vunpack.c.h.bf16 %v2642_v14 }
  0x16   :  { %102 = vadd.xlane.f32.xlu1 %v101_v25  ;;  %v2655_v25 = vld [vmem:[%s3698_s0 + $0x78] sm:$0xff]  }
  0x19   :  { %147 = vadd.xlane.f32.xlu0 %v146_v29  ;;  %v128_v29 = vsel %vm85_vm0, %v2036_v20, 0.0 }
  0x1a   :  { %150 = vadd.xlane.f32.xlu1 %v149_v30  ;;  %v131_v30 = vsel %vm85_vm0, %v2037_v24, 0.0 }
  0x1d   :  { %105 = vadd.xlane.f32.xlu0 %v104_v34  ;;  %v2068_v34 = vunpack.c.l.bf16 %v2655_v25 }
  0x1e   :  { %108 = vadd.xlane.f32.xlu1 %v107_v35  ;;  %v2069_v35 = vunpack.c.h.bf16 %v2655_v25 }
  0x21   :  { %153 = vadd.xlane.f32.xlu0 %v152_v39  ;;  %v176_v39 = vsel %vm85_vm0, %v2068_v34, 0.0 }
  0x22   :  { %156 = vadd.xlane.f32.xlu1 %v155_v40  ;;  %v179_v40 = vsel %vm85_vm0, %v2069_v35, 0.0 }
  0x25   :  { %111 = vadd.xlane.f32.xlu0 %v110_v44 }
  0x26   :  { %114 = vadd.xlane.f32.xlu1 %v113_v45 }
  0x29   :  { %159 = vadd.xlane.f32.xlu0 %v158_v49 }
  0x2a   :  { %162 = vadd.xlane.f32.xlu1 %v161_v50 }
  0x2d   :  { %117 = vadd.xlane.f32.xlu0 %v116_v54 }
  0x2e   :  { %120 = vadd.xlane.f32.xlu1 %v119_v55 }
  0x31   :  { %165 = vadd.xlane.f32.xlu0 %v164_v59 }
  0x32   :  { %168 = vadd.xlane.f32.xlu1 %v167_v60 }
  0x35   :  { %123 = vadd.xlane.f32.xlu0 %v122_v7 }
  0x36   :  { %126 = vadd.xlane.f32.xlu1 %v125_v8 }
  0x39   :  { %171 = vadd.xlane.f32.xlu0 %v170_v15 }
  0x3a   :  { %174 = vadd.xlane.f32.xlu1 %v173_v19 }
  0x3d   :  { %129 = vadd.xlane.f32.xlu0 %v128_v29 }
  0x3e   :  { %132 = vadd.xlane.f32.xlu1 %v131_v30 }
  0x41   :  { %177 = vadd.xlane.f32.xlu0 %v176_v39 }
  0x42   :  { %180 = vadd.xlane.f32.xlu1 %v179_v40 }
  0x8e   :  { %v88_v44 = vpop.xlane.xlu0 %87 }
  0x8f   :  { %v136_v45 = vpop.xlane.xlu1 %135  ;;  %v183_v49 = vmul.f32 0.03125, %v88_v44 }
  0x90   :  { %v199_v50 = vmul.f32 0.03125, %v136_v45 }
  0x91   :  { %v2673_v54 = vsub.f32 %v2008_v2, %v183_v49 }
  0x92   :  { %v2677_v55 = vsub.f32 %v2040_v3, %v199_v50  ;;  %v91_v59 = vpop.xlane.xlu0 %90 }
  0x93   :  { %v139_v60 = vpop.xlane.xlu1 %138  ;;  %v184_v7 = vmul.f32 0.03125, %v91_v59  ;;  %v247_v15 = vmul.f32 %v2673_v54, %v2673_v54 }
  0x94   :  { %v200_v8 = vmul.f32 0.03125, %v139_v60  ;;  %v263_v19 = vmul.f32 %v2677_v55, %v2677_v55 }
  0x95   :  { %v2685_v29 = vsub.f32 %v2009_v4, %v184_v7  ;;  %v279_v3 = vsel %vm85_vm0, %v247_v15, 0.0 }
  0x96   :  { %v2689_v2 = vsub.f32 %v2041_v5, %v200_v8  ;;  %280 = vadd.xlane.f32.xlu0 %v279_v3  ;;  %v94_v30 = vpop.xlane.xlu0 %93  ;;  %v327_v40 = vsel %vm85_vm0, %v263_v19, 0.0 }
  0x97   :  { %v97_v39 = vpop.xlane.xlu1 %96  ;;  %v185_v44 = vmul.f32 0.03125, %v94_v30  ;;  %v248_v49 = vmul.f32 %v2685_v29, %v2685_v29 }
  0x98   :  { %v186_v45 = vmul.f32 0.03125, %v97_v39  ;;  %v264_v0 = vmul.f32 %v2689_v2, %v2689_v2 }
  0x99   :  { %v2699_v1 = vsub.f32 %v2012_v11, %v185_v44  ;;  %v282_v5 = vsel %vm85_vm0, %v248_v49, 0.0 }
  0x9a   :  { %v2703_v4 = vsub.f32 %v2013_v12, %v186_v45  ;;  %328 = vadd.xlane.f32.xlu0 %v327_v40  ;;  %283 = vadd.xlane.f32.xlu1 %v282_v5  ;;  %v142_v50 = vpop.xlane.xlu0 %141  ;;  %v330_v60 = vsel %vm85_vm0, %v264_v0, 0.0 }
  0x9b   :  { %v145_v59 = vpop.xlane.xlu1 %144  ;;  %v201_v7 = vmul.f32 0.03125, %v142_v50  ;;  %v249_v15 = vmul.f32 %v2699_v1, %v2699_v1 }
  0x9c   :  { %v202_v8 = vmul.f32 0.03125, %v145_v59  ;;  %v250_v11 = vmul.f32 %v2703_v4, %v2703_v4 }
  0x9d   :  { %v2713_v6 = vsub.f32 %v2044_v16, %v201_v7  ;;  %v285_v19 = vsel %vm85_vm0, %v249_v15, 0.0 }
  0x9e   :  { %v2717_v12 = vsub.f32 %v2045_v17, %v202_v8  ;;  %331 = vadd.xlane.f32.xlu1 %v330_v60  ;;  %286 = vadd.xlane.f32.xlu0 %v285_v19  ;;  %v100_v3 = vpop.xlane.xlu0 %99  ;;  %v288_v39 = vsel %vm85_vm0, %v250_v11, 0.0 }
  0x9f   :  { %v103_v30 = vpop.xlane.xlu1 %102  ;;  %v187_v40 = vmul.f32 0.03125, %v100_v3  ;;  %v265_v45 = vmul.f32 %v2713_v6, %v2713_v6 }
  0xa0   :  { %v188_v44 = vmul.f32 0.03125, %v103_v30  ;;  %v266_v16 = vmul.f32 %v2717_v12, %v2717_v12 }
  0xa1   :  { %v2727_v13 = vsub.f32 %v2016_v21, %v187_v40  ;;  %v333_v49 = vsel %vm85_vm0, %v265_v45, 0.0 }
  0xa2   :  { %v2731_v17 = vsub.f32 %v2017_v22, %v188_v44  ;;  %289 = vadd.xlane.f32.xlu1 %v288_v39  ;;  %334 = vadd.xlane.f32.xlu0 %v333_v49  ;;  %v148_v0 = vpop.xlane.xlu0 %147  ;;  %v336_v50 = vsel %vm85_vm0, %v266_v16, 0.0 }
  0xa3   :  { %v151_v5 = vpop.xlane.xlu1 %150  ;;  %v203_v59 = vmul.f32 0.03125, %v148_v0  ;;  %v251_v7 = vmul.f32 %v2727_v13, %v2727_v13 }
  0xa4   :  { %v204_v60 = vmul.f32 0.03125, %v151_v5  ;;  %v252_v21 = vmul.f32 %v2731_v17, %v2731_v17 }
  0xa5   :  { %v2741_v18 = vsub.f32 %v2048_v26, %v203_v59  ;;  %v291_v8 = vsel %vm85_vm0, %v251_v7, 0.0 }
  0xa6   :  { %v2745_v22 = vsub.f32 %v2049_v27, %v204_v60  ;;  %337 = vadd.xlane.f32.xlu1 %v336_v50  ;;  %292 = vadd.xlane.f32.xlu0 %v291_v8  ;;  %v106_v15 = vpop.xlane.xlu0 %105  ;;  %v294_v19 = vsel %vm85_vm0, %v252_v21, 0.0 }
  0xa7   :  { %v109_v11 = vpop.xlane.xlu1 %108  ;;  %v189_v3 = vmul.f32 0.03125, %v106_v15  ;;  %v267_v39 = vmul.f32 %v2741_v18, %v2741_v18 }
  0xa8   :  { %v190_v30 = vmul.f32 0.03125, %v109_v11  ;;  %v268_v26 = vmul.f32 %v2745_v22, %v2745_v22 }
  0xa9   :  { %v2755_v23 = vsub.f32 %v2020_v31, %v189_v3  ;;  %v339_v40 = vsel %vm85_vm0, %v267_v39, 0.0 }
  0xaa   :  { %v2759_v27 = vsub.f32 %v2021_v32, %v190_v30  ;;  %295 = vadd.xlane.f32.xlu1 %v294_v19  ;;  %340 = vadd.xlane.f32.xlu0 %v339_v40  ;;  %v154_v44 = vpop.xlane.xlu0 %153  ;;  %v342_v16 = vsel %vm85_vm0, %v268_v26, 0.0 }
  0xab   :  { %v157_v45 = vpop.xlane.xlu1 %156  ;;  %v205_v49 = vmul.f32 0.03125, %v154_v44  ;;  %v253_v5 = vmul.f32 %v2755_v23, %v2755_v23 }
  0xac   :  { %v206_v0 = vmul.f32 0.03125, %v157_v45  ;;  %v254_v31 = vmul.f32 %v2759_v27, %v2759_v27 }
  0xad   :  { %v2769_v28 = vsub.f32 %v2052_v36, %v205_v49  ;;  %v297_v50 = vsel %vm85_vm0, %v253_v5, 0.0 }
  0xae   :  { %v2773_v32 = vsub.f32 %v2053_v37, %v206_v0  ;;  %343 = vadd.xlane.f32.xlu1 %v342_v16  ;;  %298 = vadd.xlane.f32.xlu0 %v297_v50  ;;  %v112_v59 = vpop.xlane.xlu0 %111  ;;  %v300_v7 = vsel %vm85_vm0, %v254_v31, 0.0 }
  0xaf   :  { %v115_v60 = vpop.xlane.xlu1 %114  ;;  %v191_v21 = vmul.f32 0.03125, %v112_v59  ;;  %v269_v15 = vmul.f32 %v2769_v28, %v2769_v28 }
  0xb0   :  { %v192_v8 = vmul.f32 0.03125, %v115_v60  ;;  %v270_v36 = vmul.f32 %v2773_v32, %v2773_v32 }
  0xb1   :  { %v2783_v33 = vsub.f32 %v2024_v41, %v191_v21  ;;  %v345_v11 = vsel %vm85_vm0, %v269_v15, 0.0 }
  0xb2   :  { %v2787_v37 = vsub.f32 %v2025_v42, %v192_v8  ;;  %301 = vadd.xlane.f32.xlu1 %v300_v7  ;;  %346 = vadd.xlane.f32.xlu0 %v345_v11  ;;  %v160_v19 = vpop.xlane.xlu0 %159  ;;  %v348_v30 = vsel %vm85_vm0, %v270_v36, 0.0 }
  0xb3   :  { %v163_v3 = vpop.xlane.xlu1 %162  ;;  %v207_v39 = vmul.f32 0.03125, %v160_v19  ;;  %v255_v40 = vmul.f32 %v2783_v33, %v2783_v33 }
  0xb4   :  { %v208_v26 = vmul.f32 0.03125, %v163_v3  ;;  %v256_v41 = vmul.f32 %v2787_v37, %v2787_v37 }
  0xb5   :  { %v2797_v38 = vsub.f32 %v2056_v46, %v207_v39  ;;  %v303_v44 = vsel %vm85_vm0, %v255_v40, 0.0 }
  0xb6   :  { %v2801_v42 = vsub.f32 %v2057_v47, %v208_v26  ;;  %349 = vadd.xlane.f32.xlu1 %v348_v30  ;;  %304 = vadd.xlane.f32.xlu0 %v303_v44  ;;  %v118_v45 = vpop.xlane.xlu0 %117  ;;  %v306_v49 = vsel %vm85_vm0, %v256_v41, 0.0  ;;  %v2238_v30 = vld [vmem:[%s3699_s1 + $0x8] sm:$0xff]   ;;  %v2239_v44 = vld [vmem:[%s3699_s1] sm:$0xff]  }
  0xb7   :  { %v121_v16 = vpop.xlane.xlu1 %120  ;;  %v193_v0 = vmul.f32 0.03125, %v118_v45  ;;  %v271_v31 = vmul.f32 %v2797_v38, %v2797_v38  ;;  %2198 = vmatprep.subr.bf16.mxu0 %v2238_v30  ;;  %2234 = vmatprep.subr.bf16.mxu1 %v2238_v30 }
  0xb8   :  { %v194_v5 = vmul.f32 0.03125, %v121_v16  ;;  %v272_v46 = vmul.f32 %v2801_v42, %v2801_v42  ;;  %2199 = vmatpush3.bf16.msra.mxu0 %v2238_v30  ;;  %2236 = vmatpush3.bf16.msra.mxu1 %v2238_v30 }
  0xb9   :  { %v2811_v43 = vsub.f32 %v2028_v51, %v193_v0  ;;  %v351_v50 = vsel %vm85_vm0, %v271_v31, 0.0  ;;  %2200 = vmatprep.subr.bf16.mxu0 %v2239_v44  ;;  %2235 = vmatprep.subr.bf16.mxu1 %v2239_v44 }
  0xba   :  { %v2815_v47 = vsub.f32 %v2029_v52, %v194_v5  ;;  %307 = vadd.xlane.f32.xlu1 %v306_v49  ;;  %352 = vadd.xlane.f32.xlu0 %v351_v50  ;;  %v166_v59 = vpop.xlane.xlu0 %165  ;;  %v354_v7 = vsel %vm85_vm0, %v272_v46, 0.0 }
  0xbb   :  { %v169_v60 = vpop.xlane.xlu1 %168  ;;  %v209_v21 = vmul.f32 0.03125, %v166_v59  ;;  %v257_v15 = vmul.f32 %v2811_v43, %v2811_v43 }
  0xbc   :  { %v210_v8 = vmul.f32 0.03125, %v169_v60  ;;  %v258_v51 = vmul.f32 %v2815_v47, %v2815_v47  ;;  %2201 = vmatpush3.bf16.msra.mxu0 %v2239_v44  ;;  %2237 = vmatpush3.bf16.msra.mxu1 %v2239_v44 }
  0xbd   :  { %v2825_v48 = vsub.f32 %v2060_v56, %v209_v21  ;;  %v309_v36 = vsel %vm85_vm0, %v257_v15, 0.0 }
  0xbe   :  { %v2829_v52 = vsub.f32 %v2061_v57, %v210_v8  ;;  %355 = vadd.xlane.f32.xlu1 %v354_v7  ;;  %310 = vadd.xlane.f32.xlu0 %v309_v36  ;;  %v124_v11 = vpop.xlane.xlu0 %123  ;;  %v312_v3 = vsel %vm85_vm0, %v258_v51, 0.0 }
  0xbf   :  { %v127_v19 = vpop.xlane.xlu1 %126  ;;  %v195_v39 = vmul.f32 0.03125, %v124_v11  ;;  %v273_v56 = vmul.f32 %v2825_v48, %v2825_v48 }
  0xc0   :  { %v196_v26 = vmul.f32 0.03125, %v127_v19  ;;  %v274_v53 = vmul.f32 %v2829_v52, %v2829_v52 }
  0xc1   :  { %v2842_v57 = vsub.f32 %v2032_v61, %v195_v39  ;;  %v357_v41 = vsel %vm85_vm0, %v273_v56, 0.0 }
  0xc2   :  { %v2846_v40 = vsub.f32 %v2033_v62, %v196_v26  ;;  %313 = vadd.xlane.f32.xlu1 %v312_v3  ;;  %358 = vadd.xlane.f32.xlu0 %v357_v41  ;;  %v172_v45 = vpop.xlane.xlu0 %171  ;;  %v360_v49 = vsel %vm85_vm0, %v274_v53, 0.0 }
  0xc3   :  { %v175_v16 = vpop.xlane.xlu1 %174  ;;  %v211_v61 = vmul.f32 0.03125, %v172_v45  ;;  %v259_v58 = vmul.f32 %v2842_v57, %v2842_v57 }
  0xc4   :  { %v212_v0 = vmul.f32 0.03125, %v175_v16  ;;  %v260_v62 = vmul.f32 %v2846_v40, %v2846_v40 }
  0xc5   :  { %v2859_v5 = vsub.f32 %v2064_v9, %v211_v61  ;;  %v315_v46 = vsel %vm85_vm0, %v259_v58, 0.0 }
  0xc6   :  { %v2863_v31 = vsub.f32 %v2065_v10, %v212_v0  ;;  %361 = vadd.xlane.f32.xlu1 %v360_v49  ;;  %316 = vadd.xlane.f32.xlu0 %v315_v46  ;;  %v130_v50 = vpop.xlane.xlu0 %129  ;;  %v318_v60 = vsel %vm85_vm0, %v260_v62, 0.0 }
  0xc7   :  { %v133_v59 = vpop.xlane.xlu1 %132  ;;  %v197_v7 = vmul.f32 0.03125, %v130_v50  ;;  %v275_v9 = vmul.f32 %v2859_v5, %v2859_v5 }
  0xc8   :  { %v198_v21 = vmul.f32 0.03125, %v133_v59  ;;  %v276_v63 = vmul.f32 %v2863_v31, %v2863_v31 }
  0xc9   :  { %v2873_v10 = vsub.f32 %v2036_v20, %v197_v7  ;;  %v363_v15 = vsel %vm85_vm0, %v275_v9, 0.0 }
  0xca   :  { %v2877_v8 = vsub.f32 %v2037_v24, %v198_v21  ;;  %319 = vadd.xlane.f32.xlu1 %v318_v60  ;;  %364 = vadd.xlane.f32.xlu0 %v363_v15  ;;  %v178_v51 = vpop.xlane.xlu0 %177  ;;  %v366_v11 = vsel %vm85_vm0, %v276_v63, 0.0 }
  0xcb   :  { %v181_v36 = vpop.xlane.xlu1 %180  ;;  %v213_v19 = vmul.f32 0.03125, %v178_v51  ;;  %v261_v30 = vmul.f32 %v2873_v10, %v2873_v10 }
  0xcc   :  { %v214_v3 = vmul.f32 0.03125, %v181_v36  ;;  %v262_v20 = vmul.f32 %v2877_v8, %v2877_v8 }
  0xcd   :  { %v2887_v14 = vsub.f32 %v2068_v34, %v213_v19  ;;  %v321_v39 = vsel %vm85_vm0, %v261_v30, 0.0 }
  0xce   :  { %v2891_v24 = vsub.f32 %v2069_v35, %v214_v3  ;;  %367 = vadd.xlane.f32.xlu1 %v366_v11  ;;  %322 = vadd.xlane.f32.xlu0 %v321_v39  ;;  %v324_v26 = vsel %vm85_vm0, %v262_v20, 0.0 }
  0xcf   :  { %v277_v56 = vmul.f32 %v2887_v14, %v2887_v14 }
  0xd0   :  { %v278_v53 = vmul.f32 %v2891_v24, %v2891_v24 }
  0xd1   :  { %v369_v41 = vsel %vm85_vm0, %v277_v56, 0.0 }
  0xd2   :  { %325 = vadd.xlane.f32.xlu1 %v324_v26  ;;  %370 = vadd.xlane.f32.xlu0 %v369_v41  ;;  %v372_v25 = vsel %vm85_vm0, %v278_v53, 0.0  ;;  %v2905_v53 = vld [vmem:[%s3700_s3] ss:$0 sm:$0xff] }
  0xd6   :  { %373 = vadd.xlane.f32.xlu1 %v372_v25 }
 0x11f   :  { %v281_v34 = vpop.xlane.xlu0 %280 }
 0x120   :  { %v375_v35 = vmul.f32 0.03125, %v281_v34 }
 0x122   :  { %v407_v44 = vadd.f32 1e-06, %v375_v35 }
 0x123   :  { %v284_v45 = vpop.xlane.xlu1 %283  ;;  %v329_v16 = vpop.xlane.xlu0 %328 }
 0x124   :  { %2240 = vrsqrt.f32 %v407_v44  ;;  %v376_v49 = vmul.f32 0.03125, %v284_v45  ;;  %v391_v61 = vmul.f32 0.03125, %v329_v16 }
 0x126   :  { %v408_v0 = vadd.f32 1e-06, %v376_v49  ;;  %v423_v58 = vadd.f32 1e-06, %v391_v61 }
 0x127   :  { %v332_v62 = vpop.xlane.xlu1 %331  ;;  %v287_v46 = vpop.xlane.xlu0 %286 }
 0x128   :  { %2242 = vrsqrt.f32 %v408_v0  ;;  %v392_v50 = vmul.f32 0.03125, %v332_v62  ;;  %v377_v59 = vmul.f32 0.03125, %v287_v46 }
 0x129   :  { %2244 = vrsqrt.f32 %v423_v58 }
 0x12a   :  { %v424_v60 = vadd.f32 1e-06, %v392_v50  ;;  %v409_v7 = vadd.f32 1e-06, %v377_v59 }
 0x12b   :  { %v290_v21 = vpop.xlane.xlu1 %289  ;;  %v335_v9 = vpop.xlane.xlu0 %334 }
 0x12c   :  { %2246 = vrsqrt.f32 %v424_v60  ;;  %v378_v63 = vmul.f32 0.03125, %v290_v21  ;;  %v393_v15 = vmul.f32 0.03125, %v335_v9 }
 0x12d   :  { %2248 = vrsqrt.f32 %v409_v7 }
 0x12e   :  { %v410_v51 = vadd.f32 1e-06, %v378_v63  ;;  %v425_v36 = vadd.f32 1e-06, %v393_v15 }
 0x12f   :  { %v338_v11 = vpop.xlane.xlu1 %337  ;;  %v293_v19 = vpop.xlane.xlu0 %292 }
 0x130   :  { %2250 = vrsqrt.f32 %v410_v51  ;;  %v394_v3 = vmul.f32 0.03125, %v338_v11  ;;  %v379_v30 = vmul.f32 0.03125, %v293_v19 }
 0x131   :  { %v2241_v20 = vpop.eup %2240  ;;  %2252 = vrsqrt.f32 %v425_v36 }
 0x132   :  { %v426_v39 = vadd.f32 1e-06, %v394_v3  ;;  %v411_v26 = vadd.f32 1e-06, %v379_v30  ;;  %v471_v56 = vmul.f32 %v2241_v20, %v2673_v54  ;;  %v2912_v54 = vld [vmem:[%s3701_s4] ss:$0 sm:$0xff] }
 0x133   :  { %v296_v41 = vpop.xlane.xlu1 %295  ;;  %v341_v25 = vpop.xlane.xlu0 %340 }
 0x134   :  { %2254 = vrsqrt.f32 %v426_v39  ;;  %v380_v34 = vmul.f32 0.03125, %v296_v41  ;;  %v395_v35 = vmul.f32 0.03125, %v341_v25  ;;  %v510_v45 = vmul.f32 %v2905_v53, %v471_v56 }
 0x135   :  { %v2243_v44 = vpop.eup %2242  ;;  %2256 = vrsqrt.f32 %v411_v26 }
 0x136   :  { %v2245_v16 = vpop.eup %2244  ;;  %v412_v49 = vadd.f32 1e-06, %v380_v34  ;;  %v427_v61 = vadd.f32 1e-06, %v395_v35  ;;  %v472_v0 = vmul.f32 %v2243_v44, %v2685_v29  ;;  %v549_v21 = vadd.f32 %v2912_v54, %v510_v45 }
 0x137   :  { %v344_v58 = vpop.xlane.xlu1 %343  ;;  %v299_v62 = vpop.xlane.xlu0 %298  ;;  %v487_v46 = vmul.f32 %v2245_v16, %v2677_v55 }
 0x138   :  { %2258 = vrsqrt.f32 %v412_v49  ;;  %v396_v50 = vmul.f32 0.03125, %v344_v58  ;;  %v381_v59 = vmul.f32 0.03125, %v299_v62  ;;  %v511_v60 = vmul.f32 %v2905_v53, %v472_v0 }
 0x139   :  { %v2247_v7 = vpop.eup %2246  ;;  %2260 = vrsqrt.f32 %v427_v61  ;;  %v526_v55 = vmul.f32 %v2905_v53, %v487_v46 }
 0x13a   :  { %v2249_v9 = vpop.eup %2248  ;;  %v428_v29 = vadd.f32 1e-06, %v396_v50  ;;  %v413_v63 = vadd.f32 1e-06, %v381_v59  ;;  %v550_v15 = vadd.f32 %v2912_v54, %v511_v60  ;;  %v488_v51 = vmul.f32 %v2247_v7, %v2689_v2 }
 0x13b   :  { %v302_v36 = vpop.xlane.xlu1 %301  ;;  %v347_v11 = vpop.xlane.xlu0 %346  ;;  %v473_v19 = vmul.f32 %v2249_v9, %v2699_v1  ;;  %v565_v1 = vadd.f32 %v2912_v54, %v526_v55 }
 0x13c   :  { %2262 = vrsqrt.f32 %v428_v29  ;;  %v382_v3 = vmul.f32 0.03125, %v302_v36  ;;  %v397_v30 = vmul.f32 0.03125, %v347_v11  ;;  %v581_v20 = vpack.c.bf16 %v550_v15, %v549_v21 }
 0x13d   :  { %v2251_v39 = vpop.eup %2250  ;;  %2264 = vrsqrt.f32 %v413_v63  ;;  %v527_v26 = vmul.f32 %v2905_v53, %v488_v51  ;;  %v512_v56 = vmul.f32 %v2905_v53, %v473_v19 }
 0x13e   :  { %v2253_v41 = vpop.eup %2252  ;;  %v414_v25 = vadd.f32 1e-06, %v382_v3  ;;  %v429_v34 = vadd.f32 1e-06, %v397_v30  ;;  %2202 = vmatprep.mubr.msk.bf16.mxu0 %vm85_vm0, %v581_v20  ;;  %v474_v2 = vmul.f32 %v2251_v39, %v2703_v4 }
 0x13f   :  { %v350_v35 = vpop.xlane.xlu1 %349  ;;  %v305_v44 = vpop.xlane.xlu0 %304  ;;  %v566_v45 = vadd.f32 %v2912_v54, %v527_v26  ;;  %v489_v16 = vmul.f32 %v2253_v41, %v2713_v6  ;;  %v551_v46 = vadd.f32 %v2912_v54, %v512_v56 }
 0x140   :  { %2266 = vrsqrt.f32 %v414_v25  ;;  %v398_v49 = vmul.f32 0.03125, %v350_v35  ;;  %v383_v61 = vmul.f32 0.03125, %v305_v44  ;;  %v513_v0 = vmul.f32 %v2905_v53, %v474_v2 }
 0x141   :  { %v2255_v58 = vpop.eup %2254  ;;  %2268 = vrsqrt.f32 %v429_v34  ;;  %v589_v62 = vpack.c.bf16 %v566_v45, %v565_v1  ;;  %v528_v9 = vmul.f32 %v2905_v53, %v489_v16 }
 0x142   :  { %v2257_v50 = vpop.eup %2256  ;;  %v430_v4 = vadd.f32 1e-06, %v398_v49  ;;  %v415_v59 = vadd.f32 1e-06, %v383_v61  ;;  %v552_v60 = vadd.f32 %v2912_v54, %v513_v0  ;;  %v490_v7 = vmul.f32 %v2255_v58, %v2717_v12 }
 0x143   :  { %2218 = vmatprep.mubr.msk.bf16.mxu1 %vm85_vm0, %v589_v62  ;;  %v308_v6 = vpop.xlane.xlu1 %307  ;;  %v353_v21 = vpop.xlane.xlu0 %352  ;;  %v475_v29 = vmul.f32 %v2257_v50, %v2727_v13  ;;  %v567_v13 = vadd.f32 %v2912_v54, %v528_v9 }
 0x144   :  { %2270 = vrsqrt.f32 %v430_v4  ;;  %v384_v63 = vmul.f32 0.03125, %v308_v6  ;;  %v399_v15 = vmul.f32 0.03125, %v353_v21  ;;  %v582_v51 = vpack.c.bf16 %v552_v60, %v551_v46 }
 0x145   :  { %v2259_v36 = vpop.eup %2258  ;;  %2272 = vrsqrt.f32 %v415_v59  ;;  %v529_v11 = vmul.f32 %v2905_v53, %v490_v7  ;;  %v514_v55 = vmul.f32 %v2905_v53, %v475_v29 }
 0x146   :  { %v2261_v19 = vpop.eup %2260  ;;  %v416_v12 = vadd.f32 1e-06, %v384_v63  ;;  %v431_v3 = vadd.f32 1e-06, %v399_v15  ;;  %2203 = vmatmul.mubr.msk.bf16.vlgmr.msra.gmra.mxu0 %vm85_vm0, %v582_v51  ;;  %v476_v30 = vmul.f32 %v2259_v36, %v2731_v17 }
 0x147   :  { %v356_v20 = vpop.xlane.xlu1 %355  ;;  %v311_v39 = vpop.xlane.xlu0 %310  ;;  %v568_v26 = vadd.f32 %v2912_v54, %v529_v11  ;;  %v491_v56 = vmul.f32 %v2261_v19, %v2741_v18  ;;  %v553_v44 = vadd.f32 %v2912_v54, %v514_v55 }
 0x148   :  { %2274 = vrsqrt.f32 %v416_v12  ;;  %v400_v41 = vmul.f32 0.03125, %v356_v20  ;;  %v385_v25 = vmul.f32 0.03125, %v311_v39  ;;  %v515_v34 = vmul.f32 %v2905_v53, %v476_v30 }
 0x149   :  { %v2263_v2 = vpop.eup %2262  ;;  %2276 = vrsqrt.f32 %v431_v3  ;;  %v590_v35 = vpack.c.bf16 %v568_v26, %v567_v13  ;;  %v530_v0 = vmul.f32 %v2905_v53, %v491_v56 }
 0x14a   :  { %v2265_v1 = vpop.eup %2264  ;;  %v432_v17 = vadd.f32 1e-06, %v400_v41  ;;  %v417_v45 = vadd.f32 1e-06, %v385_v25  ;;  %v554_v16 = vadd.f32 %v2912_v54, %v515_v34  ;;  %v492_v49 = vmul.f32 %v2263_v2, %v2745_v22 }
 0x14b   :  { %2219 = vmatmul.mubr.msk.bf16.vlgmr.msra.gmra.mxu1 %vm85_vm0, %v590_v35  ;;  %v314_v18 = vpop.xlane.xlu1 %313  ;;  %v359_v61 = vpop.xlane.xlu0 %358  ;;  %v477_v58 = vmul.f32 %v2265_v1, %v2755_v23  ;;  %v569_v23 = vadd.f32 %v2912_v54, %v530_v0 }
 0x14c   :  { %2278 = vrsqrt.f32 %v432_v17  ;;  %v386_v62 = vmul.f32 0.03125, %v314_v18  ;;  %v401_v46 = vmul.f32 0.03125, %v359_v61  ;;  %v583_v50 = vpack.c.bf16 %v554_v16, %v553_v44 }
 0x14d   :  { %v2267_v4 = vpop.eup %2266  ;;  %2280 = vrsqrt.f32 %v417_v45  ;;  %v531_v59 = vmul.f32 %v2905_v53, %v492_v49  ;;  %v516_v60 = vmul.f32 %v2905_v53, %v477_v58 }
 0x14e   :  { %v2269_v7 = vpop.eup %2268  ;;  %v418_v22 = vadd.f32 1e-06, %v386_v62  ;;  %v433_v6 = vadd.f32 1e-06, %v401_v46  ;;  %2206 = vmatprep.mubr.msk.bf16.mxu0 %vm85_vm0, %v583_v50  ;;  %v478_v21 = vmul.f32 %v2267_v4, %v2759_v27 }
 0x14f   :  { %v362_v9 = vpop.xlane.xlu1 %361  ;;  %v317_v29 = vpop.xlane.xlu0 %316  ;;  %v570_v63 = vadd.f32 %v2912_v54, %v531_v59  ;;  %v493_v15 = vmul.f32 %v2269_v7, %v2769_v28  ;;  %v555_v12 = vadd.f32 %v2912_v54, %v516_v60 }
 0x150   :  { %2282 = vrsqrt.f32 %v418_v22  ;;  %v402_v51 = vmul.f32 0.03125, %v362_v9  ;;  %v387_v36 = vmul.f32 0.03125, %v317_v29  ;;  %v517_v11 = vmul.f32 %v2905_v53, %v478_v21 }
 0x151   :  { %v2271_v55 = vpop.eup %2270  ;;  %2284 = vrsqrt.f32 %v433_v6  ;;  %v591_v19 = vpack.c.bf16 %v570_v63, %v569_v23  ;;  %v532_v26 = vmul.f32 %v2905_v53, %v493_v15 }
 0x152   :  { %v2273_v3 = vpop.eup %2272  ;;  %v434_v27 = vadd.f32 1e-06, %v402_v51  ;;  %v419_v30 = vadd.f32 1e-06, %v387_v36  ;;  %v556_v20 = vadd.f32 %v2912_v54, %v517_v11  ;;  %v494_v39 = vmul.f32 %v2271_v55, %v2773_v32 }
 0x153   :  { %2222 = vmatprep.mubr.msk.bf16.mxu1 %vm85_vm0, %v591_v19  ;;  %v320_v28 = vpop.xlane.xlu1 %319  ;;  %v365_v13 = vpop.xlane.xlu0 %364  ;;  %v479_v56 = vmul.f32 %v2273_v3, %v2783_v33  ;;  %v571_v33 = vadd.f32 %v2912_v54, %v532_v26 }
 0x154   :  { %2286 = vrsqrt.f32 %v434_v27  ;;  %v388_v41 = vmul.f32 0.03125, %v320_v28  ;;  %v403_v25 = vmul.f32 0.03125, %v365_v13  ;;  %v584_v34 = vpack.c.bf16 %v556_v20, %v555_v12 }
 0x155   :  { %v2275_v2 = vpop.eup %2274  ;;  %2288 = vrsqrt.f32 %v419_v30  ;;  %v533_v35 = vmul.f32 %v2905_v53, %v494_v39  ;;  %v518_v44 = vmul.f32 %v2905_v53, %v479_v56 }
 0x156   :  { %v2277_v1 = vpop.eup %2276  ;;  %v420_v32 = vadd.f32 1e-06, %v388_v41  ;;  %v435_v17 = vadd.f32 1e-06, %v403_v25  ;;  %2207 = vmatmul.mubr.msk.bf16.gmra.mxu0 %vm85_vm0, %v584_v34  ;;  %v480_v45 = vmul.f32 %v2275_v2, %v2787_v37 }
 0x157   :  { %v368_v16 = vpop.xlane.xlu1 %367  ;;  %v323_v49 = vpop.xlane.xlu0 %322  ;;  %v572_v18 = vadd.f32 %v2912_v54, %v533_v35  ;;  %v495_v61 = vmul.f32 %v2277_v1, %v2797_v38  ;;  %v557_v4 = vadd.f32 %v2912_v54, %v518_v44 }
 0x158   :  { %2290 = vrsqrt.f32 %v420_v32  ;;  %v404_v0 = vmul.f32 0.03125, %v368_v16  ;;  %v389_v58 = vmul.f32 0.03125, %v323_v49  ;;  %v519_v62 = vmul.f32 %v2905_v53, %v480_v45 }
 0x159   :  { %v2279_v46 = vpop.eup %2278  ;;  %2292 = vrsqrt.f32 %v435_v17  ;;  %v592_v50 = vpack.c.bf16 %v572_v18, %v571_v33  ;;  %v534_v21 = vmul.f32 %v2905_v53, %v495_v61 }
 0x15a   :  { %v2281_v59 = vpop.eup %2280  ;;  %v436_v37 = vadd.f32 1e-06, %v404_v0  ;;  %v421_v60 = vadd.f32 1e-06, %v389_v58  ;;  %v558_v7 = vadd.f32 %v2912_v54, %v519_v62  ;;  %v496_v22 = vmul.f32 %v2279_v46, %v2801_v42 }
 0x15b   :  { %2223 = vmatmul.mubr.msk.bf16.gmra.mxu1 %vm85_vm0, %v592_v50  ;;  %v326_v38 = vpop.xlane.xlu1 %325  ;;  %v371_v6 = vpop.xlane.xlu0 %370  ;;  %v481_v9 = vmul.f32 %v2281_v59, %v2811_v43  ;;  %v573_v43 = vadd.f32 %v2912_v54, %v534_v21 }
 0x15c   :  { %2294 = vrsqrt.f32 %v436_v37  ;;  %v390_v29 = vmul.f32 0.03125, %v326_v38  ;;  %v405_v23 = vmul.f32 0.03125, %v371_v6  ;;  %v585_v63 = vpack.c.bf16 %v558_v7, %v557_v4 }
 0x15d   :  { %v2283_v15 = vpop.eup %2282  ;;  %2296 = vrsqrt.f32 %v421_v60  ;;  %v535_v51 = vmul.f32 %v2905_v53, %v496_v22  ;;  %v520_v36 = vmul.f32 %v2905_v53, %v481_v9 }
 0x15e   :  { %v2285_v11 = vpop.eup %2284  ;;  %v422_v42 = vadd.f32 1e-06, %v390_v29  ;;  %v437_v55 = vadd.f32 1e-06, %v405_v23  ;;  %2210 = vmatprep.mubr.msk.bf16.mxu0 %vm85_vm0, %v585_v63  ;;  %v482_v19 = vmul.f32 %v2283_v15, %v2815_v47  ;;  %v3026_v15 = vld [vmem:[%s3702_s2] ss:$0 sm:$0xff] }
 0x15f   :  { %v374_v12 = vpop.xlane.xlu1 %373  ;;  %v574_v3 = vadd.f32 %v2912_v54, %v535_v51  ;;  %v497_v27 = vmul.f32 %v2285_v11, %v2825_v48  ;;  %v559_v13 = vadd.f32 %v2912_v54, %v520_v36 }
 0x160   :  { %2298 = vrsqrt.f32 %v422_v42  ;;  %v406_v30 = vmul.f32 0.03125, %v374_v12  ;;  %v521_v20 = vmul.f32 %v2905_v53, %v482_v19 }
 0x161   :  { %v2287_v39 = vpop.eup %2286  ;;  %2300 = vrsqrt.f32 %v437_v55  ;;  %v593_v28 = vpack.c.bf16 %v574_v3, %v573_v43  ;;  %v536_v25 = vmul.f32 %v2905_v53, %v497_v27 }
 0x162   :  { %v2289_v26 = vpop.eup %2288  ;;  %v438_v56 = vadd.f32 1e-06, %v406_v30  ;;  %v560_v47 = vadd.f32 %v2912_v54, %v521_v20  ;;  %v498_v41 = vmul.f32 %v2287_v39, %v2829_v52 }
 0x163   :  { %2226 = vmatprep.mubr.msk.bf16.mxu1 %vm85_vm0, %v593_v28  ;;  %v483_v48 = vmul.f32 %v2289_v26, %v2842_v57  ;;  %v575_v1 = vadd.f32 %v2912_v54, %v536_v25 }
 0x164   :  { %2302 = vrsqrt.f32 %v438_v56  ;;  %v586_v34 = vpack.c.bf16 %v560_v47, %v559_v13  ;;  %v537_v2 = vmul.f32 %v2905_v53, %v498_v41 }
 0x165   :  { %v2291_v35 = vpop.eup %2290  ;;  %v522_v17 = vmul.f32 %v2905_v53, %v483_v48 }
 0x166   :  { %v2293_v44 = vpop.eup %2292  ;;  %2211 = vmatmul.mubr.msk.bf16.gmra.mxu0 %vm85_vm0, %v586_v34  ;;  %v576_v32 = vadd.f32 %v2912_v54, %v537_v2  ;;  %v484_v52 = vmul.f32 %v2291_v35, %v2846_v40 }
 0x167   :  { %v499_v45 = vmul.f32 %v2293_v44, %v2859_v5  ;;  %v561_v18 = vadd.f32 %v2912_v54, %v522_v17 }
 0x168   :  { %v594_v16 = vpack.c.bf16 %v576_v32, %v575_v1  ;;  %v523_v57 = vmul.f32 %v2905_v53, %v484_v52 }
 0x169   :  { %v2295_v49 = vpop.eup %2294  ;;  %v538_v58 = vmul.f32 %v2905_v53, %v499_v45 }
 0x16a   :  { %v2297_v33 = vpop.eup %2296  ;;  %2227 = vmatmul.mubr.msk.bf16.gmra.mxu1 %vm85_vm0, %v594_v16  ;;  %v562_v61 = vadd.f32 %v2912_v54, %v523_v57  ;;  %v500_v0 = vmul.f32 %v2295_v49, %v2863_v31 }
 0x16b   :  { %v485_v40 = vmul.f32 %v2297_v33, %v2873_v10  ;;  %v577_v4 = vadd.f32 %v2912_v54, %v538_v58 }
 0x16c   :  { %v587_v62 = vpack.c.bf16 %v562_v61, %v561_v18  ;;  %v539_v5 = vmul.f32 %v2905_v53, %v500_v0 }
 0x16d   :  { %v2299_v46 = vpop.eup %2298  ;;  %v524_v60 = vmul.f32 %v2905_v53, %v485_v40 }
 0x16e   :  { %v2301_v50 = vpop.eup %2300  ;;  %2214 = vmatprep.mubr.msk.bf16.mxu0 %vm85_vm0, %v587_v62  ;;  %v578_v59 = vadd.f32 %v2912_v54, %v539_v5  ;;  %v486_v37 = vmul.f32 %v2299_v46, %v2877_v8 }
 0x16f   :  { %v501_v31 = vmul.f32 %v2301_v50, %v2887_v14  ;;  %v563_v38 = vadd.f32 %v2912_v54, %v524_v60 }
 0x170   :  { %v595_v7 = vpack.c.bf16 %v578_v59, %v577_v4  ;;  %v525_v10 = vmul.f32 %v2905_v53, %v486_v37 }
 0x171   :  { %v2303_v22 = vpop.eup %2302  ;;  %v540_v9 = vmul.f32 %v2905_v53, %v501_v31 }
 0x172   :  { %2230 = vmatprep.mubr.msk.bf16.mxu1 %vm85_vm0, %v595_v7  ;;  %v564_v6 = vadd.f32 %v2912_v54, %v525_v10  ;;  %v502_v21 = vmul.f32 %v2303_v22, %v2891_v24 }
 0x173   :  { %v579_v14 = vadd.f32 %v2912_v54, %v540_v9 }
 0x174   :  { %v588_v29 = vpack.c.bf16 %v564_v6, %v563_v38  ;;  %v541_v8 = vmul.f32 %v2905_v53, %v502_v21 }
 0x176   :  { %2215 = vmatmul.mubr.msk.bf16.gmra.mxu0 %vm85_vm0, %v588_v29  ;;  %v580_v23 = vadd.f32 %v2912_v54, %v541_v8 }
 0x178   :  { %v596_v63 = vpack.c.bf16 %v580_v23, %v579_v14 }
 0x17a   :  { %2231 = vmatmul.mubr.msk.bf16.gmra.mxu1 %vm85_vm0, %v596_v63 }
 0x206   :  { %v2204_v24 = vpop.f32.mrf.mxu0 }
 0x207   :  { %v711_v51 = vadd.f32 %v2204_v24, %v3026_v15 }
 0x208   :  { %v702_v36 = vpop.f32.mrf.mxu0 }
 0x209   :  { %v3029_v11 = vmul.f32 0.70710677, %v711_v51  ;;  %v703_v53 = vadd.f32 %v3026_v15, %v702_v36  ;;  %v3048_v33 = vmul.f32 0.5, %v711_v51 }
 0x20a   :  { %v2205_v42 = vpop.f32.mrf.mxu0 }
 0x20b   :  { %v863_v55 = vand.u32 2147483647, %v3029_v11  ;;  %v3033_v54 = vmul.f32 0.70710677, %v703_v53  ;;  %v2220_v19 = vpop.f32.mrf.mxu1  ;;  %v714_v12 = vadd.f32 %v2205_v42, %v3026_v15  ;;  %v3052_v58 = vmul.f32 0.5, %v703_v53 }
 0x20c   :  { %v775_v43 = vadd.f32 %v2220_v19, %v3026_v15  ;;  %v705_v25 = vpop.f32.mrf.mxu0  ;;  %vm1503_vm1 = vcmp.ge.f32.partialorder %v3029_v11, 0.0 }
 0x20d   :  { %v895_v3 = vmul.f32 0.3275911, %v863_v55  ;;  %v861_v27 = vand.u32 2147483647, %v3033_v54  ;;  %v1311_v30 = vsub.f32 0.0, %v863_v55  ;;  %v766_v28 = vpop.f32.mrf.mxu1  ;;  %v706_v32 = vadd.f32 %v3026_v15, %v705_v25 }
 0x20e   :  { %v3038_v20 = vmul.f32 0.70710677, %v714_v12  ;;  %v3040_v39 = vmul.f32 0.70710677, %v775_v43  ;;  %v767_v52 = vadd.f32 %v3026_v15, %v766_v28  ;;  %v3055_v62 = vmul.f32 0.5, %v714_v12 }
 0x20f   :  { %v927_v13 = vadd.f32 1.0, %v895_v3  ;;  %v893_v26 = vmul.f32 0.3275911, %v861_v27  ;;  %v1309_v56 = vsub.f32 0.0, %v861_v27  ;;  %v1343_v34 = vmul.f32 %v1311_v30, %v863_v55  ;;  %v2221_v44 = vpop.f32.mrf.mxu1 }
 0x210   :  { %v864_v47 = vand.u32 2147483647, %v3038_v20  ;;  %v879_v41 = vand.u32 2147483647, %v3040_v39  ;;  %v3046_v57 = vmul.f32 0.70710677, %v706_v32  ;;  %v3059_v50 = vadd.f32 %v2221_v44, %v3026_v15 }
 0x211   :  { %2304 = vrcp.f32 %v927_v13  ;;  %v925_v48 = vadd.f32 1.0, %v893_v26  ;;  %v1341_v1 = vmul.f32 %v1309_v56, %v861_v27  ;;  %v1377_v49 = vmul.f32 1.442695, %v1343_v34  ;;  %v769_v61 = vpop.f32.mrf.mxu1 }
 0x212   :  { %v896_v2 = vmul.f32 0.3275911, %v864_v47  ;;  %v911_v35 = vmul.f32 0.3275911, %v879_v41  ;;  %v1312_v16 = vsub.f32 0.0, %v864_v47  ;;  %v1327_v5 = vsub.f32 0.0, %v879_v41 }
 0x213   :  { %2306 = vrcp.f32 %v925_v48  ;;  %v3050_v18 = vmul.f32 0.70710677, %v767_v52  ;;  %v1373_v0 = vmul.f32 1.442695, %v1341_v1  ;;  %v862_v40 = vand.u32 2147483647, %v3046_v57 }
 0x214   :  { %v928_v17 = vadd.f32 1.0, %v896_v2  ;;  %v943_v45 = vadd.f32 1.0, %v911_v35  ;;  %v1344_v4 = vmul.f32 %v1312_v16, %v864_v47  ;;  %v3062_v60 = vadd.f32 %v3026_v15, %v769_v61 }
 0x215   :  { %v877_v46 = vand.u32 2147483647, %v3050_v18  ;;  %v894_v59 = vmul.f32 0.3275911, %v862_v40  ;;  %v1310_v37 = vsub.f32 0.0, %v862_v40  ;;  %v3067_v22 = vmul.f32 0.5, %v775_v43 }
 0x216   :  { %2308 = vrcp.f32 %v928_v17  ;;  %v3065_v10 = vmul.f32 0.70710677, %v3059_v50  ;;  %v3070_v6 = vmul.f32 0.70710677, %v3062_v60  ;;  %v1359_v21 = vmul.f32 %v1327_v5, %v879_v41  ;;  %v2208_v14 = vpop.f32.mrf.mxu0 }
 0x217   :  { %2310 = vrcp.f32 %v943_v45  ;;  %v909_v31 = vmul.f32 0.3275911, %v877_v46  ;;  %v1325_v7 = vsub.f32 0.0, %v877_v46  ;;  %v926_v38 = vadd.f32 1.0, %v894_v59 }
 0x218   :  { %2312 = vpow2.f32 %v1377_v49  ;;  %v3072_v9 = vmul.f32 0.5, %v706_v32  ;;  %v880_v8 = vand.u32 2147483647, %v3065_v10  ;;  %v1379_v23 = vmul.f32 1.442695, %v1344_v4  ;;  %v718_v13 = vpop.f32.mrf.mxu0 }
 0x219   :  { %2314 = vpow2.f32 %v1373_v0  ;;  %v941_v29 = vadd.f32 1.0, %v909_v31  ;;  %v1342_v63 = vmul.f32 %v1310_v37, %v862_v40  ;;  %v878_v24 = vand.u32 2147483647, %v3070_v6 }
 0x21a   :  { %2316 = vrcp.f32 %v926_v38  ;;  %v1357_v36 = vmul.f32 %v1325_v7, %v877_v46  ;;  %v912_v53 = vmul.f32 0.3275911, %v880_v8  ;;  %v1328_v42 = vsub.f32 0.0, %v880_v8 }
 0x21b   :  { %2318 = vrcp.f32 %v941_v29  ;;  %v3079_v19 = vmul.f32 0.5, %v767_v52  ;;  %v910_v12 = vmul.f32 0.3275911, %v878_v24  ;;  %v1326_v43 = vsub.f32 0.0, %v878_v24 }
 0x21c   :  { %v1409_v3 = vmul.f32 1.442695, %v1359_v21  ;;  %v944_v27 = vadd.f32 1.0, %v912_v53  ;;  %v1360_v30 = vmul.f32 %v1328_v42, %v880_v8  ;;  %v3082_v28 = vadd.f32 %v2208_v14, %v3026_v15 }
 0x21d   :  { %v1375_v47 = vmul.f32 1.442695, %v1342_v63  ;;  %v942_v41 = vadd.f32 1.0, %v910_v12  ;;  %v1358_v25 = vmul.f32 %v1326_v43, %v878_v24  ;;  %v1405_v34 = vmul.f32 1.442695, %v1357_v36 }
 0x21e   :  { %v3076_v51 = vpop.eup %2304  ;;  %2320 = vrcp.f32 %v944_v27  ;;  %v3088_v2 = vmul.f32 0.70710677, %v3082_v28  ;;  %v1411_v1 = vmul.f32 1.442695, %v1360_v30  ;;  %v3094_v32 = vadd.f32 %v3026_v15, %v718_v13 }
 0x21f   :  { %v1023_v55 = vmul.f32 1.0614054, %v3076_v51  ;;  %2322 = vrcp.f32 %v942_v41  ;;  %v1407_v0 = vmul.f32 1.442695, %v1358_v25  ;;  %vm1501_vm2 = vcmp.ge.f32.partialorder %v3033_v54, 0.0 }
 0x220   :  { %v3084_v26 = vpop.eup %2306  ;;  %2324 = vpow2.f32 %v1379_v23  ;;  %v867_v16 = vand.u32 2147483647, %v3088_v2  ;;  %v3104_v7 = vmul.f32 0.70710677, %v3094_v32  ;;  %vm1504_vm3 = vcmp.ge.f32.partialorder %v3038_v20, 0.0 }
 0x221   :  { %v1880_v56 = vadd.f32 -1.4531521, %v1023_v55  ;;  %v1021_v48 = vmul.f32 1.0614054, %v3084_v26  ;;  %2326 = vpow2.f32 %v1409_v3  ;;  %vm1502_vm4 = vcmp.ge.f32.partialorder %v3046_v57, 0.0 }
 0x222   :  { %v899_v46 = vmul.f32 0.3275911, %v867_v16  ;;  %v1315_v4 = vsub.f32 0.0, %v867_v16  ;;  %2328 = vpow2.f32 %v1375_v47  ;;  %v3109_v63 = vand.u32 2147483647, %v3104_v7 }
 0x223   :  { %v3090_v35 = vpop.eup %2308  ;;  %v1087_v44 = vmul.f32 %v3076_v51, %v1880_v56  ;;  %v1878_v17 = vadd.f32 -1.4531521, %v1021_v48  ;;  %2330 = vpow2.f32 %v1405_v34  ;;  %vm1519_vm5 = vcmp.ge.f32.partialorder %v3040_v39, 0.0  ;;  %v2224_v39 = vpop.f32.mrf.mxu1 }
 0x224   :  { %v3096_v52 = vpop.eup %2310  ;;  %v1024_v45 = vmul.f32 1.0614054, %v3090_v35  ;;  %v931_v8 = vadd.f32 1.0, %v899_v46  ;;  %2332 = vpow2.f32 %v1411_v1  ;;  %v1347_v42 = vmul.f32 %v1315_v4, %v867_v16 }
 0x225   :  { %v1119_v49 = vadd.f32 1.4214138, %v1087_v44  ;;  %v1039_v61 = vmul.f32 1.0614054, %v3096_v52  ;;  %v1085_v40 = vmul.f32 %v3084_v26, %v1878_v17  ;;  %v2313_v59 = vpop.eup %2312  ;;  %2334 = vpow2.f32 %v1407_v0 }
 0x226   :  { %v1881_v5 = vadd.f32 -1.4531521, %v1024_v45  ;;  %v2315_v38 = vpop.eup %2314  ;;  %v897_v27 = vmul.f32 0.3275911, %v3109_v63  ;;  %2336 = vrcp.f32 %v931_v8  ;;  %v3124_v17 = vmul.f32 1.442695, %v1347_v42 }
 0x227   :  { %v1151_v37 = vmul.f32 %v3076_v51, %v1119_v49  ;;  %v1896_v31 = vadd.f32 -1.4531521, %v1039_v61  ;;  %v1117_v21 = vadd.f32 1.4214138, %v1085_v40  ;;  %v3111_v24 = vpop.eup %2316  ;;  %vm1517_vm6 = vcmp.ge.f32.partialorder %v3050_v18, 0.0 }
 0x228   :  { %v1088_v29 = vmul.f32 %v3090_v35, %v1881_v5  ;;  %v3114_v55 = vpop.eup %2318  ;;  %v1022_v3 = vmul.f32 1.0614054, %v3111_v24  ;;  %v929_v48 = vadd.f32 1.0, %v897_v27  ;;  %vm1520_vm7 = vcmp.ge.f32.partialorder %v3065_v10, 0.0 }
 0x229   :  { %v1912_v14 = vadd.f32 -0.28449672, %v1151_v37  ;;  %v1103_v23 = vmul.f32 %v3096_v52, %v1896_v31  ;;  %v1149_v36 = vmul.f32 %v3084_v26, %v1117_v21  ;;  %v1037_v56 = vmul.f32 1.0614054, %v3114_v55 }
 0x22a   :  { %v1120_v53 = vadd.f32 1.4214138, %v1088_v29  ;;  %v1879_v25 = vadd.f32 -1.4531521, %v1022_v3  ;;  %2338 = vrcp.f32 %v929_v48  ;;  %vm1518_vm8 = vcmp.ge.f32.partialorder %v3070_v6, 0.0 }
 0x22b   :  { %v1215_v12 = vmul.f32 %v3076_v51, %v1912_v14  ;;  %v1135_v43 = vadd.f32 1.4214138, %v1103_v23  ;;  %v1910_v30 = vadd.f32 -0.28449672, %v1149_v36  ;;  %v1894_v1 = vadd.f32 -1.4531521, %v1037_v56  ;;  %v3126_v45 = vpop.eup %2320 }
 0x22c   :  { %v1152_v13 = vmul.f32 %v3090_v35, %v1120_v53  ;;  %v1086_v61 = vmul.f32 %v3111_v24, %v1879_v25  ;;  %v3130_v0 = vpop.eup %2322  ;;  %v1040_v4 = vmul.f32 1.0614054, %v3126_v45  ;;  %2340 = vpow2.f32 %v3124_v17 }
 0x22d   :  { %v1247_v47 = vadd.f32 0.2548296, %v1215_v12  ;;  %v1167_v41 = vmul.f32 %v3096_v52, %v1135_v43  ;;  %v1213_v34 = vmul.f32 %v3084_v26, %v1910_v30  ;;  %v1101_v46 = vmul.f32 %v3114_v55, %v1894_v1  ;;  %v2325_v37 = vpop.eup %2324 }
 0x22e   :  { %v1913_v44 = vadd.f32 -0.28449672, %v1152_v13  ;;  %v1038_v29 = vmul.f32 1.0614054, %v3130_v0  ;;  %v2327_v8 = vpop.eup %2326  ;;  %v1897_v53 = vadd.f32 -1.4531521, %v1040_v4 }
 0x22f   :  { %v1279_v16 = vmul.f32 %v3076_v51, %v1247_v47  ;;  %v1928_v49 = vadd.f32 -0.28449672, %v1167_v41  ;;  %v1245_v40 = vadd.f32 0.2548296, %v1213_v34  ;;  %v1118_v51 = vadd.f32 1.4214138, %v1086_v61  ;;  %v2329_v3 = vpop.eup %2328 }
 0x230   :  { %v1216_v5 = vmul.f32 %v3090_v35, %v1913_v44  ;;  %v1133_v36 = vadd.f32 1.4214138, %v1101_v46  ;;  %v1104_v56 = vmul.f32 %v3126_v45, %v1897_v53  ;;  %v2331_v47 = vpop.eup %2330  ;;  %vm1507_vm9 = vcmp.ge.f32.partialorder %v3088_v2, 0.0 }
 0x231   :  { %v1439_v31 = vmul.f32 %v2313_v59, %v1279_v16  ;;  %v1231_v21 = vmul.f32 %v3096_v52, %v1928_v49  ;;  %v1277_v14 = vmul.f32 %v3084_v26, %v1245_v40  ;;  %v1150_v43 = vmul.f32 %v3111_v24, %v1118_v51  ;;  %v3146_v34 = vpop.eup %2332 }
 0x232   :  { %v1248_v23 = vadd.f32 0.2548296, %v1216_v5  ;;  %v1895_v59 = vadd.f32 -1.4531521, %v1038_v29  ;;  %v1165_v13 = vmul.f32 %v3114_v55, %v1133_v36  ;;  %v1136_v49 = vadd.f32 1.4214138, %v1104_v56 }
 0x233   :  { %v1471_v42 = vsub.f32 1.0, %v1439_v31  ;;  %v1263_v12 = vadd.f32 0.2548296, %v1231_v21  ;;  %v1437_v27 = vmul.f32 %v2315_v38, %v1277_v14  ;;  %v1911_v25 = vadd.f32 -0.28449672, %v1150_v43  ;;  %v3148_v38 = vpop.eup %2334 }
 0x234   :  { %v1280_v30 = vmul.f32 %v3090_v35, %v1248_v23  ;;  %v1102_v48 = vmul.f32 %v3130_v0, %v1895_v59  ;;  %v1926_v16 = vadd.f32 -0.28449672, %v1165_v13  ;;  %v3155_v31 = vmul.f32 0.5, %v3059_v50  ;;  %v3157_v21 = vpop.eup %2336 }
 0x235   :  { %v1535_v26 = vsub.f32 0.0, %v1471_v42  ;;  %v1295_v41 = vmul.f32 %v3096_v52, %v1263_v12  ;;  %v1469_v44 = vsub.f32 1.0, %v1437_v27  ;;  %v1214_v40 = vmul.f32 %v3111_v24, %v1911_v25 }
 0x236   :  { %v1440_v1 = vmul.f32 %v2325_v37, %v1280_v30  ;;  %v1134_v5 = vadd.f32 1.4214138, %v1102_v48  ;;  %v1229_v4 = vmul.f32 %v3114_v55, %v1926_v16  ;;  %v1168_v29 = vmul.f32 %v3126_v45, %v1136_v49 }
 0x237   :  { %v1567_v35 = vsel %vm1503_vm1, %v1471_v42, %v1535_v26  ;;  %v1455_v61 = vmul.f32 %v2327_v8, %v1295_v41  ;;  %v1533_v46 = vsub.f32 0.0, %v1469_v44  ;;  %v1246_v51 = vadd.f32 0.2548296, %v1214_v40  ;;  %v3167_v12 = vpop.eup %2338 }
 0x238   :  { %v1472_v52 = vsub.f32 1.0, %v1440_v1  ;;  %v1631_v37 = vadd.f32 1.0, %v1567_v35  ;;  %v1166_v11 = vmul.f32 %v3130_v0, %v1134_v5  ;;  %v1261_v36 = vadd.f32 0.2548296, %v1229_v4 }
 0x239   :  { %v1565_v8 = vsel %vm1501_vm2, %v1469_v44, %v1533_v46  ;;  %v1487_v23 = vsub.f32 1.0, %v1455_v61  ;;  %v1278_v50 = vmul.f32 %v3111_v24, %v1246_v51  ;;  %v1929_v42 = vadd.f32 -0.28449672, %v1168_v29  ;;  %v2341_v18 = vpop.eup %2340 }
 0x23a   :  { %v1536_v14 = vsub.f32 0.0, %v1472_v52  ;;  %v1629_v53 = vadd.f32 1.0, %v1565_v8  ;;  %v1293_v54 = vmul.f32 %v3114_v55, %v1261_v36  ;;  %v1927_v59 = vadd.f32 -0.28449672, %v1166_v11 }
 0x23b   :  { %v1027_v27 = vmul.f32 1.0614054, %v3157_v21  ;;  %v1663_v30 = vmul.f32 %v1631_v37, %v3048_v33  ;;  %v1438_v56 = vmul.f32 %v2329_v3, %v1278_v50  ;;  %v1313_v24 = vsub.f32 0.0, %v3109_v63  ;;  %v2209_v3 = vpop.f32.mrf.mxu0 }
 0x23c   :  { %v1568_v43 = vsel %vm1504_vm3, %v1472_v52, %v1536_v14  ;;  %v1551_v26 = vsub.f32 0.0, %v1487_v23  ;;  %v1453_v17 = vmul.f32 %v2331_v47, %v1293_v54  ;;  %v1232_v41 = vmul.f32 %v3126_v45, %v1929_v42 }
 0x23d   :  { %v1632_v13 = vadd.f32 1.0, %v1568_v43  ;;  %v1230_v20 = vmul.f32 %v3130_v0, %v1927_v59  ;;  %v1470_v55 = vsub.f32 1.0, %v1438_v56  ;;  %v1884_v48 = vadd.f32 -1.4531521, %v1027_v27  ;;  %v721_v56 = vpop.f32.mrf.mxu0 }
 0x23e   :  { %v1025_v44 = vmul.f32 1.0614054, %v3167_v12  ;;  %v1661_v1 = vmul.f32 %v1629_v53, %v3052_v58  ;;  %v1485_v16 = vsub.f32 1.0, %v1453_v17  ;;  %v1264_v33 = vadd.f32 0.2548296, %v1232_v41  ;;  %v782_v41 = vpop.f32.mrf.mxu1 }
 0x23f   :  { %v1664_v25 = vmul.f32 %v1632_v13, %v3055_v62  ;;  %v1262_v49 = vadd.f32 0.2548296, %v1230_v20  ;;  %v1534_v61 = vsub.f32 0.0, %v1470_v55  ;;  %v1091_v47 = vmul.f32 %v3157_v21, %v1884_v48 }
 0x240   :  { %v1882_v40 = vadd.f32 -1.4531521, %v1025_v44  ;;  %v1549_v5 = vsub.f32 0.0, %v1485_v16  ;;  %v1296_v62 = vmul.f32 %v3126_v45, %v1264_v33  ;;  %v1345_v52 = vmul.f32 %v1313_v24, %v3109_v63 }
 0x241   :  { %v2078_v35 = vpack.c.bf16 %v1664_v25, %v1663_v30  ;;  %v1294_v46 = vmul.f32 %v3130_v0, %v1262_v49  ;;  %v1566_v58 = vsel %vm1502_vm4, %v1470_v55, %v1534_v61  ;;  %v1123_v4 = vadd.f32 1.4214138, %v1091_v47  ;;  %v2225_v61 = vpop.f32.mrf.mxu1 }
 0x242   :  { %v1089_v37 = vmul.f32 %v3167_v12, %v1882_v40  ;;  %v3193_v51 = vadd.f32 %v2209_v3, %v3026_v15  ;;  %v1583_v45 = vsel %vm1519_vm5, %v1487_v23, %v1551_v26  ;;  %v1630_v29 = vadd.f32 1.0, %v1566_v58 }
 0x243   :  { %2165 = vst [vmem:[%s3703_s5 + $0x8] sm:$0xff] %v2078_v35   ;;  %v1456_v0 = vmul.f32 %v3146_v34, %v1296_v62  ;;  %v1454_v63 = vmul.f32 %v3148_v38, %v1294_v46  ;;  %v1581_v11 = vsel %vm1517_vm6, %v1485_v16, %v1549_v5  ;;  %v1155_v57 = vmul.f32 %v3157_v21, %v1123_v4 }
 0x244   :  { %v1121_v8 = vadd.f32 1.4214138, %v1089_v37  ;;  %v1381_v14 = vmul.f32 1.442695, %v1345_v52  ;;  %v1662_v36 = vmul.f32 %v1630_v29, %v3072_v9  ;;  %v3204_v42 = vmul.f32 0.70710677, %v3193_v51 }
 0x245   :  { %v1488_v53 = vsub.f32 1.0, %v1456_v0  ;;  %v1486_v50 = vsub.f32 1.0, %v1454_v63  ;;  %v1647_v23 = vadd.f32 1.0, %v1583_v45  ;;  %v1916_v34 = vadd.f32 -0.28449672, %v1155_v57 }
 0x246   :  { %v1153_v38 = vmul.f32 %v3167_v12, %v1121_v8  ;;  %v2073_v43 = vpack.c.bf16 %v1662_v36, %v1661_v1  ;;  %v868_v27 = vand.u32 2147483647, %v3204_v42  ;;  %v1645_v30 = vadd.f32 1.0, %v1581_v11 }
 0x247   :  { %v1552_v54 = vsub.f32 0.0, %v1488_v53  ;;  %v1550_v59 = vsub.f32 0.0, %v1486_v50  ;;  %v1219_v9 = vmul.f32 %v3157_v21, %v1916_v34  ;;  %2342 = vpow2.f32 %v1381_v14 }
 0x248   :  { %v1914_v13 = vadd.f32 -0.28449672, %v1153_v38  ;;  %2074 = vst [vmem:[%s3703_s5] sm:$0xff] %v2073_v43   ;;  %v1614_v26 = vmul.f32 0.5, %v3062_v60  ;;  %v900_v17 = vmul.f32 0.3275911, %v868_v27  ;;  %v1679_v44 = vmul.f32 %v1647_v23, %v3067_v22  ;;  %v785_v38 = vpop.f32.mrf.mxu1 }
 0x249   :  { %v1584_v6 = vsel %vm1520_vm7, %v1488_v53, %v1552_v54  ;;  %v1582_v24 = vsel %vm1518_vm8, %v1486_v50, %v1550_v59  ;;  %v1251_v55 = vadd.f32 0.2548296, %v1219_v9  ;;  %v791_v16 = vadd.f32 %v2224_v39, %v3026_v15 }
 0x24a   :  { %v1648_v20 = vadd.f32 1.0, %v1584_v6  ;;  %v1646_v25 = vadd.f32 1.0, %v1582_v24  ;;  %v1217_v48 = vmul.f32 %v3167_v12, %v1914_v13  ;;  %v932_v1 = vadd.f32 1.0, %v900_v17 }
 0x24b   :  { %v3220_v33 = vadd.f32 %v3026_v15, %v721_v56  ;;  %v1677_v10 = vmul.f32 %v1645_v30, %v3079_v19  ;;  %v1283_v3 = vmul.f32 %v3157_v21, %v1251_v55  ;;  %v3225_v35 = vmul.f32 0.70710677, %v791_v16 }
 0x24c   :  { %v1680_v49 = vmul.f32 %v1648_v20, %v3155_v31  ;;  %v1678_v60 = vmul.f32 %v1646_v25, %v1614_v26  ;;  %2344 = vrcp.f32 %v932_v1  ;;  %v1249_v5 = vadd.f32 0.2548296, %v1217_v48 }
 0x24d   :  { %v1443_v22 = vmul.f32 %v2341_v18, %v1283_v3  ;;  %v883_v62 = vand.u32 2147483647, %v3225_v35  ;;  %v3229_v46 = vmul.f32 0.70710677, %v3220_v33  ;;  %v1316_v31 = vsub.f32 0.0, %v868_v27  ;;  %v2212_v18 = vpop.f32.mrf.mxu0 }
 0x24e   :  { %v2118_v47 = vpack.c.bf16 %v1680_v49, %v1679_v44  ;;  %v2113_v40 = vpack.c.bf16 %v1678_v60, %v1677_v10  ;;  %v783_v21 = vadd.f32 %v3026_v15, %v782_v41  ;;  %v3239_v52 = vadd.f32 %v2225_v61, %v3026_v15 }
 0x24f   :  { %v1475_v19 = vsub.f32 1.0, %v1443_v22  ;;  %v915_v58 = vmul.f32 0.3275911, %v883_v62  ;;  %v866_v4 = vand.u32 2147483647, %v3229_v46  ;;  %v1281_v37 = vmul.f32 %v3167_v12, %v1249_v5 }
 0x250   :  { %2173 = vst [vmem:[%s3703_s5 + $0x48] sm:$0xff] %v2118_v47   ;;  %2172 = vst [vmem:[%s3703_s5 + $0x40] sm:$0xff] %v2113_v40   ;;  %v3243_v45 = vmul.f32 0.70710677, %v783_v21  ;;  %v3246_v63 = vmul.f32 0.70710677, %v3239_v52  ;;  %v1348_v57 = vmul.f32 %v1316_v31, %v868_v27  ;;  %v3265_v56 = vadd.f32 %v2212_v18, %v3026_v15 }
 0x251   :  { %v947_v29 = vadd.f32 1.0, %v915_v58  ;;  %v898_v0 = vmul.f32 0.3275911, %v866_v4  ;;  %v1539_v11 = vsub.f32 0.0, %v1475_v19  ;;  %v1331_v36 = vsub.f32 0.0, %v883_v62 }
 0x252   :  { %v881_v8 = vand.u32 2147483647, %v3243_v45  ;;  %v1603_v12 = vmul.f32 0.5, %v3082_v28  ;;  %v3252_v23 = vmul.f32 0.5, %v3094_v32  ;;  %v884_v34 = vand.u32 2147483647, %v3246_v63 }
 0x253   :  { %2346 = vrcp.f32 %v947_v29  ;;  %v930_v53 = vadd.f32 1.0, %v898_v0  ;;  %v1571_v43 = vsel %vm1507_vm9, %v1475_v19, %v1539_v11  ;;  %v1387_v54 = vmul.f32 1.442695, %v1348_v57 }
 0x254   :  { %v2343_v14 = vpop.eup %2342  ;;  %v913_v39 = vmul.f32 0.3275911, %v881_v8  ;;  %vm1505_vm10 = vcmp.ge.f32.partialorder %v3104_v7, 0.0  ;;  %v1363_v27 = vmul.f32 %v1331_v36, %v883_v62  ;;  %v1314_v30 = vsub.f32 0.0, %v866_v4 }
 0x255   :  { %v1441_v50 = vmul.f32 %v2343_v14, %v1281_v37  ;;  %2348 = vrcp.f32 %v930_v53  ;;  %v916_v9 = vmul.f32 0.3275911, %v884_v34  ;;  %v3259_v28 = vmul.f32 0.5, %v3193_v51  ;;  %v734_v51 = vpop.f32.mrf.mxu0 }
 0x256   :  { %v945_v59 = vadd.f32 1.0, %v913_v39  ;;  %v3262_v32 = vadd.f32 %v3026_v15, %v785_v38  ;;  %v1635_v6 = vadd.f32 1.0, %v1571_v43  ;;  %v3268_v26 = vmul.f32 0.5, %v791_v16 }
 0x257   :  { %v1473_v2 = vsub.f32 1.0, %v1441_v50  ;;  %v1329_v17 = vsub.f32 0.0, %v881_v8  ;;  %v948_v41 = vadd.f32 1.0, %v916_v9  ;;  %v1417_v55 = vmul.f32 1.442695, %v1363_v27  ;;  %v2213_v62 = vpop.f32.mrf.mxu0 }
 0x258   :  { %2350 = vrcp.f32 %v945_v59  ;;  %v3271_v20 = vmul.f32 0.70710677, %v3262_v32  ;;  %v1346_v48 = vmul.f32 %v1314_v30, %v866_v4  ;;  %v3274_v44 = vmul.f32 0.70710677, %v3265_v56  ;;  %v2228_v30 = vpop.f32.mrf.mxu1 }
 0x259   :  { %v3256_v13 = vpop.eup %2344  ;;  %2352 = vpow2.f32 %v1387_v54  ;;  %v1537_v1 = vsub.f32 0.0, %v1473_v2  ;;  %v3277_v10 = vmul.f32 0.5, %v3220_v33  ;;  %v3280_v49 = vmul.f32 %v1635_v6, %v1603_v12 }
 0x25a   :  { %v1028_v24 = vmul.f32 1.0614054, %v3256_v13  ;;  %2354 = vrcp.f32 %v948_v41  ;;  %v882_v16 = vand.u32 2147483647, %v3271_v20  ;;  %v3283_v3 = vmul.f32 0.5, %v783_v21 }
 0x25b   :  { %v871_v61 = vand.u32 2147483647, %v3274_v44  ;;  %v1361_v47 = vmul.f32 %v1329_v17, %v881_v8  ;;  %v1332_v40 = vsub.f32 0.0, %v884_v34  ;;  %v3287_v5 = vadd.f32 %v3026_v15, %v734_v51 }
 0x25c   :  { %v1885_v25 = vadd.f32 -1.4531521, %v1028_v24  ;;  %v914_v22 = vmul.f32 0.3275911, %v882_v16  ;;  %2356 = vpow2.f32 %v1417_v55  ;;  %v1383_v19 = vmul.f32 1.442695, %v1346_v48 }
 0x25d   :  { %v903_v31 = vmul.f32 0.3275911, %v871_v61  ;;  %v1569_v4 = vsel %vm1505_vm10, %v1473_v2, %v1537_v1  ;;  %v1330_v37 = vsub.f32 0.0, %v882_v16  ;;  %v3294_v29 = vmul.f32 0.70710677, %v3287_v5 }
 0x25e   :  { %v1092_v60 = vmul.f32 %v3256_v13, %v1885_v25  ;;  %v946_v21 = vadd.f32 1.0, %v914_v22  ;;  %v3299_v8 = vadd.f32 %v2213_v62, %v3026_v15  ;;  %v1413_v14 = vmul.f32 1.442695, %v1361_v47 }
 0x25f   :  { %v935_v57 = vadd.f32 1.0, %v903_v31  ;;  %v1364_v36 = vmul.f32 %v1332_v40, %v884_v34  ;;  %v3302_v53 = vand.u32 2147483647, %v3294_v29  ;;  %v1319_v12 = vsub.f32 0.0, %v871_v61 }
 0x260   :  { %v1124_v33 = vadd.f32 1.4214138, %v1092_v60  ;;  %v3289_v58 = vpop.eup %2346  ;;  %2358 = vrcp.f32 %v946_v21  ;;  %v3306_v38 = vadd.f32 1.0, %v1569_v4  ;;  %v1362_v59 = vmul.f32 %v1330_v37, %v882_v16 }
 0x261   :  { %v1043_v11 = vmul.f32 1.0614054, %v3289_v58  ;;  %2360 = vrcp.f32 %v935_v57  ;;  %v901_v43 = vmul.f32 0.3275911, %v3302_v53  ;;  %v3313_v27 = vmul.f32 0.70710677, %v3299_v8 }
 0x262   :  { %v1156_v0 = vmul.f32 %v3256_v13, %v1124_v33  ;;  %v3304_v7 = vpop.eup %2348  ;;  %2362 = vpow2.f32 %v1383_v19  ;;  %v1419_v6 = vmul.f32 1.442695, %v1364_v36  ;;  %v1351_v55 = vmul.f32 %v1319_v12, %v871_v61 }
 0x263   :  { %v1900_v39 = vadd.f32 -1.4531521, %v1043_v11  ;;  %v1026_v18 = vmul.f32 1.0614054, %v3304_v7  ;;  %2364 = vpow2.f32 %v1413_v14  ;;  %v933_v24 = vadd.f32 1.0, %v901_v43 }
 0x264   :  { %v1917_v50 = vadd.f32 -0.28449672, %v1156_v0  ;;  %vm1508_vm11 = vcmp.ge.f32.partialorder %v3204_v42, 0.0  ;;  %v3321_v1 = vand.u32 2147483647, %v3313_v27  ;;  %v3324_v16 = vadd.f32 %v2228_v30, %v3026_v15 }
 0x265   :  { %v1107_v34 = vmul.f32 %v3289_v58, %v1900_v39  ;;  %v3315_v9 = vpop.eup %2350  ;;  %v1883_v2 = vadd.f32 -1.4531521, %v1026_v18  ;;  %2366 = vrcp.f32 %v933_v24  ;;  %v1415_v62 = vmul.f32 1.442695, %v1362_v59 }
 0x266   :  { %v1220_v54 = vmul.f32 %v3256_v13, %v1917_v50  ;;  %v2353_v17 = vpop.eup %2352  ;;  %v1041_v25 = vmul.f32 1.0614054, %v3315_v9  ;;  %2368 = vpow2.f32 %v1419_v6  ;;  %v904_v19 = vmul.f32 0.3275911, %v3321_v1 }
 0x267   :  { %v1139_v51 = vadd.f32 1.4214138, %v1107_v34  ;;  %v1090_v48 = vmul.f32 %v3304_v7, %v1883_v2  ;;  %v3326_v60 = vpop.eup %2354  ;;  %v1393_v15 = vmul.f32 1.442695, %v1351_v55  ;;  %v3335_v57 = vmul.f32 0.70710677, %v3324_v16 }
 0x268   :  { %v1252_v41 = vadd.f32 0.2548296, %v1220_v54  ;;  %v1898_v22 = vadd.f32 -1.4531521, %v1041_v25  ;;  %v1044_v33 = vmul.f32 1.0614054, %v3326_v60  ;;  %2370 = vpow2.f32 %v1415_v62 }
 0x269   :  { %v1171_v40 = vmul.f32 %v3289_v58, %v1139_v51  ;;  %v1122_v61 = vadd.f32 1.4214138, %v1090_v48  ;;  %v2357_v37 = vpop.eup %2356  ;;  %v3340_v18 = vand.u32 2147483647, %v3335_v57  ;;  %v1317_v30 = vsub.f32 0.0, %v3302_v53 }
 0x26a   :  { %v1284_v47 = vmul.f32 %v3256_v13, %v1252_v41  ;;  %v1105_v21 = vmul.f32 %v3315_v9, %v1898_v22  ;;  %v1901_v11 = vadd.f32 -1.4531521, %v1044_v33  ;;  %v936_v13 = vadd.f32 1.0, %v904_v19 }
 0x26b   :  { %v1932_v4 = vadd.f32 -0.28449672, %v1171_v40  ;;  %v1154_v0 = vmul.f32 %v3304_v7, %v1122_v61  ;;  %v919_v41 = vmul.f32 0.3275911, %v3340_v18  ;;  %vm1506_vm12 = vcmp.ge.f32.partialorder %v3229_v46, 0.0 }
 0x26c   :  { %v1444_v31 = vmul.f32 %v2353_v17, %v1284_v47  ;;  %v1137_v50 = vadd.f32 1.4214138, %v1105_v21  ;;  %v1108_v12 = vmul.f32 %v3326_v60, %v1901_v11  ;;  %2372 = vrcp.f32 %v936_v13 }
 0x26d   :  { %v1235_v36 = vmul.f32 %v3289_v58, %v1932_v4  ;;  %v1915_v39 = vadd.f32 -0.28449672, %v1154_v0  ;;  %v3342_v43 = vpop.eup %2358  ;;  %v1320_v42 = vsub.f32 0.0, %v3321_v1  ;;  %vm1523_vm13 = vcmp.ge.f32.partialorder %v3225_v35, 0.0 }
 0x26e   :  { %v1476_v14 = vsub.f32 1.0, %v1444_v31  ;;  %v1169_v59 = vmul.f32 %v3315_v9, %v1137_v50  ;;  %v3346_v2 = vpop.eup %2360  ;;  %v1140_v24 = vadd.f32 1.4214138, %v1108_v12  ;;  %v1042_v17 = vmul.f32 1.0614054, %v3342_v43 }
 0x26f   :  { %v1267_v34 = vadd.f32 0.2548296, %v1235_v36  ;;  %v1218_v6 = vmul.f32 %v3304_v7, %v1915_v39  ;;  %v2363_v51 = vpop.eup %2362  ;;  %v1031_v47 = vmul.f32 1.0614054, %v3346_v2  ;;  %v951_v50 = vadd.f32 1.0, %v919_v41 }
 0x270   :  { %v1540_v54 = vsub.f32 0.0, %v1476_v14  ;;  %v1930_v48 = vadd.f32 -0.28449672, %v1169_v59  ;;  %v1172_v62 = vmul.f32 %v3326_v60, %v1140_v24  ;;  %v1899_v61 = vadd.f32 -1.4531521, %v1042_v17  ;;  %v2365_v33 = vpop.eup %2364 }
 0x271   :  { %v1299_v55 = vmul.f32 %v3289_v58, %v1267_v34  ;;  %v1250_v22 = vadd.f32 0.2548296, %v1218_v6  ;;  %v1888_v4 = vadd.f32 -1.4531521, %v1031_v47  ;;  %2374 = vpow2.f32 %v1393_v15 }
 0x272   :  { %v1572_v25 = vsel %vm1508_vm11, %v1476_v14, %v1540_v54  ;;  %v1233_v31 = vmul.f32 %v3315_v9, %v1930_v48  ;;  %v1933_v0 = vadd.f32 -0.28449672, %v1172_v62  ;;  %v1106_v11 = vmul.f32 %v3342_v43, %v1899_v61  ;;  %v3362_v13 = vpop.eup %2366 }
 0x273   :  { %v1636_v40 = vadd.f32 1.0, %v1572_v25  ;;  %v1459_v19 = vmul.f32 %v2357_v37, %v1299_v55  ;;  %v1282_v58 = vmul.f32 %v3304_v7, %v1250_v22  ;;  %v1095_v36 = vmul.f32 %v3346_v2, %v1888_v4  ;;  %v2369_v34 = vpop.eup %2368 }
 0x274   :  { %v1265_v37 = vadd.f32 0.2548296, %v1233_v31  ;;  %v1236_v54 = vmul.f32 %v3326_v60, %v1933_v0  ;;  %v1029_v6 = vmul.f32 1.0614054, %v3362_v13  ;;  %2376 = vrcp.f32 %v951_v50 }
 0x275   :  { %v1668_v21 = vmul.f32 %v1636_v40, %v3259_v28  ;;  %v1491_v14 = vsub.f32 1.0, %v1459_v19  ;;  %v1442_v12 = vmul.f32 %v2363_v51, %v1282_v58  ;;  %v1138_v28 = vadd.f32 1.4214138, %v1106_v11 }
 0x276   :  { %v1297_v7 = vmul.f32 %v3315_v9, %v1265_v37  ;;  %v1127_v59 = vadd.f32 1.4214138, %v1095_v36  ;;  %v1268_v17 = vadd.f32 0.2548296, %v1236_v54  ;;  %v1886_v25 = vadd.f32 -1.4531521, %v1029_v6  ;;  %v2371_v9 = vpop.eup %2370 }
 0x277   :  { %v2088_v39 = vpack.c.bf16 %v1668_v21, %v3280_v49  ;;  %v1474_v24 = vsub.f32 1.0, %v1442_v12  ;;  %v1170_v41 = vmul.f32 %v3342_v43, %v1138_v28  ;;  %v1352_v55 = vmul.f32 %v1320_v42, %v3321_v1 }
 0x278   :  { %v1457_v49 = vmul.f32 %v2365_v33, %v1297_v7  ;;  %v1159_v51 = vmul.f32 %v3346_v2, %v1127_v59  ;;  %v1555_v48 = vsub.f32 0.0, %v1491_v14  ;;  %v1300_v47 = vmul.f32 %v3326_v60, %v1268_v17 }
 0x279   :  { %2167 = vst [vmem:[%s3703_s5 + $0x18] sm:$0xff] %v2088_v39   ;;  %v1538_v15 = vsub.f32 0.0, %v1474_v24  ;;  %v1931_v40 = vadd.f32 -0.28449672, %v1170_v41  ;;  %v3377_v22 = vpop.eup %2372  ;;  %v1665_v62 = vmul.f32 %v3306_v38, %v3252_v23  ;;  %vm1521_vm14 = vcmp.ge.f32.partialorder %v3243_v45, 0.0 }
 0x27a   :  { %v1920_v61 = vadd.f32 -0.28449672, %v1159_v51  ;;  %v1093_v33 = vmul.f32 %v3362_v13, %v1886_v25  ;;  %v1349_v19 = vmul.f32 %v1317_v30, %v3302_v53  ;;  %v1489_v31 = vsub.f32 1.0, %v1457_v49 }
 0x27b   :  { %v1570_v1 = vsel %vm1506_vm12, %v1474_v24, %v1538_v15  ;;  %v1460_v4 = vmul.f32 %v2369_v34, %v1300_v47  ;;  %v1234_v60 = vmul.f32 %v3342_v43, %v1931_v40  ;;  %v1395_v0 = vmul.f32 1.442695, %v1352_v55 }
 0x27c   :  { %v1634_v42 = vadd.f32 1.0, %v1570_v1  ;;  %v1223_v21 = vmul.f32 %v3346_v2, %v1920_v61  ;;  %v1125_v58 = vadd.f32 1.4214138, %v1093_v33  ;;  %v1587_v23 = vsel %vm1523_vm13, %v1491_v14, %v1555_v48  ;;  %v798_v48 = vpop.f32.mrf.mxu1 }
 0x27d   :  { %v1492_v38 = vsub.f32 1.0, %v1460_v4  ;;  %v1266_v11 = vadd.f32 0.2548296, %v1234_v60  ;;  %v1032_v37 = vmul.f32 1.0614054, %v3377_v22  ;;  %v1553_v50 = vsub.f32 0.0, %v1489_v31 }
 0x27e   :  { %v1666_v53 = vmul.f32 %v1634_v42, %v3277_v10  ;;  %v1255_v46 = vadd.f32 0.2548296, %v1223_v21  ;;  %v1157_v30 = vmul.f32 %v3362_v13, %v1125_v58  ;;  %v1389_v36 = vmul.f32 1.442695, %v1349_v19  ;;  %v737_v10 = vpop.f32.mrf.mxu0  ;;  %v2375_v17 = vpop.eup %2374 }
 0x27f   :  { %v1556_v39 = vsub.f32 0.0, %v1492_v38  ;;  %v1298_v12 = vmul.f32 %v3342_v43, %v1266_v11  ;;  %v1889_v54 = vadd.f32 -1.4531521, %v1032_v37  ;;  %v1651_v28 = vadd.f32 1.0, %v1587_v23 }
 0x280   :  { %v2083_v34 = vpack.c.bf16 %v1666_v53, %v1665_v62  ;;  %vm1524_vm15 = vcmp.ge.f32.partialorder %v3246_v63, 0.0  ;;  %v1287_v35 = vmul.f32 %v3346_v2, %v1255_v46  ;;  %2378 = vpow2.f32 %v1395_v0 }
 0x281   :  { %v1588_v14 = vsel %vm1524_vm15, %v1492_v38, %v1556_v39  ;;  %v1458_v7 = vmul.f32 %v2371_v9, %v1298_v12  ;;  %v1096_v59 = vmul.f32 %v3377_v22, %v1889_v54  ;;  %v1620_v6 = vmul.f32 0.5, %v3239_v52  ;;  %v3404_v49 = vpop.eup %2376  ;;  %v3410_v52 = vld [vmem:[%s3702_s2] ss:$0 sm:$0xff]  ;;  %v2229_v38 = vpop.f32.mrf.mxu1 }
 0x282   :  { %2166 = vst [vmem:[%s3703_s5 + $0x10] sm:$0xff] %v2083_v34   ;;  %v1652_v43 = vadd.f32 1.0, %v1588_v14  ;;  %vm1522_vm0 = vcmp.ge.f32.partialorder %v3271_v20, 0.0  ;;  %v1918_v24 = vadd.f32 -0.28449672, %v1157_v30  ;;  %v1585_v63 = vsel %vm1521_vm14, %v1489_v31, %v1553_v50 }
 0x283   :  { %v1490_v2 = vsub.f32 1.0, %v1458_v7  ;;  %2380 = vpow2.f32 %v1389_v36  ;;  %v1128_v41 = vadd.f32 1.4214138, %v1096_v59  ;;  %v1683_v51 = vmul.f32 %v1651_v28, %v3268_v26  ;;  %v801_v34 = vpop.f32.mrf.mxu1 }
 0x284   :  { %v1684_v25 = vmul.f32 %v1652_v43, %v1620_v6  ;;  %v1447_v55 = vmul.f32 %v2375_v17, %v1287_v35  ;;  %v3413_v9 = vadd.f32 %v3410_v52, %v737_v10  ;;  %v1047_v47 = vmul.f32 1.0614054, %v3404_v49 }
 0x285   :  { %v1554_v45 = vsub.f32 0.0, %v1490_v2  ;;  %v1160_v15 = vmul.f32 %v3377_v22, %v1128_v41  ;;  %v1335_v40 = vsub.f32 0.0, %v3340_v18  ;;  %v1649_v62 = vadd.f32 1.0, %v1585_v63  ;;  %v2216_v41 = vpop.f32.mrf.mxu0 }
 0x286   :  { %v2128_v26 = vpack.c.bf16 %v1684_v25, %v1683_v51  ;;  %v1221_v61 = vmul.f32 %v3362_v13, %v1918_v24  ;;  %v3420_v33 = vmul.f32 0.70710677, %v3413_v9  ;;  %v1904_v31 = vadd.f32 -1.4531521, %v1047_v47 }
 0x287   :  { %v1586_v19 = vsel %vm1522_vm0, %v1490_v2, %v1554_v45  ;;  %v1921_v1 = vadd.f32 -0.28449672, %v1160_v15  ;;  %v3425_v4 = vadd.f32 %v3410_v52, %v798_v48  ;;  %v1618_v60 = vmul.f32 0.5, %v3262_v32 }
 0x288   :  { %2175 = vst [vmem:[%s3703_s5 + $0x58] sm:$0xff] %v2128_v26   ;;  %v1650_v42 = vadd.f32 1.0, %v1586_v19  ;;  %v1479_v21 = vsub.f32 1.0, %v1447_v55  ;;  %v870_v58 = vand.u32 2147483647, %v3420_v33  ;;  %v1111_v20 = vmul.f32 %v3404_v49, %v1904_v31  ;;  %v750_v31 = vpop.f32.mrf.mxu0 }
 0x289   :  { %v1224_v0 = vmul.f32 %v3377_v22, %v1921_v1  ;;  %v1367_v23 = vmul.f32 %v1335_v40, %v3340_v18  ;;  %v1681_v11 = vmul.f32 %v1649_v62, %v3283_v3  ;;  %v1253_v53 = vadd.f32 0.2548296, %v1221_v61 }
 0x28a   :  { %v1682_v37 = vmul.f32 %v1650_v42, %v1618_v60  ;;  %v902_v46 = vmul.f32 0.3275911, %v870_v58  ;;  %v1143_v36 = vadd.f32 1.4214138, %v1111_v20  ;;  %v3437_v32 = vmul.f32 0.70710677, %v3425_v4 }
 0x28b   :  { %v1256_v30 = vadd.f32 0.2548296, %v1224_v0  ;;  %v1543_v39 = vsub.f32 0.0, %v1479_v21  ;;  %v1285_v3 = vmul.f32 %v3362_v13, %v1253_v53  ;;  %v1425_v14 = vmul.f32 1.442695, %v1367_v23 }
 0x28c   :  { %v2123_v50 = vpack.c.bf16 %v1682_v37, %v1681_v11  ;;  %v934_v12 = vadd.f32 1.0, %v902_v46  ;;  %v1175_v28 = vmul.f32 %v3404_v49, %v1143_v36  ;;  %v885_v18 = vand.u32 2147483647, %v3437_v32  ;;  %v2217_v46 = vpop.f32.mrf.mxu0 }
 0x28d   :  { %v1288_v54 = vmul.f32 %v3377_v22, %v1256_v30  ;;  %v2379_v35 = vpop.eup %2378  ;;  %vm1511_vm1 = vcmp.ge.f32.partialorder %v3274_v44, 0.0  ;;  %v3448_v6 = vadd.f32 %v3410_v52, %v2229_v38  ;;  %v3451_v43 = vadd.f32 %v3410_v52, %v801_v34 }
 0x28e   :  { %2174 = vst [vmem:[%s3703_s5 + $0x50] sm:$0xff] %v2123_v50   ;;  %2382 = vrcp.f32 %v934_v12  ;;  %v917_v59 = vmul.f32 0.3275911, %v885_v18  ;;  %v1575_v22 = vsel %vm1511_vm1, %v1479_v21, %v1543_v39  ;;  %v1936_v17 = vadd.f32 -0.28449672, %v1175_v28 }
 0x28f   :  { %v1448_v7 = vmul.f32 %v2379_v35, %v1288_v54  ;;  %2384 = vpow2.f32 %v1425_v14  ;;  %v3454_v13 = vmul.f32 0.70710677, %v3448_v6  ;;  %v3457_v44 = vmul.f32 0.70710677, %v3451_v43 }
 0x290   :  { %v2381_v10 = vpop.eup %2380  ;;  %v949_v63 = vadd.f32 1.0, %v917_v59  ;;  %v1639_v51 = vadd.f32 1.0, %v1575_v22  ;;  %v1607_v55 = vmul.f32 0.5, %v3265_v56  ;;  %vm1512_vm2 = vcmp.ge.f32.partialorder %v3313_v27, 0.0 }
 0x291   :  { %v1480_v24 = vsub.f32 1.0, %v1448_v7  ;;  %v1445_v2 = vmul.f32 %v2381_v10, %v1285_v3  ;;  %v1318_v48 = vsub.f32 0.0, %v870_v58  ;;  %v888_v45 = vand.u32 2147483647, %v3454_v13 }
 0x292   :  { %2386 = vrcp.f32 %v949_v63  ;;  %v1239_v47 = vmul.f32 %v3404_v49, %v1936_v17  ;;  %v886_v40 = vand.u32 2147483647, %v3457_v44  ;;  %v3465_v62 = vadd.f32 %v3410_v52, %v2216_v41  ;;  %v2232_v17 = vpop.f32.mrf.mxu1 }
 0x293   :  { %v1544_v25 = vsub.f32 0.0, %v1480_v24  ;;  %v1477_v26 = vsub.f32 1.0, %v1445_v2  ;;  %v1608_v61 = vmul.f32 0.5, %v3299_v8  ;;  %v920_v1 = vmul.f32 0.3275911, %v888_v45 }
 0x294   :  { %v1671_v56 = vmul.f32 %v1639_v51, %v1607_v55  ;;  %v918_v60 = vmul.f32 0.3275911, %v886_v40  ;;  %v3469_v27 = vmul.f32 0.70710677, %v3465_v62  ;;  %v1350_v21 = vmul.f32 %v1318_v48, %v870_v58 }
 0x295   :  { %v1576_v15 = vsel %vm1512_vm2, %v1480_v24, %v1544_v25  ;;  %v1333_v0 = vsub.f32 0.0, %v885_v18  ;;  %v952_v20 = vadd.f32 1.0, %v920_v1  ;;  %v1271_v23 = vadd.f32 0.2548296, %v1239_v47 }
 0x296   :  { %v1640_v19 = vadd.f32 1.0, %v1576_v15  ;;  %v950_v38 = vadd.f32 1.0, %v918_v60  ;;  %v3472_v11 = vand.u32 2147483647, %v3469_v27  ;;  %v1541_v37 = vsub.f32 0.0, %v1477_v26 }
 0x297   :  { %v3475_v8 = vmul.f32 0.5, %v3287_v5  ;;  %2388 = vrcp.f32 %v952_v20  ;;  %vm1509_vm3 = vcmp.ge.f32.partialorder %v3294_v29, 0.0  ;;  %v3481_v58 = vmul.f32 0.5, %v3324_v16 }
 0x298   :  { %v1672_v42 = vmul.f32 %v1640_v19, %v1608_v61  ;;  %2390 = vrcp.f32 %v950_v38  ;;  %v907_v36 = vmul.f32 0.3275911, %v3472_v11  ;;  %v1391_v50 = vmul.f32 1.442695, %v1350_v21 }
 0x299   :  { %v1365_v39 = vmul.f32 %v1333_v0, %v885_v18  ;;  %v3489_v12 = vadd.f32 %v3410_v52, %v750_v31  ;;  %v1303_v54 = vmul.f32 %v3404_v49, %v1271_v23  ;;  %v3493_v29 = vmul.f32 0.5, %v3413_v9 }
 0x29a   :  { %v2098_v53 = vpack.c.bf16 %v1672_v42, %v1671_v56  ;;  %v939_v16 = vadd.f32 1.0, %v907_v36  ;;  %v3496_v28 = vadd.f32 %v3410_v52, %v2217_v46  ;;  %v1573_v34 = vsel %vm1509_vm3, %v1477_v26, %v1541_v37  ;;  %v753_v42 = vpop.f32.mrf.mxu0 }
 0x29b   :  { %v3477_v30 = vpop.eup %2382  ;;  %v1336_v3 = vsub.f32 0.0, %v888_v45  ;;  %v3499_v14 = vmul.f32 0.70710677, %v3489_v12  ;;  %v3502_v18 = vmul.f32 0.5, %v3425_v4  ;;  %v1334_v59 = vsub.f32 0.0, %v886_v40 }
 0x29c   :  { %2169 = vst [vmem:[%s3703_s5 + $0x28] sm:$0xff] %v2098_v53   ;;  %v1030_v5 = vmul.f32 1.0614054, %v3477_v30  ;;  %v2385_v7 = vpop.eup %2384  ;;  %2392 = vrcp.f32 %v939_v16  ;;  %v3505_v49 = vmul.f32 0.70710677, %v3496_v28  ;;  %v3511_v63 = vadd.f32 1.0, %v1573_v34 }
 0x29d   :  { %2394 = vpow2.f32 %v1391_v50  ;;  %v1421_v22 = vmul.f32 1.442695, %v1365_v39  ;;  %v873_v24 = vand.u32 2147483647, %v3499_v14  ;;  %v3513_v2 = vmul.f32 %v2385_v7, %v1303_v54 }
 0x29e   :  { %v1887_v35 = vadd.f32 -1.4531521, %v1030_v5  ;;  %v876_v41 = vand.u32 2147483647, %v3505_v49  ;;  %v1368_v25 = vmul.f32 %v1336_v3, %v888_v45  ;;  %v3518_v55 = vmul.f32 0.5, %v3448_v6 }
 0x29f   :  { %v3507_v9 = vpop.eup %2386  ;;  %v905_v48 = vmul.f32 0.3275911, %v873_v24  ;;  %v1366_v47 = vmul.f32 %v1334_v59, %v886_v40  ;;  %v3521_v61 = vadd.f32 %v3410_v52, %v2232_v17  ;;  %2396 = vpow2.f32 %v1421_v22 }
 0x2a0   :  { %v1094_v10 = vmul.f32 %v3477_v30, %v1887_v35  ;;  %v1045_v4 = vmul.f32 1.0614054, %v3507_v9  ;;  %v908_v26 = vmul.f32 0.3275911, %v876_v41  ;;  %v1323_v1 = vsub.f32 0.0, %v3472_v11 }
 0x2a1   :  { %v937_v31 = vadd.f32 1.0, %v905_v48  ;;  %v1495_v56 = vsub.f32 1.0, %v3513_v2  ;;  %v3528_v6 = vmul.f32 0.70710677, %v3521_v61  ;;  %v1427_v21 = vmul.f32 1.442695, %v1368_v25 }
 0x2a2   :  { %v1126_v51 = vadd.f32 1.4214138, %v1094_v10  ;;  %v1902_v15 = vadd.f32 -1.4531521, %v1045_v4  ;;  %v940_v60 = vadd.f32 1.0, %v908_v26  ;;  %v3531_v0 = vmul.f32 0.5, %v3451_v43 }
 0x2a3   :  { %2398 = vrcp.f32 %v937_v31  ;;  %v1423_v38 = vmul.f32 1.442695, %v1366_v47  ;;  %v3536_v37 = vand.u32 2147483647, %v3528_v6  ;;  %v1355_v5 = vmul.f32 %v1323_v1, %v3472_v11 }
 0x2a4   :  { %v1158_v19 = vmul.f32 %v3477_v30, %v1126_v51  ;;  %v1109_v45 = vmul.f32 %v3507_v9, %v1902_v15  ;;  %v3533_v20 = vpop.eup %2388  ;;  %2400 = vrcp.f32 %v940_v60  ;;  %v3544_v43 = vadd.f32 %v3410_v52, %v753_v42 }
 0x2a5   :  { %v3538_v53 = vpop.eup %2390  ;;  %v1048_v36 = vmul.f32 1.0614054, %v3533_v20  ;;  %v3548_v50 = vsub.f32 0.0, %v1495_v56  ;;  %v923_v16 = vmul.f32 0.3275911, %v3536_v37  ;;  %2402 = vpow2.f32 %v1427_v21 }
 0x2a6   :  { %v1919_v40 = vadd.f32 -0.28449672, %v1158_v19  ;;  %v1141_v23 = vadd.f32 1.4214138, %v1109_v45  ;;  %v1046_v54 = vmul.f32 1.0614054, %v3538_v53  ;;  %2404 = vpow2.f32 %v1423_v38 }
 0x2a7   :  { %v1905_v35 = vadd.f32 -1.4531521, %v1048_v36  ;;  %v1321_v3 = vsub.f32 0.0, %v873_v24  ;;  %vm1510_vm4 = vcmp.ge.f32.partialorder %v3420_v33, 0.0  ;;  %v1324_v59 = vsub.f32 0.0, %v876_v41 }
 0x2a8   :  { %v1222_v46 = vmul.f32 %v3477_v30, %v1919_v40  ;;  %v1173_v39 = vmul.f32 %v3507_v9, %v1141_v23  ;;  %v1903_v7 = vadd.f32 -1.4531521, %v1046_v54  ;;  %v1401_v4 = vmul.f32 1.442695, %v1355_v5 }
 0x2a9   :  { %v3554_v10 = vpop.eup %2392  ;;  %v1112_v17 = vmul.f32 %v3533_v20, %v1905_v35  ;;  %v3559_v51 = vmul.f32 0.70710677, %v3544_v43  ;;  %v955_v26 = vadd.f32 1.0, %v923_v16  ;;  %v1353_v31 = vmul.f32 %v1321_v3, %v873_v24 }
 0x2aa   :  { %v1254_v34 = vadd.f32 0.2548296, %v1222_v46  ;;  %v1934_v11 = vadd.f32 -0.28449672, %v1173_v39  ;;  %v2395_v25 = vpop.eup %2394  ;;  %v1110_v15 = vmul.f32 %v3538_v53, %v1903_v7  ;;  %v1035_v47 = vmul.f32 1.0614054, %v3554_v10 }
 0x2ab   :  { %v1144_v1 = vadd.f32 1.4214138, %v1112_v17  ;;  %v3565_v45 = vand.u32 2147483647, %v3559_v51  ;;  %v1356_v40 = vmul.f32 %v1324_v59, %v876_v41  ;;  %2406 = vpow2.f32 %v1401_v4 }
 0x2ac   :  { %v1286_v22 = vmul.f32 %v3477_v30, %v1254_v34  ;;  %v1237_v48 = vmul.f32 %v3507_v9, %v1934_v11  ;;  %v1142_v60 = vadd.f32 1.4214138, %v1110_v15  ;;  %v1892_v42 = vadd.f32 -1.4531521, %v1035_v47  ;;  %v2397_v46 = vpop.eup %2396  ;;  %v814_v47 = vpop.f32.mrf.mxu1 }
 0x2ad   :  { %v1176_v23 = vmul.f32 %v3533_v20, %v1144_v1  ;;  %v906_v38 = vmul.f32 0.3275911, %v3565_v45  ;;  %2408 = vrcp.f32 %v955_v26  ;;  %vm1527_vm5 = vcmp.ge.f32.partialorder %v3335_v57, 0.0 }
 0x2ae   :  { %v1446_v19 = vmul.f32 %v2395_v25, %v1286_v22  ;;  %v1269_v30 = vadd.f32 0.2548296, %v1237_v48  ;;  %v1174_v5 = vmul.f32 %v3538_v53, %v1142_v60  ;;  %v1099_v24 = vmul.f32 %v3554_v10, %v1892_v42 }
 0x2af   :  { %v1937_v54 = vadd.f32 -0.28449672, %v1176_v23  ;;  %v1397_v16 = vmul.f32 1.442695, %v1353_v31  ;;  %v938_v41 = vadd.f32 1.0, %v906_v38  ;;  %vm1525_vm6 = vcmp.ge.f32.partialorder %v3437_v32, 0.0 }
 0x2b0   :  { %v1478_v21 = vsub.f32 1.0, %v1446_v19  ;;  %v1301_v36 = vmul.f32 %v3507_v9, %v1269_v30  ;;  %v3573_v34 = vpop.eup %2398  ;;  %v1935_v3 = vadd.f32 -0.28449672, %v1174_v5  ;;  %v1131_v11 = vadd.f32 1.4214138, %v1099_v24 }
 0x2b1   :  { %v1403_v7 = vmul.f32 1.442695, %v1356_v40  ;;  %v3575_v59 = vpop.eup %2400  ;;  %v1240_v22 = vmul.f32 %v3533_v20, %v1937_v54  ;;  %v1033_v17 = vmul.f32 1.0614054, %v3573_v34  ;;  %2410 = vrcp.f32 %v938_v41 }
 0x2b2   :  { %v1542_v39 = vsub.f32 0.0, %v1478_v21  ;;  %v1461_v35 = vmul.f32 %v2397_v46, %v1301_v36  ;;  %v1238_v48 = vmul.f32 %v3538_v53, %v1935_v3  ;;  %v1163_v15 = vmul.f32 %v3554_v10, %v1131_v11  ;;  %v2403_v31 = vpop.eup %2402 }
 0x2b3   :  { %v1669_v26 = vmul.f32 %v3511_v63, %v3475_v8  ;;  %v1272_v19 = vadd.f32 0.2548296, %v1240_v22  ;;  %v1890_v33 = vadd.f32 -1.4531521, %v1033_v17  ;;  %v1036_v1 = vmul.f32 1.0614054, %v3575_v59 }
 0x2b4   :  { %v1574_v9 = vsel %vm1510_vm4, %v1478_v21, %v1542_v39  ;;  %v1493_v25 = vsub.f32 1.0, %v1461_v35  ;;  %vm1528_vm7 = vcmp.ge.f32.partialorder %v3454_v13, 0.0  ;;  %v1270_v60 = vadd.f32 0.2548296, %v1238_v48  ;;  %v2405_v21 = vpop.eup %2404 }
 0x2b5   :  { %v1638_v4 = vadd.f32 1.0, %v1574_v9  ;;  %v1924_v42 = vadd.f32 -0.28449672, %v1163_v15  ;;  %v1322_v40 = vsub.f32 0.0, %v3565_v45  ;;  %v1304_v23 = vmul.f32 %v3533_v20, %v1272_v19 }
 0x2b6   :  { %vm1526_vm8 = vcmp.ge.f32.partialorder %v3457_v44, 0.0  ;;  %v1097_v8 = vmul.f32 %v3573_v34, %v1890_v33  ;;  %v1893_v63 = vadd.f32 -1.4531521, %v1036_v1  ;;  %v3594_v38 = vadd.f32 %v3410_v52, %v814_v47  ;;  %v2233_v33 = vpop.f32.mrf.mxu1 }
 0x2b7   :  { %v1670_v30 = vmul.f32 %v1638_v4, %v3493_v29  ;;  %v1557_v36 = vsub.f32 0.0, %v1493_v25  ;;  %v1302_v29 = vmul.f32 %v3538_v53, %v1270_v60  ;;  %v1227_v5 = vmul.f32 %v3554_v10, %v1924_v42 }
 0x2b8   :  { %v1464_v24 = vmul.f32 %v2403_v31, %v1304_v23  ;;  %v1129_v39 = vadd.f32 1.4214138, %v1097_v8  ;;  %v1100_v54 = vmul.f32 %v3575_v59, %v1893_v63  ;;  %2412 = vpow2.f32 %v1403_v7  ;;  %v2407_v7 = vpop.eup %2406 }
 0x2b9   :  { %v2093_v46 = vpack.c.bf16 %v1670_v30, %v1669_v26  ;;  %v1591_v20 = vsel %vm1527_vm5, %v1495_v56, %v3548_v50  ;;  %v1462_v41 = vmul.f32 %v2405_v21, %v1302_v29  ;;  %v1259_v35 = vadd.f32 0.2548296, %v1227_v5 }
 0x2ba   :  { %v1354_v53 = vmul.f32 %v1322_v40, %v3565_v45  ;;  %v1496_v3 = vsub.f32 1.0, %v1464_v24  ;;  %v1161_v11 = vmul.f32 %v3573_v34, %v1129_v39  ;;  %2414 = vpow2.f32 %v1397_v16  ;;  %v3615_v50 = vpop.eup %2408  ;;  %v817_v39 = vpop.f32.mrf.mxu1 }
 0x2bb   :  { %2168 = vst [vmem:[%s3703_s5 + $0x20] sm:$0xff] %v2093_v46   ;;  %v1132_v9 = vadd.f32 1.4214138, %v1100_v54  ;;  %v1589_v2 = vsel %vm1525_vm6, %v1493_v25, %v1557_v36  ;;  %v1494_v22 = vsub.f32 1.0, %v1462_v41  ;;  %v1291_v57 = vmul.f32 %v3554_v10, %v1259_v35 }
 0x2bc   :  { %v3613_v56 = vmul.f32 0.70710677, %v3594_v38  ;;  %v1655_v17 = vadd.f32 1.0, %v1591_v20  ;;  %v1560_v4 = vsub.f32 0.0, %v1496_v3  ;;  %v1922_v45 = vadd.f32 -0.28449672, %v1161_v11 }
 0x2bd   :  { %v1164_v48 = vmul.f32 %v3575_v59, %v1132_v9  ;;  %v1558_v15 = vsub.f32 0.0, %v1494_v22  ;;  %v1451_v16 = vmul.f32 %v2407_v7, %v1291_v57  ;;  %v1399_v47 = vmul.f32 1.442695, %v1354_v53 }
 0x2be   :  { %v3619_v26 = vand.u32 2147483647, %v3613_v56  ;;  %v1653_v32 = vadd.f32 1.0, %v1589_v2  ;;  %v1592_v10 = vsel %vm1528_vm7, %v1496_v3, %v1560_v4  ;;  %v1225_v25 = vmul.f32 %v3573_v34, %v1922_v45  ;;  %v3624_v1 = vpop.eup %2410 }
 0x2bf   :  { %v1925_v19 = vadd.f32 -0.28449672, %v1164_v48  ;;  %v1656_v31 = vadd.f32 1.0, %v1592_v10  ;;  %v1590_v30 = vsel %vm1526_vm8, %v1494_v22, %v1558_v15  ;;  %v1483_v60 = vsub.f32 1.0, %v1451_v16 }
 0x2c0   :  { %v1051_v42 = vmul.f32 1.0614054, %v3615_v50  ;;  %v1654_v40 = vadd.f32 1.0, %v1590_v30  ;;  %v1257_v21 = vadd.f32 0.2548296, %v1225_v25  ;;  %v1687_v8 = vmul.f32 %v1655_v17, %v3481_v58 }
 0x2c1   :  { %v1228_v23 = vmul.f32 %v3575_v59, %v1925_v19  ;;  %v1034_v13 = vmul.f32 1.0614054, %v3624_v1  ;;  %v1688_v63 = vmul.f32 %v1656_v31, %v3518_v55  ;;  %v921_v46 = vmul.f32 0.3275911, %v3619_v26 }
 0x2c2   :  { %v3635_v36 = vadd.f32 %v3410_v52, %v2233_v33  ;;  %v1685_v44 = vmul.f32 %v1653_v32, %v3502_v18  ;;  %v1686_v29 = vmul.f32 %v1654_v40, %v3531_v0  ;;  %v1908_v20 = vadd.f32 -1.4531521, %v1051_v42 }
 0x2c3   :  { %v1260_v5 = vadd.f32 0.2548296, %v1228_v23  ;;  %v1891_v24 = vadd.f32 -1.4531521, %v1034_v13  ;;  %v2138_v54 = vpack.c.bf16 %v1688_v63, %v1687_v8  ;;  %2416 = vpow2.f32 %v1399_v47 }
 0x2c4   :  { %v953_v41 = vadd.f32 1.0, %v921_v46  ;;  %v2133_v35 = vpack.c.bf16 %v1686_v29, %v1685_v44  ;;  %v1547_v58 = vsub.f32 0.0, %v1483_v60  ;;  %v1289_v55 = vmul.f32 %v3573_v34, %v1257_v21 }
 0x2c5   :  { %v1292_v53 = vmul.f32 %v3575_v59, %v1260_v5  ;;  %v2413_v3 = vpop.eup %2412  ;;  %2177 = vst [vmem:[%s3703_s5 + $0x68] sm:$0xff] %v2138_v54   ;;  %v1098_v18 = vmul.f32 %v3624_v1, %v1891_v24  ;;  %v3646_v0 = vadd.f32 %v3410_v52, %v817_v39  ;;  %v3652_v34 = vmul.f32 0.70710677, %v3635_v36 }
 0x2c6   :  { %2418 = vrcp.f32 %v953_v41  ;;  %2176 = vst [vmem:[%s3703_s5 + $0x60] sm:$0xff] %v2133_v35   ;;  %vm1515_vm9 = vcmp.ge.f32.partialorder %v3469_v27, 0.0  ;;  %v1115_v9 = vmul.f32 %v3615_v50, %v1908_v20  ;;  %v1339_v17 = vsub.f32 0.0, %v3536_v37 }
 0x2c7   :  { %v1452_v11 = vmul.f32 %v2413_v3, %v1292_v53  ;;  %v2415_v59 = vpop.eup %2414  ;;  %v1130_v7 = vadd.f32 1.4214138, %v1098_v18  ;;  %v1579_v2 = vsel %vm1515_vm9, %v1483_v60, %v1547_v58  ;;  %v892_v52 = vand.u32 2147483647, %v3652_v34 }
 0x2c8   :  { %v1449_v22 = vmul.f32 %v2415_v59, %v1289_v55  ;;  %v3660_v45 = vmul.f32 0.70710677, %v3646_v0  ;;  %v1611_v48 = vmul.f32 0.5, %v3465_v62  ;;  %v1643_v27 = vadd.f32 1.0, %v1579_v2 }
 0x2c9   :  { %v1484_v57 = vsub.f32 1.0, %v1452_v11  ;;  %v1162_v4 = vmul.f32 %v3624_v1, %v1130_v7  ;;  %v924_v16 = vmul.f32 0.3275911, %v892_v52  ;;  %vm1516_vm10 = vcmp.ge.f32.partialorder %v3505_v49, 0.0 }
 0x2ca   :  { %v1147_v47 = vadd.f32 1.4214138, %v1115_v9  ;;  %v1481_v10 = vsub.f32 1.0, %v1449_v22  ;;  %v890_v33 = vand.u32 2147483647, %v3660_v45  ;;  %v1612_v31 = vmul.f32 0.5, %v3496_v28 }
 0x2cb   :  { %v1548_v15 = vsub.f32 0.0, %v1484_v57  ;;  %v1923_v32 = vadd.f32 -0.28449672, %v1162_v4  ;;  %v956_v19 = vadd.f32 1.0, %v924_v16  ;;  %v1371_v60 = vmul.f32 %v1339_v17, %v3536_v37 }
 0x2cc   :  { %v1337_v62 = vsub.f32 0.0, %v3619_v26  ;;  %v922_v40 = vmul.f32 0.3275911, %v890_v33  ;;  %v1675_v21 = vmul.f32 %v1643_v27, %v1611_v48  ;;  %v1179_v23 = vmul.f32 %v3615_v50, %v1147_v47 }
 0x2cd   :  { %v1580_v25 = vsel %vm1516_vm10, %v1484_v57, %v1548_v15  ;;  %v1226_v42 = vmul.f32 %v3624_v1, %v1923_v32  ;;  %2420 = vrcp.f32 %v956_v19  ;;  %v1545_v63 = vsub.f32 0.0, %v1481_v10 }
 0x2ce   :  { %v1644_v30 = vadd.f32 1.0, %v1580_v25  ;;  %v954_v46 = vadd.f32 1.0, %v922_v40  ;;  %v1433_v29 = vmul.f32 1.442695, %v1371_v60  ;;  %v1369_v37 = vmul.f32 %v1337_v62, %v3619_v26 }
 0x2cf   :  { %v1258_v13 = vadd.f32 0.2548296, %v1226_v42  ;;  %vm1513_vm11 = vcmp.ge.f32.partialorder %v3499_v14, 0.0  ;;  %v1940_v24 = vadd.f32 -0.28449672, %v1179_v23  ;;  %v1340_v41 = vsub.f32 0.0, %v892_v52 }
 0x2d0   :  { %v1676_v49 = vmul.f32 %v1644_v30, %v1612_v31  ;;  %v2417_v8 = vpop.eup %2416  ;;  %2422 = vrcp.f32 %v954_v46  ;;  %v1577_v20 = vsel %vm1513_vm11, %v1481_v10, %v1545_v63  ;;  %v1429_v55 = vmul.f32 1.442695, %v1369_v37 }
 0x2d1   :  { %v1290_v28 = vmul.f32 %v3624_v1, %v1258_v13  ;;  %2424 = vpow2.f32 %v1433_v29  ;;  %v1641_v1 = vadd.f32 1.0, %v1577_v20  ;;  %v1243_v53 = vmul.f32 %v3615_v50, %v1940_v24 }
 0x2d2   :  { %v2108_v44 = vpack.c.bf16 %v1676_v49, %v1675_v21  ;;  %vm1514_vm12 = vcmp.ge.f32.partialorder %v3559_v51, 0.0  ;;  %v1372_v14 = vmul.f32 %v1340_v41, %v892_v52  ;;  %v1338_v18 = vsub.f32 0.0, %v890_v33 }
 0x2d3   :  { %v2419_v5 = vpop.eup %2418  ;;  %v1450_v39 = vmul.f32 %v2417_v8, %v1290_v28  ;;  %v1609_v11 = vmul.f32 0.5, %v3489_v12  ;;  %v1610_v7 = vmul.f32 0.5, %v3544_v43  ;;  %2426 = vpow2.f32 %v1429_v55 }
 0x2d4   :  { %2171 = vst [vmem:[%s3703_s5 + $0x38] sm:$0xff] %v2108_v44   ;;  %v1049_v54 = vmul.f32 1.0614054, %v2419_v5  ;;  %v1275_v17 = vadd.f32 0.2548296, %v1243_v53  ;;  %v1370_v27 = vmul.f32 %v1338_v18, %v890_v33  ;;  %vm1531_vm13 = vcmp.ge.f32.partialorder %v3528_v6, 0.0 }
 0x2d5   :  { %v1482_v35 = vsub.f32 1.0, %v1450_v39  ;;  %v1673_v57 = vmul.f32 %v1641_v1, %v1609_v11  ;;  %v1435_v16 = vmul.f32 1.442695, %v1372_v14  ;;  %vm1529_vm14 = vcmp.ge.f32.partialorder %v3613_v56, 0.0 }
 0x2d6   :  { %v1906_v58 = vadd.f32 -1.4531521, %v1049_v54  ;;  %v1307_v12 = vmul.f32 %v3615_v50, %v1275_v17  ;;  %v1431_v19 = vmul.f32 1.442695, %v1370_v27  ;;  %vm1532_vm15 = vcmp.ge.f32.partialorder %v3652_v34, 0.0 }
 0x2d7   :  { %v1546_v26 = vsub.f32 0.0, %v1482_v35  ;;  %2428 = vpow2.f32 %v1435_v16  ;;  %vm1530_vm0 = vcmp.ge.f32.partialorder %v3660_v45, 0.0  ;;  %v1626_v34 = vmul.f32 0.5, %v3646_v0 }
 0x2d8   :  { %v1113_v3 = vmul.f32 %v2419_v5, %v1906_v58  ;;  %2430 = vpow2.f32 %v1431_v19 }
 0x2d9   :  { %v1578_v59 = vsel %vm1514_vm12, %v1482_v35, %v1546_v26 }
 0x2da   :  { %v1145_v9 = vadd.f32 1.4214138, %v1113_v3  ;;  %v1642_v2 = vadd.f32 1.0, %v1578_v59  ;;  %v2421_v22 = vpop.eup %2420  ;;  %v1627_v59 = vmul.f32 0.5, %v3521_v61 }
 0x2db   :  { %v1052_v15 = vmul.f32 1.0614054, %v2421_v22 }
 0x2dc   :  { %v1177_v4 = vmul.f32 %v2419_v5, %v1145_v9  ;;  %v1674_v48 = vmul.f32 %v1642_v2, %v1610_v7  ;;  %v1628_v9 = vmul.f32 0.5, %v3635_v36 }
 0x2dd   :  { %v1909_v52 = vadd.f32 -1.4531521, %v1052_v15  ;;  %v2423_v32 = vpop.eup %2422 }
 0x2de   :  { %v1938_v47 = vadd.f32 -0.28449672, %v1177_v4  ;;  %v2103_v51 = vpack.c.bf16 %v1674_v48, %v1673_v57  ;;  %v1050_v25 = vmul.f32 1.0614054, %v2423_v32  ;;  %v2425_v30 = vpop.eup %2424  ;;  %v1625_v4 = vmul.f32 0.5, %v3594_v38 }
 0x2df   :  { %v1116_v43 = vmul.f32 %v2421_v22, %v1909_v52  ;;  %v1467_v33 = vmul.f32 %v2425_v30, %v1307_v12 }
 0x2e0   :  { %v1241_v10 = vmul.f32 %v2419_v5, %v1938_v47  ;;  %2170 = vst [vmem:[%s3703_s5 + $0x30] sm:$0xff] %v2103_v51   ;;  %v1907_v42 = vadd.f32 -1.4531521, %v1050_v25  ;;  %v2427_v23 = vpop.eup %2426 }
 0x2e1   :  { %v1148_v60 = vadd.f32 1.4214138, %v1116_v43  ;;  %v1499_v13 = vsub.f32 1.0, %v1467_v33 }
 0x2e2   :  { %v1273_v31 = vadd.f32 0.2548296, %v1241_v10  ;;  %v1114_v21 = vmul.f32 %v2423_v32, %v1907_v42 }
 0x2e3   :  { %v1180_v40 = vmul.f32 %v2421_v22, %v1148_v60  ;;  %v1563_v28 = vsub.f32 0.0, %v1499_v13 }
 0x2e4   :  { %v1305_v62 = vmul.f32 %v2419_v5, %v1273_v31  ;;  %v1146_v50 = vadd.f32 1.4214138, %v1114_v21  ;;  %v2429_v54 = vpop.eup %2428 }
 0x2e5   :  { %v1941_v49 = vadd.f32 -0.28449672, %v1180_v40  ;;  %v1595_v5 = vsel %vm1531_vm13, %v1499_v13, %v1563_v28  ;;  %v2431_v1 = vpop.eup %2430 }
 0x2e6   :  { %v1465_v8 = vmul.f32 %v2427_v23, %v1305_v62  ;;  %v1178_v46 = vmul.f32 %v2423_v32, %v1146_v50  ;;  %v1659_v3 = vadd.f32 1.0, %v1595_v5 }
 0x2e7   :  { %v1244_v63 = vmul.f32 %v2421_v22, %v1941_v49 }
 0x2e8   :  { %v1939_v29 = vadd.f32 -0.28449672, %v1178_v46  ;;  %v1497_v37 = vsub.f32 1.0, %v1465_v8  ;;  %v1691_v2 = vmul.f32 %v1659_v3, %v1627_v59 }
 0x2e9   :  { %v1276_v44 = vadd.f32 0.2548296, %v1244_v63 }
 0x2ea   :  { %v1242_v39 = vmul.f32 %v2423_v32, %v1939_v29  ;;  %v1561_v35 = vsub.f32 0.0, %v1497_v37 }
 0x2eb   :  { %v1308_v24 = vmul.f32 %v2421_v22, %v1276_v44 }
 0x2ec   :  { %v1274_v41 = vadd.f32 0.2548296, %v1242_v39  ;;  %v1593_v14 = vsel %vm1529_vm14, %v1497_v37, %v1561_v35 }
 0x2ed   :  { %v1468_v20 = vmul.f32 %v2429_v54, %v1308_v24  ;;  %v1657_v22 = vadd.f32 1.0, %v1593_v14 }
 0x2ee   :  { %v1306_v55 = vmul.f32 %v2423_v32, %v1274_v41 }
 0x2ef   :  { %v1500_v58 = vsub.f32 1.0, %v1468_v20  ;;  %v1689_v15 = vmul.f32 %v1657_v22, %v1625_v4 }
 0x2f0   :  { %v1466_v26 = vmul.f32 %v2431_v1, %v1306_v55 }
 0x2f1   :  { %v1564_v53 = vsub.f32 0.0, %v1500_v58 }
 0x2f2   :  { %v1498_v11 = vsub.f32 1.0, %v1466_v26 }
 0x2f3   :  { %v1596_v18 = vsel %vm1532_vm15, %v1500_v58, %v1564_v53 }
 0x2f4   :  { %v1660_v6 = vadd.f32 1.0, %v1596_v18  ;;  %v1562_v7 = vsub.f32 0.0, %v1498_v11 }
 0x2f6   :  { %v1692_v57 = vmul.f32 %v1660_v6, %v1628_v9  ;;  %v1594_v17 = vsel %vm1530_vm0, %v1498_v11, %v1562_v7 }
 0x2f7   :  { %v1658_v48 = vadd.f32 1.0, %v1594_v17 }
 0x2f8   :  { %v2148_v56 = vpack.c.bf16 %v1692_v57, %v1691_v2 }
 0x2f9   :  { %v1690_v61 = vmul.f32 %v1658_v48, %v1626_v34 }
 0x2fa   :  { %2179 = vst [vmem:[%s3703_s5 + $0x78] sm:$0xff] %v2148_v56  }
 0x2fb   :  { %v2143_v36 = vpack.c.bf16 %v1690_v61, %v1689_v15 }
 0x2fd   :  { %2178 = vst [vmem:[%s3703_s5 + $0x70] sm:$0xff] %v2143_v36  }

// kernel: vit_forward_intermediates.17
= control target key start
LH: loop header
LB: loop body
LE: loop exit
PB: predicated region body
PF: predicated region fallthrough
CT: control target
= control target key end

     0   :  { %vm602_vm0 = vcmask 257024   ;;  %s1277_s1 = inlined_call_operand.vmem [shape: bf16[128,32], index: 1, kind: input, shape index: {}]   ;;  %s1278_s0 = inlined_call_operand.vmem [shape: bf16[256,128], index: 0, kind: input, shape index: {}]   ;;  %s1279_s3 = inlined_call_operand.vmem [shape: bf16[256,32], index: 3, kind: input, shape index: {}]   ;;  %s1280_s2 = inlined_call_operand.vmem [shape: f32[1,32], index: 2, kind: input, shape index: {}]   ;;  %s1281_s4 = inlined_call_operand.vmem [shape: bf16[256,32], index: 4, kind: output, shape index: {}]  }
   0x1   :  { %v895_v0 = vld [vmem:[%s1277_s1 + $0x38] sm:$0xff]   ;;  %v896_v1 = vld [vmem:[%s1277_s1 + $0x30] sm:$0xff]   ;;  %v897_v2 = vld [vmem:[%s1277_s1 + $0x28] sm:$0xff]  }
   0x2   :  { %831 = vmatprep.subr.bf16.mxu0 %v895_v0  ;;  %879 = vmatprep.subr.bf16.mxu1 %v895_v0  ;;  %v898_v3 = vld [vmem:[%s1277_s1 + $0x20] sm:$0xff]   ;;  %v899_v6 = vld [vmem:[%s1277_s1 + $0x18] sm:$0xff]   ;;  %v900_v7 = vld [vmem:[%s1277_s1 + $0x10] sm:$0xff]  }
   0x3   :  { %832 = vmatpush3.bf16.msra.mxu0 %v895_v0  ;;  %887 = vmatpush3.bf16.msra.mxu1 %v895_v0  ;;  %v903_v4 = vld [vmem:[%s1278_s0] sm:$0xff]   ;;  %v901_v8 = vld [vmem:[%s1277_s1 + $0x8] sm:$0xff]   ;;  %v907_v12 = vld [vmem:[%s1278_s0 + $0x10] sm:$0xff]  }
   0x4   :  { %833 = vmatprep.subr.bf16.mxu0 %v896_v1  ;;  %880 = vmatprep.subr.bf16.mxu1 %v896_v1  ;;  %v904_v5 = vld [vmem:[%s1278_s0 + $0x40] sm:$0xff]   ;;  %v905_v10 = vld [vmem:[%s1278_s0 + $0x8] sm:$0xff]   ;;  %v908_v13 = vld [vmem:[%s1278_s0 + $0x50] sm:$0xff]  }
   0x5   :  { %847 = vmatprep.mubr.bf16.mxu0 %v903_v4  ;;  %863 = vmatprep.mubr.bf16.mxu1 %v904_v5  ;;  %v902_v9 = vld [vmem:[%s1277_s1] sm:$0xff]   ;;  %v906_v11 = vld [vmem:[%s1278_s0 + $0x48] sm:$0xff]   ;;  %v909_v14 = vld [vmem:[%s1278_s0 + $0x18] sm:$0xff]  }
   0x6   :  { %v910_v15 = vld [vmem:[%s1278_s0 + $0x58] sm:$0xff]   ;;  %v911_v16 = vld [vmem:[%s1278_s0 + $0x20] sm:$0xff]   ;;  %v913_v18 = vld [vmem:[%s1278_s0 + $0x28] sm:$0xff]  }
   0x7   :  { %834 = vmatpush3.bf16.msra.mxu0 %v896_v1  ;;  %888 = vmatpush3.bf16.msra.mxu1 %v896_v1  ;;  %v912_v17 = vld [vmem:[%s1278_s0 + $0x60] sm:$0xff]   ;;  %v914_v19 = vld [vmem:[%s1278_s0 + $0x68] sm:$0xff]   ;;  %v915_v20 = vld [vmem:[%s1278_s0 + $0x30] sm:$0xff]  }
   0x8   :  { %835 = vmatprep.subr.bf16.mxu0 %v897_v2  ;;  %881 = vmatprep.subr.bf16.mxu1 %v897_v2  ;;  %v916_v21 = vld [vmem:[%s1278_s0 + $0x70] sm:$0xff]   ;;  %v917_v22 = vld [vmem:[%s1278_s0 + $0x38] sm:$0xff]   ;;  %v792_v24 = vld [vmem:[%s1279_s3 + $0x8] sm:$0xff]  }
   0x9   :  { %v918_v23 = vld [vmem:[%s1278_s0 + $0x78] sm:$0xff]   ;;  %v800_v25 = vld [vmem:[%s1279_s3 + $0x48] sm:$0xff]   ;;  %v1025_v26 = vld [vmem:[%s1280_s2] ss:$0 sm:$0xff]  ;;  %v734_v29 = vunpack.c.l.bf16 %v792_v24  ;;  %v735_v46 = vunpack.c.h.bf16 %v792_v24 }
   0xa   :  { %v729_v27 = vld [vmem:[%s1279_s3] sm:$0xff]   ;;  %v766_v30 = vunpack.c.l.bf16 %v800_v25  ;;  %v1040_v43 = vld [vmem:[%s1279_s3 + $0x18] sm:$0xff]   ;;  %v767_v48 = vunpack.c.h.bf16 %v800_v25  ;;  %v1050_v55 = vld [vmem:[%s1279_s3 + $0x10] sm:$0xff]  }
   0xb   :  { %836 = vmatpush3.bf16.msra.mxu0 %v897_v2  ;;  %889 = vmatpush3.bf16.msra.mxu1 %v897_v2  ;;  %v799_v28 = vld [vmem:[%s1279_s3 + $0x40] sm:$0xff]   ;;  %v730_v35 = vunpack.c.l.bf16 %v729_v27  ;;  %v1045_v44 = vld [vmem:[%s1279_s3 + $0x58] sm:$0xff]   ;;  %v731_v49 = vunpack.c.h.bf16 %v729_v27  ;;  %v1055_v56 = vld [vmem:[%s1279_s3 + $0x50] sm:$0xff]   ;;  %v742_v61 = vunpack.c.l.bf16 %v1040_v43 }
   0xc   :  { %837 = vmatprep.subr.bf16.mxu0 %v898_v3  ;;  %882 = vmatprep.subr.bf16.mxu1 %v898_v3  ;;  %v762_v36 = vunpack.c.l.bf16 %v799_v28  ;;  %v763_v50 = vunpack.c.h.bf16 %v799_v28  ;;  %v774_v62 = vunpack.c.l.bf16 %v1045_v44  ;;  %v1093_v24 = vld [vmem:[%s1279_s3 + $0x68] sm:$0xff]  }
   0xf   :  { %838 = vmatpush3.bf16.msra.mxu0 %v898_v3  ;;  %890 = vmatpush3.bf16.msra.mxu1 %v898_v3 }
  0x10   :  { %839 = vmatprep.subr.bf16.mxu0 %v899_v6  ;;  %883 = vmatprep.subr.bf16.mxu1 %v899_v6 }
  0x13   :  { %840 = vmatpush3.bf16.msra.mxu0 %v899_v6  ;;  %891 = vmatpush3.bf16.msra.mxu1 %v899_v6 }
  0x14   :  { %841 = vmatprep.subr.bf16.mxu0 %v900_v7  ;;  %884 = vmatprep.subr.bf16.mxu1 %v900_v7 }
  0x17   :  { %842 = vmatpush3.bf16.msra.mxu0 %v900_v7  ;;  %892 = vmatpush3.bf16.msra.mxu1 %v900_v7  ;;  %v738_v7 = vunpack.c.l.bf16 %v1050_v55 }
  0x18   :  { %843 = vmatprep.subr.bf16.mxu0 %v901_v8  ;;  %885 = vmatprep.subr.bf16.mxu1 %v901_v8 }
  0x1b   :  { %844 = vmatpush3.bf16.msra.mxu0 %v901_v8  ;;  %893 = vmatpush3.bf16.msra.mxu1 %v901_v8  ;;  %v770_v8 = vunpack.c.l.bf16 %v1055_v56 }
  0x1c   :  { %845 = vmatprep.subr.bf16.mxu0 %v902_v9  ;;  %886 = vmatprep.subr.bf16.mxu1 %v902_v9 }
  0x1f   :  { %846 = vmatpush3.bf16.msra.mxu0 %v902_v9  ;;  %894 = vmatpush3.bf16.msra.mxu1 %v902_v9 }
  0x22   :  { %848 = vmatmul.mubr.bf16.vlgmr.msra.gmra.mxu0 %v905_v10  ;;  %864 = vmatmul.mubr.bf16.vlgmr.msra.gmra.mxu1 %v906_v11 }
  0x23   :  { %851 = vmatprep.mubr.bf16.mxu0 %v907_v12  ;;  %867 = vmatprep.mubr.bf16.mxu1 %v908_v13 }
  0x2a   :  { %852 = vmatmul.mubr.bf16.gmra.mxu0 %v909_v14  ;;  %868 = vmatmul.mubr.bf16.gmra.mxu1 %v910_v15 }
  0x2b   :  { %855 = vmatprep.mubr.bf16.mxu0 %v911_v16  ;;  %871 = vmatprep.mubr.bf16.mxu1 %v912_v17  ;;  %v743_v17 = vunpack.c.h.bf16 %v1040_v43  ;;  %v782_v43 = vunpack.c.l.bf16 %v1093_v24 }
  0x32   :  { %856 = vmatmul.mubr.bf16.gmra.mxu0 %v913_v18  ;;  %872 = vmatmul.mubr.bf16.gmra.mxu1 %v914_v19  ;;  %v775_v18 = vunpack.c.h.bf16 %v1045_v44 }
  0x33   :  { %859 = vmatprep.mubr.bf16.mxu0 %v915_v20  ;;  %875 = vmatprep.mubr.bf16.mxu1 %v916_v21 }
  0x3a   :  { %860 = vmatmul.mubr.bf16.gmra.mxu0 %v917_v22  ;;  %876 = vmatmul.mubr.bf16.gmra.mxu1 %v918_v23  ;;  %v1088_v23 = vld [vmem:[%s1279_s3 + $0x28] sm:$0xff]  }
  0xe2   :  { %v849_v31 = vpop.f32.mrf.mxu0  ;;  %v865_v32 = vpop.f32.mrf.mxu1 }
  0xe3   :  { %v260_v33 = vadd.f32 %v849_v31, %v1025_v26  ;;  %v324_v34 = vadd.f32 %v865_v32, %v1025_v26  ;;  %v771_v31 = vunpack.c.h.bf16 %v1055_v56 }
  0xe4   :  { %v251_v37 = vpop.f32.mrf.mxu0  ;;  %v315_v38 = vpop.f32.mrf.mxu1 }
  0xe5   :  { %v444_v39 = vadd.f32 %v734_v29, %v260_v33  ;;  %v460_v40 = vadd.f32 %v766_v30, %v324_v34  ;;  %v252_v41 = vadd.f32 %v1025_v26, %v251_v37  ;;  %v316_v42 = vadd.f32 %v1025_v26, %v315_v38  ;;  %v1125_v37 = vld [vmem:[%s1279_s3 + $0x60] sm:$0xff]  }
  0xe6   :  { %v850_v45 = vpop.f32.mrf.mxu0  ;;  %v866_v47 = vpop.f32.mrf.mxu1  ;;  %v739_v30 = vunpack.c.h.bf16 %v1050_v55 }
  0xe7   :  { %v698_v51 = vpack.c.bf16 %v444_v39, %v444_v39  ;;  %v714_v52 = vpack.c.bf16 %v460_v40, %v460_v40  ;;  %v442_v53 = vadd.f32 %v730_v35, %v252_v41  ;;  %v458_v54 = vadd.f32 %v762_v36, %v316_v42  ;;  %v1120_v36 = vld [vmem:[%s1279_s3 + $0x20] sm:$0xff]  }
  0xe8   :  { %v263_v57 = vadd.f32 %v850_v45, %v1025_v26  ;;  %v327_v58 = vadd.f32 %v866_v47, %v1025_v26  ;;  %v254_v59 = vpop.f32.mrf.mxu0  ;;  %v318_v60 = vpop.f32.mrf.mxu1  ;;  %v750_v42 = vunpack.c.l.bf16 %v1088_v23 }
  0xe9   :  { %605 = vst.msk [vmem:[%s1281_s4 + $0x8] sm:$0xf] %vm602_vm0, %v698_v51  ;;  %621 = vst.msk [vmem:[%s1281_s4 + $0x48] sm:$0xf] %vm602_vm0, %v714_v52  ;;  %v696_v63 = vpack.c.bf16 %v442_v53, %v442_v53  ;;  %v712_v0 = vpack.c.bf16 %v458_v54, %v458_v54  ;;  %v255_v1 = vadd.f32 %v1025_v26, %v254_v59  ;;  %v746_v52 = vunpack.c.l.bf16 %v1120_v36 }
  0xea   :  { %v319_v2 = vadd.f32 %v1025_v26, %v318_v60  ;;  %v445_v3 = vadd.f32 %v735_v46, %v263_v57  ;;  %v461_v4 = vadd.f32 %v767_v48, %v327_v58  ;;  %v853_v5 = vpop.f32.mrf.mxu0  ;;  %v869_v6 = vpop.f32.mrf.mxu1  ;;  %v778_v53 = vunpack.c.l.bf16 %v1125_v37 }
  0xeb   :  { %603 = vst.msk [vmem:[%s1281_s4] sm:$0xf] %vm602_vm0, %v696_v63  ;;  %619 = vst.msk [vmem:[%s1281_s4 + $0x40] sm:$0xf] %vm602_vm0, %v712_v0  ;;  %v443_v9 = vadd.f32 %v731_v49, %v255_v1  ;;  %v276_v11 = vadd.f32 %v853_v5, %v1025_v26  ;;  %v340_v12 = vadd.f32 %v869_v6, %v1025_v26  ;;  %v783_v63 = vunpack.c.h.bf16 %v1093_v24  ;;  %v1171_v5 = vld [vmem:[%s1279_s3 + $0x78] sm:$0xff]  }
  0xec   :  { %v459_v10 = vadd.f32 %v763_v50, %v319_v2  ;;  %v699_v13 = vpack.c.bf16 %v445_v3, %v445_v3  ;;  %v715_v14 = vpack.c.bf16 %v461_v4, %v461_v4  ;;  %v267_v15 = vpop.f32.mrf.mxu0  ;;  %v331_v16 = vpop.f32.mrf.mxu1  ;;  %v1166_v4 = vld [vmem:[%s1279_s3 + $0x38] sm:$0xff]  }
  0xed   :  { %v697_v19 = vpack.c.bf16 %v443_v9, %v443_v9  ;;  %v448_v21 = vadd.f32 %v742_v61, %v276_v11  ;;  %v464_v22 = vadd.f32 %v774_v62, %v340_v12  ;;  %v268_v25 = vadd.f32 %v1025_v26, %v267_v15 }
  0xee   :  { %v713_v20 = vpack.c.bf16 %v459_v10, %v459_v10  ;;  %606 = vst.msk [vmem:[%s1281_s4 + $0xc] sm:$0xf] %vm602_vm0, %v699_v13  ;;  %622 = vst.msk [vmem:[%s1281_s4 + $0x4c] sm:$0xf] %vm602_vm0, %v715_v14  ;;  %v332_v27 = vadd.f32 %v1025_v26, %v331_v16  ;;  %v854_v28 = vpop.f32.mrf.mxu0  ;;  %v870_v29 = vpop.f32.mrf.mxu1  ;;  %v751_v62 = vunpack.c.h.bf16 %v1088_v23  ;;  %v747_v10 = vunpack.c.h.bf16 %v1120_v36  ;;  %v1188_v16 = vld [vmem:[%s1279_s3 + $0x30] sm:$0xff]  }
  0xef   :  { %604 = vst.msk [vmem:[%s1281_s4 + $0x4] sm:$0xf] %vm602_vm0, %v697_v19  ;;  %v702_v32 = vpack.c.bf16 %v448_v21, %v448_v21  ;;  %v718_v33 = vpack.c.bf16 %v464_v22, %v464_v22  ;;  %v279_v34 = vadd.f32 %v854_v28, %v1025_v26  ;;  %v343_v35 = vadd.f32 %v870_v29, %v1025_v26 }
  0xf0   :  { %620 = vst.msk [vmem:[%s1281_s4 + $0x44] sm:$0xf] %vm602_vm0, %v713_v20  ;;  %v446_v38 = vadd.f32 %v738_v7, %v268_v25  ;;  %v462_v39 = vadd.f32 %v770_v8, %v332_v27  ;;  %v270_v40 = vpop.f32.mrf.mxu0  ;;  %v334_v41 = vpop.f32.mrf.mxu1  ;;  %v779_v11 = vunpack.c.h.bf16 %v1125_v37  ;;  %v758_v22 = vunpack.c.l.bf16 %v1166_v4 }
  0xf1   :  { %609 = vst.msk [vmem:[%s1281_s4 + $0x18] sm:$0xf] %vm602_vm0, %v702_v32  ;;  %625 = vst.msk [vmem:[%s1281_s4 + $0x58] sm:$0xf] %vm602_vm0, %v718_v33  ;;  %v449_v44 = vadd.f32 %v743_v17, %v279_v34  ;;  %v465_v45 = vadd.f32 %v775_v18, %v343_v35  ;;  %v271_v46 = vadd.f32 %v1025_v26, %v270_v40  ;;  %v1193_v17 = vld [vmem:[%s1279_s3 + $0x70] sm:$0xff]   ;;  %v790_v23 = vunpack.c.l.bf16 %v1171_v5 }
  0xf2   :  { %v335_v47 = vadd.f32 %v1025_v26, %v334_v41  ;;  %v700_v48 = vpack.c.bf16 %v446_v38, %v446_v38  ;;  %v716_v49 = vpack.c.bf16 %v462_v39, %v462_v39  ;;  %v857_v50 = vpop.f32.mrf.mxu0  ;;  %v873_v51 = vpop.f32.mrf.mxu1  ;;  %v754_v33 = vunpack.c.l.bf16 %v1188_v16 }
  0xf3   :  { %v703_v54 = vpack.c.bf16 %v449_v44, %v449_v44  ;;  %v719_v55 = vpack.c.bf16 %v465_v45, %v465_v45  ;;  %v447_v56 = vadd.f32 %v739_v30, %v271_v46  ;;  %v292_v58 = vadd.f32 %v857_v50, %v1025_v26 }
  0xf4   :  { %v463_v57 = vadd.f32 %v771_v31, %v335_v47  ;;  %607 = vst.msk [vmem:[%s1281_s4 + $0x10] sm:$0xf] %vm602_vm0, %v700_v48  ;;  %623 = vst.msk [vmem:[%s1281_s4 + $0x50] sm:$0xf] %vm602_vm0, %v716_v49  ;;  %v356_v59 = vadd.f32 %v873_v51, %v1025_v26  ;;  %v283_v60 = vpop.f32.mrf.mxu0  ;;  %v347_v61 = vpop.f32.mrf.mxu1  ;;  %v786_v34 = vunpack.c.l.bf16 %v1193_v17  ;;  %v791_v44 = vunpack.c.h.bf16 %v1171_v5 }
  0xf5   :  { %610 = vst.msk [vmem:[%s1281_s4 + $0x1c] sm:$0xf] %vm602_vm0, %v703_v54  ;;  %626 = vst.msk [vmem:[%s1281_s4 + $0x5c] sm:$0xf] %vm602_vm0, %v719_v55  ;;  %v701_v0 = vpack.c.bf16 %v447_v56, %v447_v56  ;;  %v284_v2 = vadd.f32 %v1025_v26, %v283_v60  ;;  %v348_v3 = vadd.f32 %v1025_v26, %v347_v61  ;;  %v787_v54 = vunpack.c.h.bf16 %v1193_v17 }
  0xf6   :  { %v717_v1 = vpack.c.bf16 %v463_v57, %v463_v57  ;;  %v452_v6 = vadd.f32 %v750_v42, %v292_v58  ;;  %v468_v7 = vadd.f32 %v782_v43, %v356_v59  ;;  %v858_v8 = vpop.f32.mrf.mxu0  ;;  %v874_v9 = vpop.f32.mrf.mxu1  ;;  %v759_v43 = vunpack.c.h.bf16 %v1166_v4 }
  0xf7   :  { %608 = vst.msk [vmem:[%s1281_s4 + $0x14] sm:$0xf] %vm602_vm0, %v701_v0  ;;  %v450_v12 = vadd.f32 %v746_v52, %v284_v2  ;;  %v466_v13 = vadd.f32 %v778_v53, %v348_v3  ;;  %v295_v14 = vadd.f32 %v858_v8, %v1025_v26  ;;  %v359_v15 = vadd.f32 %v874_v9, %v1025_v26 }
  0xf8   :  { %624 = vst.msk [vmem:[%s1281_s4 + $0x54] sm:$0xf] %vm602_vm0, %v717_v1  ;;  %v706_v18 = vpack.c.bf16 %v452_v6, %v452_v6  ;;  %v722_v19 = vpack.c.bf16 %v468_v7, %v468_v7  ;;  %v286_v20 = vpop.f32.mrf.mxu0  ;;  %v350_v21 = vpop.f32.mrf.mxu1  ;;  %v755_v53 = vunpack.c.h.bf16 %v1188_v16 }
  0xf9   :  { %v704_v24 = vpack.c.bf16 %v450_v12, %v450_v12  ;;  %v720_v25 = vpack.c.bf16 %v466_v13, %v466_v13  ;;  %v453_v27 = vadd.f32 %v751_v62, %v295_v14  ;;  %v469_v28 = vadd.f32 %v783_v63, %v359_v15 }
  0xfa   :  { %613 = vst.msk [vmem:[%s1281_s4 + $0x28] sm:$0xf] %vm602_vm0, %v706_v18  ;;  %629 = vst.msk [vmem:[%s1281_s4 + $0x68] sm:$0xf] %vm602_vm0, %v722_v19  ;;  %v287_v29 = vadd.f32 %v1025_v26, %v286_v20  ;;  %v351_v30 = vadd.f32 %v1025_v26, %v350_v21  ;;  %v861_v31 = vpop.f32.mrf.mxu0  ;;  %v877_v32 = vpop.f32.mrf.mxu1 }
  0xfb   :  { %611 = vst.msk [vmem:[%s1281_s4 + $0x20] sm:$0xf] %vm602_vm0, %v704_v24  ;;  %627 = vst.msk [vmem:[%s1281_s4 + $0x60] sm:$0xf] %vm602_vm0, %v720_v25  ;;  %v707_v35 = vpack.c.bf16 %v453_v27, %v453_v27  ;;  %v723_v36 = vpack.c.bf16 %v469_v28, %v469_v28  ;;  %v308_v37 = vadd.f32 %v861_v31, %v1025_v26 }
  0xfc   :  { %v372_v38 = vadd.f32 %v877_v32, %v1025_v26  ;;  %v451_v39 = vadd.f32 %v747_v10, %v287_v29  ;;  %v467_v40 = vadd.f32 %v779_v11, %v351_v30  ;;  %v299_v41 = vpop.f32.mrf.mxu0  ;;  %v363_v42 = vpop.f32.mrf.mxu1 }
  0xfd   :  { %614 = vst.msk [vmem:[%s1281_s4 + $0x2c] sm:$0xf] %vm602_vm0, %v707_v35  ;;  %630 = vst.msk [vmem:[%s1281_s4 + $0x6c] sm:$0xf] %vm602_vm0, %v723_v36  ;;  %v456_v45 = vadd.f32 %v758_v22, %v308_v37  ;;  %v300_v47 = vadd.f32 %v1025_v26, %v299_v41  ;;  %v364_v48 = vadd.f32 %v1025_v26, %v363_v42 }
  0xfe   :  { %v472_v46 = vadd.f32 %v790_v23, %v372_v38  ;;  %v705_v49 = vpack.c.bf16 %v451_v39, %v451_v39  ;;  %v721_v50 = vpack.c.bf16 %v467_v40, %v467_v40  ;;  %v862_v51 = vpop.f32.mrf.mxu0  ;;  %v878_v52 = vpop.f32.mrf.mxu1 }
  0xff   :  { %v710_v55 = vpack.c.bf16 %v456_v45, %v456_v45  ;;  %v454_v57 = vadd.f32 %v754_v33, %v300_v47  ;;  %v470_v58 = vadd.f32 %v786_v34, %v364_v48  ;;  %v311_v59 = vadd.f32 %v862_v51, %v1025_v26 }
 0x100   :  { %v726_v56 = vpack.c.bf16 %v472_v46, %v472_v46  ;;  %612 = vst.msk [vmem:[%s1281_s4 + $0x24] sm:$0xf] %vm602_vm0, %v705_v49  ;;  %628 = vst.msk [vmem:[%s1281_s4 + $0x64] sm:$0xf] %vm602_vm0, %v721_v50  ;;  %v375_v60 = vadd.f32 %v878_v52, %v1025_v26  ;;  %v302_v61 = vpop.f32.mrf.mxu0  ;;  %v366_v62 = vpop.f32.mrf.mxu1 }
 0x101   :  { %617 = vst.msk [vmem:[%s1281_s4 + $0x38] sm:$0xf] %vm602_vm0, %v710_v55  ;;  %v708_v63 = vpack.c.bf16 %v454_v57, %v454_v57  ;;  %v724_v0 = vpack.c.bf16 %v470_v58, %v470_v58  ;;  %v303_v1 = vadd.f32 %v1025_v26, %v302_v61  ;;  %v367_v2 = vadd.f32 %v1025_v26, %v366_v62 }
 0x102   :  { %633 = vst.msk [vmem:[%s1281_s4 + $0x78] sm:$0xf] %vm602_vm0, %v726_v56  ;;  %v457_v3 = vadd.f32 %v759_v43, %v311_v59  ;;  %v473_v4 = vadd.f32 %v791_v44, %v375_v60 }
 0x103   :  { %615 = vst.msk [vmem:[%s1281_s4 + $0x30] sm:$0xf] %vm602_vm0, %v708_v63  ;;  %631 = vst.msk [vmem:[%s1281_s4 + $0x70] sm:$0xf] %vm602_vm0, %v724_v0  ;;  %v455_v5 = vadd.f32 %v755_v53, %v303_v1  ;;  %v471_v6 = vadd.f32 %v787_v54, %v367_v2 }
 0x104   :  { %v711_v7 = vpack.c.bf16 %v457_v3, %v457_v3  ;;  %v727_v8 = vpack.c.bf16 %v473_v4, %v473_v4 }
 0x105   :  { %v709_v9 = vpack.c.bf16 %v455_v5, %v455_v5  ;;  %v725_v10 = vpack.c.bf16 %v471_v6, %v471_v6 }
 0x106   :  { %618 = vst.msk [vmem:[%s1281_s4 + $0x3c] sm:$0xf] %vm602_vm0, %v711_v7  ;;  %634 = vst.msk [vmem:[%s1281_s4 + $0x7c] sm:$0xf] %vm602_vm0, %v727_v8 }
 0x107   :  { %616 = vst.msk [vmem:[%s1281_s4 + $0x34] sm:$0xf] %vm602_vm0, %v709_v9  ;;  %632 = vst.msk [vmem:[%s1281_s4 + $0x74] sm:$0xf] %vm602_vm0, %v725_v10 }

// kernel: vit_forward_intermediates.23
= control target key start
LH: loop header
LB: loop body
LE: loop exit
PB: predicated region body
PF: predicated region fallthrough
CT: control target
= control target key end

     0   :  { %vm78_vm0 = vcmask 261120   ;;  %s1441_s0 = inlined_call_operand.vmem [shape: bf16[256,32], index: 0, kind: input, shape index: {}]   ;;  %s1442_s1 = inlined_call_operand.vmem [shape: f32[1,32], index: 1, kind: input, shape index: {}]   ;;  %s1443_s2 = inlined_call_operand.vmem [shape: f32[1,32], index: 2, kind: input, shape index: {}]   ;;  %s1444_s3 = inlined_call_operand.vmem [shape: f32[256,32], index: 3, kind: output, shape index: {}]  }
   0x1   :  { %v778_v0 = vld [vmem:[%s1441_s0] sm:$0xff]   ;;  %v783_v1 = vld [vmem:[%s1441_s0 + $0x8] sm:$0xff]   ;;  %v792_v6 = vld [vmem:[%s1441_s0 + $0x10] sm:$0xff]  }
   0x2   :  { %v614_v2 = vunpack.c.l.bf16 %v778_v0  ;;  %v618_v3 = vunpack.c.l.bf16 %v783_v1  ;;  %v615_v4 = vunpack.c.h.bf16 %v778_v0  ;;  %v619_v5 = vunpack.c.h.bf16 %v783_v1  ;;  %v811_v13 = vld [vmem:[%s1441_s0 + $0x18] sm:$0xff]   ;;  %v824_v18 = vld [vmem:[%s1441_s0 + $0x20] sm:$0xff]   ;;  %v837_v23 = vld [vmem:[%s1441_s0 + $0x28] sm:$0xff]  }
   0x3   :  { %v622_v11 = vunpack.c.l.bf16 %v792_v6  ;;  %v623_v12 = vunpack.c.h.bf16 %v792_v6  ;;  %v626_v16 = vunpack.c.l.bf16 %v811_v13  ;;  %v627_v17 = vunpack.c.h.bf16 %v811_v13  ;;  %v850_v28 = vld [vmem:[%s1441_s0 + $0x30] sm:$0xff]   ;;  %v863_v33 = vld [vmem:[%s1441_s0 + $0x38] sm:$0xff]   ;;  %v876_v38 = vld [vmem:[%s1441_s0 + $0x40] sm:$0xff]  }
   0x4   :  { %v79_v7 = vsel %vm78_vm0, %v614_v2, 0.0  ;;  %v85_v8 = vsel %vm78_vm0, %v618_v3, 0.0  ;;  %v82_v9 = vsel %vm78_vm0, %v615_v4, 0.0  ;;  %v88_v10 = vsel %vm78_vm0, %v619_v5, 0.0  ;;  %v889_v43 = vld [vmem:[%s1441_s0 + $0x48] sm:$0xff]   ;;  %v902_v48 = vld [vmem:[%s1441_s0 + $0x50] sm:$0xff]  }
   0x5   :  { %80 = vadd.xlane.f32.xlu0 %v79_v7  ;;  %86 = vadd.xlane.f32.xlu1 %v85_v8  ;;  %v91_v14 = vsel %vm78_vm0, %v622_v11, 0.0  ;;  %v94_v15 = vsel %vm78_vm0, %v623_v12, 0.0  ;;  %v97_v19 = vsel %vm78_vm0, %v626_v16, 0.0  ;;  %v100_v20 = vsel %vm78_vm0, %v627_v17, 0.0  ;;  %v915_v53 = vld [vmem:[%s1441_s0 + $0x58] sm:$0xff]   ;;  %v928_v58 = vld [vmem:[%s1441_s0 + $0x60] sm:$0xff]  }
   0x6   :  { %v630_v21 = vunpack.c.l.bf16 %v824_v18  ;;  %v631_v22 = vunpack.c.h.bf16 %v824_v18  ;;  %v634_v26 = vunpack.c.l.bf16 %v837_v23  ;;  %v635_v27 = vunpack.c.h.bf16 %v837_v23  ;;  %v941_v63 = vld [vmem:[%s1441_s0 + $0x68] sm:$0xff]  }
   0x7   :  { %v638_v31 = vunpack.c.l.bf16 %v850_v28  ;;  %v639_v32 = vunpack.c.h.bf16 %v850_v28  ;;  %v642_v36 = vunpack.c.l.bf16 %v863_v33  ;;  %v643_v37 = vunpack.c.h.bf16 %v863_v33 }
   0x8   :  { %v103_v24 = vsel %vm78_vm0, %v630_v21, 0.0  ;;  %v106_v25 = vsel %vm78_vm0, %v631_v22, 0.0  ;;  %v109_v29 = vsel %vm78_vm0, %v634_v26, 0.0  ;;  %v112_v30 = vsel %vm78_vm0, %v635_v27, 0.0 }
   0x9   :  { %83 = vadd.xlane.f32.xlu0 %v82_v9  ;;  %89 = vadd.xlane.f32.xlu1 %v88_v10  ;;  %v115_v34 = vsel %vm78_vm0, %v638_v31, 0.0  ;;  %v118_v35 = vsel %vm78_vm0, %v639_v32, 0.0  ;;  %v121_v39 = vsel %vm78_vm0, %v642_v36, 0.0  ;;  %v124_v40 = vsel %vm78_vm0, %v643_v37, 0.0 }
   0xa   :  { %v646_v41 = vunpack.c.l.bf16 %v876_v38  ;;  %v647_v42 = vunpack.c.h.bf16 %v876_v38  ;;  %v650_v46 = vunpack.c.l.bf16 %v889_v43  ;;  %v651_v47 = vunpack.c.h.bf16 %v889_v43 }
   0xb   :  { %v654_v51 = vunpack.c.l.bf16 %v902_v48  ;;  %v655_v52 = vunpack.c.h.bf16 %v902_v48  ;;  %v658_v56 = vunpack.c.l.bf16 %v915_v53  ;;  %v659_v57 = vunpack.c.h.bf16 %v915_v53 }
   0xc   :  { %v127_v44 = vsel %vm78_vm0, %v646_v41, 0.0  ;;  %v130_v45 = vsel %vm78_vm0, %v647_v42, 0.0  ;;  %v133_v49 = vsel %vm78_vm0, %v650_v46, 0.0  ;;  %v136_v50 = vsel %vm78_vm0, %v651_v47, 0.0 }
   0xd   :  { %92 = vadd.xlane.f32.xlu0 %v91_v14  ;;  %95 = vadd.xlane.f32.xlu1 %v94_v15  ;;  %v139_v54 = vsel %vm78_vm0, %v654_v51, 0.0  ;;  %v142_v55 = vsel %vm78_vm0, %v655_v52, 0.0  ;;  %v145_v59 = vsel %vm78_vm0, %v658_v56, 0.0  ;;  %v148_v60 = vsel %vm78_vm0, %v659_v57, 0.0  ;;  %v954_v14 = vld [vmem:[%s1441_s0 + $0x70] sm:$0xff]  }
   0xe   :  { %v662_v61 = vunpack.c.l.bf16 %v928_v58  ;;  %v663_v62 = vunpack.c.h.bf16 %v928_v58  ;;  %v666_v9 = vunpack.c.l.bf16 %v941_v63  ;;  %v667_v10 = vunpack.c.h.bf16 %v941_v63 }
  0x10   :  { %v151_v7 = vsel %vm78_vm0, %v662_v61, 0.0  ;;  %v154_v8 = vsel %vm78_vm0, %v663_v62, 0.0  ;;  %v157_v15 = vsel %vm78_vm0, %v666_v9, 0.0 }
  0x11   :  { %98 = vadd.xlane.f32.xlu0 %v97_v19  ;;  %101 = vadd.xlane.f32.xlu1 %v100_v20  ;;  %v160_v19 = vsel %vm78_vm0, %v667_v10, 0.0  ;;  %v670_v20 = vunpack.c.l.bf16 %v954_v14 }
  0x15   :  { %104 = vadd.xlane.f32.xlu0 %v103_v24  ;;  %107 = vadd.xlane.f32.xlu1 %v106_v25  ;;  %v671_v24 = vunpack.c.h.bf16 %v954_v14  ;;  %v967_v25 = vld [vmem:[%s1441_s0 + $0x78] sm:$0xff]  }
  0x19   :  { %110 = vadd.xlane.f32.xlu0 %v109_v29  ;;  %113 = vadd.xlane.f32.xlu1 %v112_v30  ;;  %v163_v29 = vsel %vm78_vm0, %v670_v20, 0.0  ;;  %v166_v30 = vsel %vm78_vm0, %v671_v24, 0.0 }
  0x1d   :  { %116 = vadd.xlane.f32.xlu0 %v115_v34  ;;  %119 = vadd.xlane.f32.xlu1 %v118_v35  ;;  %v674_v34 = vunpack.c.l.bf16 %v967_v25  ;;  %v675_v35 = vunpack.c.h.bf16 %v967_v25 }
  0x21   :  { %122 = vadd.xlane.f32.xlu0 %v121_v39  ;;  %125 = vadd.xlane.f32.xlu1 %v124_v40  ;;  %v169_v39 = vsel %vm78_vm0, %v674_v34, 0.0  ;;  %v172_v40 = vsel %vm78_vm0, %v675_v35, 0.0 }
  0x25   :  { %128 = vadd.xlane.f32.xlu0 %v127_v44  ;;  %131 = vadd.xlane.f32.xlu1 %v130_v45 }
  0x29   :  { %134 = vadd.xlane.f32.xlu0 %v133_v49  ;;  %137 = vadd.xlane.f32.xlu1 %v136_v50 }
  0x2d   :  { %140 = vadd.xlane.f32.xlu0 %v139_v54  ;;  %143 = vadd.xlane.f32.xlu1 %v142_v55 }
  0x31   :  { %146 = vadd.xlane.f32.xlu0 %v145_v59  ;;  %149 = vadd.xlane.f32.xlu1 %v148_v60 }
  0x35   :  { %152 = vadd.xlane.f32.xlu0 %v151_v7  ;;  %155 = vadd.xlane.f32.xlu1 %v154_v8 }
  0x39   :  { %158 = vadd.xlane.f32.xlu0 %v157_v15  ;;  %161 = vadd.xlane.f32.xlu1 %v160_v19 }
  0x3d   :  { %164 = vadd.xlane.f32.xlu0 %v163_v29  ;;  %167 = vadd.xlane.f32.xlu1 %v166_v30 }
  0x41   :  { %170 = vadd.xlane.f32.xlu0 %v169_v39  ;;  %173 = vadd.xlane.f32.xlu1 %v172_v40 }
  0x8e   :  { %v81_v44 = vpop.xlane.xlu0 %80  ;;  %v87_v45 = vpop.xlane.xlu1 %86 }
  0x8f   :  { %v176_v49 = vmul.f32 0.03125, %v81_v44  ;;  %v178_v50 = vmul.f32 0.03125, %v87_v45 }
  0x91   :  { %v985_v54 = vsub.f32 %v614_v2, %v176_v49  ;;  %v989_v55 = vsub.f32 %v618_v3, %v178_v50 }
  0x92   :  { %v84_v59 = vpop.xlane.xlu0 %83  ;;  %v90_v60 = vpop.xlane.xlu1 %89 }
  0x93   :  { %v177_v7 = vmul.f32 0.03125, %v84_v59  ;;  %v179_v8 = vmul.f32 0.03125, %v90_v60  ;;  %v240_v15 = vmul.f32 %v985_v54, %v985_v54  ;;  %v242_v19 = vmul.f32 %v989_v55, %v989_v55 }
  0x95   :  { %v997_v29 = vsub.f32 %v615_v4, %v177_v7  ;;  %v1001_v2 = vsub.f32 %v619_v5, %v179_v8  ;;  %v272_v3 = vsel %vm78_vm0, %v240_v15, 0.0  ;;  %v278_v40 = vsel %vm78_vm0, %v242_v19, 0.0 }
  0x96   :  { %273 = vadd.xlane.f32.xlu0 %v272_v3  ;;  %v93_v30 = vpop.xlane.xlu0 %92  ;;  %v96_v39 = vpop.xlane.xlu1 %95 }
  0x97   :  { %v180_v44 = vmul.f32 0.03125, %v93_v30  ;;  %v181_v45 = vmul.f32 0.03125, %v96_v39  ;;  %v241_v49 = vmul.f32 %v997_v29, %v997_v29  ;;  %v243_v0 = vmul.f32 %v1001_v2, %v1001_v2 }
  0x99   :  { %v1011_v1 = vsub.f32 %v622_v11, %v180_v44  ;;  %v1015_v4 = vsub.f32 %v623_v12, %v181_v45  ;;  %v275_v5 = vsel %vm78_vm0, %v241_v49, 0.0  ;;  %v281_v60 = vsel %vm78_vm0, %v243_v0, 0.0 }
  0x9a   :  { %279 = vadd.xlane.f32.xlu0 %v278_v40  ;;  %276 = vadd.xlane.f32.xlu1 %v275_v5  ;;  %v99_v50 = vpop.xlane.xlu0 %98  ;;  %v102_v59 = vpop.xlane.xlu1 %101 }
  0x9b   :  { %v182_v7 = vmul.f32 0.03125, %v99_v50  ;;  %v183_v8 = vmul.f32 0.03125, %v102_v59  ;;  %v244_v15 = vmul.f32 %v1011_v1, %v1011_v1  ;;  %v245_v11 = vmul.f32 %v1015_v4, %v1015_v4 }
  0x9d   :  { %v1025_v6 = vsub.f32 %v626_v16, %v182_v7  ;;  %v1029_v12 = vsub.f32 %v627_v17, %v183_v8  ;;  %v284_v19 = vsel %vm78_vm0, %v244_v15, 0.0  ;;  %v287_v39 = vsel %vm78_vm0, %v245_v11, 0.0 }
  0x9e   :  { %282 = vadd.xlane.f32.xlu1 %v281_v60  ;;  %285 = vadd.xlane.f32.xlu0 %v284_v19  ;;  %v105_v3 = vpop.xlane.xlu0 %104  ;;  %v108_v30 = vpop.xlane.xlu1 %107 }
  0x9f   :  { %v184_v40 = vmul.f32 0.03125, %v105_v3  ;;  %v185_v44 = vmul.f32 0.03125, %v108_v30  ;;  %v246_v45 = vmul.f32 %v1025_v6, %v1025_v6  ;;  %v247_v16 = vmul.f32 %v1029_v12, %v1029_v12 }
  0xa1   :  { %v1039_v13 = vsub.f32 %v630_v21, %v184_v40  ;;  %v1043_v17 = vsub.f32 %v631_v22, %v185_v44  ;;  %v290_v49 = vsel %vm78_vm0, %v246_v45, 0.0  ;;  %v293_v50 = vsel %vm78_vm0, %v247_v16, 0.0 }
  0xa2   :  { %288 = vadd.xlane.f32.xlu1 %v287_v39  ;;  %291 = vadd.xlane.f32.xlu0 %v290_v49  ;;  %v111_v0 = vpop.xlane.xlu0 %110  ;;  %v114_v5 = vpop.xlane.xlu1 %113 }
  0xa3   :  { %v186_v59 = vmul.f32 0.03125, %v111_v0  ;;  %v187_v60 = vmul.f32 0.03125, %v114_v5  ;;  %v248_v7 = vmul.f32 %v1039_v13, %v1039_v13  ;;  %v249_v21 = vmul.f32 %v1043_v17, %v1043_v17 }
  0xa5   :  { %v1053_v18 = vsub.f32 %v634_v26, %v186_v59  ;;  %v1057_v22 = vsub.f32 %v635_v27, %v187_v60  ;;  %v296_v8 = vsel %vm78_vm0, %v248_v7, 0.0  ;;  %v299_v19 = vsel %vm78_vm0, %v249_v21, 0.0 }
  0xa6   :  { %294 = vadd.xlane.f32.xlu1 %v293_v50  ;;  %297 = vadd.xlane.f32.xlu0 %v296_v8  ;;  %v117_v15 = vpop.xlane.xlu0 %116  ;;  %v120_v11 = vpop.xlane.xlu1 %119 }
  0xa7   :  { %v188_v3 = vmul.f32 0.03125, %v117_v15  ;;  %v189_v30 = vmul.f32 0.03125, %v120_v11  ;;  %v250_v39 = vmul.f32 %v1053_v18, %v1053_v18  ;;  %v251_v26 = vmul.f32 %v1057_v22, %v1057_v22 }
  0xa9   :  { %v1067_v23 = vsub.f32 %v638_v31, %v188_v3  ;;  %v1071_v27 = vsub.f32 %v639_v32, %v189_v30  ;;  %v302_v40 = vsel %vm78_vm0, %v250_v39, 0.0  ;;  %v305_v16 = vsel %vm78_vm0, %v251_v26, 0.0 }
  0xaa   :  { %300 = vadd.xlane.f32.xlu1 %v299_v19  ;;  %303 = vadd.xlane.f32.xlu0 %v302_v40  ;;  %v123_v44 = vpop.xlane.xlu0 %122  ;;  %v126_v45 = vpop.xlane.xlu1 %125 }
  0xab   :  { %v190_v49 = vmul.f32 0.03125, %v123_v44  ;;  %v191_v0 = vmul.f32 0.03125, %v126_v45  ;;  %v252_v5 = vmul.f32 %v1067_v23, %v1067_v23  ;;  %v253_v31 = vmul.f32 %v1071_v27, %v1071_v27 }
  0xad   :  { %v1081_v28 = vsub.f32 %v642_v36, %v190_v49  ;;  %v1085_v32 = vsub.f32 %v643_v37, %v191_v0  ;;  %v308_v50 = vsel %vm78_vm0, %v252_v5, 0.0  ;;  %v311_v7 = vsel %vm78_vm0, %v253_v31, 0.0 }
  0xae   :  { %306 = vadd.xlane.f32.xlu1 %v305_v16  ;;  %309 = vadd.xlane.f32.xlu0 %v308_v50  ;;  %v129_v59 = vpop.xlane.xlu0 %128  ;;  %v132_v60 = vpop.xlane.xlu1 %131 }
  0xaf   :  { %v192_v21 = vmul.f32 0.03125, %v129_v59  ;;  %v193_v8 = vmul.f32 0.03125, %v132_v60  ;;  %v254_v15 = vmul.f32 %v1081_v28, %v1081_v28  ;;  %v255_v36 = vmul.f32 %v1085_v32, %v1085_v32 }
  0xb1   :  { %v1095_v33 = vsub.f32 %v646_v41, %v192_v21  ;;  %v1099_v37 = vsub.f32 %v647_v42, %v193_v8  ;;  %v314_v11 = vsel %vm78_vm0, %v254_v15, 0.0  ;;  %v317_v30 = vsel %vm78_vm0, %v255_v36, 0.0 }
  0xb2   :  { %312 = vadd.xlane.f32.xlu1 %v311_v7  ;;  %315 = vadd.xlane.f32.xlu0 %v314_v11  ;;  %v135_v19 = vpop.xlane.xlu0 %134  ;;  %v138_v3 = vpop.xlane.xlu1 %137 }
  0xb3   :  { %v194_v39 = vmul.f32 0.03125, %v135_v19  ;;  %v195_v26 = vmul.f32 0.03125, %v138_v3  ;;  %v256_v40 = vmul.f32 %v1095_v33, %v1095_v33  ;;  %v257_v41 = vmul.f32 %v1099_v37, %v1099_v37 }
  0xb5   :  { %v1109_v38 = vsub.f32 %v650_v46, %v194_v39  ;;  %v1113_v42 = vsub.f32 %v651_v47, %v195_v26  ;;  %v320_v44 = vsel %vm78_vm0, %v256_v40, 0.0  ;;  %v323_v49 = vsel %vm78_vm0, %v257_v41, 0.0 }
  0xb6   :  { %318 = vadd.xlane.f32.xlu1 %v317_v30  ;;  %321 = vadd.xlane.f32.xlu0 %v320_v44  ;;  %v141_v45 = vpop.xlane.xlu0 %140  ;;  %v144_v16 = vpop.xlane.xlu1 %143 }
  0xb7   :  { %v196_v0 = vmul.f32 0.03125, %v141_v45  ;;  %v197_v5 = vmul.f32 0.03125, %v144_v16  ;;  %v258_v31 = vmul.f32 %v1109_v38, %v1109_v38  ;;  %v259_v46 = vmul.f32 %v1113_v42, %v1113_v42 }
  0xb9   :  { %v1123_v43 = vsub.f32 %v654_v51, %v196_v0  ;;  %v1127_v47 = vsub.f32 %v655_v52, %v197_v5  ;;  %v326_v50 = vsel %vm78_vm0, %v258_v31, 0.0  ;;  %v329_v7 = vsel %vm78_vm0, %v259_v46, 0.0 }
  0xba   :  { %324 = vadd.xlane.f32.xlu1 %v323_v49  ;;  %327 = vadd.xlane.f32.xlu0 %v326_v50  ;;  %v147_v59 = vpop.xlane.xlu0 %146  ;;  %v150_v60 = vpop.xlane.xlu1 %149 }
  0xbb   :  { %v198_v21 = vmul.f32 0.03125, %v147_v59  ;;  %v199_v8 = vmul.f32 0.03125, %v150_v60  ;;  %v260_v15 = vmul.f32 %v1123_v43, %v1123_v43  ;;  %v261_v51 = vmul.f32 %v1127_v47, %v1127_v47 }
  0xbd   :  { %v1137_v48 = vsub.f32 %v658_v56, %v198_v21  ;;  %v1141_v52 = vsub.f32 %v659_v57, %v199_v8  ;;  %v332_v36 = vsel %vm78_vm0, %v260_v15, 0.0  ;;  %v335_v3 = vsel %vm78_vm0, %v261_v51, 0.0 }
  0xbe   :  { %330 = vadd.xlane.f32.xlu1 %v329_v7  ;;  %333 = vadd.xlane.f32.xlu0 %v332_v36  ;;  %v153_v11 = vpop.xlane.xlu0 %152  ;;  %v156_v19 = vpop.xlane.xlu1 %155 }
  0xbf   :  { %v200_v30 = vmul.f32 0.03125, %v153_v11  ;;  %v201_v39 = vmul.f32 0.03125, %v156_v19  ;;  %v262_v26 = vmul.f32 %v1137_v48, %v1137_v48  ;;  %v263_v56 = vmul.f32 %v1141_v52, %v1141_v52 }
  0xc1   :  { %v1151_v53 = vsub.f32 %v662_v61, %v200_v30  ;;  %v1155_v57 = vsub.f32 %v663_v62, %v201_v39  ;;  %v338_v40 = vsel %vm78_vm0, %v262_v26, 0.0  ;;  %v341_v45 = vsel %vm78_vm0, %v263_v56, 0.0 }
  0xc2   :  { %336 = vadd.xlane.f32.xlu1 %v335_v3  ;;  %339 = vadd.xlane.f32.xlu0 %v338_v40  ;;  %v159_v41 = vpop.xlane.xlu0 %158  ;;  %v162_v44 = vpop.xlane.xlu1 %161 }
  0xc3   :  { %v202_v16 = vmul.f32 0.03125, %v159_v41  ;;  %v203_v49 = vmul.f32 0.03125, %v162_v44  ;;  %v264_v0 = vmul.f32 %v1151_v53, %v1151_v53  ;;  %v265_v61 = vmul.f32 %v1155_v57, %v1155_v57 }
  0xc5   :  { %v1165_v58 = vsub.f32 %v666_v9, %v202_v16  ;;  %v1169_v62 = vsub.f32 %v667_v10, %v203_v49  ;;  %v344_v5 = vsel %vm78_vm0, %v264_v0, 0.0  ;;  %v347_v50 = vsel %vm78_vm0, %v265_v61, 0.0 }
  0xc6   :  { %342 = vadd.xlane.f32.xlu1 %v341_v45  ;;  %345 = vadd.xlane.f32.xlu0 %v344_v5  ;;  %v165_v31 = vpop.xlane.xlu0 %164  ;;  %v168_v46 = vpop.xlane.xlu1 %167 }
  0xc7   :  { %v204_v59 = vmul.f32 0.03125, %v165_v31  ;;  %v205_v60 = vmul.f32 0.03125, %v168_v46  ;;  %v266_v7 = vmul.f32 %v1165_v58, %v1165_v58  ;;  %v267_v9 = vmul.f32 %v1169_v62, %v1169_v62 }
  0xc9   :  { %v1179_v63 = vsub.f32 %v670_v20, %v204_v59  ;;  %v1183_v10 = vsub.f32 %v671_v24, %v205_v60  ;;  %v350_v21 = vsel %vm78_vm0, %v266_v7, 0.0  ;;  %v353_v51 = vsel %vm78_vm0, %v267_v9, 0.0 }
  0xca   :  { %348 = vadd.xlane.f32.xlu1 %v347_v50  ;;  %351 = vadd.xlane.f32.xlu0 %v350_v21  ;;  %v171_v8 = vpop.xlane.xlu0 %170  ;;  %v174_v15 = vpop.xlane.xlu1 %173 }
  0xcb   :  { %v206_v36 = vmul.f32 0.03125, %v171_v8  ;;  %v207_v11 = vmul.f32 0.03125, %v174_v15  ;;  %v268_v19 = vmul.f32 %v1179_v63, %v1179_v63  ;;  %v269_v20 = vmul.f32 %v1183_v10, %v1183_v10 }
  0xcd   :  { %v1193_v14 = vsub.f32 %v674_v34, %v206_v36  ;;  %v1197_v24 = vsub.f32 %v675_v35, %v207_v11  ;;  %v356_v3 = vsel %vm78_vm0, %v268_v19, 0.0  ;;  %v359_v30 = vsel %vm78_vm0, %v269_v20, 0.0 }
  0xce   :  { %354 = vadd.xlane.f32.xlu1 %v353_v51  ;;  %357 = vadd.xlane.f32.xlu0 %v356_v3  ;;  %v1210_v3 = vld [vmem:[%s1442_s1] ss:$0 sm:$0xff] }
  0xcf   :  { %v270_v39 = vmul.f32 %v1193_v14, %v1193_v14  ;;  %v271_v26 = vmul.f32 %v1197_v24, %v1197_v24 }
  0xd1   :  { %v362_v56 = vsel %vm78_vm0, %v270_v39, 0.0  ;;  %v365_v25 = vsel %vm78_vm0, %v271_v26, 0.0 }
  0xd2   :  { %360 = vadd.xlane.f32.xlu1 %v359_v30  ;;  %363 = vadd.xlane.f32.xlu0 %v362_v56  ;;  %v1216_v56 = vld [vmem:[%s1443_s2] ss:$0 sm:$0xff] }
  0xd6   :  { %366 = vadd.xlane.f32.xlu1 %v365_v25 }
 0x11f   :  { %v274_v34 = vpop.xlane.xlu0 %273 }
 0x120   :  { %v368_v35 = vmul.f32 0.03125, %v274_v34 }
 0x122   :  { %v400_v40 = vadd.f32 1e-06, %v368_v35 }
 0x123   :  { %v277_v41 = vpop.xlane.xlu1 %276  ;;  %v280_v44 = vpop.xlane.xlu0 %279 }
 0x124   :  { %691 = vrsqrt.f32 %v400_v40  ;;  %v369_v45 = vmul.f32 0.03125, %v277_v41  ;;  %v370_v16 = vmul.f32 0.03125, %v280_v44 }
 0x126   :  { %v401_v49 = vadd.f32 1e-06, %v369_v45  ;;  %v402_v0 = vadd.f32 1e-06, %v370_v16 }
 0x127   :  { %v283_v61 = vpop.xlane.xlu1 %282  ;;  %v286_v5 = vpop.xlane.xlu0 %285 }
 0x128   :  { %693 = vrsqrt.f32 %v401_v49  ;;  %v371_v31 = vmul.f32 0.03125, %v283_v61  ;;  %v372_v46 = vmul.f32 0.03125, %v286_v5 }
 0x129   :  { %695 = vrsqrt.f32 %v402_v0 }
 0x12a   :  { %v403_v50 = vadd.f32 1e-06, %v371_v31  ;;  %v404_v59 = vadd.f32 1e-06, %v372_v46 }
 0x12b   :  { %v289_v60 = vpop.xlane.xlu1 %288  ;;  %v292_v7 = vpop.xlane.xlu0 %291 }
 0x12c   :  { %697 = vrsqrt.f32 %v403_v50  ;;  %v373_v9 = vmul.f32 0.03125, %v289_v60  ;;  %v374_v21 = vmul.f32 0.03125, %v292_v7 }
 0x12d   :  { %699 = vrsqrt.f32 %v404_v59 }
 0x12e   :  { %v405_v8 = vadd.f32 1e-06, %v373_v9  ;;  %v406_v15 = vadd.f32 1e-06, %v374_v21 }
 0x12f   :  { %v295_v51 = vpop.xlane.xlu1 %294  ;;  %v298_v36 = vpop.xlane.xlu0 %297 }
 0x130   :  { %701 = vrsqrt.f32 %v405_v8  ;;  %v375_v11 = vmul.f32 0.03125, %v295_v51  ;;  %v376_v19 = vmul.f32 0.03125, %v298_v36 }
 0x131   :  { %v692_v20 = vpop.eup %691  ;;  %703 = vrsqrt.f32 %v406_v15 }
 0x132   :  { %v464_v30 = vmul.f32 %v692_v20, %v985_v54  ;;  %v407_v39 = vadd.f32 1e-06, %v375_v11  ;;  %v408_v26 = vadd.f32 1e-06, %v376_v19 }
 0x133   :  { %v301_v25 = vpop.xlane.xlu1 %300  ;;  %v304_v34 = vpop.xlane.xlu0 %303 }
 0x134   :  { %v503_v35 = vmul.f32 %v1210_v3, %v464_v30  ;;  %705 = vrsqrt.f32 %v407_v39  ;;  %v377_v40 = vmul.f32 0.03125, %v301_v25  ;;  %v378_v41 = vmul.f32 0.03125, %v304_v34 }
 0x135   :  { %v694_v44 = vpop.eup %693  ;;  %707 = vrsqrt.f32 %v408_v26 }
 0x136   :  { %v696_v45 = vpop.eup %695  ;;  %v542_v16 = vadd.f32 %v1216_v56, %v503_v35  ;;  %v465_v54 = vmul.f32 %v694_v44, %v997_v29  ;;  %v409_v49 = vadd.f32 1e-06, %v377_v40  ;;  %v410_v0 = vadd.f32 1e-06, %v378_v41 }
 0x137   :  { %v466_v61 = vmul.f32 %v696_v45, %v989_v55  ;;  %v307_v5 = vpop.xlane.xlu1 %306  ;;  %v310_v31 = vpop.xlane.xlu0 %309 }
 0x138   :  { %574 = vst.msk [vmem:[%s1444_s3] sm:$0xff] %vm78_vm0, %v542_v16  ;;  %v504_v46 = vmul.f32 %v1210_v3, %v465_v54  ;;  %709 = vrsqrt.f32 %v409_v49  ;;  %v379_v50 = vmul.f32 0.03125, %v307_v5  ;;  %v380_v59 = vmul.f32 0.03125, %v310_v31 }
 0x139   :  { %v698_v60 = vpop.eup %697  ;;  %v505_v7 = vmul.f32 %v1210_v3, %v466_v61  ;;  %711 = vrsqrt.f32 %v410_v0 }
 0x13a   :  { %v700_v29 = vpop.eup %699  ;;  %v543_v9 = vadd.f32 %v1216_v56, %v504_v46  ;;  %v467_v55 = vmul.f32 %v698_v60, %v1001_v2  ;;  %v411_v21 = vadd.f32 1e-06, %v379_v50  ;;  %v412_v8 = vadd.f32 1e-06, %v380_v59 }
 0x13b   :  { %v544_v15 = vadd.f32 %v1216_v56, %v505_v7  ;;  %v468_v51 = vmul.f32 %v700_v29, %v1011_v1  ;;  %v313_v36 = vpop.xlane.xlu1 %312  ;;  %v316_v11 = vpop.xlane.xlu0 %315 }
 0x13c   :  { %575 = vst.msk [vmem:[%s1444_s3 + $0x8] sm:$0xff] %vm78_vm0, %v543_v9  ;;  %v506_v19 = vmul.f32 %v1210_v3, %v467_v55  ;;  %713 = vrsqrt.f32 %v411_v21  ;;  %v381_v20 = vmul.f32 0.03125, %v313_v36  ;;  %v382_v30 = vmul.f32 0.03125, %v316_v11 }
 0x13d   :  { %v702_v39 = vpop.eup %701  ;;  %576 = vst.msk [vmem:[%s1444_s3 + $0x10] sm:$0xff] %vm78_vm0, %v544_v15  ;;  %v507_v2 = vmul.f32 %v1210_v3, %v468_v51  ;;  %715 = vrsqrt.f32 %v412_v8 }
 0x13e   :  { %v704_v1 = vpop.eup %703  ;;  %v545_v26 = vadd.f32 %v1216_v56, %v506_v19  ;;  %v469_v25 = vmul.f32 %v702_v39, %v1015_v4  ;;  %v413_v34 = vadd.f32 1e-06, %v381_v20  ;;  %v414_v35 = vadd.f32 1e-06, %v382_v30 }
 0x13f   :  { %v546_v40 = vadd.f32 %v1216_v56, %v507_v2  ;;  %v470_v41 = vmul.f32 %v704_v1, %v1025_v6  ;;  %v319_v44 = vpop.xlane.xlu1 %318  ;;  %v322_v45 = vpop.xlane.xlu0 %321 }
 0x140   :  { %577 = vst.msk [vmem:[%s1444_s3 + $0x18] sm:$0xff] %vm78_vm0, %v545_v26  ;;  %v508_v16 = vmul.f32 %v1210_v3, %v469_v25  ;;  %717 = vrsqrt.f32 %v413_v34  ;;  %v383_v54 = vmul.f32 0.03125, %v319_v44  ;;  %v384_v49 = vmul.f32 0.03125, %v322_v45 }
 0x141   :  { %v706_v0 = vpop.eup %705  ;;  %578 = vst.msk [vmem:[%s1444_s3 + $0x20] sm:$0xff] %vm78_vm0, %v546_v40  ;;  %v509_v4 = vmul.f32 %v1210_v3, %v470_v41  ;;  %719 = vrsqrt.f32 %v414_v35 }
 0x142   :  { %v708_v6 = vpop.eup %707  ;;  %v547_v61 = vadd.f32 %v1216_v56, %v508_v16  ;;  %v471_v5 = vmul.f32 %v706_v0, %v1029_v12  ;;  %v415_v31 = vadd.f32 1e-06, %v383_v54  ;;  %v416_v46 = vadd.f32 1e-06, %v384_v49 }
 0x143   :  { %v548_v50 = vadd.f32 %v1216_v56, %v509_v4  ;;  %v472_v59 = vmul.f32 %v708_v6, %v1039_v13  ;;  %v325_v60 = vpop.xlane.xlu1 %324  ;;  %v328_v7 = vpop.xlane.xlu0 %327 }
 0x144   :  { %579 = vst.msk [vmem:[%s1444_s3 + $0x28] sm:$0xff] %vm78_vm0, %v547_v61  ;;  %v510_v29 = vmul.f32 %v1210_v3, %v471_v5  ;;  %721 = vrsqrt.f32 %v415_v31  ;;  %v385_v9 = vmul.f32 0.03125, %v325_v60  ;;  %v386_v55 = vmul.f32 0.03125, %v328_v7 }
 0x145   :  { %v710_v21 = vpop.eup %709  ;;  %580 = vst.msk [vmem:[%s1444_s3 + $0x30] sm:$0xff] %vm78_vm0, %v548_v50  ;;  %v511_v12 = vmul.f32 %v1210_v3, %v472_v59  ;;  %723 = vrsqrt.f32 %v416_v46 }
 0x146   :  { %v712_v13 = vpop.eup %711  ;;  %v549_v8 = vadd.f32 %v1216_v56, %v510_v29  ;;  %v473_v15 = vmul.f32 %v710_v21, %v1043_v17  ;;  %v417_v51 = vadd.f32 1e-06, %v385_v9  ;;  %v418_v36 = vadd.f32 1e-06, %v386_v55 }
 0x147   :  { %v550_v11 = vadd.f32 %v1216_v56, %v511_v12  ;;  %v474_v19 = vmul.f32 %v712_v13, %v1053_v18  ;;  %v331_v20 = vpop.xlane.xlu1 %330  ;;  %v334_v30 = vpop.xlane.xlu0 %333 }
 0x148   :  { %581 = vst.msk [vmem:[%s1444_s3 + $0x38] sm:$0xff] %vm78_vm0, %v549_v8  ;;  %v512_v39 = vmul.f32 %v1210_v3, %v473_v15  ;;  %725 = vrsqrt.f32 %v417_v51  ;;  %v387_v2 = vmul.f32 0.03125, %v331_v20  ;;  %v388_v1 = vmul.f32 0.03125, %v334_v30 }
 0x149   :  { %v714_v26 = vpop.eup %713  ;;  %582 = vst.msk [vmem:[%s1444_s3 + $0x40] sm:$0xff] %vm78_vm0, %v550_v11  ;;  %v513_v17 = vmul.f32 %v1210_v3, %v474_v19  ;;  %727 = vrsqrt.f32 %v418_v36 }
 0x14a   :  { %v716_v18 = vpop.eup %715  ;;  %v551_v25 = vadd.f32 %v1216_v56, %v512_v39  ;;  %v475_v34 = vmul.f32 %v714_v26, %v1057_v22  ;;  %v419_v35 = vadd.f32 1e-06, %v387_v2  ;;  %v420_v40 = vadd.f32 1e-06, %v388_v1 }
 0x14b   :  { %v552_v41 = vadd.f32 %v1216_v56, %v513_v17  ;;  %v476_v44 = vmul.f32 %v716_v18, %v1067_v23  ;;  %v337_v45 = vpop.xlane.xlu1 %336  ;;  %v340_v16 = vpop.xlane.xlu0 %339 }
 0x14c   :  { %583 = vst.msk [vmem:[%s1444_s3 + $0x48] sm:$0xff] %vm78_vm0, %v551_v25  ;;  %v514_v54 = vmul.f32 %v1210_v3, %v475_v34  ;;  %729 = vrsqrt.f32 %v419_v35  ;;  %v389_v49 = vmul.f32 0.03125, %v337_v45  ;;  %v390_v0 = vmul.f32 0.03125, %v340_v16 }
 0x14d   :  { %v718_v4 = vpop.eup %717  ;;  %584 = vst.msk [vmem:[%s1444_s3 + $0x50] sm:$0xff] %vm78_vm0, %v552_v41  ;;  %v515_v22 = vmul.f32 %v1210_v3, %v476_v44  ;;  %731 = vrsqrt.f32 %v420_v40 }
 0x14e   :  { %v720_v23 = vpop.eup %719  ;;  %v553_v6 = vadd.f32 %v1216_v56, %v514_v54  ;;  %v477_v61 = vmul.f32 %v718_v4, %v1071_v27  ;;  %v421_v5 = vadd.f32 1e-06, %v389_v49  ;;  %v422_v31 = vadd.f32 1e-06, %v390_v0 }
 0x14f   :  { %v554_v46 = vadd.f32 %v1216_v56, %v515_v22  ;;  %v478_v50 = vmul.f32 %v720_v23, %v1081_v28  ;;  %v343_v59 = vpop.xlane.xlu1 %342  ;;  %v346_v60 = vpop.xlane.xlu0 %345 }
 0x150   :  { %585 = vst.msk [vmem:[%s1444_s3 + $0x58] sm:$0xff] %vm78_vm0, %v553_v6  ;;  %v516_v7 = vmul.f32 %v1210_v3, %v477_v61  ;;  %733 = vrsqrt.f32 %v421_v5  ;;  %v391_v29 = vmul.f32 0.03125, %v343_v59  ;;  %v392_v9 = vmul.f32 0.03125, %v346_v60 }
 0x151   :  { %v722_v55 = vpop.eup %721  ;;  %586 = vst.msk [vmem:[%s1444_s3 + $0x60] sm:$0xff] %vm78_vm0, %v554_v46  ;;  %v517_v27 = vmul.f32 %v1210_v3, %v478_v50  ;;  %735 = vrsqrt.f32 %v422_v31 }
 0x152   :  { %v724_v28 = vpop.eup %723  ;;  %v555_v21 = vadd.f32 %v1216_v56, %v516_v7  ;;  %v479_v12 = vmul.f32 %v722_v55, %v1085_v32  ;;  %v423_v13 = vadd.f32 1e-06, %v391_v29  ;;  %v424_v8 = vadd.f32 1e-06, %v392_v9 }
 0x153   :  { %v556_v15 = vadd.f32 %v1216_v56, %v517_v27  ;;  %v480_v51 = vmul.f32 %v724_v28, %v1095_v33  ;;  %v349_v36 = vpop.xlane.xlu1 %348  ;;  %v352_v11 = vpop.xlane.xlu0 %351 }
 0x154   :  { %587 = vst.msk [vmem:[%s1444_s3 + $0x68] sm:$0xff] %vm78_vm0, %v555_v21  ;;  %v518_v19 = vmul.f32 %v1210_v3, %v479_v12  ;;  %737 = vrsqrt.f32 %v423_v13  ;;  %v393_v20 = vmul.f32 0.03125, %v349_v36  ;;  %v394_v30 = vmul.f32 0.03125, %v352_v11 }
 0x155   :  { %v726_v39 = vpop.eup %725  ;;  %588 = vst.msk [vmem:[%s1444_s3 + $0x70] sm:$0xff] %vm78_vm0, %v556_v15  ;;  %v519_v32 = vmul.f32 %v1210_v3, %v480_v51  ;;  %739 = vrsqrt.f32 %v424_v8 }
 0x156   :  { %v728_v33 = vpop.eup %727  ;;  %v557_v2 = vadd.f32 %v1216_v56, %v518_v19  ;;  %v481_v1 = vmul.f32 %v726_v39, %v1099_v37  ;;  %v425_v26 = vadd.f32 1e-06, %v393_v20  ;;  %v426_v17 = vadd.f32 1e-06, %v394_v30 }
 0x157   :  { %v558_v18 = vadd.f32 %v1216_v56, %v519_v32  ;;  %v482_v25 = vmul.f32 %v728_v33, %v1109_v38  ;;  %v355_v34 = vpop.xlane.xlu1 %354  ;;  %v358_v35 = vpop.xlane.xlu0 %357 }
 0x158   :  { %589 = vst.msk [vmem:[%s1444_s3 + $0x78] sm:$0xff] %vm78_vm0, %v557_v2  ;;  %v520_v40 = vmul.f32 %v1210_v3, %v481_v1  ;;  %741 = vrsqrt.f32 %v425_v26  ;;  %v395_v41 = vmul.f32 0.03125, %v355_v34  ;;  %v396_v44 = vmul.f32 0.03125, %v358_v35 }
 0x159   :  { %v730_v45 = vpop.eup %729  ;;  %590 = vst.msk [vmem:[%s1444_s3 + $0x80] sm:$0xff] %vm78_vm0, %v558_v18  ;;  %v521_v37 = vmul.f32 %v1210_v3, %v482_v25  ;;  %743 = vrsqrt.f32 %v426_v17 }
 0x15a   :  { %v732_v38 = vpop.eup %731  ;;  %v559_v16 = vadd.f32 %v1216_v56, %v520_v40  ;;  %v483_v54 = vmul.f32 %v730_v45, %v1113_v42  ;;  %v427_v49 = vadd.f32 1e-06, %v395_v41  ;;  %v428_v0 = vadd.f32 1e-06, %v396_v44 }
 0x15b   :  { %v560_v4 = vadd.f32 %v1216_v56, %v521_v37  ;;  %v484_v22 = vmul.f32 %v732_v38, %v1123_v43  ;;  %v361_v23 = vpop.xlane.xlu1 %360  ;;  %v364_v6 = vpop.xlane.xlu0 %363 }
 0x15c   :  { %591 = vst.msk [vmem:[%s1444_s3 + $0x88] sm:$0xff] %vm78_vm0, %v559_v16  ;;  %v522_v61 = vmul.f32 %v1210_v3, %v483_v54  ;;  %745 = vrsqrt.f32 %v427_v49  ;;  %v397_v5 = vmul.f32 0.03125, %v361_v23  ;;  %v398_v31 = vmul.f32 0.03125, %v364_v6 }
 0x15d   :  { %v734_v46 = vpop.eup %733  ;;  %592 = vst.msk [vmem:[%s1444_s3 + $0x90] sm:$0xff] %vm78_vm0, %v560_v4  ;;  %v523_v42 = vmul.f32 %v1210_v3, %v484_v22  ;;  %747 = vrsqrt.f32 %v428_v0 }
 0x15e   :  { %v736_v43 = vpop.eup %735  ;;  %v561_v50 = vadd.f32 %v1216_v56, %v522_v61  ;;  %v485_v59 = vmul.f32 %v734_v46, %v1127_v47  ;;  %v429_v60 = vadd.f32 1e-06, %v397_v5  ;;  %v430_v7 = vadd.f32 1e-06, %v398_v31 }
 0x15f   :  { %v562_v29 = vadd.f32 %v1216_v56, %v523_v42  ;;  %v486_v9 = vmul.f32 %v736_v43, %v1137_v48  ;;  %v367_v55 = vpop.xlane.xlu1 %366 }
 0x160   :  { %593 = vst.msk [vmem:[%s1444_s3 + $0x98] sm:$0xff] %vm78_vm0, %v561_v50  ;;  %v524_v27 = vmul.f32 %v1210_v3, %v485_v59  ;;  %749 = vrsqrt.f32 %v429_v60  ;;  %v399_v28 = vmul.f32 0.03125, %v367_v55 }
 0x161   :  { %v738_v21 = vpop.eup %737  ;;  %594 = vst.msk [vmem:[%s1444_s3 + $0xa0] sm:$0xff] %vm78_vm0, %v562_v29  ;;  %v525_v47 = vmul.f32 %v1210_v3, %v486_v9  ;;  %751 = vrsqrt.f32 %v430_v7 }
 0x162   :  { %v740_v48 = vpop.eup %739  ;;  %v563_v12 = vadd.f32 %v1216_v56, %v524_v27  ;;  %v487_v13 = vmul.f32 %v738_v21, %v1141_v52  ;;  %v431_v8 = vadd.f32 1e-06, %v399_v28 }
 0x163   :  { %v564_v15 = vadd.f32 %v1216_v56, %v525_v47  ;;  %v488_v51 = vmul.f32 %v740_v48, %v1151_v53 }
 0x164   :  { %595 = vst.msk [vmem:[%s1444_s3 + $0xa8] sm:$0xff] %vm78_vm0, %v563_v12  ;;  %v526_v36 = vmul.f32 %v1210_v3, %v487_v13  ;;  %753 = vrsqrt.f32 %v431_v8 }
 0x165   :  { %v742_v11 = vpop.eup %741  ;;  %596 = vst.msk [vmem:[%s1444_s3 + $0xb0] sm:$0xff] %vm78_vm0, %v564_v15  ;;  %v527_v52 = vmul.f32 %v1210_v3, %v488_v51 }
 0x166   :  { %v744_v19 = vpop.eup %743  ;;  %v565_v20 = vadd.f32 %v1216_v56, %v526_v36  ;;  %v489_v53 = vmul.f32 %v742_v11, %v1155_v57 }
 0x167   :  { %v566_v30 = vadd.f32 %v1216_v56, %v527_v52  ;;  %v490_v39 = vmul.f32 %v744_v19, %v1165_v58 }
 0x168   :  { %597 = vst.msk [vmem:[%s1444_s3 + $0xb8] sm:$0xff] %vm78_vm0, %v565_v20  ;;  %v528_v32 = vmul.f32 %v1210_v3, %v489_v53 }
 0x169   :  { %v746_v33 = vpop.eup %745  ;;  %598 = vst.msk [vmem:[%s1444_s3 + $0xc0] sm:$0xff] %vm78_vm0, %v566_v30  ;;  %v529_v2 = vmul.f32 %v1210_v3, %v490_v39 }
 0x16a   :  { %v748_v57 = vpop.eup %747  ;;  %v567_v1 = vadd.f32 %v1216_v56, %v528_v32  ;;  %v491_v58 = vmul.f32 %v746_v33, %v1169_v62 }
 0x16b   :  { %v568_v26 = vadd.f32 %v1216_v56, %v529_v2  ;;  %v492_v17 = vmul.f32 %v748_v57, %v1179_v63 }
 0x16c   :  { %599 = vst.msk [vmem:[%s1444_s3 + $0xc8] sm:$0xff] %vm78_vm0, %v567_v1  ;;  %v530_v18 = vmul.f32 %v1210_v3, %v491_v58 }
 0x16d   :  { %v750_v25 = vpop.eup %749  ;;  %600 = vst.msk [vmem:[%s1444_s3 + $0xd0] sm:$0xff] %vm78_vm0, %v568_v26  ;;  %v531_v34 = vmul.f32 %v1210_v3, %v492_v17 }
 0x16e   :  { %v752_v62 = vpop.eup %751  ;;  %v569_v35 = vadd.f32 %v1216_v56, %v530_v18  ;;  %v493_v63 = vmul.f32 %v750_v25, %v1183_v10 }
 0x16f   :  { %v570_v40 = vadd.f32 %v1216_v56, %v531_v34  ;;  %v494_v41 = vmul.f32 %v752_v62, %v1193_v14 }
 0x170   :  { %601 = vst.msk [vmem:[%s1444_s3 + $0xd8] sm:$0xff] %vm78_vm0, %v569_v35  ;;  %v532_v44 = vmul.f32 %v1210_v3, %v493_v63 }
 0x171   :  { %v754_v45 = vpop.eup %753  ;;  %602 = vst.msk [vmem:[%s1444_s3 + $0xe0] sm:$0xff] %vm78_vm0, %v570_v40  ;;  %v533_v37 = vmul.f32 %v1210_v3, %v494_v41 }
 0x172   :  { %v571_v10 = vadd.f32 %v1216_v56, %v532_v44  ;;  %v495_v38 = vmul.f32 %v754_v45, %v1197_v24 }
 0x173   :  { %v572_v14 = vadd.f32 %v1216_v56, %v533_v37 }
 0x174   :  { %603 = vst.msk [vmem:[%s1444_s3 + $0xe8] sm:$0xff] %vm78_vm0, %v571_v10  ;;  %v534_v16 = vmul.f32 %v1210_v3, %v495_v38 }
 0x175   :  { %604 = vst.msk [vmem:[%s1444_s3 + $0xf0] sm:$0xff] %vm78_vm0, %v572_v14 }
 0x176   :  { %v573_v54 = vadd.f32 %v1216_v56, %v534_v16 }
 0x178   :  { %605 = vst.msk [vmem:[%s1444_s3 + $0xf8] sm:$0xff] %vm78_vm0, %v573_v54 }

</bundles_post_ra>
